<compile_context>
chip_gen: v5e
topology: v5e:2x2
jax: 0.10.0
libtpu: 0.0.40
codegen_flags: <defaults>
</compile_context>

<pallas_src>
import jax
import jax.numpy as jnp
from jax.experimental import pallas as pl
from jax.experimental.pallas import tpu as pltpu

LANE = 128  # TPU lane width


def _round_up(n, m):
    return ((n + m - 1) // m) * m


def _choose_tile(P):
    # Big tiles amortize per-grid-step overhead (~0.35us/step); keep >=2 row
    # blocks when possible so the "parallel" pixel axis can be megacore-sharded
    # on v7x.  All candidates are multiples of 8 (sublane constraint).
    for tm in (2048, 1024, 512, 256, 128, 64, 32, 16, 8):
        if P % tm == 0 and P // tm >= 2:
            return tm
    return P


def conv_encoder_kernel(x_ref, w1_ref, b1_ref, w2_ref, b2_ref,
                        scale_ref, shift_ref,
                        h2_out_ref, c2_out_ref,
                        comb1_ref, c1_ref, comb2_ref, c2_ref):
    """Fused 2-cell ConvLSTM step for one (pixel-block, timestep) grid point.

    comb1 scratch layout: [ x_t (lanes 0:cin) | zeros | h1 (lanes seg1:seg1+ch1) ]
    comb2 scratch layout: [ h1  (lanes 0:ch1) | zeros | h2 (lanes seg2:seg2+ch2) ]
    seg1/seg2 are multiples of 128 so every scratch store is lane-aligned, and
    the zero-padded weight rows make the padding lanes contribute exactly 0.
    """
    t = pl.program_id(1)
    cin = x_ref.shape[-1]
    ch1 = c1_ref.shape[-1]
    ch2 = c2_ref.shape[-1]
    seg1 = comb1_ref.shape[-1] - ch1
    seg2 = comb2_ref.shape[-1] - ch2

    @pl.when(t == 0)
    def _init():
        # Fresh pixel block: zero recurrent state (and padding lanes).
        comb1_ref[...] = jnp.zeros_like(comb1_ref)
        c1_ref[...] = jnp.zeros_like(c1_ref)
        comb2_ref[...] = jnp.zeros_like(comb2_ref)
        c2_ref[...] = jnp.zeros_like(c2_ref)

    def lstm_gates(act, c_cur, ch):
        # NOTE: gate slices (width 32/16) sit inside one 128-lane vreg; fine at
        # these sizes — pad gates to 128-lane blocks if channels ever scale.
        i = jax.nn.sigmoid(act[:, 0 * ch:1 * ch])
        f = jax.nn.sigmoid(act[:, 1 * ch:2 * ch])
        o = jax.nn.sigmoid(act[:, 2 * ch:3 * ch])
        g = jnp.tanh(act[:, 3 * ch:4 * ch])
        c_next = f * c_cur + i * g
        h_next = o * jnp.tanh(c_next)
        return h_next, c_next

    # ---------------- cell 1: conv([x_t, h1]) -> gates ----------------
    comb1_ref[:, 0:cin] = x_ref[...]
    pre1 = jnp.dot(comb1_ref[...], w1_ref[...],
                   preferred_element_type=jnp.float32) + b1_ref[...]
    act1 = jnp.maximum(pre1, 0.0)          # F.relu on the combined conv output
    h1, c1n = lstm_gates(act1, c1_ref[...], ch1)
    comb1_ref[:, seg1:seg1 + ch1] = h1     # store recurrent h1 (lane-aligned)
    c1_ref[...] = c1n

    # ---------------- cell 2: conv([h1, h2]) -> gates ----------------
    comb2_ref[:, 0:ch1] = h1
    pre2 = jnp.dot(comb2_ref[...], w2_ref[...],
                   preferred_element_type=jnp.float32) + b2_ref[...]
    act2 = jnp.maximum(pre2, 0.0)
    h2, c2n = lstm_gates(act2, c2_ref[...], ch2)
    # BatchNorm2d (eval-mode folded affine); Dropout2d in eval mode == identity.
    h2 = h2 * scale_ref[...] + shift_ref[...]
    comb2_ref[:, seg2:seg2 + ch2] = h2     # BN'd h2 is the recurrent state
    c2_ref[...] = c2n

    @pl.when(t == pl.num_programs(1) - 1)
    def _write_out():
        h2_out_ref[...] = h2
        c2_out_ref[...] = c2n


def _conv_encoder_pallas(x_tpc, w1p, b1, w2p, b2, bn_scale, bn_shift):
    """x_tpc: (T, P, cin) channels-last stream.  Returns (h2, c2) as (P, ch2)."""
    T, P, cin = x_tpc.shape
    ch1 = w1p.shape[1] // 4
    ch2 = w2p.shape[1] // 4
    k1 = w1p.shape[0]   # seg1 + ch1
    k2 = w2p.shape[0]   # seg2 + ch2

    tm = _choose_tile(P)
    assert P % tm == 0

    rep = lambda r, c: pl.BlockSpec((r, c), lambda p, t: (0, 0))
    row_out = pl.BlockSpec((tm, ch2), lambda p, t: (p, 0))

    return pl.pallas_call(
        conv_encoder_kernel,
        out_shape=(jax.ShapeDtypeStruct((P, ch2), jnp.float32),
                   jax.ShapeDtypeStruct((P, ch2), jnp.float32)),
        grid_spec=pltpu.PrefetchScalarGridSpec(
            num_scalar_prefetch=0,
            grid=(P // tm, T),
            in_specs=[
                # stream x(t) block directly; time dim squeezed out of the ref
                pl.BlockSpec((None, tm, cin), lambda p, t: (t, p, 0)),
                rep(k1, 4 * ch1), rep(1, 4 * ch1),
                rep(k2, 4 * ch2), rep(1, 4 * ch2),
                rep(1, ch2), rep(1, ch2),
            ],
            out_specs=(row_out, row_out),
            scratch_shapes=[
                pltpu.VMEM((tm, k1), jnp.float32),   # [x | h1] combined operand
                pltpu.VMEM((tm, ch1), jnp.float32),  # c1
                pltpu.VMEM((tm, k2), jnp.float32),   # [h1 | h2] combined operand
                pltpu.VMEM((tm, ch2), jnp.float32),  # c2
            ]),
        compiler_params=pltpu.CompilerParams(
            dimension_semantics=("parallel", "arbitrary")),
    )(x_tpc, w1p, b1, w2p, b2, bn_scale, bn_shift)


def init_params(key, input_channels, hidden_channels):
    """Deterministic parameter init (PyTorch-like uniform bounds); arrays only."""
    ch1 = hidden_channels
    ch2 = hidden_channels // 2
    k1, k2, k3, k4, k5, k6 = jax.random.split(key, 6)

    def conv1x1(k, cin_total, cout):
        bound = 1.0 / (cin_total ** 0.5)
        kw, kb = jax.random.split(k)
        w = jax.random.uniform(kw, (cin_total, cout), jnp.float32, -bound, bound)
        b = jax.random.uniform(kb, (1, cout), jnp.float32, -bound, bound)
        return w, b

    w1, b1 = conv1x1(k1, input_channels + ch1, 4 * ch1)
    w2, b2 = conv1x1(k2, ch1 + ch2, 4 * ch2)

    # BatchNorm2d(ch2) parameters / running stats (eval mode)
    bn_gamma = 1.0 + 0.1 * jax.random.normal(k3, (ch2,), jnp.float32)
    bn_beta = 0.1 * jax.random.normal(k4, (ch2,), jnp.float32)
    bn_mean = 0.1 * jax.random.normal(k5, (ch2,), jnp.float32)
    bn_var = jnp.abs(jax.random.normal(k6, (ch2,), jnp.float32)) + 0.5

    return dict(
        wx1=w1[:input_channels], wh1=w1[input_channels:], b1=b1,
        wx2=w2[:ch1], wh2=w2[ch1:], b2=b2,
        bn_gamma=bn_gamma, bn_beta=bn_beta, bn_mean=bn_mean, bn_var=bn_var,
    )


def conv_encoder_forward(params, x_ntchw):
    """x_ntchw: (N, T, Cin, H, W) f32 -> (last_state, (h2, c2)) in NCHW."""
    N, T, cin, H, W = x_ntchw.shape
    P = N * H * W
    ch1 = params["wh1"].shape[0]
    ch2 = params["wh2"].shape[0]

    # Hoist layout plumbing out of the time loop: one transpose to (T, P, cin).
    x_tpc = jnp.transpose(x_ntchw, (1, 0, 3, 4, 2)).reshape(T, P, cin)

    # Stack [Wx; 0; Wh] with the h segment starting on a 128-lane boundary.
    seg1 = _round_up(cin, LANE)
    seg2 = _round_up(ch1, LANE)
    w1p = jnp.zeros((seg1 + ch1, 4 * ch1), jnp.float32)
    w1p = w1p.at[:cin].set(params["wx1"]).at[seg1:].set(params["wh1"])
    w2p = jnp.zeros((seg2 + ch2, 4 * ch2), jnp.float32)
    w2p = w2p.at[:ch1].set(params["wx2"]).at[seg2:].set(params["wh2"])

    # Fold BatchNorm (eval) running stats into a per-channel affine.
    eps = 1e-5
    inv_std = jax.lax.rsqrt(params["bn_var"] + eps)
    bn_scale = (params["bn_gamma"] * inv_std).reshape(1, ch2)
    bn_shift = (params["bn_beta"]
                - params["bn_mean"] * params["bn_gamma"] * inv_std).reshape(1, ch2)

    h2_flat, c2_flat = _conv_encoder_pallas(
        x_tpc, w1p, params["b1"], w2p, params["b2"], bn_scale, bn_shift)

    def to_nchw(a, C):
        return jnp.transpose(a.reshape(N, H, W, C), (0, 3, 1, 2))

    last_state = to_nchw(h2_flat, ch2)      # == h2 after BN + dropout(eval)
    return last_state, (last_state, to_nchw(c2_flat, ch2))


# ---------------- pure-JAX reference (sanity check) ----------------
def reference_forward(params, x_ntchw):
    N, T, cin, H, W = x_ntchw.shape
    P = N * H * W
    ch1 = params["wh1"].shape[0]
    ch2 = params["wh2"].shape[0]
    w1 = jnp.concatenate([params["wx1"], params["wh1"]], axis=0)
    w2 = jnp.concatenate([params["wx2"], params["wh2"]], axis=0)
    h1 = jnp.zeros((P, ch1), jnp.float32); c1 = jnp.zeros((P, ch1), jnp.float32)
    h2 = jnp.zeros((P, ch2), jnp.float32); c2 = jnp.zeros((P, ch2), jnp.float32)
    eps = 1e-5
    inv_std = jax.lax.rsqrt(params["bn_var"] + eps)
    scale = (params["bn_gamma"] * inv_std)[None, :]
    shift = (params["bn_beta"] - params["bn_mean"] * params["bn_gamma"] * inv_std)[None, :]

    def cell(inp, h, c, w, b, ch):
        act = jax.nn.relu(jnp.concatenate([inp, h], axis=-1) @ w + b)
        i = jax.nn.sigmoid(act[:, 0 * ch:1 * ch])
        f = jax.nn.sigmoid(act[:, 1 * ch:2 * ch])
        o = jax.nn.sigmoid(act[:, 2 * ch:3 * ch])
        g = jnp.tanh(act[:, 3 * ch:4 * ch])
        cn = f * c + i * g
        return o * jnp.tanh(cn), cn

    for t in range(T):
        xt = jnp.transpose(x_ntchw[:, t], (0, 2, 3, 1)).reshape(P, cin)
        h1, c1 = cell(xt, h1, c1, w1, params["b1"], ch1)
        h2, c2 = cell(h1, h2, c2, w2, params["b2"], ch2)
        h2 = h2 * scale + shift
    to_nchw = lambda a, C: jnp.transpose(a.reshape(N, H, W, C), (0, 3, 1, 2))
    return to_nchw(h2, ch2), (to_nchw(h2, ch2), to_nchw(c2, ch2))


if __name__ == "__main__":
    # Small deterministic shapes consistent with the module (scaled down from
    # hidden=128, 224x224): batch=2, seq=5, cin=4, 16x16 spatial, hidden=32.
    N, T, CIN, H, W = 2, 5, 4, 16, 16
    HIDDEN = 32
    KERNEL_SIZE = 1  # as in the reference script (=> 1x1 conv)

    key = jax.random.PRNGKey(0)
    k_param, k_x = jax.random.split(key)
    params = init_params(k_param, CIN, HIDDEN)
    x = jax.random.uniform(k_x, (N, T, CIN, H, W), jnp.float32)

    fwd = jax.jit(conv_encoder_forward)
    last_state, (h2, c2) = fwd(params, x)
    jax.block_until_ready((last_state, h2, c2))

    ref_last, (ref_h2, ref_c2) = reference_forward(params, x)
    assert last_state.shape == (N, HIDDEN // 2, H, W)
    # Both kernel and reference use default (MXU) matmul precision; tolerance
    # leaves margin for bf16-pass vs f32 path differences on some backends.
    err = max(float(jnp.max(jnp.abs(last_state - ref_last))),
              float(jnp.max(jnp.abs(c2 - ref_c2))))
    assert err < 5e-3, f"max abs error {err}"

    print("KERNEL_OK")
</pallas_src>

<mosaic_0001>
module attributes {stable_mosaic.version = 11 : i64} {
  func.func @conv_encoder_kernel(%arg0: i32, %arg1: i32, %arg2: memref<1x256x4xf32, #tpu.memory_space<vmem>>, %arg3: memref<160x128xf32, #tpu.memory_space<vmem>>, %arg4: memref<1x128xf32, #tpu.memory_space<vmem>>, %arg5: memref<144x64xf32, #tpu.memory_space<vmem>>, %arg6: memref<1x64xf32, #tpu.memory_space<vmem>>, %arg7: memref<1x16xf32, #tpu.memory_space<vmem>>, %arg8: memref<1x16xf32, #tpu.memory_space<vmem>>, %arg9: memref<256x16xf32, #tpu.memory_space<vmem>>, %arg10: memref<256x16xf32, #tpu.memory_space<vmem>>, %arg11: memref<256x160xf32, #tpu.memory_space<vmem>>, %arg12: memref<256x32xf32, #tpu.memory_space<vmem>>, %arg13: memref<256x144xf32, #tpu.memory_space<vmem>>, %arg14: memref<256x16xf32, #tpu.memory_space<vmem>>) attributes {dimension_semantics = [#tpu.dimension_semantics<parallel>, #tpu.dimension_semantics<arbitrary>], iteration_bounds = array<i64: 2, 5>, scalar_prefetch = 0 : i64, scratch_operands = 4 : i64, tpu.core_type = #tpu.core_type<tc>, window_params = [{transform_indices = @transform_0, window_bounds = array<i64: 1, 256, 4>}, {pipeline_mode = #tpu.pipeline_mode<synchronous>, transform_indices = @transform_1, window_bounds = array<i64: 160, 128>}, {pipeline_mode = #tpu.pipeline_mode<synchronous>, transform_indices = @transform_2, window_bounds = array<i64: 1, 128>}, {pipeline_mode = #tpu.pipeline_mode<synchronous>, transform_indices = @transform_3, window_bounds = array<i64: 144, 64>}, {pipeline_mode = #tpu.pipeline_mode<synchronous>, transform_indices = @transform_4, window_bounds = array<i64: 1, 64>}, {pipeline_mode = #tpu.pipeline_mode<synchronous>, transform_indices = @transform_5, window_bounds = array<i64: 1, 16>}, {pipeline_mode = #tpu.pipeline_mode<synchronous>, transform_indices = @transform_6, window_bounds = array<i64: 1, 16>}, {transform_indices = @transform_7, window_bounds = array<i64: 256, 16>}, {transform_indices = @transform_8, window_bounds = array<i64: 256, 16>}]} {
    %c0_i32 = arith.constant 0 : i32
    %0 = arith.cmpi eq, %arg1, %c0_i32 : i32
    %1 = arith.extui %0 : i1 to i32
    %c0_i32_0 = arith.constant 0 : i32
    %2 = arith.cmpi ne, %1, %c0_i32_0 : i32
    scf.if %2 {
      %cst_44 = arith.constant 0.000000e+00 : f32
      %88 = vector.broadcast %cst_44 : f32 to vector<256x160xf32>
      %c0_45 = arith.constant 0 : index
      %c0_46 = arith.constant 0 : index
      %89 = vector.load %arg11[%c0_45, %c0_46] : memref<256x160xf32, #tpu.memory_space<vmem>>, vector<256x160xf32>
      tpu.vector_store %arg11[%c0_45, %c0_46], %88 {strides = array<i32>} : memref<256x160xf32, #tpu.memory_space<vmem>>, vector<256x160xf32>,
      %cst_47 = arith.constant 0.000000e+00 : f32
      %90 = vector.broadcast %cst_47 : f32 to vector<256x32xf32>
      %c0_48 = arith.constant 0 : index
      %c0_49 = arith.constant 0 : index
      %91 = vector.load %arg12[%c0_48, %c0_49] : memref<256x32xf32, #tpu.memory_space<vmem>>, vector<256x32xf32>
      tpu.vector_store %arg12[%c0_48, %c0_49], %90 {strides = array<i32>} : memref<256x32xf32, #tpu.memory_space<vmem>>, vector<256x32xf32>,
      %cst_50 = arith.constant 0.000000e+00 : f32
      %92 = vector.broadcast %cst_50 : f32 to vector<256x144xf32>
      %c0_51 = arith.constant 0 : index
      %c0_52 = arith.constant 0 : index
      %93 = vector.load %arg13[%c0_51, %c0_52] : memref<256x144xf32, #tpu.memory_space<vmem>>, vector<256x144xf32>
      tpu.vector_store %arg13[%c0_51, %c0_52], %92 {strides = array<i32>} : memref<256x144xf32, #tpu.memory_space<vmem>>, vector<256x144xf32>,
      %cst_53 = arith.constant 0.000000e+00 : f32
      %94 = vector.broadcast %cst_53 : f32 to vector<256x16xf32>
      %c0_54 = arith.constant 0 : index
      %c0_55 = arith.constant 0 : index
      %95 = vector.load %arg14[%c0_54, %c0_55] : memref<256x16xf32, #tpu.memory_space<vmem>>, vector<256x16xf32>
      tpu.vector_store %arg14[%c0_54, %c0_55], %94 {strides = array<i32>} : memref<256x16xf32, #tpu.memory_space<vmem>>, vector<256x16xf32>,
    } else {
    }
    %c0 = arith.constant 0 : index
    %c0_1 = arith.constant 0 : index
    %c0_2 = arith.constant 0 : index
    %3 = vector.load %arg2[%c0, %c0_1, %c0_2] : memref<1x256x4xf32, #tpu.memory_space<vmem>>, vector<1x256x4xf32>
    %4 = vector.shape_cast %3 : vector<1x256x4xf32> to vector<256x4xf32>
    %c0_3 = arith.constant 0 : index
    %c0_4 = arith.constant 0 : index
    %5 = vector.load %arg11[%c0_3, %c0_4] : memref<256x160xf32, #tpu.memory_space<vmem>>, vector<256x4xf32>
    tpu.vector_store %arg11[%c0_3, %c0_4], %4 {strides = array<i32>} : memref<256x160xf32, #tpu.memory_space<vmem>>, vector<256x4xf32>,
    %c0_5 = arith.constant 0 : index
    %c0_6 = arith.constant 0 : index
    %6 = vector.load %arg11[%c0_5, %c0_6] : memref<256x160xf32, #tpu.memory_space<vmem>>, vector<256x160xf32>
    %c0_7 = arith.constant 0 : index
    %c0_8 = arith.constant 0 : index
    %7 = vector.load %arg3[%c0_7, %c0_8] : memref<160x128xf32, #tpu.memory_space<vmem>>, vector<160x128xf32>
    %cst = arith.constant dense<0.000000e+00> : vector<256x128xf32>
    %8 = tpu.matmul %6, %7, %cst {dimension_numbers = #tpu.dot_dimension_numbers<[1], [0], [0], [1], [0, 0, 1, 1], [], []>} : vector<256x160xf32>, vector<160x128xf32>, vector<256x128xf32> -> vector<256x128xf32>
    %c0_9 = arith.constant 0 : index
    %c0_10 = arith.constant 0 : index
    %9 = vector.load %arg4[%c0_9, %c0_10] : memref<1x128xf32, #tpu.memory_space<vmem>>, vector<1x128xf32>
    %10 = vector.broadcast %9 : vector<1x128xf32> to vector<256x128xf32>
    %11 = arith.addf %8, %10 : vector<256x128xf32>
    %cst_11 = arith.constant 0.000000e+00 : f32
    %12 = vector.broadcast %cst_11 : f32 to vector<256x128xf32>
    %13 = arith.maximumf %11, %12 : vector<256x128xf32>
    %c0_12 = arith.constant 0 : index
    %c0_13 = arith.constant 0 : index
    %14 = vector.load %arg12[%c0_12, %c0_13] : memref<256x32xf32, #tpu.memory_space<vmem>>, vector<256x32xf32>
    %15 = vector.extract_strided_slice %13 {offsets = [0, 0], sizes = [256, 32], strides = [1, 1]} : vector<256x128xf32> to vector<256x32xf32>
    %16 = arith.negf %15 : vector<256x32xf32>
    %17 = math.exp %16 : vector<256x32xf32>
    %cst_14 = arith.constant 1.000000e+00 : f32
    %18 = vector.broadcast %cst_14 : f32 to vector<256x32xf32>
    %19 = arith.addf %18, %17 : vector<256x32xf32>
    %20 = arith.divf %18, %19 : vector<256x32xf32>
    %21 = vector.extract_strided_slice %13 {offsets = [0, 32], sizes = [256, 32], strides = [1, 1]} : vector<256x128xf32> to vector<256x32xf32>
    %22 = arith.negf %21 : vector<256x32xf32>
    %23 = math.exp %22 : vector<256x32xf32>
    %cst_15 = arith.constant 1.000000e+00 : f32
    %24 = vector.broadcast %cst_15 : f32 to vector<256x32xf32>
    %25 = arith.addf %24, %23 : vector<256x32xf32>
    %26 = arith.divf %24, %25 : vector<256x32xf32>
    %27 = vector.extract_strided_slice %13 {offsets = [0, 64], sizes = [256, 32], strides = [1, 1]} : vector<256x128xf32> to vector<256x32xf32>
    %28 = arith.negf %27 : vector<256x32xf32>
    %29 = math.exp %28 : vector<256x32xf32>
    %cst_16 = arith.constant 1.000000e+00 : f32
    %30 = vector.broadcast %cst_16 : f32 to vector<256x32xf32>
    %31 = arith.addf %30, %29 : vector<256x32xf32>
    %32 = arith.divf %30, %31 : vector<256x32xf32>
    %33 = vector.extract_strided_slice %13 {offsets = [0, 96], sizes = [256, 32], strides = [1, 1]} : vector<256x128xf32> to vector<256x32xf32>
    %34 = math.tanh %33 : vector<256x32xf32>
    %35 = arith.mulf %26, %14 : vector<256x32xf32>
    %36 = arith.mulf %20, %34 : vector<256x32xf32>
    %37 = arith.addf %35, %36 : vector<256x32xf32>
    %38 = math.tanh %37 : vector<256x32xf32>
    %39 = arith.mulf %32, %38 : vector<256x32xf32>
    %c0_17 = arith.constant 0 : index
    %c128 = arith.constant 128 : index
    %40 = vector.load %arg11[%c0_17, %c128] : memref<256x160xf32, #tpu.memory_space<vmem>>, vector<256x32xf32>
    tpu.vector_store %arg11[%c0_17, %c128], %39 {strides = array<i32>} : memref<256x160xf32, #tpu.memory_space<vmem>>, vector<256x32xf32>,
    %c0_18 = arith.constant 0 : index
    %c0_19 = arith.constant 0 : index
    %41 = vector.load %arg12[%c0_18, %c0_19] : memref<256x32xf32, #tpu.memory_space<vmem>>, vector<256x32xf32>
    tpu.vector_store %arg12[%c0_18, %c0_19], %37 {strides = array<i32>} : memref<256x32xf32, #tpu.memory_space<vmem>>, vector<256x32xf32>,
    %c0_20 = arith.constant 0 : index
    %c0_21 = arith.constant 0 : index
    %42 = vector.load %arg13[%c0_20, %c0_21] : memref<256x144xf32, #tpu.memory_space<vmem>>, vector<256x32xf32>
    tpu.vector_store %arg13[%c0_20, %c0_21], %39 {strides = array<i32>} : memref<256x144xf32, #tpu.memory_space<vmem>>, vector<256x32xf32>,
    %c0_22 = arith.constant 0 : index
    %c0_23 = arith.constant 0 : index
    %43 = vector.load %arg13[%c0_22, %c0_23] : memref<256x144xf32, #tpu.memory_space<vmem>>, vector<256x144xf32>
    %c0_24 = arith.constant 0 : index
    %c0_25 = arith.constant 0 : index
    %44 = vector.load %arg5[%c0_24, %c0_25] : memref<144x64xf32, #tpu.memory_space<vmem>>, vector<144x64xf32>
    %cst_26 = arith.constant dense<0.000000e+00> : vector<256x64xf32>
    %45 = tpu.matmul %43, %44, %cst_26 {dimension_numbers = #tpu.dot_dimension_numbers<[1], [0], [0], [1], [0, 0, 1, 1], [], []>} : vector<256x144xf32>, vector<144x64xf32>, vector<256x64xf32> -> vector<256x64xf32>
    %c0_27 = arith.constant 0 : index
    %c0_28 = arith.constant 0 : index
    %46 = vector.load %arg6[%c0_27, %c0_28] : memref<1x64xf32, #tpu.memory_space<vmem>>, vector<1x64xf32>
    %47 = vector.broadcast %46 : vector<1x64xf32> to vector<256x64xf32>
    %48 = arith.addf %45, %47 : vector<256x64xf32>
    %cst_29 = arith.constant 0.000000e+00 : f32
    %49 = vector.broadcast %cst_29 : f32 to vector<256x64xf32>
    %50 = arith.maximumf %48, %49 : vector<256x64xf32>
    %c0_30 = arith.constant 0 : index
    %c0_31 = arith.constant 0 : index
    %51 = vector.load %arg14[%c0_30, %c0_31] : memref<256x16xf32, #tpu.memory_space<vmem>>, vector<256x16xf32>
    %52 = vector.extract_strided_slice %50 {offsets = [0, 0], sizes = [256, 16], strides = [1, 1]} : vector<256x64xf32> to vector<256x16xf32>
    %53 = arith.negf %52 : vector<256x16xf32>
    %54 = math.exp %53 : vector<256x16xf32>
    %cst_32 = arith.constant 1.000000e+00 : f32
    %55 = vector.broadcast %cst_32 : f32 to vector<256x16xf32>
    %56 = arith.addf %55, %54 : vector<256x16xf32>
    %57 = arith.divf %55, %56 : vector<256x16xf32>
    %58 = vector.extract_strided_slice %50 {offsets = [0, 16], sizes = [256, 16], strides = [1, 1]} : vector<256x64xf32> to vector<256x16xf32>
    %59 = arith.negf %58 : vector<256x16xf32>
    %60 = math.exp %59 : vector<256x16xf32>
    %cst_33 = arith.constant 1.000000e+00 : f32
    %61 = vector.broadcast %cst_33 : f32 to vector<256x16xf32>
    %62 = arith.addf %61, %60 : vector<256x16xf32>
    %63 = arith.divf %61, %62 : vector<256x16xf32>
    %64 = vector.extract_strided_slice %50 {offsets = [0, 32], sizes = [256, 16], strides = [1, 1]} : vector<256x64xf32> to vector<256x16xf32>
    %65 = arith.negf %64 : vector<256x16xf32>
    %66 = math.exp %65 : vector<256x16xf32>
    %cst_34 = arith.constant 1.000000e+00 : f32
    %67 = vector.broadcast %cst_34 : f32 to vector<256x16xf32>
    %68 = arith.addf %67, %66 : vector<256x16xf32>
    %69 = arith.divf %67, %68 : vector<256x16xf32>
    %70 = vector.extract_strided_slice %50 {offsets = [0, 48], sizes = [256, 16], strides = [1, 1]} : vector<256x64xf32> to vector<256x16xf32>
    %71 = math.tanh %70 : vector<256x16xf32>
    %72 = arith.mulf %63, %51 : vector<256x16xf32>
    %73 = arith.mulf %57, %71 : vector<256x16xf32>
    %74 = arith.addf %72, %73 : vector<256x16xf32>
    %75 = math.tanh %74 : vector<256x16xf32>
    %76 = arith.mulf %69, %75 : vector<256x16xf32>
    %c0_35 = arith.constant 0 : index
    %c0_36 = arith.constant 0 : index
    %77 = vector.load %arg7[%c0_35, %c0_36] : memref<1x16xf32, #tpu.memory_space<vmem>>, vector<1x16xf32>
    %78 = vector.broadcast %77 : vector<1x16xf32> to vector<256x16xf32>
    %79 = arith.mulf %76, %78 : vector<256x16xf32>
    %c0_37 = arith.constant 0 : index
    %c0_38 = arith.constant 0 : index
    %80 = vector.load %arg8[%c0_37, %c0_38] : memref<1x16xf32, #tpu.memory_space<vmem>>, vector<1x16xf32>
    %81 = vector.broadcast %80 : vector<1x16xf32> to vector<256x16xf32>
    %82 = arith.addf %79, %81 : vector<256x16xf32>
    %c0_39 = arith.constant 0 : index
    %c128_40 = arith.constant 128 : index
    %83 = vector.load %arg13[%c0_39, %c128_40] : memref<256x144xf32, #tpu.memory_space<vmem>>, vector<256x16xf32>
    tpu.vector_store %arg13[%c0_39, %c128_40], %82 {strides = array<i32>} : memref<256x144xf32, #tpu.memory_space<vmem>>, vector<256x16xf32>,
    %c0_41 = arith.constant 0 : index
    %c0_42 = arith.constant 0 : index
    %84 = vector.load %arg14[%c0_41, %c0_42] : memref<256x16xf32, #tpu.memory_space<vmem>>, vector<256x16xf32>
    tpu.vector_store %arg14[%c0_41, %c0_42], %74 {strides = array<i32>} : memref<256x16xf32, #tpu.memory_space<vmem>>, vector<256x16xf32>,
    %c4_i32 = arith.constant 4 : i32
    %85 = arith.cmpi eq, %arg1, %c4_i32 : i32
    %86 = arith.extui %85 : i1 to i32
    %c0_i32_43 = arith.constant 0 : i32
    %87 = arith.cmpi ne, %86, %c0_i32_43 : i32
    scf.if %87 {
      %c0_44 = arith.constant 0 : index
      %c0_45 = arith.constant 0 : index
      %88 = vector.load %arg9[%c0_44, %c0_45] : memref<256x16xf32, #tpu.memory_space<vmem>>, vector<256x16xf32>
      tpu.vector_store %arg9[%c0_44, %c0_45], %82 {strides = array<i32>} : memref<256x16xf32, #tpu.memory_space<vmem>>, vector<256x16xf32>,
      %c0_46 = arith.constant 0 : index
      %c0_47 = arith.constant 0 : index
      %89 = vector.load %arg10[%c0_46, %c0_47] : memref<256x16xf32, #tpu.memory_space<vmem>>, vector<256x16xf32>
      tpu.vector_store %arg10[%c0_46, %c0_47], %74 {strides = array<i32>} : memref<256x16xf32, #tpu.memory_space<vmem>>, vector<256x16xf32>,
    } else {
    }
    return
  }
  func.func @transform_0(%arg0: i32, %arg1: i32) -> (i32, i32, i32) {
    %c0_i32 = arith.constant 0 : i32
    %c0_i32_0 = arith.constant 0 : i32
    return %arg1, %arg0, %c0_i32 : i32, i32, i32
  }
  func.func @transform_1(%arg0: i32, %arg1: i32) -> (i32, i32) {
    %c0_i32 = arith.constant 0 : i32
    %c0_i32_0 = arith.constant 0 : i32
    %c0_i32_1 = arith.constant 0 : i32
    return %c0_i32, %c0_i32_0 : i32, i32
  }
  func.func @transform_2(%arg0: i32, %arg1: i32) -> (i32, i32) {
    %c0_i32 = arith.constant 0 : i32
    %c0_i32_0 = arith.constant 0 : i32
    %c0_i32_1 = arith.constant 0 : i32
    return %c0_i32, %c0_i32_0 : i32, i32
  }
  func.func @transform_3(%arg0: i32, %arg1: i32) -> (i32, i32) {
    %c0_i32 = arith.constant 0 : i32
    %c0_i32_0 = arith.constant 0 : i32
    %c0_i32_1 = arith.constant 0 : i32
    return %c0_i32, %c0_i32_0 : i32, i32
  }
  func.func @transform_4(%arg0: i32, %arg1: i32) -> (i32, i32) {
    %c0_i32 = arith.constant 0 : i32
    %c0_i32_0 = arith.constant 0 : i32
    %c0_i32_1 = arith.constant 0 : i32
    return %c0_i32, %c0_i32_0 : i32, i32
  }
  func.func @transform_5(%arg0: i32, %arg1: i32) -> (i32, i32) {
    %c0_i32 = arith.constant 0 : i32
    %c0_i32_0 = arith.constant 0 : i32
    %c0_i32_1 = arith.constant 0 : i32
    return %c0_i32, %c0_i32_0 : i32, i32
  }
  func.func @transform_6(%arg0: i32, %arg1: i32) -> (i32, i32) {
    %c0_i32 = arith.constant 0 : i32
    %c0_i32_0 = arith.constant 0 : i32
    %c0_i32_1 = arith.constant 0 : i32
    return %c0_i32, %c0_i32_0 : i32, i32
  }
  func.func @transform_7(%arg0: i32, %arg1: i32) -> (i32, i32) {
    %c0_i32 = arith.constant 0 : i32
    %c0_i32_0 = arith.constant 0 : i32
    return %arg0, %c0_i32 : i32, i32
  }
  func.func @transform_8(%arg0: i32, %arg1: i32) -> (i32, i32) {
    %c0_i32 = arith.constant 0 : i32
    %c0_i32_0 = arith.constant 0 : i32
    return %arg0, %c0_i32 : i32, i32
  }
}

</mosaic_0001>

<bundles_post_ra>
// kernel: conv_encoder_forward.1
= control target key start
LH: loop header
LB: loop body
LE: loop exit
PB: predicated region body
PF: predicated region fallthrough
CT: control target
= control target key end

     0   :  { %s5909_s27 = smov 0   ;;  %s5911_s28 = smov 0   ;;  %s9606_s0 = inlined_call_operand.vmem [shape: f32[5,512,4], index: 0, kind: input, shape index: {}]   ;;  %s9607_s1 = inlined_call_operand.vmem [shape: f32[160,128], index: 1, kind: input, shape index: {}]   ;;  %s9608_s2 = inlined_call_operand.vmem [shape: f32[1,128], index: 2, kind: input, shape index: {}]   ;;  %s9609_s3 = inlined_call_operand.vmem [shape: f32[144,64], index: 3, kind: input, shape index: {}]   ;;  %s9610_s4 = inlined_call_operand.vmem [shape: f32[1,64], index: 4, kind: input, shape index: {}]   ;;  %s9611_s5 = inlined_call_operand.vmem [shape: f32[1,16], index: 5, kind: input, shape index: {}]   ;;  %s9612_s6 = inlined_call_operand.vmem [shape: f32[1,16], index: 6, kind: input, shape index: {}]   ;;  %s9613_s7 = inlined_call_operand.vmem [shape: f32[512,16], index: 7, kind: output, shape index: {0}]   ;;  %s9614_s8 = inlined_call_operand.vmem [shape: f32[512,16], index: 8, kind: output, shape index: {1}]  }
   0x1   :  { %s5913_s29 = smov 0   ;;  %s5915_s30 = smov 0  }
   0x2   :  { %s5917_s9 = smov 0  }
   0x3 LB: > { %s28_s10 = sadd.s32 1, %s5847_s29  ;;  %s31_s11 = sadd.s32 1, %s5851_s30  ;;  %s5855_s9 = sphi %s5917_s9, %s19_s9   ;;  %s5851_s30 = sphi %s5915_s30, %s9809_s30   ;;  %s5847_s29 = sphi %s5913_s29, %s9808_s29   ;;  %s5843_s28 = sphi %s5911_s28, %s9807_s28   ;;  %s5839_s27 = sphi %s5909_s27, %s9806_s27  }
   0x4   : > { %p29_p0 = scmp.ge.s32.totalorder %s28_s10, 5  ;;  %p5112_p1 = scmp.ge.s32.totalorder %s5855_s9, 1 }
   0x5   : > { %p284_p2 = scmp.lt.s32.totalorder %s5855_s9, 11 }
   0x6   : > { %s9811_s10 = smov (%p29_p0, %s28_s10), 0  ;;  %s9813_s11 = smov (!%p29_p0, %s31_s11), %s5851_s30 }
   0x7   : > { %p285_p3 = pnand %p5112_p1, %p284_p2  ;;  %p33_p4 = scmp.ge.s32.totalorder %s9813_s11, 2 }
   0x9   : > { %s9815_s11 = smov (%p33_p4, %s9813_s11), 0  ;;  %288 = sbr.rel (%p285_p3) target bundleno = 1830 (0x726), region = 48 }
   0xe   : > { %s5113_s12 = sshll.u32 %s5843_s28, 5  ;;  %p328_p5 = scmp.lt.s32.totalorder %s5839_s27, 4 }
   0xf   : > { %p330_p6 = scmp.lt.s32.totalorder %s5113_s12, 63  ;;  %p5120_p7 = scmp.ne.s32.totalorder %s5839_s27, 0 }
  0x10   : > { %s329_s13 = scalar_select %p328_p5, %s5839_s27, 4 }
  0x11   : > { %s9817_s12 = smov (!%p330_p6, %s5113_s12), 63  ;;  %352 = sbr.rel (%p5120_p7) target bundleno = 215 (0xd7), region = 52 }
  0x12   : > { %s5114_s14 = sshll.u32 %s329_s13, 6  ;;  %s5117_s16 = sshll.u32 %s9817_s12, 3 }
  0x13   : > { %s333_s15 = sadd.s32 %s5114_s14, %s9817_s12  ;;  %s5946_s20 = scalar_lea.vmem %s9613_s7, %s5117_s16 }
  0x14   : > { %s5115_s17 = sshll.u32 %s333_s15, 3  ;;  %s5956_s26 = scalar_lea.vmem %s9614_s8, %s5117_s16 }
  0x15   : > { %s5951_s23 = scalar_lea.vmem %s9606_s0, %s5115_s17 }
  0x16   : > { %v5857_v0 = vmov 0.0   ;;  %vm354_vm0 = vcmask 261120   ;;  %vm451_vm1 = vcmask 130048  }
  0x17   : > { %353 = vst [vmem:[#allocation2] sm:$0xff] %v5857_v0 }
  0x18   : > { %356 = vst [vmem:[#allocation2 + $0x10] sm:$0xff] %v5857_v0 }
  0x19   : > { %358 = vst [vmem:[#allocation2 + $0x20] sm:$0xff] %v5857_v0 }
  0x1a   : > { %360 = vst [vmem:[#allocation2 + $0x30] sm:$0xff] %v5857_v0 }
  0x1b   : > { %362 = vst [vmem:[#allocation2 + $0x40] sm:$0xff] %v5857_v0 }
  0x1c   : > { %364 = vst [vmem:[#allocation2 + $0x50] sm:$0xff] %v5857_v0 }
  0x1d   : > { %366 = vst [vmem:[#allocation2 + $0x60] sm:$0xff] %v5857_v0 }
  0x1e   : > { %368 = vst [vmem:[#allocation2 + $0x70] sm:$0xff] %v5857_v0 }
  0x1f   : > { %370 = vst [vmem:[#allocation2 + $0x80] sm:$0xff] %v5857_v0 }
  0x20   : > { %372 = vst [vmem:[#allocation2 + $0x90] sm:$0xff] %v5857_v0 }
  0x21   : > { %374 = vst [vmem:[#allocation2 + $0xa0] sm:$0xff] %v5857_v0 }
  0x22   : > { %376 = vst [vmem:[#allocation2 + $0xb0] sm:$0xff] %v5857_v0 }
  0x23   : > { %378 = vst [vmem:[#allocation2 + $0xc0] sm:$0xff] %v5857_v0 }
  0x24   : > { %380 = vst [vmem:[#allocation2 + $0xd0] sm:$0xff] %v5857_v0 }
  0x25   : > { %382 = vst [vmem:[#allocation2 + $0xe0] sm:$0xff] %v5857_v0 }
  0x26   : > { %384 = vst [vmem:[#allocation2 + $0xf0] sm:$0xff] %v5857_v0 }
  0x27   : > { %386 = vst [vmem:[#allocation2 + $0x100] sm:$0xff] %v5857_v0 }
  0x28   : > { %388 = vst [vmem:[#allocation2 + $0x110] sm:$0xff] %v5857_v0 }
  0x29   : > { %390 = vst [vmem:[#allocation2 + $0x120] sm:$0xff] %v5857_v0 }
  0x2a   : > { %392 = vst [vmem:[#allocation2 + $0x130] sm:$0xff] %v5857_v0 }
  0x2b   : > { %394 = vst [vmem:[#allocation2 + $0x140] sm:$0xff] %v5857_v0 }
  0x2c   : > { %396 = vst [vmem:[#allocation2 + $0x150] sm:$0xff] %v5857_v0 }
  0x2d   : > { %398 = vst [vmem:[#allocation2 + $0x160] sm:$0xff] %v5857_v0 }
  0x2e   : > { %400 = vst [vmem:[#allocation2 + $0x170] sm:$0xff] %v5857_v0 }
  0x2f   : > { %402 = vst [vmem:[#allocation2 + $0x180] sm:$0xff] %v5857_v0 }
  0x30   : > { %404 = vst [vmem:[#allocation2 + $0x190] sm:$0xff] %v5857_v0 }
  0x31   : > { %406 = vst [vmem:[#allocation2 + $0x1a0] sm:$0xff] %v5857_v0 }
  0x32   : > { %408 = vst [vmem:[#allocation2 + $0x1b0] sm:$0xff] %v5857_v0 }
  0x33   : > { %410 = vst [vmem:[#allocation2 + $0x1c0] sm:$0xff] %v5857_v0 }
  0x34   : > { %412 = vst [vmem:[#allocation2 + $0x1d0] sm:$0xff] %v5857_v0 }
  0x35   : > { %414 = vst [vmem:[#allocation2 + $0x1e0] sm:$0xff] %v5857_v0 }
  0x36   : > { %416 = vst [vmem:[#allocation2 + $0x1f0] sm:$0xff] %v5857_v0 }
  0x37   : > { %450 = vst [vmem:[#allocation4] sm:$0xff] %v5857_v0 }
  0x38   : > { %453 = vst [vmem:[#allocation4 + $0x10] sm:$0xff] %v5857_v0 }
  0x39   : > { %455 = vst [vmem:[#allocation4 + $0x20] sm:$0xff] %v5857_v0 }
  0x3a   : > { %457 = vst [vmem:[#allocation4 + $0x30] sm:$0xff] %v5857_v0 }
  0x3b   : > { %459 = vst [vmem:[#allocation4 + $0x40] sm:$0xff] %v5857_v0 }
  0x3c   : > { %461 = vst [vmem:[#allocation4 + $0x50] sm:$0xff] %v5857_v0 }
  0x3d   : > { %463 = vst [vmem:[#allocation4 + $0x60] sm:$0xff] %v5857_v0 }
  0x3e   : > { %465 = vst [vmem:[#allocation4 + $0x70] sm:$0xff] %v5857_v0 }
  0x3f   : > { %467 = vst [vmem:[#allocation4 + $0x80] sm:$0xff] %v5857_v0 }
  0x40   : > { %469 = vst [vmem:[#allocation4 + $0x90] sm:$0xff] %v5857_v0 }
  0x41   : > { %471 = vst [vmem:[#allocation4 + $0xa0] sm:$0xff] %v5857_v0 }
  0x42   : > { %473 = vst [vmem:[#allocation4 + $0xb0] sm:$0xff] %v5857_v0 }
  0x43   : > { %475 = vst [vmem:[#allocation4 + $0xc0] sm:$0xff] %v5857_v0 }
  0x44   : > { %477 = vst [vmem:[#allocation4 + $0xd0] sm:$0xff] %v5857_v0 }
  0x45   : > { %479 = vst [vmem:[#allocation4 + $0xe0] sm:$0xff] %v5857_v0 }
  0x46   : > { %481 = vst [vmem:[#allocation4 + $0xf0] sm:$0xff] %v5857_v0 }
  0x47   : > { %483 = vst [vmem:[#allocation4 + $0x100] sm:$0xff] %v5857_v0 }
  0x48   : > { %485 = vst [vmem:[#allocation4 + $0x110] sm:$0xff] %v5857_v0 }
  0x49   : > { %487 = vst [vmem:[#allocation4 + $0x120] sm:$0xff] %v5857_v0 }
  0x4a   : > { %489 = vst [vmem:[#allocation4 + $0x130] sm:$0xff] %v5857_v0 }
  0x4b   : > { %491 = vst [vmem:[#allocation4 + $0x140] sm:$0xff] %v5857_v0 }
  0x4c   : > { %493 = vst [vmem:[#allocation4 + $0x150] sm:$0xff] %v5857_v0 }
  0x4d   : > { %495 = vst [vmem:[#allocation4 + $0x160] sm:$0xff] %v5857_v0 }
  0x4e   : > { %497 = vst [vmem:[#allocation4 + $0x170] sm:$0xff] %v5857_v0 }
  0x4f   : > { %499 = vst [vmem:[#allocation4 + $0x180] sm:$0xff] %v5857_v0 }
  0x50   : > { %501 = vst [vmem:[#allocation4 + $0x190] sm:$0xff] %v5857_v0 }
  0x51   : > { %503 = vst [vmem:[#allocation4 + $0x1a0] sm:$0xff] %v5857_v0 }
  0x52   : > { %505 = vst [vmem:[#allocation4 + $0x1b0] sm:$0xff] %v5857_v0 }
  0x53   : > { %507 = vst [vmem:[#allocation4 + $0x1c0] sm:$0xff] %v5857_v0 }
  0x54   : > { %509 = vst [vmem:[#allocation4 + $0x1d0] sm:$0xff] %v5857_v0 }
  0x55   : > { %511 = vst [vmem:[#allocation4 + $0x1e0] sm:$0xff] %v5857_v0 }
  0x56   : > { %513 = vst [vmem:[#allocation4 + $0x1f0] sm:$0xff] %v5857_v0 }
  0x57   : > { %355 = vst.msk [vmem:[#allocation2 + $0x8] sm:$0xff] %vm354_vm0, %v5857_v0 }
  0x58   : > { %357 = vst.msk [vmem:[#allocation2 + $0x18] sm:$0xff] %vm354_vm0, %v5857_v0 }
  0x59   : > { %359 = vst.msk [vmem:[#allocation2 + $0x28] sm:$0xff] %vm354_vm0, %v5857_v0 }
  0x5a   : > { %361 = vst.msk [vmem:[#allocation2 + $0x38] sm:$0xff] %vm354_vm0, %v5857_v0 }
  0x5b   : > { %363 = vst.msk [vmem:[#allocation2 + $0x48] sm:$0xff] %vm354_vm0, %v5857_v0 }
  0x5c   : > { %365 = vst.msk [vmem:[#allocation2 + $0x58] sm:$0xff] %vm354_vm0, %v5857_v0 }
  0x5d   : > { %367 = vst.msk [vmem:[#allocation2 + $0x68] sm:$0xff] %vm354_vm0, %v5857_v0 }
  0x5e   : > { %369 = vst.msk [vmem:[#allocation2 + $0x78] sm:$0xff] %vm354_vm0, %v5857_v0 }
  0x5f   : > { %371 = vst.msk [vmem:[#allocation2 + $0x88] sm:$0xff] %vm354_vm0, %v5857_v0 }
  0x60   : > { %373 = vst.msk [vmem:[#allocation2 + $0x98] sm:$0xff] %vm354_vm0, %v5857_v0 }
  0x61   : > { %375 = vst.msk [vmem:[#allocation2 + $0xa8] sm:$0xff] %vm354_vm0, %v5857_v0 }
  0x62   : > { %377 = vst.msk [vmem:[#allocation2 + $0xb8] sm:$0xff] %vm354_vm0, %v5857_v0 }
  0x63   : > { %379 = vst.msk [vmem:[#allocation2 + $0xc8] sm:$0xff] %vm354_vm0, %v5857_v0 }
  0x64   : > { %381 = vst.msk [vmem:[#allocation2 + $0xd8] sm:$0xff] %vm354_vm0, %v5857_v0 }
  0x65   : > { %383 = vst.msk [vmem:[#allocation2 + $0xe8] sm:$0xff] %vm354_vm0, %v5857_v0 }
  0x66   : > { %385 = vst.msk [vmem:[#allocation2 + $0xf8] sm:$0xff] %vm354_vm0, %v5857_v0 }
  0x67   : > { %387 = vst.msk [vmem:[#allocation2 + $0x108] sm:$0xff] %vm354_vm0, %v5857_v0 }
  0x68   : > { %389 = vst.msk [vmem:[#allocation2 + $0x118] sm:$0xff] %vm354_vm0, %v5857_v0 }
  0x69   : > { %391 = vst.msk [vmem:[#allocation2 + $0x128] sm:$0xff] %vm354_vm0, %v5857_v0 }
  0x6a   : > { %393 = vst.msk [vmem:[#allocation2 + $0x138] sm:$0xff] %vm354_vm0, %v5857_v0 }
  0x6b   : > { %395 = vst.msk [vmem:[#allocation2 + $0x148] sm:$0xff] %vm354_vm0, %v5857_v0 }
  0x6c   : > { %397 = vst.msk [vmem:[#allocation2 + $0x158] sm:$0xff] %vm354_vm0, %v5857_v0 }
  0x6d   : > { %399 = vst.msk [vmem:[#allocation2 + $0x168] sm:$0xff] %vm354_vm0, %v5857_v0 }
  0x6e   : > { %401 = vst.msk [vmem:[#allocation2 + $0x178] sm:$0xff] %vm354_vm0, %v5857_v0 }
  0x6f   : > { %403 = vst.msk [vmem:[#allocation2 + $0x188] sm:$0xff] %vm354_vm0, %v5857_v0 }
  0x70   : > { %405 = vst.msk [vmem:[#allocation2 + $0x198] sm:$0xff] %vm354_vm0, %v5857_v0 }
  0x71   : > { %407 = vst.msk [vmem:[#allocation2 + $0x1a8] sm:$0xff] %vm354_vm0, %v5857_v0 }
  0x72   : > { %409 = vst.msk [vmem:[#allocation2 + $0x1b8] sm:$0xff] %vm354_vm0, %v5857_v0 }
  0x73   : > { %411 = vst.msk [vmem:[#allocation2 + $0x1c8] sm:$0xff] %vm354_vm0, %v5857_v0 }
  0x74   : > { %413 = vst.msk [vmem:[#allocation2 + $0x1d8] sm:$0xff] %vm354_vm0, %v5857_v0 }
  0x75   : > { %415 = vst.msk [vmem:[#allocation2 + $0x1e8] sm:$0xff] %vm354_vm0, %v5857_v0 }
  0x76   : > { %417 = vst.msk [vmem:[#allocation2 + $0x1f8] sm:$0xff] %vm354_vm0, %v5857_v0 }
  0x77   : > { %418 = vst.msk [vmem:[#allocation3] sm:$0xff] %vm354_vm0, %v5857_v0 }
  0x78   : > { %419 = vst.msk [vmem:[#allocation3 + $0x8] sm:$0xff] %vm354_vm0, %v5857_v0 }
  0x79   : > { %420 = vst.msk [vmem:[#allocation3 + $0x10] sm:$0xff] %vm354_vm0, %v5857_v0 }
  0x7a   : > { %421 = vst.msk [vmem:[#allocation3 + $0x18] sm:$0xff] %vm354_vm0, %v5857_v0 }
  0x7b   : > { %422 = vst.msk [vmem:[#allocation3 + $0x20] sm:$0xff] %vm354_vm0, %v5857_v0 }
  0x7c   : > { %423 = vst.msk [vmem:[#allocation3 + $0x28] sm:$0xff] %vm354_vm0, %v5857_v0 }
  0x7d   : > { %424 = vst.msk [vmem:[#allocation3 + $0x30] sm:$0xff] %vm354_vm0, %v5857_v0 }
  0x7e   : > { %425 = vst.msk [vmem:[#allocation3 + $0x38] sm:$0xff] %vm354_vm0, %v5857_v0 }
  0x7f   : > { %426 = vst.msk [vmem:[#allocation3 + $0x40] sm:$0xff] %vm354_vm0, %v5857_v0 }
  0x80   : > { %427 = vst.msk [vmem:[#allocation3 + $0x48] sm:$0xff] %vm354_vm0, %v5857_v0 }
  0x81   : > { %428 = vst.msk [vmem:[#allocation3 + $0x50] sm:$0xff] %vm354_vm0, %v5857_v0 }
  0x82   : > { %429 = vst.msk [vmem:[#allocation3 + $0x58] sm:$0xff] %vm354_vm0, %v5857_v0 }
  0x83   : > { %430 = vst.msk [vmem:[#allocation3 + $0x60] sm:$0xff] %vm354_vm0, %v5857_v0 }
  0x84   : > { %431 = vst.msk [vmem:[#allocation3 + $0x68] sm:$0xff] %vm354_vm0, %v5857_v0 }
  0x85   : > { %432 = vst.msk [vmem:[#allocation3 + $0x70] sm:$0xff] %vm354_vm0, %v5857_v0 }
  0x86   : > { %433 = vst.msk [vmem:[#allocation3 + $0x78] sm:$0xff] %vm354_vm0, %v5857_v0 }
  0x87   : > { %434 = vst.msk [vmem:[#allocation3 + $0x80] sm:$0xff] %vm354_vm0, %v5857_v0 }
  0x88   : > { %435 = vst.msk [vmem:[#allocation3 + $0x88] sm:$0xff] %vm354_vm0, %v5857_v0 }
  0x89   : > { %436 = vst.msk [vmem:[#allocation3 + $0x90] sm:$0xff] %vm354_vm0, %v5857_v0 }
  0x8a   : > { %437 = vst.msk [vmem:[#allocation3 + $0x98] sm:$0xff] %vm354_vm0, %v5857_v0 }
  0x8b   : > { %438 = vst.msk [vmem:[#allocation3 + $0xa0] sm:$0xff] %vm354_vm0, %v5857_v0 }
  0x8c   : > { %439 = vst.msk [vmem:[#allocation3 + $0xa8] sm:$0xff] %vm354_vm0, %v5857_v0 }
  0x8d   : > { %440 = vst.msk [vmem:[#allocation3 + $0xb0] sm:$0xff] %vm354_vm0, %v5857_v0 }
  0x8e   : > { %441 = vst.msk [vmem:[#allocation3 + $0xb8] sm:$0xff] %vm354_vm0, %v5857_v0 }
  0x8f   : > { %442 = vst.msk [vmem:[#allocation3 + $0xc0] sm:$0xff] %vm354_vm0, %v5857_v0 }
  0x90   : > { %443 = vst.msk [vmem:[#allocation3 + $0xc8] sm:$0xff] %vm354_vm0, %v5857_v0 }
  0x91   : > { %444 = vst.msk [vmem:[#allocation3 + $0xd0] sm:$0xff] %vm354_vm0, %v5857_v0 }
  0x92   : > { %445 = vst.msk [vmem:[#allocation3 + $0xd8] sm:$0xff] %vm354_vm0, %v5857_v0 }
  0x93   : > { %446 = vst.msk [vmem:[#allocation3 + $0xe0] sm:$0xff] %vm354_vm0, %v5857_v0 }
  0x94   : > { %447 = vst.msk [vmem:[#allocation3 + $0xe8] sm:$0xff] %vm354_vm0, %v5857_v0 }
  0x95   : > { %448 = vst.msk [vmem:[#allocation3 + $0xf0] sm:$0xff] %vm354_vm0, %v5857_v0 }
  0x96   : > { %449 = vst.msk [vmem:[#allocation3 + $0xf8] sm:$0xff] %vm354_vm0, %v5857_v0 }
  0x97   : > { %452 = vst.msk [vmem:[#allocation4 + $0x8] sm:$0xff] %vm451_vm1, %v5857_v0 }
  0x98   : > { %454 = vst.msk [vmem:[#allocation4 + $0x18] sm:$0xff] %vm451_vm1, %v5857_v0 }
  0x99   : > { %456 = vst.msk [vmem:[#allocation4 + $0x28] sm:$0xff] %vm451_vm1, %v5857_v0 }
  0x9a   : > { %458 = vst.msk [vmem:[#allocation4 + $0x38] sm:$0xff] %vm451_vm1, %v5857_v0 }
  0x9b   : > { %460 = vst.msk [vmem:[#allocation4 + $0x48] sm:$0xff] %vm451_vm1, %v5857_v0 }
  0x9c   : > { %462 = vst.msk [vmem:[#allocation4 + $0x58] sm:$0xff] %vm451_vm1, %v5857_v0 }
  0x9d   : > { %464 = vst.msk [vmem:[#allocation4 + $0x68] sm:$0xff] %vm451_vm1, %v5857_v0 }
  0x9e   : > { %466 = vst.msk [vmem:[#allocation4 + $0x78] sm:$0xff] %vm451_vm1, %v5857_v0 }
  0x9f   : > { %468 = vst.msk [vmem:[#allocation4 + $0x88] sm:$0xff] %vm451_vm1, %v5857_v0 }
  0xa0   : > { %470 = vst.msk [vmem:[#allocation4 + $0x98] sm:$0xff] %vm451_vm1, %v5857_v0 }
  0xa1   : > { %472 = vst.msk [vmem:[#allocation4 + $0xa8] sm:$0xff] %vm451_vm1, %v5857_v0 }
  0xa2   : > { %474 = vst.msk [vmem:[#allocation4 + $0xb8] sm:$0xff] %vm451_vm1, %v5857_v0 }
  0xa3   : > { %476 = vst.msk [vmem:[#allocation4 + $0xc8] sm:$0xff] %vm451_vm1, %v5857_v0 }
  0xa4   : > { %478 = vst.msk [vmem:[#allocation4 + $0xd8] sm:$0xff] %vm451_vm1, %v5857_v0 }
  0xa5   : > { %480 = vst.msk [vmem:[#allocation4 + $0xe8] sm:$0xff] %vm451_vm1, %v5857_v0 }
  0xa6   : > { %482 = vst.msk [vmem:[#allocation4 + $0xf8] sm:$0xff] %vm451_vm1, %v5857_v0 }
  0xa7   : > { %484 = vst.msk [vmem:[#allocation4 + $0x108] sm:$0xff] %vm451_vm1, %v5857_v0 }
  0xa8   : > { %486 = vst.msk [vmem:[#allocation4 + $0x118] sm:$0xff] %vm451_vm1, %v5857_v0 }
  0xa9   : > { %488 = vst.msk [vmem:[#allocation4 + $0x128] sm:$0xff] %vm451_vm1, %v5857_v0 }
  0xaa   : > { %490 = vst.msk [vmem:[#allocation4 + $0x138] sm:$0xff] %vm451_vm1, %v5857_v0 }
  0xab   : > { %492 = vst.msk [vmem:[#allocation4 + $0x148] sm:$0xff] %vm451_vm1, %v5857_v0 }
  0xac   : > { %494 = vst.msk [vmem:[#allocation4 + $0x158] sm:$0xff] %vm451_vm1, %v5857_v0 }
  0xad   : > { %496 = vst.msk [vmem:[#allocation4 + $0x168] sm:$0xff] %vm451_vm1, %v5857_v0 }
  0xae   : > { %498 = vst.msk [vmem:[#allocation4 + $0x178] sm:$0xff] %vm451_vm1, %v5857_v0 }
  0xaf   : > { %500 = vst.msk [vmem:[#allocation4 + $0x188] sm:$0xff] %vm451_vm1, %v5857_v0 }
  0xb0   : > { %502 = vst.msk [vmem:[#allocation4 + $0x198] sm:$0xff] %vm451_vm1, %v5857_v0 }
  0xb1   : > { %504 = vst.msk [vmem:[#allocation4 + $0x1a8] sm:$0xff] %vm451_vm1, %v5857_v0 }
  0xb2   : > { %506 = vst.msk [vmem:[#allocation4 + $0x1b8] sm:$0xff] %vm451_vm1, %v5857_v0 }
  0xb3   : > { %508 = vst.msk [vmem:[#allocation4 + $0x1c8] sm:$0xff] %vm451_vm1, %v5857_v0 }
  0xb4   : > { %510 = vst.msk [vmem:[#allocation4 + $0x1d8] sm:$0xff] %vm451_vm1, %v5857_v0 }
  0xb5   : > { %512 = vst.msk [vmem:[#allocation4 + $0x1e8] sm:$0xff] %vm451_vm1, %v5857_v0 }
  0xb6   : > { %514 = vst.msk [vmem:[#allocation4 + $0x1f8] sm:$0xff] %vm451_vm1, %v5857_v0 }
  0xb7   : > { %515 = vst.msk [vmem:[#allocation5] sm:$0xff] %vm451_vm1, %v5857_v0 }
  0xb8   : > { %516 = vst.msk [vmem:[#allocation5 + $0x8] sm:$0xff] %vm451_vm1, %v5857_v0 }
  0xb9   : > { %517 = vst.msk [vmem:[#allocation5 + $0x10] sm:$0xff] %vm451_vm1, %v5857_v0 }
  0xba   : > { %518 = vst.msk [vmem:[#allocation5 + $0x18] sm:$0xff] %vm451_vm1, %v5857_v0 }
  0xbb   : > { %519 = vst.msk [vmem:[#allocation5 + $0x20] sm:$0xff] %vm451_vm1, %v5857_v0 }
  0xbc   : > { %520 = vst.msk [vmem:[#allocation5 + $0x28] sm:$0xff] %vm451_vm1, %v5857_v0 }
  0xbd   : > { %521 = vst.msk [vmem:[#allocation5 + $0x30] sm:$0xff] %vm451_vm1, %v5857_v0 }
  0xbe   : > { %522 = vst.msk [vmem:[#allocation5 + $0x38] sm:$0xff] %vm451_vm1, %v5857_v0 }
  0xbf   : > { %523 = vst.msk [vmem:[#allocation5 + $0x40] sm:$0xff] %vm451_vm1, %v5857_v0 }
  0xc0   : > { %524 = vst.msk [vmem:[#allocation5 + $0x48] sm:$0xff] %vm451_vm1, %v5857_v0 }
  0xc1   : > { %525 = vst.msk [vmem:[#allocation5 + $0x50] sm:$0xff] %vm451_vm1, %v5857_v0 }
  0xc2   : > { %526 = vst.msk [vmem:[#allocation5 + $0x58] sm:$0xff] %vm451_vm1, %v5857_v0 }
  0xc3   : > { %527 = vst.msk [vmem:[#allocation5 + $0x60] sm:$0xff] %vm451_vm1, %v5857_v0 }
  0xc4   : > { %528 = vst.msk [vmem:[#allocation5 + $0x68] sm:$0xff] %vm451_vm1, %v5857_v0 }
  0xc5   : > { %529 = vst.msk [vmem:[#allocation5 + $0x70] sm:$0xff] %vm451_vm1, %v5857_v0 }
  0xc6   : > { %530 = vst.msk [vmem:[#allocation5 + $0x78] sm:$0xff] %vm451_vm1, %v5857_v0 }
  0xc7   : > { %531 = vst.msk [vmem:[#allocation5 + $0x80] sm:$0xff] %vm451_vm1, %v5857_v0 }
  0xc8   : > { %532 = vst.msk [vmem:[#allocation5 + $0x88] sm:$0xff] %vm451_vm1, %v5857_v0 }
  0xc9   : > { %533 = vst.msk [vmem:[#allocation5 + $0x90] sm:$0xff] %vm451_vm1, %v5857_v0 }
  0xca   : > { %534 = vst.msk [vmem:[#allocation5 + $0x98] sm:$0xff] %vm451_vm1, %v5857_v0 }
  0xcb   : > { %535 = vst.msk [vmem:[#allocation5 + $0xa0] sm:$0xff] %vm451_vm1, %v5857_v0 }
  0xcc   : > { %536 = vst.msk [vmem:[#allocation5 + $0xa8] sm:$0xff] %vm451_vm1, %v5857_v0 }
  0xcd   : > { %537 = vst.msk [vmem:[#allocation5 + $0xb0] sm:$0xff] %vm451_vm1, %v5857_v0 }
  0xce   : > { %538 = vst.msk [vmem:[#allocation5 + $0xb8] sm:$0xff] %vm451_vm1, %v5857_v0 }
  0xcf   : > { %539 = vst.msk [vmem:[#allocation5 + $0xc0] sm:$0xff] %vm451_vm1, %v5857_v0 }
  0xd0   : > { %540 = vst.msk [vmem:[#allocation5 + $0xc8] sm:$0xff] %vm451_vm1, %v5857_v0 }
  0xd1   : > { %541 = vst.msk [vmem:[#allocation5 + $0xd0] sm:$0xff] %vm451_vm1, %v5857_v0 }
  0xd2   : > { %542 = vst.msk [vmem:[#allocation5 + $0xd8] sm:$0xff] %vm451_vm1, %v5857_v0 }
  0xd3   : > { %543 = vst.msk [vmem:[#allocation5 + $0xe0] sm:$0xff] %vm451_vm1, %v5857_v0 }
  0xd4   : > { %544 = vst.msk [vmem:[#allocation5 + $0xe8] sm:$0xff] %vm451_vm1, %v5857_v0 }
  0xd5   : > { %545 = vst.msk [vmem:[#allocation5 + $0xf0] sm:$0xff] %vm451_vm1, %v5857_v0 }
  0xd6   : > { %546 = vst.msk [vmem:[#allocation5 + $0xf8] sm:$0xff] %vm451_vm1, %v5857_v0 }
  0xd7 PF: > { %v691_v1 = vld [vmem:[%s9607_s1 + $0x78] sm:$0xff]  ;;  %v1059_v2 = vld [vmem:[#allocation3 + $0x20] sm:$0xff]  ;;  %s5858_s13 = smov 32   ;;  %v690_v4 = vld [vmem:[%s9607_s1 + $0x70] sm:$0xff]  ;;  %vm579_vm2 = vcmask 31744   ;;  %vm700_vm3 = vcmask 261120  }
  0xd8   : > { %v1055_v3 = vld [vmem:[#allocation3] sm:$0xff]  ;;  %797 = vmatpush.msra.mxu0 %v691_v1  ;;  %1767 = vrot.lane.b32.xlu2 %v1059_v2, %s5858_s13  ;;  %v689_v5 = vld [vmem:[%s9607_s1 + $0x68] sm:$0xff]  ;;  %v1057_v6 = vld [vmem:[#allocation3 + $0x10] sm:$0xff]  ;;  %s5859_s16 = smov 16   ;;  %s5860_s28 = smov 96  }
  0xd9   : > { %1759 = vrot.lane.b32.xlu0 %v1055_v3, %s5858_s13  ;;  %1763 = vrot.lane.b32.xlu1 %v1057_v6, %s5858_s13  ;;  %v688_v7 = vld [vmem:[%s9607_s1 + $0x60] sm:$0xff]  ;;  %v687_v8 = vld [vmem:[%s9607_s1 + $0x58] sm:$0xff]  ;;  %v1060_v9 = vld [vmem:[#allocation3 + $0x28] sm:$0xff]  ;;  %s5861_s12 = smov 64   ;;  %s5862_s24 = smov 80  }
  0xda   : > { %798 = vmatpush.msra.mxu0 %v690_v4  ;;  %v1056_v10 = vld [vmem:[#allocation3 + $0x8] sm:$0xff]  ;;  %v686_v11 = vld [vmem:[%s9607_s1 + $0x50] sm:$0xff]  ;;  %v1058_v12 = vld [vmem:[#allocation3 + $0x18] sm:$0xff]  ;;  %s5863_s25 = smov 112   ;;  %p5249_p8 = scmp.ne.s32.totalorder %s5839_s27, 4 }
  0xdb   : > { %v695_v13 = vld [vmem:[%s9607_s1 + $0x98] sm:$0xff]  ;;  %v694_v14 = vld [vmem:[%s9607_s1 + $0x90] sm:$0xff]  ;;  %v685_v15 = vld [vmem:[%s9607_s1 + $0x48] sm:$0xff] }
  0xdc   : > { %799 = vmatpush.msra.mxu0 %v689_v5  ;;  %922 = vmatpush.msra.mxu1 %v695_v13  ;;  %v547_v16 = vld [vmem:[%s5951_s23] sm:$0xff]  ;;  %v693_v18 = vld [vmem:[%s9607_s1 + $0x88] sm:$0xff]  ;;  %v683_v19 = vld [vmem:[%s9607_s1 + $0x38] sm:$0xff] }
  0xdd   : > { %v684_v17 = vld [vmem:[%s9607_s1 + $0x40] sm:$0xff]  ;;  %580 = vst.msk [vmem:[#allocation2] sm:$0xff] %vm579_vm2, %v547_v16  ;;  %v548_v21 = vld [vmem:[%s5951_s23 + $0x8] sm:$0xff]  ;;  %v1061_v22 = vld [vmem:[#allocation3 + $0x30] sm:$0xff] }
  0xde   : > { %800 = vmatpush.msra.mxu0 %v688_v7  ;;  %v1063_v20 = vld [vmem:[#allocation3 + $0x40] sm:$0xff]  ;;  %923 = vmatpush.msra.mxu1 %v694_v14  ;;  %581 = vst.msk [vmem:[#allocation2 + $0x10] sm:$0xff] %vm579_vm2, %v548_v21  ;;  %v549_v24 = vld [vmem:[%s5951_s23 + $0x10] sm:$0xff]  ;;  %v613_v25 = vld [vmem:[#allocation2 + $0x8] sm:$0xff] }
  0xdf   : > { %v692_v23 = vld [vmem:[%s9607_s1 + $0x80] sm:$0xff]  ;;  %582 = vst.msk [vmem:[#allocation2 + $0x20] sm:$0xff] %vm579_vm2, %v549_v24  ;;  %v550_v26 = vld [vmem:[%s5951_s23 + $0x18] sm:$0xff]  ;;  %v682_v27 = vld [vmem:[%s9607_s1 + $0x30] sm:$0xff] }
  0xe0   : > { %801 = vmatpush.msra.mxu0 %v687_v8  ;;  %1769 = vrot.lane.b32.xlu2 %v1060_v9, %s5858_s13  ;;  %v1062_v28 = vld [vmem:[#allocation3 + $0x38] sm:$0xff]  ;;  %583 = vst.msk [vmem:[#allocation2 + $0x30] sm:$0xff] %vm579_vm2, %v550_v26  ;;  %v681_v29 = vld [vmem:[%s9607_s1 + $0x28] sm:$0xff]  ;;  %v680_v30 = vld [vmem:[%s9607_s1 + $0x20] sm:$0xff] }
  0xe1   : > { %1761 = vrot.lane.b32.xlu0 %v1056_v10, %s5858_s13  ;;  %1765 = vrot.lane.b32.xlu1 %v1058_v12, %s5858_s13  ;;  %v679_v31 = vld [vmem:[%s9607_s1 + $0x18] sm:$0xff]  ;;  %v1064_v33 = vld [vmem:[#allocation3 + $0x48] sm:$0xff]  ;;  %v551_v35 = vld [vmem:[%s5951_s23 + $0x20] sm:$0xff] }
  0xe2   : > { %802 = vmatpush.msra.mxu0 %v686_v11  ;;  %924 = vmatpush.msra.mxu1 %v693_v18  ;;  %v1066_v32 = vld [vmem:[#allocation3 + $0x58] sm:$0xff]  ;;  %v678_v36 = vld [vmem:[%s9607_s1 + $0x10] sm:$0xff]  ;;  %584 = vst.msk [vmem:[#allocation2 + $0x40] sm:$0xff] %vm579_vm2, %v551_v35  ;;  %v677_v38 = vld [vmem:[%s9607_s1 + $0x8] sm:$0xff] }
  0xe3   : > { %v615_v34 = vld [vmem:[#allocation2 + $0x18] sm:$0xff]  ;;  %v1065_v37 = vld [vmem:[#allocation3 + $0x50] sm:$0xff]  ;;  %v676_v39 = vld [vmem:[%s9607_s1] sm:$0xff] }
  0xe4   : > { %803 = vmatpush.msra.mxu0 %v685_v15  ;;  %925 = vmatpush.msra.mxu1 %v692_v23  ;;  %v612_v40 = vld [vmem:[#allocation2] sm:$0xff]  ;;  %v1069_v41 = vld [vmem:[#allocation3 + $0x70] sm:$0xff]  ;;  %v617_v43 = vld [vmem:[#allocation2 + $0x28] sm:$0xff] }
  0xe5   : > { %5121 = vmatmul.msk.f32.vlgmr.msra.gmra.mxu1 %vm700_vm3, %v613_v25  ;;  %v1067_v42 = vld [vmem:[#allocation3 + $0x60] sm:$0xff]  ;;  %v552_v44 = vld [vmem:[%s5951_s23 + $0x28] sm:$0xff]  ;;  %v614_v46 = vld [vmem:[#allocation2 + $0x10] sm:$0xff] }
  0xe6   : > { %804 = vmatpush.msra.mxu0 %v684_v17  ;;  %v1068_v45 = vld [vmem:[#allocation3 + $0x68] sm:$0xff]  ;;  %585 = vst.msk [vmem:[#allocation2 + $0x50] sm:$0xff] %vm579_vm2, %v552_v44  ;;  %v1070_v48 = vld [vmem:[#allocation3 + $0x78] sm:$0xff]  ;;  %v553_v50 = vld [vmem:[%s5951_s23 + $0x30] sm:$0xff] }
  0xe7   : > { %v1072_v47 = vld [vmem:[#allocation3 + $0x88] sm:$0xff]  ;;  %v619_v49 = vld [vmem:[#allocation2 + $0x38] sm:$0xff]  ;;  %v1071_v51 = vld [vmem:[#allocation3 + $0x80] sm:$0xff]  ;;  %586 = vst.msk [vmem:[#allocation2 + $0x60] sm:$0xff] %vm579_vm2, %v553_v50 }
  0xe8   : > { %805 = vmatpush.msra.mxu0 %v683_v19  ;;  %1775 = vrot.lane.b32.xlu2 %v1063_v20, %s5858_s13  ;;  %v616_v52 = vld [vmem:[#allocation2 + $0x20] sm:$0xff]  ;;  %v1073_v54 = vld [vmem:[#allocation3 + $0x90] sm:$0xff]  ;;  %v621_v55 = vld [vmem:[#allocation2 + $0x48] sm:$0xff] }
  0xe9   : > { %1771 = vrot.lane.b32.xlu0 %v1061_v22, %s5858_s13  ;;  %1773 = vrot.lane.b32.xlu1 %v1062_v28, %s5858_s13  ;;  %v1075_v53 = vld [vmem:[#allocation3 + $0xa0] sm:$0xff]  ;;  %v554_v56 = vld [vmem:[%s5951_s23 + $0x38] sm:$0xff]  ;;  %v618_v58 = vld [vmem:[#allocation2 + $0x30] sm:$0xff] }
  0xea   : > { %806 = vmatpush.msra.mxu0 %v682_v27  ;;  %v1074_v57 = vld [vmem:[#allocation3 + $0x98] sm:$0xff]  ;;  %587 = vst.msk [vmem:[#allocation2 + $0x70] sm:$0xff] %vm579_vm2, %v554_v56  ;;  %v1076_v60 = vld [vmem:[#allocation3 + $0xa8] sm:$0xff]  ;;  %v555_v62 = vld [vmem:[%s5951_s23 + $0x40] sm:$0xff] }
  0xeb   : > { %v1078_v59 = vld [vmem:[#allocation3 + $0xb8] sm:$0xff]  ;;  %v1077_v63 = vld [vmem:[#allocation3 + $0xb0] sm:$0xff]  ;;  %588 = vst.msk [vmem:[#allocation2 + $0x80] sm:$0xff] %vm579_vm2, %v555_v62  ;;  %v620_v0 = vld [vmem:[#allocation2 + $0x40] sm:$0xff] }
  0xec   : > { %807 = vmatpush.msra.mxu0 %v681_v29  ;;  %v623_v61 = vld [vmem:[#allocation2 + $0x58] sm:$0xff]  ;;  %v1081_v1 = vld [vmem:[#allocation3 + $0xd0] sm:$0xff]  ;;  %v1079_v2 = vld [vmem:[#allocation3 + $0xc0] sm:$0xff] }
  0xed   : > { %5122 = vmatmul.msk.f32.gmra.mxu1 %vm700_vm3, %v615_v34  ;;  %v625_v3 = vld [vmem:[#allocation2 + $0x68] sm:$0xff]  ;;  %v622_v6 = vld [vmem:[#allocation2 + $0x50] sm:$0xff]  ;;  %v1082_v8 = vld [vmem:[#allocation3 + $0xd8] sm:$0xff] }
  0xee   : > { %808 = vmatpush.msra.mxu0 %v680_v30  ;;  %v556_v4 = vld [vmem:[%s5951_s23 + $0x48] sm:$0xff]  ;;  %v627_v9 = vld [vmem:[#allocation2 + $0x78] sm:$0xff]  ;;  %v557_v10 = vld [vmem:[%s5951_s23 + $0x50] sm:$0xff] }
  0xef   : > { %v1080_v5 = vld [vmem:[#allocation3 + $0xc8] sm:$0xff]  ;;  %589 = vst.msk [vmem:[#allocation2 + $0x90] sm:$0xff] %vm579_vm2, %v556_v4  ;;  %v1083_v11 = vld [vmem:[#allocation3 + $0xe0] sm:$0xff]  ;;  %v3194_v13 = vld [vmem:[#allocation5 + $0x10] sm:$0xff] }
  0xf0   : > { %809 = vmatpush.msra.mxu0 %v679_v31  ;;  %1781 = vrot.lane.b32.xlu2 %v1066_v32, %s5858_s13  ;;  %v1084_v7 = vld [vmem:[#allocation3 + $0xe8] sm:$0xff]  ;;  %590 = vst.msk [vmem:[#allocation2 + $0xa0] sm:$0xff] %vm579_vm2, %v557_v10  ;;  %v624_v12 = vld [vmem:[#allocation2 + $0x60] sm:$0xff]  ;;  %v1085_v14 = vld [vmem:[#allocation3 + $0xf0] sm:$0xff] }
  0xf1   : > { %1777 = vrot.lane.b32.xlu0 %v1064_v33, %s5858_s13  ;;  %1779 = vrot.lane.b32.xlu1 %v1065_v37, %s5858_s13  ;;  %v629_v15 = vld [vmem:[#allocation2 + $0x88] sm:$0xff]  ;;  %v558_v16 = vld [vmem:[%s5951_s23 + $0x58] sm:$0xff]  ;;  %v626_v18 = vld [vmem:[#allocation2 + $0x70] sm:$0xff] }
  0xf2   : > { %810 = vmatpush.msra.mxu0 %v678_v36  ;;  %v1086_v17 = vld [vmem:[#allocation3 + $0xf8] sm:$0xff]  ;;  %591 = vst.msk [vmem:[#allocation2 + $0xb0] sm:$0xff] %vm579_vm2, %v558_v16  ;;  %v3197_v19 = vld [vmem:[#allocation5 + $0x28] sm:$0xff]  ;;  %v3192_v20 = vld [vmem:[#allocation5] sm:$0xff] }
  0xf3   : > { %v631_v21 = vld [vmem:[#allocation2 + $0x98] sm:$0xff]  ;;  %v559_v22 = vld [vmem:[%s5951_s23 + $0x60] sm:$0xff]  ;;  %v3193_v23 = vld [vmem:[#allocation5 + $0x8] sm:$0xff] }
  0xf4   : > { %811 = vmatpush.msra.mxu0 %v677_v38  ;;  %592 = vst.msk [vmem:[#allocation2 + $0xc0] sm:$0xff] %vm579_vm2, %v559_v22  ;;  %v628_v25 = vld [vmem:[#allocation2 + $0x80] sm:$0xff]  ;;  %v3195_v27 = vld [vmem:[#allocation5 + $0x18] sm:$0xff]  ;;  %v633_v28 = vld [vmem:[#allocation2 + $0xa8] sm:$0xff] }
  0xf5   : > { %5123 = vmatmul.msk.f32.gmra.mxu1 %vm700_vm3, %v617_v43  ;;  %v3200_v26 = vld [vmem:[#allocation5 + $0x40] sm:$0xff]  ;;  %v560_v29 = vld [vmem:[%s5951_s23 + $0x68] sm:$0xff]  ;;  %v3203_v33 = vld [vmem:[#allocation5 + $0x58] sm:$0xff] }
  0xf6   : > { %812 = vmatpush.msra.mxu0 %v676_v39  ;;  %v3196_v30 = vld [vmem:[#allocation5 + $0x20] sm:$0xff]  ;;  %593 = vst.msk [vmem:[#allocation2 + $0xd0] sm:$0xff] %vm579_vm2, %v560_v29  ;;  %v630_v32 = vld [vmem:[#allocation2 + $0x90] sm:$0xff]  ;;  %v635_v35 = vld [vmem:[#allocation2 + $0xb8] sm:$0xff] }
  0xf7   : > { %813 = vmatmul.f32.vlgmr.msra.gmra.mxu0 %v612_v40  ;;  %v3198_v34 = vld [vmem:[#allocation5 + $0x30] sm:$0xff]  ;;  %v3199_v37 = vld [vmem:[#allocation5 + $0x38] sm:$0xff]  ;;  %v632_v39 = vld [vmem:[#allocation2 + $0xa0] sm:$0xff] }
  0xf8   : > { %1787 = vrot.lane.b32.xlu2 %v1069_v41, %s5858_s13  ;;  %v561_v36 = vld [vmem:[%s5951_s23 + $0x70] sm:$0xff]  ;;  %v3201_v41 = vld [vmem:[#allocation5 + $0x48] sm:$0xff]  ;;  %v562_v43 = vld [vmem:[%s5951_s23 + $0x78] sm:$0xff] }
  0xf9   : > { %1783 = vrot.lane.b32.xlu0 %v1067_v42, %s5858_s13  ;;  %1785 = vrot.lane.b32.xlu1 %v1068_v45, %s5858_s13  ;;  %594 = vst.msk [vmem:[#allocation2 + $0xe0] sm:$0xff] %vm579_vm2, %v561_v36  ;;  %v3206_v40 = vld [vmem:[#allocation5 + $0x70] sm:$0xff]  ;;  %v637_v42 = vld [vmem:[#allocation2 + $0xc8] sm:$0xff]  ;;  %v3204_v50 = vld [vmem:[#allocation5 + $0x60] sm:$0xff] }
  0xfa   : > { %v3202_v44 = vld [vmem:[#allocation5 + $0x50] sm:$0xff]  ;;  %595 = vst.msk [vmem:[#allocation2 + $0xf0] sm:$0xff] %vm579_vm2, %v562_v43  ;;  %v3208_v62 = vld [vmem:[#allocation5 + $0x80] sm:$0xff]  ;;  %v566_v16 = vld [vmem:[%s5951_s23 + $0x98] sm:$0xff] }
  0xfb   : > { %v636_v56 = vld [vmem:[#allocation2 + $0xc0] sm:$0xff]  ;;  %v3210_v4 = vld [vmem:[#allocation5 + $0x90] sm:$0xff]  ;;  %599 = vst.msk [vmem:[#allocation2 + $0x130] sm:$0xff] %vm579_vm2, %v566_v16  ;;  %v3221_v22 = vld [vmem:[#allocation5 + $0xe8] sm:$0xff] }
  0xfc   : > { %v6496_v29 = vld [vmem:[%s9608_s2] ss:$0 sm:$0xff] }
  0xfd   : > { %5124 = vmatmul.msk.f32.gmra.mxu1 %vm700_vm3, %v619_v49  ;;  %v3209_v49 = vld [vmem:[#allocation5 + $0x88] sm:$0xff] }
  0xff   : > { %816 = vmatmul.f32.gmra.mxu0 %v614_v46 }
 0x100   : > { %1793 = vrot.lane.b32.xlu2 %v1072_v47, %s5858_s13  ;;  %v634_v47 = vld [vmem:[#allocation2 + $0xb0] sm:$0xff]  ;;  %v640_v10 = vld [vmem:[#allocation2 + $0xe0] sm:$0xff] }
 0x101   : > { %1789 = vrot.lane.b32.xlu0 %v1070_v48, %s5858_s13  ;;  %1791 = vrot.lane.b32.xlu1 %v1071_v51, %s5858_s13  ;;  %v639_v51 = vld [vmem:[#allocation2 + $0xd8] sm:$0xff] }
 0x105   : > { %5125 = vmatmul.msk.f32.gmra.mxu1 %vm700_vm3, %v621_v55 }
 0x107   : > { %819 = vmatmul.f32.gmra.mxu0 %v616_v52  ;;  %v563_v52 = vld [vmem:[%s5951_s23 + $0x80] sm:$0xff] }
 0x108   : > { %1799 = vrot.lane.b32.xlu2 %v1075_v53, %s5858_s13  ;;  %v3205_v53 = vld [vmem:[#allocation5 + $0x68] sm:$0xff]  ;;  %596 = vst.msk [vmem:[#allocation2 + $0x100] sm:$0xff] %vm579_vm2, %v563_v52 }
 0x109   : > { %1795 = vrot.lane.b32.xlu0 %v1073_v54, %s5858_s13  ;;  %1797 = vrot.lane.b32.xlu1 %v1074_v57, %s5858_s13 }
 0x10d   : > { %5126 = vmatmul.msk.f32.gmra.mxu1 %vm700_vm3, %v623_v61  ;;  %v564_v61 = vld [vmem:[%s5951_s23 + $0x88] sm:$0xff] }
 0x10e   : > { %597 = vst.msk [vmem:[#allocation2 + $0x110] sm:$0xff] %vm579_vm2, %v564_v61  ;;  %v569_v61 = vld [vmem:[%s5951_s23 + $0xb0] sm:$0xff] }
 0x10f   : > { %822 = vmatmul.f32.gmra.mxu0 %v618_v58  ;;  %v3212_v58 = vld [vmem:[#allocation5 + $0xa0] sm:$0xff]  ;;  %602 = vst.msk [vmem:[#allocation2 + $0x160] sm:$0xff] %vm579_vm2, %v569_v61  ;;  %v572_v61 = vld [vmem:[%s5951_s23 + $0xc8] sm:$0xff] }
 0x110   : > { %1805 = vrot.lane.b32.xlu2 %v1078_v59, %s5858_s13  ;;  %v3207_v59 = vld [vmem:[#allocation5 + $0x78] sm:$0xff]  ;;  %605 = vst.msk [vmem:[#allocation2 + $0x190] sm:$0xff] %vm579_vm2, %v572_v61 }
 0x111   : > { %1801 = vrot.lane.b32.xlu0 %v1076_v60, %s5858_s13  ;;  %1803 = vrot.lane.b32.xlu1 %v1077_v63, %s5858_s13  ;;  %v641_v60 = vld [vmem:[#allocation2 + $0xe8] sm:$0xff] }
 0x115   : > { %5127 = vmatmul.msk.f32.gmra.mxu1 %vm700_vm3, %v625_v3  ;;  %v3215_v3 = vld [vmem:[#allocation5 + $0xb8] sm:$0xff] }
 0x117   : > { %825 = vmatmul.f32.gmra.mxu0 %v620_v0 }
 0x118   : > { %1811 = vrot.lane.b32.xlu2 %v1081_v1, %s5858_s13  ;;  %v638_v1 = vld [vmem:[#allocation2 + $0xd0] sm:$0xff] }
 0x119   : > { %1807 = vrot.lane.b32.xlu0 %v1079_v2, %s5858_s13  ;;  %1809 = vrot.lane.b32.xlu1 %v1080_v5, %s5858_s13  ;;  %v643_v5 = vld [vmem:[#allocation2 + $0xf8] sm:$0xff] }
 0x11d   : > { %5128 = vmatmul.msk.f32.gmra.mxu1 %vm700_vm3, %v627_v9 }
 0x11f   : > { %828 = vmatmul.f32.gmra.mxu0 %v622_v6  ;;  %v565_v6 = vld [vmem:[%s5951_s23 + $0x90] sm:$0xff] }
 0x120   : > { %1817 = vrot.lane.b32.xlu2 %v1084_v7, %s5858_s13  ;;  %v3211_v7 = vld [vmem:[#allocation5 + $0x98] sm:$0xff]  ;;  %598 = vst.msk [vmem:[#allocation2 + $0x120] sm:$0xff] %vm579_vm2, %v565_v6 }
 0x121   : > { %1813 = vrot.lane.b32.xlu0 %v1082_v8, %s5858_s13  ;;  %1815 = vrot.lane.b32.xlu1 %v1083_v11, %s5858_s13 }
 0x125   : > { %5129 = vmatmul.msk.f32.gmra.mxu1 %vm700_vm3, %v629_v15  ;;  %v645_v15 = vld [vmem:[#allocation2 + $0x108] sm:$0xff] }
 0x127   : > { %831 = vmatmul.f32.gmra.mxu0 %v624_v12  ;;  %v3218_v12 = vld [vmem:[#allocation5 + $0xd0] sm:$0xff] }
 0x128   : > { %3900 = vrot.lane.b32.xlu2 %v3194_v13, %s5859_s16  ;;  %v3213_v13 = vld [vmem:[#allocation5 + $0xa8] sm:$0xff] }
 0x129   : > { %1819 = vrot.lane.b32.xlu0 %v1085_v14, %s5858_s13  ;;  %1821 = vrot.lane.b32.xlu1 %v1086_v17, %s5858_s13  ;;  %v3214_v17 = vld [vmem:[#allocation5 + $0xb0] sm:$0xff] }
 0x12d   : > { %5130 = vmatmul.msk.f32.gmra.mxu1 %vm700_vm3, %v631_v21 }
 0x12f   : > { %834 = vmatmul.f32.gmra.mxu0 %v626_v18 }
 0x130   : > { %3906 = vrot.lane.b32.xlu2 %v3197_v19, %s5859_s16 }
 0x131   : > { %3896 = vrot.lane.b32.xlu0 %v3192_v20, %s5859_s16  ;;  %3898 = vrot.lane.b32.xlu1 %v3193_v23, %s5859_s16  ;;  %v642_v20 = vld [vmem:[#allocation2 + $0xf0] sm:$0xff]  ;;  %v3216_v23 = vld [vmem:[#allocation5 + $0xc0] sm:$0xff] }
 0x132   : > { %v6410_v24 = vpop.permute.xlu2 %1767 }
 0x135   : > { %5131 = vmatmul.msk.f32.gmra.mxu1 %vm700_vm3, %v633_v28  ;;  %v3217_v28 = vld [vmem:[#allocation5 + $0xc8] sm:$0xff] }
 0x137   : > { %837 = vmatmul.f32.gmra.mxu0 %v628_v25 }
 0x138   : > { %3912 = vrot.lane.b32.xlu2 %v3200_v26, %s5859_s16  ;;  %v647_v26 = vld [vmem:[#allocation2 + $0x118] sm:$0xff] }
 0x139   : > { %3902 = vrot.lane.b32.xlu0 %v3195_v27, %s5859_s16  ;;  %3904 = vrot.lane.b32.xlu1 %v3196_v30, %s5859_s16  ;;  %v567_v27 = vld [vmem:[%s5951_s23 + $0xa0] sm:$0xff] }
 0x13a   : > { %v6418_v31 = vpop.permute.xlu2 %1769  ;;  %600 = vst.msk [vmem:[#allocation2 + $0x140] sm:$0xff] %vm579_vm2, %v567_v27 }
 0x13d   : > { %5132 = vmatmul.msk.f32.gmra.mxu1 %vm700_vm3, %v635_v35  ;;  %v5300_v35 = vld [vmem:[%s9611_s5] ss:$0 sm:$0xff] }
 0x13f   : > { %840 = vmatmul.f32.gmra.mxu0 %v630_v32 }
 0x140   : > { %3918 = vrot.lane.b32.xlu2 %v3203_v33, %s5859_s16 }
 0x141   : > { %3908 = vrot.lane.b32.xlu0 %v3198_v34, %s5859_s16  ;;  %3910 = vrot.lane.b32.xlu1 %v3199_v37, %s5859_s16  ;;  %v644_v34 = vld [vmem:[#allocation2 + $0x100] sm:$0xff] }
 0x142   : > { %v6426_v38 = vpop.permute.xlu2 %1775 }
 0x145   : > { %5133 = vmatmul.msk.f32.gmra.mxu1 %vm700_vm3, %v637_v42  ;;  %v568_v42 = vld [vmem:[%s5951_s23 + $0xa8] sm:$0xff] }
 0x146   : > { %601 = vst.msk [vmem:[#allocation2 + $0x150] sm:$0xff] %vm579_vm2, %v568_v42 }
 0x147   : > { %843 = vmatmul.f32.gmra.mxu0 %v632_v39  ;;  %v3219_v39 = vld [vmem:[#allocation5 + $0xd8] sm:$0xff] }
 0x148   : > { %3924 = vrot.lane.b32.xlu2 %v3206_v40, %s5859_s16 }
 0x149   : > { %3914 = vrot.lane.b32.xlu0 %v3201_v41, %s5859_s16  ;;  %3916 = vrot.lane.b32.xlu1 %v3202_v44, %s5859_s16  ;;  %v649_v41 = vld [vmem:[#allocation2 + $0x128] sm:$0xff]  ;;  %v3220_v44 = vld [vmem:[#allocation5 + $0xe0] sm:$0xff] }
 0x14a   : > { %v6434_v45 = vpop.permute.xlu2 %1781 }
 0x14b   : > { %v6437_v46 = vpop.permute.xlu0 %1759  ;;  %v6439_v48 = vpop.permute.xlu1 %1763 }
 0x14d   : > { %5134 = vmatmul.msk.f32.gmra.mxu1 %vm700_vm3, %v639_v51  ;;  %v646_v51 = vld [vmem:[#allocation2 + $0x110] sm:$0xff] }
 0x14f   : > { %846 = vmatmul.f32.gmra.mxu0 %v634_v47 }
 0x150   : > { %3930 = vrot.lane.b32.xlu2 %v3209_v49, %s5859_s16 }
 0x151   : > { %3920 = vrot.lane.b32.xlu0 %v3204_v50, %s5859_s16  ;;  %3922 = vrot.lane.b32.xlu1 %v3205_v53, %s5859_s16 }
 0x152   : > { %v6446_v54 = vpop.permute.xlu2 %1787 }
 0x153   : > { %v6449_v55 = vpop.permute.xlu0 %1761  ;;  %v6451_v57 = vpop.permute.xlu1 %1765 }
 0x155   : > { %5135 = vmatmul.msk.f32.gmra.mxu1 %vm700_vm3, %v641_v60  ;;  %v651_v60 = vld [vmem:[#allocation2 + $0x138] sm:$0xff] }
 0x157   : > { %849 = vmatmul.f32.gmra.mxu0 %v636_v56 }
 0x158   : > { %3936 = vrot.lane.b32.xlu2 %v3212_v58, %s5859_s16  ;;  %v3222_v58 = vld [vmem:[#allocation5 + $0xf0] sm:$0xff] }
 0x159   : > { %3926 = vrot.lane.b32.xlu0 %v3207_v59, %s5859_s16  ;;  %3928 = vrot.lane.b32.xlu1 %v3208_v62, %s5859_s16 }
 0x15a   : > { %v6458_v63 = vpop.permute.xlu2 %1793 }
 0x15b   : > { %9650 = vst [vmem:[#allocation6_spill] sm:$0xff] %v6458_v63  ;;  %v6461_v0 = vpop.permute.xlu0 %1771  ;;  %v6463_v2 = vpop.permute.xlu1 %1773 }
 0x15d   : > { %5136 = vmatmul.msk.f32.gmra.mxu1 %vm700_vm3, %v643_v5 }
 0x15f   : > { %852 = vmatmul.f32.gmra.mxu0 %v638_v1  ;;  %v3223_v1 = vld [vmem:[#allocation5 + $0xf8] sm:$0xff] }
 0x160   : > { %3942 = vrot.lane.b32.xlu2 %v3215_v3, %s5859_s16 }
 0x161   : > { %3932 = vrot.lane.b32.xlu0 %v3210_v4, %s5859_s16  ;;  %3934 = vrot.lane.b32.xlu1 %v3211_v7, %s5859_s16  ;;  %v648_v7 = vld [vmem:[#allocation2 + $0x120] sm:$0xff] }
 0x162   : > { %v6470_v8 = vpop.permute.xlu2 %1799  ;;  %v927_v14 = vpop.f32.mrf.mxu1 }
 0x163   : > { %9651 = vst [vmem:[#allocation7_spill] sm:$0xff] %v6470_v8  ;;  %v6473_v9 = vpop.permute.xlu0 %1777  ;;  %v6475_v11 = vpop.permute.xlu1 %1779 }
 0x165   : > { %5137 = vmatmul.msk.f32.gmra.mxu1 %vm700_vm3, %v645_v15  ;;  %v570_v15 = vld [vmem:[%s5951_s23 + $0xb8] sm:$0xff] }
 0x166   : > { %603 = vst.msk [vmem:[#allocation2 + $0x170] sm:$0xff] %vm579_vm2, %v570_v15 }
 0x167   : > { %855 = vmatmul.f32.gmra.mxu0 %v640_v10 }
 0x168   : > { %3948 = vrot.lane.b32.xlu2 %v3218_v12, %s5859_s16 }
 0x169   : > { %3938 = vrot.lane.b32.xlu0 %v3213_v13, %s5859_s16  ;;  %3940 = vrot.lane.b32.xlu1 %v3214_v17, %s5859_s16 }
 0x16a   : > { %v6482_v18 = vpop.permute.xlu2 %1805  ;;  %v930_v25 = vpop.f32.mrf.mxu1 }
 0x16b   : > { %9652 = vst [vmem:[#allocation8_spill] sm:$0xff] %v6482_v18  ;;  %v6485_v19 = vpop.permute.xlu0 %1783  ;;  %v6487_v21 = vpop.permute.xlu1 %1785 }
 0x16d   : > { %5138 = vmatmul.msk.f32.gmra.mxu1 %vm700_vm3, %v647_v26  ;;  %v650_v26 = vld [vmem:[#allocation2 + $0x130] sm:$0xff] }
 0x16f   : > { %858 = vmatmul.f32.gmra.mxu0 %v642_v20 }
 0x170   : > { %3954 = vrot.lane.b32.xlu2 %v3221_v22, %s5859_s16 }
 0x171   : > { %3944 = vrot.lane.b32.xlu0 %v3216_v23, %s5859_s16  ;;  %3946 = vrot.lane.b32.xlu1 %v3217_v28, %s5859_s16 }
 0x172   : > { %v6500_v30 = vpop.permute.xlu2 %1811  ;;  %v933_v40 = vpop.f32.mrf.mxu1 }
 0x173   : > { %9653 = vst [vmem:[#allocation9_spill] sm:$0xff] %v6500_v30  ;;  %v6502_v32 = vpop.permute.xlu0 %1789  ;;  %v6507_v36 = vpop.permute.xlu1 %1791 }
 0x174   : > { %9654 = vst [vmem:[#allocation10_spill] sm:$0xff] %v6502_v32  ;;  %v814_v33 = vpop.f32.mrf.mxu0 }
 0x175   : > { %9655 = vst [vmem:[#allocation11_spill] sm:$0xff] %v6507_v36  ;;  %v815_v37 = vadd.f32 %v6496_v29, %v814_v33  ;;  %5139 = vmatmul.msk.f32.gmra.mxu1 %vm700_vm3, %v649_v41  ;;  %v5301_v33 = vld [vmem:[%s9612_s6] ss:$0 sm:$0xff] }
 0x177   : > { %v6511_v43 = vadd.f32 %v927_v14, %v815_v37  ;;  %861 = vmatmul.f32.gmra.mxu0 %v644_v34  ;;  %v653_v14 = vld [vmem:[#allocation2 + $0x148] sm:$0xff]  ;;  %v571_v37 = vld [vmem:[%s5951_s23 + $0xc0] sm:$0xff] }
 0x178   : > { %4539 = vrot.lane.b32.xlu2 %v5300_v35, %s5858_s13  ;;  %v655_v35 = vld [vmem:[#allocation2 + $0x158] sm:$0xff]  ;;  %604 = vst.msk [vmem:[#allocation2 + $0x180] sm:$0xff] %vm579_vm2, %v571_v37 }
 0x179   : > { %v9621_v47 = vmax.f32 %v6511_v43, 0.0  ;;  %3950 = vrot.lane.b32.xlu0 %v3219_v39, %s5859_s16  ;;  %3952 = vrot.lane.b32.xlu1 %v3220_v44, %s5859_s16 }
 0x17a   : > { %v6525_v53 = vpop.permute.xlu2 %1817  ;;  %v936_v59 = vpop.f32.mrf.mxu1 }
 0x17b   : > { %5303 = vtanh.f32 %v9621_v47  ;;  %v6521_v49 = vpop.permute.xlu0 %1795  ;;  %v6523_v52 = vpop.permute.xlu1 %1797  ;;  %9658 = vst [vmem:[#allocation14_spill] sm:$0xff] %v6525_v53 }
 0x17c   : > { %9656 = vst [vmem:[#allocation12_spill] sm:$0xff] %v6521_v49  ;;  %v817_v50 = vpop.f32.mrf.mxu0 }
 0x17d   : > { %9657 = vst [vmem:[#allocation13_spill] sm:$0xff] %v6523_v52  ;;  %v818_v56 = vadd.f32 %v6496_v29, %v817_v50  ;;  %5140 = vmatmul.msk.f32.gmra.mxu1 %vm700_vm3, %v651_v60  ;;  %v657_v60 = vld [vmem:[#allocation2 + $0x168] sm:$0xff] }
 0x17f   : > { %v6529_v62 = vadd.f32 %v930_v25, %v818_v56  ;;  %864 = vmatmul.f32.gmra.mxu0 %v646_v51  ;;  %v652_v51 = vld [vmem:[#allocation2 + $0x140] sm:$0xff] }
 0x181   : > { %v5304_v3 = vpop.eup %5303  ;;  %v9620_v4 = vmax.f32 %v6529_v62, 0.0  ;;  %3956 = vrot.lane.b32.xlu0 %v3222_v58, %s5859_s16  ;;  %3958 = vrot.lane.b32.xlu1 %v3223_v1, %s5859_s16 }
 0x182   : > { %1919 = vrot.lane.b32.xlu2 %v5304_v3, %s5858_s13  ;;  %v939_v13 = vpop.f32.mrf.mxu1  ;;  %v6545_v16 = vpop.permute.xlu2 %3900 }
 0x183   : > { %5305 = vtanh.f32 %v9620_v4  ;;  %v6539_v5 = vpop.permute.xlu0 %1801  ;;  %v6541_v10 = vpop.permute.xlu1 %1803  ;;  %9661 = vst [vmem:[#allocation17_spill] sm:$0xff] %v6545_v16 }
 0x184   : > { %9659 = vst [vmem:[#allocation15_spill] sm:$0xff] %v6539_v5  ;;  %v820_v6 = vpop.f32.mrf.mxu0 }
 0x185   : > { %9660 = vst [vmem:[#allocation16_spill] sm:$0xff] %v6541_v10  ;;  %v821_v12 = vadd.f32 %v6496_v29, %v820_v6  ;;  %5141 = vmatmul.msk.f32.gmra.mxu1 %vm700_vm3, %v653_v14  ;;  %v654_v14 = vld [vmem:[#allocation2 + $0x150] sm:$0xff] }
 0x187   : > { %v6547_v17 = vadd.f32 %v933_v40, %v821_v12  ;;  %867 = vmatmul.f32.gmra.mxu0 %v648_v7 }
 0x189   : > { %v5306_v20 = vpop.eup %5305  ;;  %v9619_v22 = vmax.f32 %v6547_v17, 0.0 }
 0x18a   : > { %1921 = vrot.lane.b32.xlu0 %v5306_v20, %s5858_s13  ;;  %v942_v34 = vpop.f32.mrf.mxu1  ;;  %v6567_v41 = vpop.permute.xlu2 %3906 }
 0x18b   : > { %5307 = vtanh.f32 %v9619_v22  ;;  %v6555_v23 = vpop.permute.xlu0 %1807  ;;  %v6557_v27 = vpop.permute.xlu1 %1809  ;;  %9664 = vst [vmem:[#allocation20_spill] sm:$0xff] %v6567_v41  ;;  %v660_v22 = vld [vmem:[#allocation2 + $0x180] sm:$0xff] }
 0x18c   : > { %9662 = vst [vmem:[#allocation18_spill] sm:$0xff] %v6555_v23  ;;  %v823_v25 = vpop.f32.mrf.mxu0 }
 0x18d   : > { %9663 = vst [vmem:[#allocation19_spill] sm:$0xff] %v6557_v27  ;;  %v824_v28 = vadd.f32 %v6496_v29, %v823_v25  ;;  %5142 = vmatmul.msk.f32.gmra.mxu1 %vm700_vm3, %v655_v35 }
 0x18f   : > { %v6564_v39 = vadd.f32 %v936_v59, %v824_v28  ;;  %870 = vmatmul.f32.gmra.mxu0 %v650_v26  ;;  %v659_v26 = vld [vmem:[#allocation2 + $0x178] sm:$0xff]  ;;  %v573_v28 = vld [vmem:[%s5951_s23 + $0xd0] sm:$0xff] }
 0x190   : > { %606 = vst.msk [vmem:[#allocation2 + $0x1a0] sm:$0xff] %vm579_vm2, %v573_v28 }
 0x191   : > { %v5308_v40 = vpop.eup %5307  ;;  %v9618_v42 = vmax.f32 %v6564_v39, 0.0 }
 0x192   : > { %1923 = vrot.lane.b32.xlu1 %v5308_v40, %s5858_s13  ;;  %4577 = vrot.lane.b32.xlu0 %v5301_v33, %s5858_s13  ;;  %v945_v59 = vpop.f32.mrf.mxu1  ;;  %v6587_v7 = vpop.permute.xlu2 %3912 }
 0x193   : > { %5309 = vtanh.f32 %v9618_v42  ;;  %v6575_v44 = vpop.permute.xlu0 %1813  ;;  %v6577_v56 = vpop.permute.xlu1 %1815  ;;  %9667 = vst [vmem:[#allocation23_spill] sm:$0xff] %v6587_v7 }
 0x194   : > { %9665 = vst [vmem:[#allocation21_spill] sm:$0xff] %v6575_v44  ;;  %v826_v50 = vpop.f32.mrf.mxu0 }
 0x195   : > { %9666 = vst [vmem:[#allocation22_spill] sm:$0xff] %v6577_v56  ;;  %v827_v58 = vadd.f32 %v6496_v29, %v826_v50  ;;  %5143 = vmatmul.msk.f32.gmra.mxu1 %vm700_vm3, %v657_v60 }
 0x197   : > { %v6581_v1 = vadd.f32 %v939_v13, %v827_v58  ;;  %873 = vmatmul.f32.gmra.mxu0 %v652_v51  ;;  %v656_v51 = vld [vmem:[#allocation2 + $0x160] sm:$0xff] }
 0x199   : > { %v5310_v3 = vpop.eup %5309  ;;  %v9616_v6 = vmax.f32 %v6581_v1, 0.0  ;;  %v9699_v16 = vmax.f32 %v6581_v1, 0.0 }
 0x19a   : > { %1925 = vrot.lane.b32.xlu2 %v5310_v3, %s5858_s13  ;;  %v948_v25 = vpop.f32.mrf.mxu1  ;;  %v6609_v58 = vpop.permute.xlu2 %3918  ;;  %v661_v3 = vld [vmem:[#allocation2 + $0x188] sm:$0xff] }
 0x19b   : > { %5311 = vtanh.f32 %v9616_v6  ;;  %v6591_v12 = vpop.permute.xlu0 %1819  ;;  %v6593_v15 = vpop.permute.xlu1 %1821  ;;  %9672 = vst [vmem:[#allocation28_spill] sm:$0xff] %v6609_v58  ;;  %v667_v58 = vld [vmem:[#allocation2 + $0x1b8] sm:$0xff] }
 0x19c   : > { %9668 = vst [vmem:[#allocation24_spill] sm:$0xff] %v6591_v12  ;;  %v829_v13 = vpop.f32.mrf.mxu0 }
 0x19d   : > { %9669 = vst [vmem:[#allocation25_spill] sm:$0xff] %v6593_v15  ;;  %v830_v20 = vadd.f32 %v6496_v29, %v829_v13  ;;  %5144 = vmatmul.msk.f32.gmra.mxu1 %vm700_vm3, %v659_v26  ;;  %v574_v13 = vld [vmem:[%s5951_s23 + $0xd8] sm:$0xff] }
 0x19e   : > { %607 = vst.msk [vmem:[#allocation2 + $0x1b0] sm:$0xff] %vm579_vm2, %v574_v13  ;;  %v575_v13 = vld [vmem:[%s5951_s23 + $0xe0] sm:$0xff] }
 0x19f   : > { %v6597_v33 = vadd.f32 %v942_v34, %v830_v20  ;;  %876 = vmatmul.f32.gmra.mxu0 %v654_v14  ;;  %608 = vst.msk [vmem:[#allocation2 + $0x1c0] sm:$0xff] %vm579_vm2, %v575_v13  ;;  %v576_v13 = vld [vmem:[%s5951_s23 + $0xe8] sm:$0xff] }
 0x1a0   : > { %609 = vst.msk [vmem:[#allocation2 + $0x1d0] sm:$0xff] %vm579_vm2, %v576_v13 }
 0x1a1   : > { %v5312_v35 = vpop.eup %5311  ;;  %v9615_v37 = vmax.f32 %v6597_v33, 0.0  ;;  %v9702_v15 = vmax.f32 %v6597_v33, 0.0 }
 0x1a2   : > { %1927 = vrot.lane.b32.xlu0 %v5312_v35, %s5858_s13  ;;  %v951_v61 = vpop.f32.mrf.mxu1  ;;  %v6627_v6 = vpop.permute.xlu2 %3924 }
 0x1a3   : > { %5313 = vtanh.f32 %v9615_v37  ;;  %v6605_v40 = vpop.permute.xlu0 %3896  ;;  %v6607_v34 = vpop.permute.xlu1 %3898  ;;  %9675 = vst [vmem:[#allocation31_spill] sm:$0xff] %v6627_v6 }
 0x1a4   : > { %9670 = vst [vmem:[#allocation26_spill] sm:$0xff] %v6605_v40  ;;  %v832_v50 = vpop.f32.mrf.mxu0 }
 0x1a5   : > { %9671 = vst [vmem:[#allocation27_spill] sm:$0xff] %v6607_v34  ;;  %v833_v60 = vadd.f32 %v6496_v29, %v832_v50  ;;  %5145 = vmatmul.msk.f32.gmra.mxu1 %vm700_vm3, %v661_v3  ;;  %v658_v50 = vld [vmem:[#allocation2 + $0x170] sm:$0xff]  ;;  %v5157_v34 = vmul.f32 -1.442695, %v9699_v16 }
 0x1a7   : > { %v6613_v14 = vadd.f32 %v945_v59, %v833_v60  ;;  %879 = vmatmul.f32.gmra.mxu0 %v656_v51  ;;  %v663_v60 = vld [vmem:[#allocation2 + $0x198] sm:$0xff] }
 0x1a9   : > { %v5314_v20 = vpop.eup %5313  ;;  %v9617_v26 = vmax.f32 %v6613_v14, 0.0 }
 0x1aa   : > { %1929 = vrot.lane.b32.xlu1 %v5314_v20, %s5858_s13  ;;  %v954_v51 = vpop.f32.mrf.mxu1 }
 0x1ab   : > { %5315 = vtanh.f32 %v9617_v26  ;;  %v6621_v28 = vpop.permute.xlu0 %3902  ;;  %v6623_v37 = vpop.permute.xlu1 %3904 }
 0x1ac   : > { %9673 = vst [vmem:[#allocation29_spill] sm:$0xff] %v6621_v28  ;;  %v835_v35 = vpop.f32.mrf.mxu0 }
 0x1ad   : > { %9674 = vst [vmem:[#allocation30_spill] sm:$0xff] %v6623_v37  ;;  %v836_v59 = vadd.f32 %v6496_v29, %v835_v35  ;;  %5146 = vmatmul.msk.f32.gmra.mxu1 %vm700_vm3, %v663_v60 }
 0x1af   : > { %v6629_v3 = vadd.f32 %v948_v25, %v836_v59  ;;  %882 = vmatmul.f32.gmra.mxu0 %v658_v50  ;;  %v665_v59 = vld [vmem:[#allocation2 + $0x1a8] sm:$0xff] }
 0x1b1   : > { %v5316_v20 = vpop.eup %5315  ;;  %v9622_v26 = vmax.f32 %v6629_v3, 0.0 }
 0x1b2   : > { %1931 = vrot.lane.b32.xlu2 %v5316_v20, %s5858_s13  ;;  %v957_v50 = vpop.f32.mrf.mxu1  ;;  %v6646_v20 = vpop.permute.xlu2 %3930 }
 0x1b3   : > { %5317 = vtanh.f32 %v9622_v26  ;;  %v6637_v35 = vpop.permute.xlu0 %3908  ;;  %v6639_v4 = vpop.permute.xlu1 %3910  ;;  %9678 = vst [vmem:[#allocation34_spill] sm:$0xff] %v6646_v20  ;;  %v577_v20 = vld [vmem:[%s5951_s23 + $0xf0] sm:$0xff] }
 0x1b4   : > { %9676 = vst [vmem:[#allocation32_spill] sm:$0xff] %v6637_v35  ;;  %v838_v42 = vpop.f32.mrf.mxu0  ;;  %v578_v35 = vld [vmem:[%s5951_s23 + $0xf8] sm:$0xff] }
 0x1b5   : > { %9677 = vst [vmem:[#allocation33_spill] sm:$0xff] %v6639_v4  ;;  %v839_v25 = vadd.f32 %v6496_v29, %v838_v42  ;;  %5147 = vmatmul.msk.f32.gmra.mxu1 %vm700_vm3, %v665_v59 }
 0x1b6   : > { %610 = vst.msk [vmem:[#allocation2 + $0x1e0] sm:$0xff] %vm579_vm2, %v577_v20 }
 0x1b7   : > { %v6643_v47 = vadd.f32 %v951_v61, %v839_v25  ;;  %885 = vmatmul.f32.gmra.mxu0 %v660_v22  ;;  %v662_v25 = vld [vmem:[#allocation2 + $0x190] sm:$0xff]  ;;  %611 = vst.msk [vmem:[#allocation2 + $0x1f0] sm:$0xff] %vm579_vm2, %v578_v35 }
 0x1b9   : > { %v5318_v60 = vpop.eup %5317  ;;  %v9623_v26 = vmax.f32 %v6643_v47, 0.0 }
 0x1ba   : > { %1933 = vrot.lane.b32.xlu0 %v5318_v60, %s5858_s13  ;;  %v960_v13 = vpop.f32.mrf.mxu1 }
 0x1bb   : > { %5319 = vtanh.f32 %v9623_v26  ;;  %v6653_v42 = vpop.permute.xlu0 %3914  ;;  %v6655_v6 = vpop.permute.xlu1 %3916 }
 0x1bc   : > { %9679 = vst [vmem:[#allocation35_spill] sm:$0xff] %v6653_v42  ;;  %v841_v61 = vpop.f32.mrf.mxu0  ;;  %v6665_v26 = vpop.permute.xlu2 %3936 }
 0x1bd   : > { %9680 = vst [vmem:[#allocation36_spill] sm:$0xff] %v6655_v6  ;;  %v842_v22 = vadd.f32 %v6496_v29, %v841_v61  ;;  %5148 = vmatmul.msk.f32.gmra.mxu1 %vm700_vm3, %v667_v58  ;;  %v669_v6 = vld [vmem:[#allocation2 + $0x1c8] sm:$0xff] }
 0x1be   : > { %9681 = vst [vmem:[#allocation37_spill] sm:$0xff] %v6665_v26 }
 0x1bf   : > { %v6659_v7 = vadd.f32 %v954_v51, %v842_v22  ;;  %888 = vmatmul.f32.gmra.mxu0 %v662_v25  ;;  %v664_v22 = vld [vmem:[#allocation2 + $0x1a0] sm:$0xff] }
 0x1c1   : > { %v5320_v59 = vpop.eup %5319  ;;  %v9624_v60 = vmax.f32 %v6659_v7, 0.0 }
 0x1c2   : > { %1935 = vrot.lane.b32.xlu1 %v5320_v59, %s5858_s13  ;;  %v963_v25 = vpop.f32.mrf.mxu1  ;;  %v9684_v59 = vmax.f32 %v6511_v43, 0.0 }
 0x1c3   : > { %5321 = vtanh.f32 %v9624_v60  ;;  %v6669_v61 = vpop.permute.xlu0 %3920  ;;  %v6671_v42 = vpop.permute.xlu1 %3922 }
 0x1c4   : > { %9682 = vst [vmem:[#allocation38_spill] sm:$0xff] %v6669_v61  ;;  %v844_v51 = vpop.f32.mrf.mxu0  ;;  %v5153_v60 = vmul.f32 -1.442695, %v9684_v59  ;;  %v6689_v35 = vpop.permute.xlu2 %3942  ;;  %v671_v61 = vld [vmem:[#allocation2 + $0x1d8] sm:$0xff] }
 0x1c5   : > { %9683 = vst [vmem:[#allocation39_spill] sm:$0xff] %v6671_v42  ;;  %v845_v20 = vadd.f32 %v6496_v29, %v844_v51  ;;  %5149 = vmatmul.msk.f32.gmra.mxu1 %vm700_vm3, %v669_v6 }
 0x1c6   : > { %9687 = vst [vmem:[#allocation42_spill] sm:$0xff] %v6689_v35 }
 0x1c7   : > { %v6675_v4 = vadd.f32 %v957_v50, %v845_v20  ;;  %891 = vmatmul.f32.gmra.mxu0 %v664_v22  ;;  %v666_v20 = vld [vmem:[#allocation2 + $0x1b0] sm:$0xff] }
 0x1c9   : > { %v5322_v58 = vpop.eup %5321  ;;  %v9625_v26 = vmax.f32 %v6675_v4, 0.0 }
 0x1ca   : > { %1937 = vrot.lane.b32.xlu2 %v5322_v58, %s5858_s13  ;;  %v966_v59 = vpop.f32.mrf.mxu1  ;;  %v9688_v58 = vmax.f32 %v6529_v62, 0.0 }
 0x1cb   : > { %5323 = vtanh.f32 %v9625_v26  ;;  %v6685_v51 = vpop.permute.xlu0 %3926  ;;  %v6687_v22 = vpop.permute.xlu1 %3928 }
 0x1cc   : > { %9685 = vst [vmem:[#allocation40_spill] sm:$0xff] %v6685_v51  ;;  %v847_v50 = vpop.f32.mrf.mxu0  ;;  %5325 = vpow2.f32 %v5153_v60  ;;  %v5154_v26 = vmul.f32 -1.442695, %v9688_v58 }
 0x1cd   : > { %9686 = vst [vmem:[#allocation41_spill] sm:$0xff] %v6687_v22  ;;  %v848_v43 = vadd.f32 %v6496_v29, %v847_v50  ;;  %5150 = vmatmul.msk.f32.gmra.mxu1 %vm700_vm3, %v671_v61  ;;  %v673_v22 = vld [vmem:[#allocation2 + $0x1e8] sm:$0xff]  ;;  %v6708_v61 = vpop.permute.xlu2 %3948 }
 0x1ce   : > { %9691 = vst [vmem:[#allocation45_spill] sm:$0xff] %v6708_v61 }
 0x1cf   : > { %v6692_v42 = vadd.f32 %v960_v13, %v848_v43  ;;  %894 = vmatmul.f32.gmra.mxu0 %v666_v20  ;;  %v668_v13 = vld [vmem:[#allocation2 + $0x1c0] sm:$0xff] }
 0x1d1   : > { %v5324_v6 = vpop.eup %5323  ;;  %v9626_v51 = vmax.f32 %v6692_v42, 0.0 }
 0x1d2   : > { %1939 = vrot.lane.b32.xlu0 %v5324_v6, %s5858_s13  ;;  %v5326_v60 = vpop.eup %5325  ;;  %v969_v58 = vpop.f32.mrf.mxu1 }
 0x1d3   : > { %5327 = vtanh.f32 %v9626_v51  ;;  %v6701_v50 = vpop.permute.xlu0 %3932  ;;  %v6703_v43 = vpop.permute.xlu1 %3934  ;;  %v6706_v20 = vadd.f32 1.0, %v5326_v60  ;;  %v9692_v51 = vmax.f32 %v6547_v17, 0.0  ;;  %v670_v60 = vld [vmem:[#allocation2 + $0x1d0] sm:$0xff] }
 0x1d4   : > { %9689 = vst [vmem:[#allocation43_spill] sm:$0xff] %v6701_v50  ;;  %v850_v35 = vpop.f32.mrf.mxu0  ;;  %5329 = vpow2.f32 %v5154_v26 }
 0x1d5   : > { %9690 = vst [vmem:[#allocation44_spill] sm:$0xff] %v6703_v43  ;;  %v851_v62 = vadd.f32 %v6496_v29, %v850_v35  ;;  %v5155_v50 = vmul.f32 -1.442695, %v9692_v51  ;;  %5151 = vmatmul.msk.f32.gmra.mxu1 %vm700_vm3, %v673_v22  ;;  %5331 = vrcp.f32 %v6706_v20  ;;  %v6733_v37 = vpop.permute.xlu2 %3954  ;;  %vm1220_vm5 = vweird.f32 %v6706_v20 }
 0x1d6   : > { %9696 = vst [vmem:[#allocation48_spill] sm:$0xff] %v6733_v37 }
 0x1d7   : > { %v6710_v6 = vadd.f32 %v963_v25, %v851_v62  ;;  %897 = vmatmul.f32.gmra.mxu0 %v668_v13  ;;  %v675_v62 = vld [vmem:[#allocation2 + $0x1f8] sm:$0xff] }
 0x1d9   : > { %v5328_v41 = vpop.eup %5327  ;;  %v9627_v28 = vmax.f32 %v6710_v6, 0.0 }
 0x1da   : > { %1941 = vrot.lane.b32.xlu1 %v5328_v41, %s5858_s13  ;;  %v5330_v26 = vpop.eup %5329  ;;  %v972_v22 = vpop.f32.mrf.mxu1 }
 0x1db   : > { %5333 = vtanh.f32 %v9627_v28  ;;  %v6720_v35 = vpop.permute.xlu0 %3938  ;;  %v6723_v51 = vpop.permute.xlu1 %3940  ;;  %v6725_v13 = vadd.f32 1.0, %v5330_v26  ;;  %v9695_v28 = vmax.f32 %v6564_v39, 0.0 }
 0x1dc   : > { %9693 = vst [vmem:[#allocation46_spill] sm:$0xff] %v6720_v35  ;;  %v853_v25 = vpop.f32.mrf.mxu0  ;;  %5335 = vpow2.f32 %v5155_v50  ;;  %v6729_v41 = vpop.eup %5331 }
 0x1dd   : > { %v854_v17 = vadd.f32 %v6496_v29, %v853_v25  ;;  %9694 = vst [vmem:[#allocation47_spill] sm:$0xff] %v6723_v51  ;;  %v5156_v35 = vmul.f32 -1.442695, %v9695_v28  ;;  %5152 = vmatmul.msk.f32.gmra.mxu1 %vm700_vm3, %v675_v62  ;;  %5337 = vrcp.f32 %v6725_v13  ;;  %v1216_v39 = vmul.f32 %v6729_v41, %v6706_v20  ;;  %v672_v25 = vld [vmem:[#allocation2 + $0x1e0] sm:$0xff] }
 0x1de   : > { %vm1221_vm4 = vweird.f32 %v6729_v41  ;;  %vm1235_vm9 = vweird.f32 %v6725_v13 }
 0x1df   : > { %v6727_v61 = vadd.f32 %v966_v59, %v854_v17  ;;  %900 = vmatmul.f32.gmra.mxu0 %v670_v60  ;;  %vm1222_vm6 = vmor %vm1220_vm5, %vm1221_vm4 }
 0x1e1   : > { %v5334_v43 = vpop.eup %5333  ;;  %v9628_v50 = vmax.f32 %v6727_v61, 0.0 }
 0x1e2   : > { %1943 = vrot.lane.b32.xlu2 %v5334_v43, %s5858_s13  ;;  %v5336_v26 = vpop.eup %5335  ;;  %v975_v62 = vpop.f32.mrf.mxu1 }
 0x1e3   : > { %5339 = vtanh.f32 %v9628_v50  ;;  %v6741_v59 = vpop.permute.xlu0 %3944  ;;  %v6746_v17 = vadd.f32 1.0, %v5336_v26  ;;  %v6750_v43 = vpop.permute.xlu1 %3946  ;;  %v1217_v50 = vsub.f32 1.0, %v1216_v39 }
 0x1e4   : > { %9697 = vst [vmem:[#allocation49_spill] sm:$0xff] %v6741_v59  ;;  %v856_v28 = vpop.f32.mrf.mxu0  ;;  %5341 = vpow2.f32 %v5156_v35  ;;  %v6752_v51 = vpop.eup %5337 }
 0x1e5   : > { %v857_v60 = vadd.f32 %v6496_v29, %v856_v28  ;;  %9698 = vst [vmem:[#allocation50_spill] sm:$0xff] %v6750_v43  ;;  %5343 = vrcp.f32 %v6746_v17  ;;  %v6759_v26 = vpop.permute.xlu2 %4539  ;;  %v1218_v39 = vmul.f32 %v6729_v41, %v1217_v50  ;;  %v1231_v16 = vmul.f32 %v6752_v51, %v6725_v13 }
 0x1e6   : > { %9700 = vst [vmem:[#allocation51_spill] sm:$0xff] %v6759_v26  ;;  %vm1236_vm8 = vweird.f32 %v6752_v51  ;;  %vm1250_vm13 = vweird.f32 %v6746_v17 }
 0x1e7   : > { %v6748_v37 = vadd.f32 %v969_v58, %v857_v60  ;;  %903 = vmatmul.f32.gmra.mxu0 %v672_v25  ;;  %v674_v25 = vld [vmem:[#allocation2 + $0x1f0] sm:$0xff]  ;;  %v1232_v50 = vsub.f32 1.0, %v1231_v16  ;;  %vm1237_vm10 = vmor %vm1235_vm9, %vm1236_vm8 }
 0x1e9   : > { %v5340_v59 = vpop.eup %5339  ;;  %v9629_v40 = vmax.f32 %v6748_v37, 0.0  ;;  %v1233_v16 = vmul.f32 %v6752_v51, %v1232_v50 }
 0x1ea   : > { %1945 = vrot.lane.b32.xlu0 %v5340_v59, %s5858_s13  ;;  %v5342_v35 = vpop.eup %5341  ;;  %v6771_v59 = vpop.f32.mrf.mxu1 }
 0x1eb   : > { %5345 = vtanh.f32 %v9629_v40  ;;  %v6763_v58 = vpop.permute.xlu0 %3950  ;;  %v6769_v60 = vadd.f32 1.0, %v5342_v35  ;;  %v6775_v40 = vpop.eup %5343  ;;  %v1234_v50 = vadd.f32 %v6752_v51, %v1233_v16 }
 0x1ec   : > { %9701 = vst [vmem:[#allocation52_spill] sm:$0xff] %v6763_v58  ;;  %v859_v28 = vpop.f32.mrf.mxu0  ;;  %5347 = vpow2.f32 %v5157_v34  ;;  %v1219_v58 = vadd.f32 %v6729_v41, %v1218_v39  ;;  %v5158_v34 = vmul.f32 -1.442695, %v9702_v15  ;;  %v6783_v12 = vpop.permute.xlu1 %3952  ;;  %vm1251_vm12 = vweird.f32 %v6775_v40 }
 0x1ed   : > { %v860_v1 = vadd.f32 %v6496_v29, %v859_v28  ;;  %v1226_v28 = vand.u32 2147483648, %v6706_v20  ;;  %9703 = vst [vmem:[#allocation53_spill] sm:$0xff] %v6783_v12  ;;  %5349 = vrcp.f32 %v6769_v60  ;;  %v1920_v12 = vpop.permute.xlu2 %1919  ;;  %vm1252_vm14 = vmor %vm1250_vm13, %vm1251_vm12  ;;  %vm1265_vm1 = vweird.f32 %v6769_v60 }
 0x1ee   : > { %v1223_v33 = vsel %vm1222_vm6, %v6729_v41, %v1219_v58 }
 0x1ef   : > { %v6773_v43 = vadd.f32 %v972_v22, %v860_v1  ;;  %906 = vmatmul.f32.gmra.mxu0 %v674_v25  ;;  %v1224_v22 = vand.u32 2147483647, %v6706_v20  ;;  %v1246_v1 = vmul.f32 %v6775_v40, %v6746_v17  ;;  %v1227_v20 = vor.u32 1.1754944e-38, %v1226_v28 }
 0x1f1   : > { %v5346_v26 = vpop.eup %5345  ;;  %v9631_v35 = vmax.f32 %v6773_v43, 0.0  ;;  %vm1225_vm7 = vcmp.eq.f32.partialorder %v1224_v22, 8.507059e+37 }
 0x1f2   : > { %1947 = vrot.lane.b32.xlu1 %v5346_v26, %s5858_s13  ;;  %v5348_v39 = vpop.eup %5347  ;;  %v6800_v56 = vpop.f32.mrf.mxu1 }
 0x1f3   : > { %5351 = vtanh.f32 %v9631_v35  ;;  %v6791_v15 = vpop.permute.xlu0 %3956  ;;  %v6798_v53 = vadd.f32 1.0, %v5348_v39  ;;  %v6802_v35 = vsel %vm1225_vm7, %v1227_v20, %v1223_v33  ;;  %v6806_v41 = vpop.eup %5349  ;;  %v9705_v39 = vmax.f32 %v6613_v14, 0.0 }
 0x1f4   : > { %9704 = vst [vmem:[#allocation54_spill] sm:$0xff] %v6791_v15  ;;  %v862_v25 = vpop.f32.mrf.mxu0  ;;  %5353 = vpow2.f32 %v5158_v34  ;;  %v2015_v58 = vmul.f32 %v1920_v12, %v6802_v35  ;;  %v1247_v34 = vsub.f32 1.0, %v1246_v1  ;;  %v1241_v33 = vand.u32 2147483648, %v6725_v13  ;;  %v6822_v14 = vpop.permute.xlu1 %3958 }
 0x1f5   : > { %v863_v26 = vadd.f32 %v6496_v29, %v862_v25  ;;  %v5159_v25 = vmul.f32 -1.442695, %v9705_v39  ;;  %5355 = vrcp.f32 %v6798_v53  ;;  %v1239_v12 = vand.u32 2147483647, %v6725_v13  ;;  %9706 = vst [vmem:[#allocation55_spill] sm:$0xff] %v6822_v14 }
 0x1f6   : > { %v1261_v16 = vmul.f32 %v6806_v41, %v6769_v60  ;;  %v1238_v20 = vsel %vm1237_vm10, %v6752_v51, %v1234_v50  ;;  %v1242_v13 = vor.u32 1.1754944e-38, %v1241_v33  ;;  %v9708_v33 = vmax.f32 %v6629_v3, 0.0 }
 0x1f7   : > { %v6804_v15 = vadd.f32 %v975_v62, %v863_v26  ;;  %v1248_v26 = vmul.f32 %v6775_v40, %v1247_v34  ;;  %vm1240_vm11 = vcmp.eq.f32.partialorder %v1239_v12, 8.507059e+37  ;;  %vm1266_vm0 = vweird.f32 %v6806_v41 }
 0x1f8   : > { %v6833_v14 = vsel %vm1240_vm11, %v1242_v13, %v1238_v20  ;;  %v1262_v51 = vsub.f32 1.0, %v1261_v16  ;;  %v5160_v12 = vmul.f32 -1.442695, %v9708_v33  ;;  %vm1267_vm2 = vmor %vm1265_vm1, %vm1266_vm0  ;;  %vm1280_vm6 = vweird.f32 %v6798_v53 }
 0x1f9   : > { %v5352_v28 = vpop.eup %5351  ;;  %v9632_v22 = vmax.f32 %v6804_v15, 0.0  ;;  %9707 = vst [vmem:[#allocation56_spill] sm:$0xff] %v6833_v14  ;;  %v1249_v34 = vadd.f32 %v6775_v40, %v1248_v26 }
 0x1fa   : > { %1949 = vrot.lane.b32.xlu2 %v5352_v28, %s5858_s13  ;;  %2079 = vrot.lane.b32.xlu1 %v2015_v58, %s5858_s13  ;;  %v5354_v62 = vpop.eup %5353  ;;  %v1263_v3 = vmul.f32 %v6806_v41, %v1262_v51 }
 0x1fb   : > { %5357 = vtanh.f32 %v9632_v22  ;;  %v6829_v39 = vadd.f32 1.0, %v5354_v62  ;;  %v6831_v22 = vpop.f32.mrf.mxu1  ;;  %v6838_v30 = vpop.eup %5355  ;;  %v1253_v26 = vsel %vm1252_vm14, %v6775_v40, %v1249_v34 }
 0x1fc   : > { %v865_v1 = vpop.f32.mrf.mxu0  ;;  %5359 = vpow2.f32 %v5159_v25  ;;  %v1922_v28 = vpop.permute.xlu0 %1921  ;;  %v1264_v40 = vadd.f32 %v6806_v41, %v1263_v3  ;;  %vm1281_vm5 = vweird.f32 %v6838_v30 }
 0x1fd   : > { %v866_v58 = vadd.f32 %v6496_v29, %v865_v1  ;;  %v2016_v50 = vmul.f32 %v1922_v28, %v6833_v14  ;;  %v1256_v1 = vand.u32 2147483648, %v6746_v17  ;;  %5361 = vrcp.f32 %v6829_v39  ;;  %vm1282_vm7 = vmor %vm1280_vm6, %vm1281_vm5 }
 0x1fe   : > { %vm1295_vm10 = vweird.f32 %v6829_v39 }
 0x1ff   : > { %v6836_v44 = vadd.f32 %v6771_v59, %v866_v58  ;;  %v1254_v59 = vand.u32 2147483647, %v6746_v17  ;;  %v1276_v58 = vmul.f32 %v6838_v30, %v6798_v53 }
 0x201   : > { %v5358_v25 = vpop.eup %5357  ;;  %v9633_v62 = vmax.f32 %v6836_v44, 0.0  ;;  %vm1255_vm15 = vcmp.eq.f32.partialorder %v1254_v59, 8.507059e+37 }
 0x202   : > { %1951 = vrot.lane.b32.xlu0 %v5358_v25, %s5858_s13  ;;  %2081 = vrot.lane.b32.xlu2 %v2016_v50, %s5858_s13  ;;  %v5360_v16 = vpop.eup %5359  ;;  %v1257_v50 = vor.u32 1.1754944e-38, %v1256_v1 }
 0x203   : > { %5363 = vtanh.f32 %v9633_v62  ;;  %v6859_v25 = vadd.f32 1.0, %v5360_v16  ;;  %v6861_v17 = vpop.f32.mrf.mxu1  ;;  %v6868_v62 = vpop.eup %5361  ;;  %v9709_v16 = vmax.f32 %v6643_v47, 0.0 }
 0x204   : > { %v868_v20 = vpop.f32.mrf.mxu0  ;;  %5365 = vpow2.f32 %v5160_v12  ;;  %v1924_v13 = vpop.permute.xlu1 %1923  ;;  %v6863_v33 = vsel %vm1255_vm15, %v1257_v50, %v1253_v26  ;;  %v1277_v12 = vsub.f32 1.0, %v1276_v58  ;;  %v1268_v58 = vsel %vm1267_vm2, %v6806_v41, %v1264_v40 }
 0x205   : > { %v869_v28 = vadd.f32 %v6496_v29, %v868_v20  ;;  %v2017_v34 = vmul.f32 %v1924_v13, %v6863_v33  ;;  %v5161_v59 = vmul.f32 -1.442695, %v9709_v16  ;;  %v1271_v20 = vand.u32 2147483648, %v6769_v60  ;;  %v6884_v47 = vpop.permute.xlu0 %4577 }
 0x206   : > { %5367 = vrcp.f32 %v6859_v25  ;;  %9710 = vst [vmem:[#allocation57_spill] sm:$0xff] %v6884_v47  ;;  %v1278_v13 = vmul.f32 %v6838_v30, %v1277_v12  ;;  %v1291_v50 = vmul.f32 %v6868_v62, %v6829_v39  ;;  %vm1296_vm9 = vweird.f32 %v6868_v62 }
 0x207   : > { %v6866_v51 = vadd.f32 %v6800_v56, %v869_v28  ;;  %v1269_v56 = vand.u32 2147483647, %v6769_v60  ;;  %v1272_v60 = vor.u32 1.1754944e-38, %v1271_v20  ;;  %vm1297_vm11 = vmor %vm1295_vm10, %vm1296_vm9  ;;  %vm1310_vm14 = vweird.f32 %v6859_v25 }
 0x208   : > { %v1292_v20 = vsub.f32 1.0, %v1291_v50 }
 0x209   : > { %v5364_v1 = vpop.eup %5363  ;;  %v9634_v26 = vmax.f32 %v6866_v51, 0.0  ;;  %vm1270_vm4 = vcmp.eq.f32.partialorder %v1269_v56, 8.507059e+37 }
 0x20a   : > { %2083 = vrot.lane.b32.xlu0 %v2017_v34, %s5858_s13  ;;  %1953 = vrot.lane.b32.xlu1 %v5364_v1, %s5858_s13  ;;  %v5366_v3 = vpop.eup %5365  ;;  %v1926_v34 = vpop.permute.xlu2 %1925 }
 0x20b   : > { %5369 = vtanh.f32 %v9634_v26  ;;  %v6891_v16 = vadd.f32 1.0, %v5366_v3  ;;  %v6893_v27 = vpop.f32.mrf.mxu1  ;;  %v6895_v26 = vsel %vm1270_vm4, %v1272_v60, %v1268_v58  ;;  %v9711_v3 = vmax.f32 %v6659_v7, 0.0 }
 0x20c   : > { %v871_v28 = vpop.f32.mrf.mxu0  ;;  %5371 = vpow2.f32 %v5161_v59  ;;  %v6900_v40 = vpop.eup %5367  ;;  %v2018_v12 = vmul.f32 %v1926_v34, %v6895_v26  ;;  %v1279_v59 = vadd.f32 %v6838_v30, %v1278_v13  ;;  %v1286_v58 = vand.u32 2147483648, %v6798_v53 }
 0x20d   : > { %v872_v1 = vadd.f32 %v6496_v29, %v871_v28  ;;  %v5162_v56 = vmul.f32 -1.442695, %v9711_v3  ;;  %5373 = vrcp.f32 %v6891_v16  ;;  %v1306_v7 = vmul.f32 %v6900_v40, %v6859_v25 }
 0x20e   : > { %v1283_v60 = vsel %vm1282_vm7, %v6838_v30, %v1279_v59  ;;  %v1293_v34 = vmul.f32 %v6868_v62, %v1292_v20  ;;  %vm1311_vm13 = vweird.f32 %v6900_v40  ;;  %vm1325_vm2 = vweird.f32 %v6891_v16 }
 0x20f   : > { %v6898_v41 = vadd.f32 %v6831_v22, %v872_v1  ;;  %v1284_v22 = vand.u32 2147483647, %v6798_v53  ;;  %v1307_v10 = vsub.f32 1.0, %v1306_v7  ;;  %vm1312_vm15 = vmor %vm1310_vm14, %vm1311_vm13 }
 0x210   : > { %v1294_v59 = vadd.f32 %v6868_v62, %v1293_v34 }
 0x211   : > { %v5370_v28 = vpop.eup %5369  ;;  %v9636_v47 = vmax.f32 %v6898_v41, 0.0  ;;  %vm1285_vm8 = vcmp.eq.f32.partialorder %v1284_v22, 8.507059e+37  ;;  %v9721_v32 = vmax.f32 %v6898_v41, 0.0  ;;  %v1855_v41 = vmul.f32 %v6437_v46, %v6802_v35 }
 0x212   : > { %1955 = vrot.lane.b32.xlu2 %v5370_v28, %s5858_s13  ;;  %2085 = vrot.lane.b32.xlu1 %v2018_v12, %s5858_s13  ;;  %v5372_v13 = vpop.eup %5371  ;;  %v1287_v12 = vor.u32 1.1754944e-38, %v1286_v58 }
 0x213   : > { %5375 = vtanh.f32 %v9636_v47  ;;  %v6921_v3 = vadd.f32 1.0, %v5372_v13  ;;  %v993_v53 = vpop.f32.mrf.mxu1  ;;  %v6928_v18 = vpop.eup %5373  ;;  %v1301_v13 = vand.u32 2147483648, %v6829_v39 }
 0x214   : > { %v874_v50 = vpop.f32.mrf.mxu0  ;;  %5377 = vpow2.f32 %v5162_v56  ;;  %v1928_v28 = vpop.permute.xlu0 %1927  ;;  %v6923_v23 = vsel %vm1285_vm8, %v1287_v12, %v1283_v60  ;;  %v9712_v56 = vmax.f32 %v6675_v4, 0.0  ;;  %v1308_v4 = vmul.f32 %v6900_v40, %v1307_v10 }
 0x215   : > { %v875_v1 = vadd.f32 %v6496_v29, %v874_v50  ;;  %v2019_v30 = vmul.f32 %v1928_v28, %v6923_v23  ;;  %5379 = vrcp.f32 %v6921_v3  ;;  %v1298_v60 = vsel %vm1297_vm11, %v6868_v62, %v1294_v59 }
 0x216   : > { %v5163_v58 = vmul.f32 -1.442695, %v9712_v56  ;;  %v1321_v34 = vmul.f32 %v6928_v18, %v6891_v16  ;;  %v1302_v12 = vor.u32 1.1754944e-38, %v1301_v13  ;;  %v1309_v62 = vadd.f32 %v6900_v40, %v1308_v4 }
 0x217   : > { %v6926_v47 = vadd.f32 %v6861_v17, %v875_v1  ;;  %v1299_v17 = vand.u32 2147483647, %v6829_v39  ;;  %vm1326_vm1 = vweird.f32 %v6928_v18  ;;  %vm1340_vm7 = vweird.f32 %v6921_v3 }
 0x218   : > { %vm1327_vm4 = vmor %vm1325_vm2, %vm1326_vm1 }
 0x219   : > { %v5376_v20 = vpop.eup %5375  ;;  %v9637_v22 = vmax.f32 %v6926_v47, 0.0  ;;  %vm1300_vm12 = vcmp.eq.f32.partialorder %v1299_v17, 8.507059e+37 }
 0x21a   : > { %1957 = vrot.lane.b32.xlu0 %v5376_v20, %s5858_s13  ;;  %2087 = vrot.lane.b32.xlu2 %v2019_v30, %s5858_s13  ;;  %v5378_v7 = vpop.eup %5377  ;;  %v6953_v20 = vsel %vm1300_vm12, %v1302_v12, %v1298_v60 }
 0x21b   : > { %5381 = vtanh.f32 %v9637_v22  ;;  %v6949_v30 = vadd.f32 1.0, %v5378_v7  ;;  %v6951_v39 = vpop.f32.mrf.mxu1  ;;  %v6958_v56 = vpop.eup %5379  ;;  %v9713_v7 = vmax.f32 %v6692_v42, 0.0  ;;  %v1313_v42 = vsel %vm1312_vm15, %v6900_v40, %v1309_v62 }
 0x21c   : > { %v877_v50 = vpop.f32.mrf.mxu0  ;;  %5383 = vpow2.f32 %v5163_v58  ;;  %v1930_v28 = vpop.permute.xlu1 %1929  ;;  %v1322_v58 = vsub.f32 1.0, %v1321_v34  ;;  %v1336_v12 = vmul.f32 %v6958_v56, %v6921_v3  ;;  %vm1341_vm6 = vweird.f32 %v6958_v56 }
 0x21d   : > { %v878_v1 = vadd.f32 %v6496_v29, %v877_v50  ;;  %v2020_v59 = vmul.f32 %v1930_v28, %v6953_v20  ;;  %v5164_v17 = vmul.f32 -1.442695, %v9713_v7  ;;  %v1316_v50 = vand.u32 2147483648, %v6859_v25  ;;  %vm1342_vm8 = vmor %vm1340_vm7, %vm1341_vm6 }
 0x21e   : > { %5385 = vrcp.f32 %v6949_v30  ;;  %vm1355_vm11 = vweird.f32 %v6949_v30 }
 0x21f   : > { %v6956_v10 = vadd.f32 %v6893_v27, %v878_v1  ;;  %v1314_v27 = vand.u32 2147483647, %v6859_v25  ;;  %v1323_v1 = vmul.f32 %v6928_v18, %v1322_v58  ;;  %v1317_v28 = vor.u32 1.1754944e-38, %v1316_v50  ;;  %v1932_v25 = vpop.permute.xlu2 %1931 }
 0x221   : > { %v5382_v13 = vpop.eup %5381  ;;  %v9638_v60 = vmax.f32 %v6956_v10, 0.0  ;;  %vm1315_vm0 = vcmp.eq.f32.partialorder %v1314_v27, 8.507059e+37  ;;  %v1324_v58 = vadd.f32 %v6928_v18, %v1323_v1 }
 0x222   : > { %2089 = vrot.lane.b32.xlu0 %v2020_v59, %s5858_s13  ;;  %1959 = vrot.lane.b32.xlu1 %v5382_v13, %s5858_s13  ;;  %v5384_v4 = vpop.eup %5383  ;;  %v6981_v13 = vsel %vm1315_vm0, %v1317_v28, %v1313_v42  ;;  %v1331_v42 = vand.u32 2147483648, %v6891_v16 }
 0x223   : > { %5387 = vtanh.f32 %v9638_v60  ;;  %v6979_v7 = vadd.f32 1.0, %v5384_v4  ;;  %v999_v60 = vpop.f32.mrf.mxu1  ;;  %v2021_v62 = vmul.f32 %v1932_v25, %v6981_v13  ;;  %v7008_v25 = vld [vmem:[%s9608_s2] ss:$0 sm:$0xff] }
 0x224   : > { %v880_v34 = vpop.f32.mrf.mxu0  ;;  %5389 = vpow2.f32 %v5164_v17  ;;  %v6985_v40 = vpop.eup %5385  ;;  %v1337_v17 = vsub.f32 1.0, %v1336_v12  ;;  %v1328_v12 = vsel %vm1327_vm4, %v6928_v18, %v1324_v58 }
 0x225   : > { %v881_v59 = vadd.f32 %v6496_v29, %v880_v34  ;;  %v9714_v29 = vmax.f32 %v6710_v6, 0.0  ;;  %5391 = vrcp.f32 %v6979_v7  ;;  %v1351_v6 = vmul.f32 %v6985_v40, %v6949_v30 }
 0x226   : > { %v1338_v28 = vmul.f32 %v6958_v56, %v1337_v17  ;;  %vm1356_vm10 = vweird.f32 %v6985_v40  ;;  %vm1370_vm15 = vweird.f32 %v6979_v7 }
 0x227   : > { %v6983_v22 = vadd.f32 %v993_v53, %v881_v59  ;;  %v5165_v4 = vmul.f32 -1.442695, %v9714_v29  ;;  %v1329_v53 = vand.u32 2147483647, %v6891_v16  ;;  %v1332_v59 = vor.u32 1.1754944e-38, %v1331_v42  ;;  %vm1357_vm12 = vmor %vm1355_vm11, %vm1356_vm10 }
 0x228   : > { %v1352_v58 = vsub.f32 1.0, %v1351_v6  ;;  %v9715_v42 = vmax.f32 %v6727_v61, 0.0 }
 0x229   : > { %v5388_v50 = vpop.eup %5387  ;;  %v9639_v27 = vmax.f32 %v6983_v22, 0.0  ;;  %vm1330_vm5 = vcmp.eq.f32.partialorder %v1329_v53, 8.507059e+37 }
 0x22a   : > { %1961 = vrot.lane.b32.xlu2 %v5388_v50, %s5858_s13  ;;  %2091 = vrot.lane.b32.xlu1 %v2021_v62, %s5858_s13  ;;  %v5390_v34 = vpop.eup %5389  ;;  %v7013_v29 = vsel %vm1330_vm5, %v1332_v59, %v1328_v12  ;;  %v1346_v12 = vand.u32 2147483648, %v6921_v3  ;;  %v1353_v61 = vmul.f32 %v6985_v40, %v1352_v58 }
 0x22b   : > { %5393 = vtanh.f32 %v9639_v27  ;;  %v7011_v50 = vadd.f32 1.0, %v5390_v34  ;;  %v7018_v18 = vpop.eup %5391  ;;  %v5166_v34 = vmul.f32 -1.442695, %v9715_v42  ;;  %v1002_v59 = vpop.f32.mrf.mxu1 }
 0x22c   : > { %v883_v1 = vpop.f32.mrf.mxu0  ;;  %5395 = vpow2.f32 %v5165_v4  ;;  %v1934_v62 = vpop.permute.xlu0 %1933  ;;  %v1339_v4 = vadd.f32 %v6958_v56, %v1338_v28  ;;  %v1354_v58 = vadd.f32 %v6985_v40, %v1353_v61  ;;  %vm1371_vm14 = vweird.f32 %v7018_v18 }
 0x22d   : > { %v884_v16 = vadd.f32 %v7008_v25, %v883_v1  ;;  %v2022_v17 = vmul.f32 %v1934_v62, %v7013_v29  ;;  %5397 = vrcp.f32 %v7011_v50  ;;  %v1366_v62 = vmul.f32 %v7018_v18, %v6979_v7  ;;  %vm1372_vm0 = vmor %vm1370_vm15, %vm1371_vm14 }
 0x22e   : > { %vm1385_vm4 = vweird.f32 %v7011_v50 }
 0x22f   : > { %v7016_v27 = vadd.f32 %v6951_v39, %v884_v16  ;;  %v1344_v39 = vand.u32 2147483647, %v6921_v3  ;;  %v1343_v16 = vsel %vm1342_vm8, %v6958_v56, %v1339_v4  ;;  %v1367_v4 = vsub.f32 1.0, %v1366_v62 }
 0x231   : > { %v5394_v1 = vpop.eup %5393  ;;  %v9640_v53 = vmax.f32 %v7016_v27, 0.0  ;;  %vm1345_vm9 = vcmp.eq.f32.partialorder %v1344_v39, 8.507059e+37 }
 0x232   : > { %1963 = vrot.lane.b32.xlu0 %v5394_v1, %s5858_s13  ;;  %2093 = vrot.lane.b32.xlu2 %v2022_v17, %s5858_s13  ;;  %v5396_v6 = vpop.eup %5395  ;;  %v1347_v1 = vor.u32 1.1754944e-38, %v1346_v12  ;;  %v9716_v12 = vmax.f32 %v6748_v37, 0.0 }
 0x233   : > { %5399 = vtanh.f32 %v9640_v53  ;;  %v7039_v5 = vadd.f32 1.0, %v5396_v6  ;;  %v7045_v8 = vpop.eup %5397  ;;  %v1361_v6 = vand.u32 2147483648, %v6949_v30  ;;  %v1005_v37 = vpop.f32.mrf.mxu1 }
 0x234   : > { %v886_v28 = vpop.f32.mrf.mxu0  ;;  %5401 = vpow2.f32 %v5166_v34  ;;  %v1936_v42 = vpop.permute.xlu1 %1935  ;;  %v7041_v3 = vsel %vm1345_vm9, %v1347_v1, %v1343_v16  ;;  %v1358_v16 = vsel %vm1357_vm12, %v6985_v40, %v1354_v58  ;;  %v1381_v1 = vmul.f32 %v7045_v8, %v7011_v50 }
 0x235   : > { %v887_v17 = vadd.f32 %v7008_v25, %v886_v28  ;;  %v2023_v56 = vmul.f32 %v1936_v42, %v7041_v3  ;;  %v5167_v28 = vmul.f32 -1.442695, %v9716_v12  ;;  %5403 = vrcp.f32 %v7039_v5  ;;  %v1938_v42 = vpop.permute.xlu2 %1937 }
 0x236   : > { %vm1386_vm2 = vweird.f32 %v7045_v8  ;;  %vm1400_vm8 = vweird.f32 %v7039_v5 }
 0x237   : > { %v7043_v53 = vadd.f32 %v999_v60, %v887_v17  ;;  %v1359_v60 = vand.u32 2147483647, %v6949_v30  ;;  %v1368_v17 = vmul.f32 %v7018_v18, %v1367_v4  ;;  %v1362_v30 = vor.u32 1.1754944e-38, %v1361_v6  ;;  %vm1387_vm5 = vmor %vm1385_vm4, %vm1386_vm2 }
 0x238   : > { %v1382_v4 = vsub.f32 1.0, %v1381_v1 }
 0x239   : > { %v5400_v34 = vpop.eup %5399  ;;  %v9641_v39 = vmax.f32 %v7043_v53, 0.0  ;;  %vm1360_vm13 = vcmp.eq.f32.partialorder %v1359_v60, 8.507059e+37  ;;  %v1369_v58 = vadd.f32 %v7018_v18, %v1368_v17 }
 0x23a   : > { %2095 = vrot.lane.b32.xlu0 %v2023_v56, %s5858_s13  ;;  %1965 = vrot.lane.b32.xlu1 %v5400_v34, %s5858_s13  ;;  %v5402_v61 = vpop.eup %5401  ;;  %v7068_v12 = vsel %vm1360_vm13, %v1362_v30, %v1358_v16  ;;  %v1383_v1 = vmul.f32 %v7045_v8, %v1382_v4  ;;  %v9717_v4 = vmax.f32 %v6773_v43, 0.0 }
 0x23b   : > { %5405 = vtanh.f32 %v9641_v39  ;;  %v7066_v34 = vadd.f32 1.0, %v5402_v61  ;;  %v7072_v52 = vpop.eup %5403  ;;  %v2024_v40 = vmul.f32 %v1938_v42, %v7068_v12  ;;  %v1376_v61 = vand.u32 2147483648, %v6979_v7 }
 0x23c   : > { %v889_v62 = vpop.f32.mrf.mxu0  ;;  %5407 = vpow2.f32 %v5167_v28  ;;  %v1396_v16 = vmul.f32 %v7072_v52, %v7039_v5  ;;  %v1373_v17 = vsel %vm1372_vm0, %v7018_v18, %v1369_v58  ;;  %v1384_v18 = vadd.f32 %v7045_v8, %v1383_v1 }
 0x23d   : > { %v890_v56 = vadd.f32 %v7008_v25, %v889_v62  ;;  %5409 = vrcp.f32 %v7066_v34  ;;  %v1377_v42 = vor.u32 1.1754944e-38, %v1376_v61  ;;  %v5168_v61 = vmul.f32 -1.442695, %v9717_v4 }
 0x23e   : > { %v1397_v63 = vsub.f32 1.0, %v1396_v16  ;;  %vm1401_vm7 = vweird.f32 %v7072_v52  ;;  %vm1415_vm12 = vweird.f32 %v7066_v34 }
 0x23f   : > { %v7070_v39 = vadd.f32 %v1002_v59, %v890_v56  ;;  %v1374_v59 = vand.u32 2147483647, %v6979_v7  ;;  %vm1402_vm9 = vmor %vm1400_vm8, %vm1401_vm7 }
 0x240   : > { %v1398_v43 = vmul.f32 %v7072_v52, %v1397_v63 }
 0x241   : > { %v5406_v28 = vpop.eup %5405  ;;  %v9642_v6 = vmax.f32 %v7070_v39, 0.0  ;;  %vm1375_vm1 = vcmp.eq.f32.partialorder %v1374_v59, 8.507059e+37  ;;  %v1391_v59 = vand.u32 2147483648, %v7011_v50 }
 0x242   : > { %1967 = vrot.lane.b32.xlu2 %v5406_v28, %s5858_s13  ;;  %2097 = vrot.lane.b32.xlu1 %v2024_v40, %s5858_s13  ;;  %v5408_v60 = vpop.eup %5407  ;;  %v1008_v40 = vpop.f32.mrf.mxu1  ;;  %v7093_v7 = vsel %vm1375_vm1, %v1377_v42, %v1373_v17  ;;  %v1399_v63 = vadd.f32 %v7072_v52, %v1398_v43 }
 0x243   : > { %5411 = vtanh.f32 %v9642_v6  ;;  %v7091_v28 = vadd.f32 1.0, %v5408_v60  ;;  %v7097_v49 = vpop.eup %5409 }
 0x244   : > { %v892_v62 = vpop.f32.mrf.mxu0  ;;  %v1940_v56 = vpop.permute.xlu0 %1939  ;;  %v1411_v17 = vmul.f32 %v7097_v49, %v7066_v34  ;;  %vm1416_vm11 = vweird.f32 %v7097_v49 }
 0x245   : > { %v893_v30 = vadd.f32 %v7008_v25, %v892_v62  ;;  %v2025_v36 = vmul.f32 %v1940_v56, %v7093_v7  ;;  %5413 = vrcp.f32 %v7091_v28  ;;  %v1388_v62 = vsel %vm1387_vm5, %v7045_v8, %v1384_v18  ;;  %vm1417_vm13 = vmor %vm1415_vm12, %vm1416_vm11 }
 0x246   : > { %v1412_v18 = vsub.f32 1.0, %v1411_v17  ;;  %vm1430_vm0 = vweird.f32 %v7091_v28 }
 0x247   : > { %v7095_v6 = vadd.f32 %v1005_v37, %v893_v30  ;;  %v1389_v37 = vand.u32 2147483647, %v7011_v50 }
 0x248   : > { %v1413_v17 = vmul.f32 %v7097_v49, %v1412_v18 }
 0x249   : > { %v5412_v58 = vpop.eup %5411  ;;  %v9644_v60 = vmax.f32 %v7095_v6, 0.0  ;;  %vm1390_vm6 = vcmp.eq.f32.partialorder %v1389_v37, 8.507059e+37  ;;  %v1406_v37 = vand.u32 2147483648, %v7039_v5 }
 0x24a   : > { %1969 = vrot.lane.b32.xlu0 %v5412_v58, %s5858_s13  ;;  %2099 = vrot.lane.b32.xlu2 %v2025_v36, %s5858_s13  ;;  %v1392_v36 = vor.u32 1.1754944e-38, %v1391_v59  ;;  %v1011_v56 = vpop.f32.mrf.mxu1 }
 0x24b   : > { %5415 = vtanh.f32 %v9644_v60  ;;  %v7122_v58 = vpop.eup %5413 }
 0x24c   : > { %v895_v16 = vpop.f32.mrf.mxu0  ;;  %5417 = vpow2.f32 %v5168_v61  ;;  %v1942_v30 = vpop.permute.xlu1 %1941  ;;  %v7118_v42 = vsel %vm1390_vm6, %v1392_v36, %v1388_v62  ;;  %v9718_v61 = vmax.f32 %v6804_v15, 0.0  ;;  %v1403_v15 = vsel %vm1402_vm9, %v7072_v52, %v1399_v63 }
 0x24d   : > { %v896_v1 = vadd.f32 %v7008_v25, %v895_v16  ;;  %v2026_v8 = vmul.f32 %v1942_v30, %v7118_v42  ;;  %v1407_v36 = vor.u32 1.1754944e-38, %v1406_v37  ;;  %v1414_v63 = vadd.f32 %v7097_v49, %v1413_v17 }
 0x24e   : > { %v5169_v59 = vmul.f32 -1.442695, %v9718_v61  ;;  %v1421_v37 = vand.u32 2147483648, %v7066_v34  ;;  %vm1431_vm15 = vweird.f32 %v7122_v58 }
 0x24f   : > { %v7120_v50 = vadd.f32 %v1008_v40, %v896_v1  ;;  %v1404_v40 = vand.u32 2147483647, %v7039_v5  ;;  %v1426_v1 = vmul.f32 %v7122_v58, %v7091_v28  ;;  %v1944_v5 = vpop.permute.xlu2 %1943  ;;  %vm1432_vm1 = vmor %vm1430_vm0, %vm1431_vm15 }
 0x251   : > { %v5416_v4 = vpop.eup %5415  ;;  %v9643_v16 = vmax.f32 %v7120_v50, 0.0  ;;  %vm1405_vm10 = vcmp.eq.f32.partialorder %v1404_v40, 8.507059e+37  ;;  %v1427_v18 = vsub.f32 1.0, %v1426_v1  ;;  %v9719_v1 = vmax.f32 %v6836_v44, 0.0 }
 0x252   : > { %2101 = vrot.lane.b32.xlu0 %v2026_v8, %s5858_s13  ;;  %1971 = vrot.lane.b32.xlu1 %v5416_v4, %s5858_s13  ;;  %v5418_v43 = vpop.eup %5417  ;;  %v7144_v4 = vsel %vm1405_vm10, %v1407_v36, %v1403_v15  ;;  %v1418_v15 = vsel %vm1417_vm13, %v7097_v49, %v1414_v63 }
 0x253   : > { %5419 = vtanh.f32 %v9643_v16  ;;  %v7142_v8 = vadd.f32 1.0, %v5418_v43  ;;  %v2027_v52 = vmul.f32 %v1944_v5, %v7144_v4  ;;  %v1428_v17 = vmul.f32 %v7122_v58, %v1427_v18 }
 0x254   : > { %v898_v62 = vpop.f32.mrf.mxu0  ;;  %5421 = vpow2.f32 %v5169_v59  ;;  %v5170_v36 = vmul.f32 -1.442695, %v9719_v1  ;;  %v1422_v5 = vor.u32 1.1754944e-38, %v1421_v37  ;;  %v1436_v37 = vand.u32 2147483648, %v7091_v28 }
 0x255   : > { %v899_v30 = vadd.f32 %v7008_v25, %v898_v62  ;;  %v1014_v62 = vpop.f32.mrf.mxu1  ;;  %5423 = vrcp.f32 %v7142_v8  ;;  %v1429_v63 = vadd.f32 %v7122_v58, %v1428_v17  ;;  %vm1445_vm5 = vweird.f32 %v7142_v8 }
 0x257   : > { %v7146_v61 = vadd.f32 %v1011_v56, %v899_v30  ;;  %v1419_v56 = vand.u32 2147483647, %v7066_v34 }
 0x259   : > { %v5420_v16 = vpop.eup %5419  ;;  %v9645_v59 = vmax.f32 %v7146_v61, 0.0  ;;  %vm1420_vm14 = vcmp.eq.f32.partialorder %v1419_v56, 8.507059e+37  ;;  %v9720_v56 = vmax.f32 %v6866_v51, 0.0  ;;  %v1433_v51 = vsel %vm1432_vm1, %v7122_v58, %v1429_v63 }
 0x25a   : > { %1973 = vrot.lane.b32.xlu2 %v5420_v16, %s5858_s13  ;;  %2103 = vrot.lane.b32.xlu1 %v2027_v52, %s5858_s13  ;;  %v5422_v40 = vpop.eup %5421  ;;  %v7167_v34 = vsel %vm1420_vm14, %v1422_v5, %v1418_v15  ;;  %v5172_v58 = vmul.f32 -1.442695, %v9721_v32 }
 0x25b   : > { %5425 = vtanh.f32 %v9645_v59  ;;  %v7165_v52 = vadd.f32 1.0, %v5422_v40  ;;  %v7171_v59 = vpop.eup %5423  ;;  %v1434_v40 = vand.u32 2147483647, %v7091_v28 }
 0x25c   : > { %v901_v43 = vpop.f32.mrf.mxu0  ;;  %v1946_v30 = vpop.permute.xlu0 %1945  ;;  %5427 = vpow2.f32 %v5170_v36  ;;  %v1441_v15 = vmul.f32 %v7171_v59, %v7142_v8  ;;  %vm1446_vm4 = vweird.f32 %v7171_v59 }
 0x25d   : > { %v902_v16 = vadd.f32 %v7008_v25, %v901_v43  ;;  %v2028_v49 = vmul.f32 %v1946_v30, %v7167_v34  ;;  %5429 = vrcp.f32 %v7165_v52  ;;  %v1017_v43 = vpop.f32.mrf.mxu1  ;;  %vm1435_vm2 = vcmp.eq.f32.partialorder %v1434_v40, 8.507059e+37  ;;  %vm1447_vm6 = vmor %vm1445_vm5, %vm1446_vm4 }
 0x25e   : > { %vm1460_vm9 = vweird.f32 %v7165_v52 }
 0x25f   : > { %v7169_v60 = vadd.f32 %v1014_v62, %v902_v16  ;;  %v5171_v62 = vmul.f32 -1.442695, %v9720_v56  ;;  %v1437_v16 = vor.u32 1.1754944e-38, %v1436_v37 }
 0x261   : > { %v5426_v44 = vpop.eup %5425  ;;  %v9646_v18 = vmax.f32 %v7169_v60, 0.0  ;;  %v7191_v30 = vsel %vm1435_vm2, %v1437_v16, %v1433_v51 }
 0x262   : > { %1975 = vrot.lane.b32.xlu0 %v5426_v44, %s5858_s13  ;;  %2105 = vrot.lane.b32.xlu2 %v2028_v49, %s5858_s13  ;;  %v5428_v5 = vpop.eup %5427  ;;  %v1442_v44 = vsub.f32 1.0, %v1441_v15 }
 0x263   : > { %5431 = vtanh.f32 %v9646_v18  ;;  %v7195_v49 = vpop.eup %5429  ;;  %v7203_v37 = vadd.f32 1.0, %v5428_v5 }
 0x264   : > { %v904_v17 = vpop.f32.mrf.mxu0  ;;  %v1948_v1 = vpop.permute.xlu1 %1947  ;;  %5433 = vpow2.f32 %v5171_v62  ;;  %v1443_v40 = vmul.f32 %v7171_v59, %v1442_v44  ;;  %v1456_v32 = vmul.f32 %v7195_v49, %v7165_v52  ;;  %vm1461_vm8 = vweird.f32 %v7195_v49 }
 0x265   : > { %v905_v36 = vadd.f32 %v7008_v25, %v904_v17  ;;  %v2029_v56 = vmul.f32 %v1948_v1, %v7191_v30  ;;  %v1950_v17 = vpop.permute.xlu2 %1949  ;;  %vm1462_vm10 = vmor %vm1460_vm9, %vm1461_vm8  ;;  %vm1475_vm14 = vweird.f32 %v7203_v37 }
 0x266   : > { %v1444_v16 = vadd.f32 %v7171_v59, %v1443_v40  ;;  %v1457_v46 = vsub.f32 1.0, %v1456_v32 }
 0x267   : > { %v7193_v28 = vadd.f32 %v1017_v43, %v905_v36 }
 0x269   : > { %v5432_v18 = vpop.eup %5431  ;;  %v9647_v63 = vmax.f32 %v7193_v28, 0.0 }
 0x26a   : > { %2107 = vrot.lane.b32.xlu0 %v2029_v56, %s5858_s13  ;;  %1977 = vrot.lane.b32.xlu1 %v5432_v18, %s5858_s13  ;;  %v5434_v62 = vpop.eup %5433  ;;  %v1020_v18 = vpop.f32.mrf.mxu1  ;;  %v1451_v56 = vand.u32 2147483648, %v7142_v8 }
 0x26b   : > { %5435 = vtanh.f32 %v9647_v63  ;;  %v7214_v36 = vadd.f32 1.0, %v5434_v62  ;;  %v1448_v62 = vsel %vm1447_vm6, %v7171_v59, %v1444_v16 }
 0x26c   : > { %v907_v43 = vpop.f32.mrf.mxu0  ;;  %5437 = vpow2.f32 %v5172_v58  ;;  %v2080_v51 = vpop.permute.xlu1 %2079 }
 0x26d   : > { %v908_v15 = vadd.f32 %v7008_v25, %v907_v43  ;;  %v2175_v1 = vadd.f32 %v2080_v51, %v1855_v41  ;;  %5439 = vrcp.f32 %v7203_v37  ;;  %v1449_v25 = vand.u32 2147483647, %v7142_v8  ;;  %v2082_v40 = vpop.permute.xlu2 %2081 }
 0x26e   : > { %v1458_v41 = vmul.f32 %v7195_v49, %v1457_v46  ;;  %v9722_v8 = vmax.f32 %v6926_v47, 0.0  ;;  %vm1490_vm0 = vweird.f32 %v7214_v36 }
 0x26f   : > { %5441 = vtanh.f32 %v2175_v1  ;;  %v7218_v5 = vadd.f32 %v1020_v18, %v908_v15  ;;  %v1452_v18 = vor.u32 1.1754944e-38, %v1451_v56  ;;  %vm1450_vm7 = vcmp.eq.f32.partialorder %v1449_v25, 8.507059e+37 }
 0x270   : > { %5443 = vrcp.f32 %v7214_v36  ;;  %v5173_v51 = vmul.f32 -1.442695, %v9722_v8  ;;  %v1459_v47 = vadd.f32 %v7195_v49, %v1458_v41 }
 0x271   : > { %v5436_v44 = vpop.eup %5435  ;;  %v9648_v43 = vmax.f32 %v7218_v5, 0.0  ;;  %v7239_v59 = vsel %vm1450_vm7, %v1452_v18, %v1448_v62 }
 0x272   : > { %1979 = vrot.lane.b32.xlu2 %v5436_v44, %s5858_s13  ;;  %2591 = vrot.lane.b32.xlu1 %v2175_v1, %s5860_s28  ;;  %v5438_v58 = vpop.eup %5437  ;;  %v1856_v1 = vmul.f32 %v6449_v55, %v6833_v14  ;;  %v2030_v46 = vmul.f32 %v1950_v17, %v7239_v59  ;;  %v1466_v55 = vand.u32 2147483648, %v7165_v52  ;;  %v1464_v17 = vand.u32 2147483647, %v7165_v52 }
 0x273   : > { %v7229_v15 = vpop.eup %5439  ;;  %v7235_v63 = vadd.f32 1.0, %v5438_v58  ;;  %5445 = vtanh.f32 %v9648_v43  ;;  %v9723_v58 = vmax.f32 %v6956_v10, 0.0  ;;  %v1463_v8 = vsel %vm1462_vm10, %v7195_v49, %v1459_v47 }
 0x274   : > { %v1952_v32 = vpop.permute.xlu0 %1951  ;;  %v2176_v16 = vadd.f32 %v2082_v40, %v1856_v1  ;;  %5447 = vpow2.f32 %v5173_v51  ;;  %v1471_v25 = vmul.f32 %v7229_v15, %v7203_v37  ;;  %v1467_v10 = vor.u32 1.1754944e-38, %v1466_v55 }
 0x275   : > { %v5442_v44 = vpop.eup %5441  ;;  %5449 = vrcp.f32 %v7235_v63  ;;  %v5174_v62 = vmul.f32 -1.442695, %v9723_v58  ;;  %v1857_v1 = vmul.f32 %v6439_v48, %v6863_v33  ;;  %vm1465_vm11 = vcmp.eq.f32.partialorder %v1464_v17, 8.507059e+37 }
 0x276   : > { %2271 = vrot.lane.b32.xlu0 %v5442_v44, %s5858_s13  ;;  %v7245_v56 = vpop.eup %5443  ;;  %5451 = vtanh.f32 %v2176_v16  ;;  %v1472_v44 = vsub.f32 1.0, %v1471_v25  ;;  %v7262_v58 = vsel %vm1465_vm11, %v1467_v10, %v1463_v8  ;;  %v9724_v55 = vmax.f32 %v6983_v22, 0.0  ;;  %v1956_v25 = vpop.permute.xlu2 %1955 }
 0x277   : > { %v1486_v41 = vmul.f32 %v7245_v56, %v7214_v36  ;;  %5453 = vpow2.f32 %v5174_v62  ;;  %v2031_v49 = vmul.f32 %v1952_v32, %v7262_v58  ;;  %vm1476_vm12 = vweird.f32 %v7229_v15 }
 0x278   : > { %v5175_v14 = vmul.f32 -1.442695, %v9724_v55  ;;  %v1473_v48 = vmul.f32 %v7229_v15, %v1472_v44  ;;  %v1481_v8 = vand.u32 2147483648, %v7203_v37  ;;  %vm1491_vm13 = vweird.f32 %v7245_v56  ;;  %vm7291_vm15 = vmor %vm1475_vm14, %vm1476_vm12 }
 0x279   : > { %v5446_v40 = vpop.eup %5445  ;;  %v1487_v43 = vsub.f32 1.0, %v1486_v41  ;;  %vm1492_vm1 = vmor %vm1490_vm0, %vm1491_vm13  ;;  %vm1505_vm6 = vweird.f32 %v7235_v63 }
 0x27a   : > { %2593 = vrot.lane.b32.xlu2 %v2176_v16, %s5860_s28  ;;  %2109 = vrot.lane.b32.xlu1 %v2030_v46, %s5858_s13  ;;  %v5448_v52 = vpop.eup %5447  ;;  %v1474_v22 = vadd.f32 %v7229_v15, %v1473_v48 }
 0x27b   : > { %v7265_v46 = vpop.eup %5449  ;;  %v7273_v17 = vadd.f32 1.0, %v5448_v52 }
 0x27c   : > { %v2084_v51 = vpop.permute.xlu0 %2083  ;;  %v1954_v18 = vpop.permute.xlu1 %1953  ;;  %v1501_v32 = vmul.f32 %v7265_v46, %v7235_v63  ;;  %vm1506_vm5 = vweird.f32 %v7265_v46 }
 0x27d   : > { %v2177_v16 = vadd.f32 %v2084_v51, %v1857_v1  ;;  %v5452_v47 = vpop.eup %5451  ;;  %v1858_v51 = vmul.f32 %v6451_v57, %v6895_v26  ;;  %vm1507_vm7 = vmor %vm1505_vm6, %vm1506_vm5  ;;  %vm1520_vm11 = vweird.f32 %v7273_v17 }
 0x27e   : > { %1981 = vrot.lane.b32.xlu0 %v5446_v40, %s5858_s13  ;;  %v5454_v62 = vpop.eup %5453  ;;  %v1488_v40 = vmul.f32 %v7245_v56, %v1487_v43  ;;  %v1479_v43 = vand.u32 2147483647, %v7203_v37  ;;  %v1502_v57 = vsub.f32 1.0, %v1501_v32  ;;  %v1494_v37 = vand.u32 2147483647, %v7214_v36 }
 0x27f   : > { %5455 = vtanh.f32 %v2177_v16  ;;  %v7283_v10 = vadd.f32 1.0, %v5454_v62  ;;  %v2088_v62 = vpop.permute.xlu2 %2087  ;;  %v9727_v32 = vmax.f32 %v7016_v27, 0.0 }
 0x280   : > { %5457 = vpow2.f32 %v5175_v14  ;;  %v1489_v14 = vadd.f32 %v7245_v56, %v1488_v40  ;;  %vm1480_vm2 = vcmp.eq.f32.partialorder %v1479_v43, 8.507059e+37  ;;  %v1503_v40 = vmul.f32 %v7265_v46, %v1502_v57 }
 0x281   : > { %5459 = vrcp.f32 %v7273_v17  ;;  %vm1495_vm4 = vcmp.eq.f32.partialorder %v1494_v37, 8.507059e+37  ;;  %vm1535_vm13 = vweird.f32 %v7283_v10 }
 0x282   : > { %2111 = vrot.lane.b32.xlu2 %v2031_v49, %s5858_s13  ;;  %2273 = vrot.lane.b32.xlu1 %v5452_v47, %s5858_s13  ;;  %v1496_v49 = vand.u32 2147483648, %v7214_v36  ;;  %v1478_v47 = vsel %vm7291_vm15, %v7229_v15, %v1474_v22  ;;  %5461 = vrcp.f32 %v7283_v10  ;;  %v1493_v48 = vsel %vm1492_vm1, %v7245_v56, %v1489_v14 }
 0x283   : > { %v5176_v22 = vmul.f32 -1.442695, %v9727_v32  ;;  %v1504_v27 = vadd.f32 %v7265_v46, %v1503_v40 }
 0x284   : > { %v2086_v41 = vpop.permute.xlu1 %2085 }
 0x285   : > { %v2178_v44 = vadd.f32 %v2086_v41, %v1858_v51  ;;  %v5456_v52 = vpop.eup %5455  ;;  %v1497_v41 = vor.u32 1.1754944e-38, %v1496_v49  ;;  %v9728_v49 = vmax.f32 %v7043_v53, 0.0  ;;  %v1508_v37 = vsel %vm1507_vm7, %v7265_v46, %v1504_v27 }
 0x286   : > { %2595 = vrot.lane.b32.xlu0 %v2177_v16, %s5860_s28  ;;  %v1482_v16 = vor.u32 1.1754944e-38, %v1481_v8  ;;  %v5458_v55 = vpop.eup %5457  ;;  %v1859_v8 = vmul.f32 %v6410_v24, %v6923_v23 }
 0x287   : > { %v7315_v1 = vpop.eup %5459  ;;  %v7317_v43 = vadd.f32 1.0, %v5458_v55  ;;  %v7319_v56 = vsel %vm1495_vm4, %v1497_v41, %v1493_v48  ;;  %5463 = vtanh.f32 %v2178_v44  ;;  %v7340_v48 = vpop.permute.xlu2 %1961 }
 0x288   : > { %v7307_v15 = vsel %vm1480_vm2, %v1482_v16, %v1478_v47  ;;  %v2179_v14 = vadd.f32 %v2088_v62, %v1859_v8  ;;  %v2033_v57 = vmul.f32 %v1956_v25, %v7319_v56  ;;  %v7325_v24 = vpop.eup %5461  ;;  %5465 = vpow2.f32 %v5176_v22 }
 0x289   : > { %v2032_v51 = vmul.f32 %v1954_v18, %v7307_v15  ;;  %v1511_v18 = vand.u32 2147483648, %v7235_v63  ;;  %5467 = vrcp.f32 %v7317_v43  ;;  %v5177_v47 = vmul.f32 -1.442695, %v9728_v49 }
 0x28a   : > { %2275 = vrot.lane.b32.xlu2 %v5456_v52, %s5858_s13  ;;  %2597 = vrot.lane.b32.xlu1 %v2178_v44, %s5860_s28  ;;  %v1516_v52 = vmul.f32 %v7315_v1, %v7273_v17  ;;  %v1509_v25 = vand.u32 2147483647, %v7235_v63  ;;  %5469 = vtanh.f32 %v2179_v14  ;;  %v1531_v44 = vmul.f32 %v7325_v24, %v7283_v10 }
 0x28b   : > { %v1512_v53 = vor.u32 1.1754944e-38, %v1511_v18  ;;  %v1860_v62 = vmul.f32 %v6418_v31, %v6953_v20  ;;  %5471 = vpow2.f32 %v5177_v47  ;;  %vm1521_vm9 = vweird.f32 %v7315_v1 }
 0x28c   : > { %v1958_v36 = vpop.permute.xlu0 %1957  ;;  %v1517_v63 = vsub.f32 1.0, %v1516_v52  ;;  %vm1510_vm8 = vcmp.eq.f32.partialorder %v1509_v25, 8.507059e+37  ;;  %v1532_v46 = vsub.f32 1.0, %v1531_v44  ;;  %v1526_v25 = vand.u32 2147483648, %v7273_v17  ;;  %vm7373_vm12 = vmor %vm1520_vm11, %vm1521_vm9 }
 0x28d   : > { %v5464_v40 = vpop.eup %5463  ;;  %v7344_v22 = vsel %vm1510_vm8, %v1512_v53, %v1508_v37  ;;  %v1861_v44 = vmul.f32 %v6461_v0, %v6981_v13  ;;  %vm1536_vm10 = vweird.f32 %v7325_v24  ;;  %v1524_v53 = vand.u32 2147483647, %v7273_v17 }
 0x28e   : > { %2113 = vrot.lane.b32.xlu0 %v2032_v51, %s5858_s13  ;;  %v5466_v32 = vpop.eup %5465  ;;  %v2034_v51 = vmul.f32 %v1958_v36, %v7344_v22  ;;  %v1518_v31 = vmul.f32 %v7315_v1, %v1517_v63  ;;  %v1533_v49 = vmul.f32 %v7325_v24, %v1532_v46  ;;  %v1541_v46 = vand.u32 2147483648, %v7283_v10  ;;  %vm1537_vm14 = vmor %vm1535_vm13, %vm1536_vm10 }
 0x28f   : > { %v7347_v8 = vpop.eup %5467  ;;  %v7355_v52 = vadd.f32 1.0, %v5466_v32  ;;  %v1539_v17 = vand.u32 2147483647, %v7283_v10  ;;  %vm1525_vm15 = vcmp.eq.f32.partialorder %v1524_v53, 8.507059e+37  ;;  %v9732_v10 = vmax.f32 %v7095_v6, 0.0 }
 0x290   : > { %v1546_v47 = vmul.f32 %v7347_v8, %v7317_v43  ;;  %v1519_v36 = vadd.f32 %v7315_v1, %v1518_v31  ;;  %vm1551_vm1 = vweird.f32 %v7347_v8  ;;  %v9733_v63 = vmax.f32 %v7120_v50, 0.0 }
 0x291   : > { %vm1540_vm0 = vcmp.eq.f32.partialorder %v1539_v17, 8.507059e+37  ;;  %vm1550_vm2 = vweird.f32 %v7317_v43  ;;  %v1863_v50 = vmul.f32 %v6426_v38, %v7041_v3  ;;  %vm1565_vm8 = vweird.f32 %v7355_v52 }
 0x292   : > { %2599 = vrot.lane.b32.xlu2 %v2179_v14, %s5860_s28  ;;  %2115 = vrot.lane.b32.xlu1 %v2033_v57, %s5858_s13  ;;  %v5470_v14 = vpop.eup %5469  ;;  %v9729_v57 = vmax.f32 %v7070_v39, 0.0  ;;  %vm1552_vm4 = vmor %vm1550_vm2, %vm1551_vm1 }
 0x293   : > { %v5472_v18 = vpop.eup %5471 }
 0x294   : > { %v2090_v16 = vpop.permute.xlu0 %2089  ;;  %v1960_v55 = vpop.permute.xlu1 %1959  ;;  %v5178_v27 = vmul.f32 -1.442695, %v9729_v57  ;;  %v7365_v37 = vadd.f32 1.0, %v5472_v18  ;;  %v5179_v18 = vmul.f32 -1.442695, %v9732_v10 }
 0x295   : > { %v2180_v41 = vadd.f32 %v2090_v16, %v1860_v62  ;;  %v2094_v16 = vpop.permute.xlu2 %2093  ;;  %v1534_v62 = vadd.f32 %v7325_v24, %v1533_v49  ;;  %v1542_v49 = vor.u32 1.1754944e-38, %v1541_v46 }
 0x296   : > { %2277 = vrot.lane.b32.xlu0 %v5464_v40, %s5858_s13  ;;  %v1547_v40 = vsub.f32 1.0, %v1546_v47  ;;  %v1862_v47 = vmul.f32 %v6463_v2, %v7013_v29  ;;  %vm1580_vm10 = vweird.f32 %v7365_v37 }
 0x297   : > { %5473 = vtanh.f32 %v2180_v41  ;;  %v1538_v57 = vsel %vm1537_vm14, %v7325_v24, %v1534_v62  ;;  %v1556_v62 = vand.u32 2147483648, %v7317_v43 }
 0x298   : > { %5475 = vpow2.f32 %v5178_v27  ;;  %v7401_v24 = vsel %vm1540_vm0, %v1542_v49, %v1538_v57 }
 0x299   : > { %5477 = vrcp.f32 %v7355_v52  ;;  %v2036_v6 = vmul.f32 %v7340_v48, %v7401_v24  ;;  %v1554_v48 = vand.u32 2147483647, %v7317_v43  ;;  %v1557_v17 = vor.u32 1.1754944e-38, %v1556_v62 }
 0x29a   : > { %2117 = vrot.lane.b32.xlu2 %v2034_v51, %s5858_s13  ;;  %2279 = vrot.lane.b32.xlu1 %v5470_v14, %s5858_s13  ;;  %v1523_v51 = vsel %vm7373_vm12, %v7315_v1, %v1519_v36  ;;  %5479 = vrcp.f32 %v7365_v37  ;;  %v1548_v1 = vmul.f32 %v7347_v8, %v1547_v40  ;;  %v5180_v40 = vmul.f32 -1.442695, %v9733_v63 }
 0x29b   : > { %vm1555_vm5 = vcmp.eq.f32.partialorder %v1554_v48, 8.507059e+37  ;;  %v1571_v63 = vand.u32 2147483648, %v7355_v52 }
 0x29c   : > { %v2092_v39 = vpop.permute.xlu1 %2091  ;;  %v1549_v2 = vadd.f32 %v7347_v8, %v1548_v1 }
 0x29d   : > { %v2181_v0 = vadd.f32 %v2092_v39, %v1861_v44  ;;  %v5474_v32 = vpop.eup %5473  ;;  %v2182_v44 = vadd.f32 %v2094_v16, %v1862_v47  ;;  %v7403_v53 = vpop.permute.xlu2 %1967  ;;  %v9734_v47 = vmax.f32 %v7146_v61, 0.0 }
 0x29e   : > { %2601 = vrot.lane.b32.xlu0 %v2180_v41, %s5860_s28  ;;  %v1527_v41 = vor.u32 1.1754944e-38, %v1526_v25  ;;  %v5476_v14 = vpop.eup %5475 }
 0x29f   : > { %v7397_v39 = vpop.eup %5477  ;;  %v7399_v25 = vadd.f32 1.0, %v5476_v14  ;;  %5481 = vtanh.f32 %v2181_v0 }
 0x2a0   : > { %v7389_v27 = vsel %vm1525_vm15, %v1527_v41, %v1523_v51  ;;  %5483 = vpow2.f32 %v5179_v18  ;;  %v1561_v16 = vmul.f32 %v7397_v39, %v7355_v52  ;;  %vm1566_vm6 = vweird.f32 %v7397_v39 }
 0x2a1   : > { %v2035_v36 = vmul.f32 %v1960_v55, %v7389_v27  ;;  %v7410_v55 = vpop.eup %5479  ;;  %5485 = vrcp.f32 %v7399_v25  ;;  %vm7456_vm9 = vmor %vm1565_vm8, %vm1566_vm6  ;;  %vm1595_vm15 = vweird.f32 %v7399_v25 }
 0x2a2   : > { %2281 = vrot.lane.b32.xlu2 %v5474_v32, %s5858_s13  ;;  %2603 = vrot.lane.b32.xlu1 %v2181_v0, %s5860_s28  ;;  %5487 = vtanh.f32 %v2182_v44  ;;  %v1576_v0 = vmul.f32 %v7410_v55, %v7365_v37  ;;  %v1553_v32 = vsel %vm1552_vm4, %v7347_v8, %v1549_v2  ;;  %v1562_v41 = vsub.f32 1.0, %v1561_v16 }
 0x2a3   : > { %5489 = vpow2.f32 %v5180_v40  ;;  %v7427_v57 = vsel %vm1555_vm5, %v1557_v17, %v1553_v32  ;;  %v1864_v40 = vmul.f32 %v6473_v9, %v7068_v12  ;;  %vm1581_vm7 = vweird.f32 %v7410_v55 }
 0x2a4   : > { %v1964_v31 = vpop.permute.xlu0 %1963  ;;  %v1577_v18 = vsub.f32 1.0, %v1576_v0  ;;  %v1569_v0 = vand.u32 2147483647, %v7355_v52  ;;  %vm1582_vm11 = vmor %vm1580_vm10, %vm1581_vm7 }
 0x2a5   : > { %v5482_v14 = vpop.eup %5481  ;;  %v2037_v8 = vmul.f32 %v1964_v31, %v7427_v57  ;;  %v2100_v38 = vpop.permute.xlu2 %2099 }
 0x2a6   : > { %2119 = vrot.lane.b32.xlu0 %v2035_v36, %s5858_s13  ;;  %v5484_v43 = vpop.eup %5483  ;;  %v5181_v36 = vmul.f32 -1.442695, %v9734_v47  ;;  %v1578_v62 = vmul.f32 %v7410_v55, %v1577_v18  ;;  %vm1570_vm12 = vcmp.eq.f32.partialorder %v1569_v0, 8.507059e+37 }
 0x2a7   : > { %v7430_v10 = vpop.eup %5485  ;;  %v7438_v2 = vadd.f32 1.0, %v5484_v43  ;;  %v1584_v43 = vand.u32 2147483647, %v7365_v37 }
 0x2a8   : > { %v5488_v49 = vpop.eup %5487  ;;  %v1591_v31 = vmul.f32 %v7430_v10, %v7399_v25  ;;  %v1579_v32 = vadd.f32 %v7410_v55, %v1578_v62  ;;  %vm1596_vm14 = vweird.f32 %v7430_v10 }
 0x2a9   : > { %vm1585_vm13 = vcmp.eq.f32.partialorder %v1584_v43, 8.507059e+37  ;;  %vm1597_vm0 = vmor %vm1595_vm15, %vm1596_vm14  ;;  %vm1610_vm5 = vweird.f32 %v7438_v2 }
 0x2aa   : > { %2605 = vrot.lane.b32.xlu2 %v2182_v44, %s5860_s28  ;;  %2121 = vrot.lane.b32.xlu1 %v2036_v6, %s5858_s13  ;;  %v1563_v44 = vmul.f32 %v7397_v39, %v1562_v41  ;;  %v5490_v6 = vpop.eup %5489  ;;  %v1592_v9 = vsub.f32 1.0, %v1591_v31  ;;  %v1586_v41 = vand.u32 2147483648, %v7365_v37  ;;  %v9737_v37 = vmax.f32 %v7169_v60, 0.0 }
 0x2ab   : > { %v7448_v48 = vadd.f32 1.0, %v5490_v6  ;;  %v1865_v6 = vmul.f32 %v6475_v11, %v7093_v7 }
 0x2ac   : > { %v2096_v46 = vpop.permute.xlu0 %2095  ;;  %v1966_v51 = vpop.permute.xlu1 %1965  ;;  %v1564_v61 = vadd.f32 %v7397_v39, %v1563_v44  ;;  %v1587_v44 = vor.u32 1.1754944e-38, %v1586_v41 }
 0x2ad   : > { %v2183_v1 = vadd.f32 %v2096_v46, %v1863_v50  ;;  %vm1625_vm7 = vweird.f32 %v7448_v48 }
 0x2ae   : > { %2283 = vrot.lane.b32.xlu0 %v5482_v14, %s5858_s13  ;;  %v1568_v14 = vsel %vm7456_vm9, %v7397_v39, %v1564_v61  ;;  %v1583_v39 = vsel %vm1582_vm11, %v7410_v55, %v1579_v32 }
 0x2af   : > { %5491 = vtanh.f32 %v2183_v1  ;;  %v7486_v55 = vsel %vm1585_vm13, %v1587_v44, %v1583_v39  ;;  %v9738_v39 = vmax.f32 %v7193_v28, 0.0 }
 0x2b0   : > { %5493 = vpow2.f32 %v5181_v36  ;;  %v5182_v36 = vmul.f32 -1.442695, %v9737_v37  ;;  %v2039_v60 = vmul.f32 %v7403_v53, %v7486_v55 }
 0x2b1   : > { %5495 = vrcp.f32 %v7438_v2 }
 0x2b2   : > { %2123 = vrot.lane.b32.xlu2 %v2037_v8, %s5858_s13  ;;  %2285 = vrot.lane.b32.xlu1 %v5488_v49, %s5858_s13  ;;  %5497 = vrcp.f32 %v7448_v48  ;;  %v1593_v49 = vmul.f32 %v7430_v10, %v1592_v9 }
 0x2b4   : > { %v2098_v16 = vpop.permute.xlu1 %2097  ;;  %v7464_v52 = vpop.permute.xlu2 %1973 }
 0x2b5   : > { %v2184_v17 = vadd.f32 %v2098_v16, %v1864_v40  ;;  %v5492_v50 = vpop.eup %5491  ;;  %v2185_v16 = vadd.f32 %v2100_v38, %v1865_v6  ;;  %v1599_v38 = vand.u32 2147483647, %v7399_v25 }
 0x2b6   : > { %2607 = vrot.lane.b32.xlu0 %v2183_v1, %s5860_s28  ;;  %v1572_v1 = vor.u32 1.1754944e-38, %v1571_v63  ;;  %v5494_v18 = vpop.eup %5493  ;;  %v1594_v63 = vadd.f32 %v7430_v10, %v1593_v49 }
 0x2b7   : > { %v7482_v31 = vpop.eup %5495  ;;  %v7484_v61 = vadd.f32 1.0, %v5494_v18  ;;  %5499 = vtanh.f32 %v2184_v17  ;;  %vm1600_vm1 = vcmp.eq.f32.partialorder %v1599_v38, 8.507059e+37  ;;  %v1869_v38 = vmul.f32 %v6446_v54, %v7191_v30 }
 0x2b8   : > { %v7474_v8 = vsel %vm1570_vm12, %v1572_v1, %v1568_v14  ;;  %v7493_v11 = vpop.eup %5497  ;;  %5501 = vpow2.f32 %v5182_v36  ;;  %v1606_v40 = vmul.f32 %v7482_v31, %v7438_v2  ;;  %v1598_v32 = vsel %vm1597_vm0, %v7430_v10, %v1594_v63 }
 0x2b9   : > { %v2038_v62 = vmul.f32 %v1966_v51, %v7474_v8  ;;  %v1601_v51 = vand.u32 2147483648, %v7399_v25  ;;  %5503 = vrcp.f32 %v7484_v61  ;;  %v1621_v0 = vmul.f32 %v7493_v11, %v7448_v48 }
 0x2ba   : > { %2287 = vrot.lane.b32.xlu2 %v5492_v50, %s5858_s13  ;;  %2609 = vrot.lane.b32.xlu1 %v2184_v17, %s5860_s28  ;;  %5505 = vtanh.f32 %v2185_v16  ;;  %v1866_v50 = vmul.f32 %v6434_v45, %v7118_v42  ;;  %v1607_v25 = vsub.f32 1.0, %v1606_v40  ;;  %v5183_v10 = vmul.f32 -1.442695, %v9738_v39 }
 0x2bb   : > { %v1602_v9 = vor.u32 1.1754944e-38, %v1601_v51  ;;  %v1622_v49 = vsub.f32 1.0, %v1621_v0  ;;  %vm1611_vm2 = vweird.f32 %v7482_v31  ;;  %v1867_v63 = vmul.f32 %v6485_v19, %v7144_v4 }
 0x2bc   : > { %v1970_v47 = vpop.permute.xlu0 %1969  ;;  %v7503_v53 = vpop.permute.xlu2 %2105  ;;  %v1608_v45 = vmul.f32 %v7482_v31, %v1607_v25  ;;  %vm1626_vm4 = vweird.f32 %v7493_v11  ;;  %v1614_v51 = vand.u32 2147483647, %v7438_v2  ;;  %vm7539_vm6 = vmor %vm1610_vm5, %vm1611_vm2  ;;  %v9741_v19 = vmax.f32 %v7218_v5, 0.0 }
 0x2bd   : > { %v5500_v41 = vpop.eup %5499  ;;  %v7510_v43 = vsel %vm1600_vm1, %v1602_v9, %v1598_v32  ;;  %v1623_v6 = vmul.f32 %v7493_v11, %v1622_v49  ;;  %vm7555_vm8 = vmor %vm1625_vm7, %vm1626_vm4  ;;  %vm1640_vm12 = vweird.f32 %v7484_v61 }
 0x2be   : > { %2125 = vrot.lane.b32.xlu0 %v2038_v62, %s5858_s13  ;;  %v5502_v14 = vpop.eup %5501  ;;  %v2040_v37 = vmul.f32 %v1970_v47, %v7510_v43  ;;  %v1609_v47 = vadd.f32 %v7482_v31, %v1608_v45  ;;  %v5184_v9 = vmul.f32 -1.442695, %v9741_v19  ;;  %vm1615_vm9 = vcmp.eq.f32.partialorder %v1614_v51, 8.507059e+37 }
 0x2bf   : > { %v7513_v18 = vpop.eup %5503  ;;  %v7521_v44 = vadd.f32 1.0, %v5502_v14  ;;  %v1624_v40 = vadd.f32 %v7493_v11, %v1623_v6 }
 0x2c0   : > { %v5506_v36 = vpop.eup %5505  ;;  %v1636_v28 = vmul.f32 %v7513_v18, %v7484_v61  ;;  %vm1641_vm11 = vweird.f32 %v7513_v18 }
 0x2c1   : > { %vm1642_vm13 = vmor %vm1640_vm12, %vm1641_vm11  ;;  %vm1655_vm0 = vweird.f32 %v7521_v44  ;;  %vm2837_vm12 = vcmask 130048  }
 0x2c2   : > { %2611 = vrot.lane.b32.xlu2 %v2185_v16, %s5860_s28  ;;  %2127 = vrot.lane.b32.xlu1 %v2039_v60, %s5858_s13  ;;  %v1616_v60 = vand.u32 2147483648, %v7438_v2  ;;  %v1637_v32 = vsub.f32 1.0, %v1636_v28  ;;  %v1613_v2 = vsel %vm7539_vm6, %v7482_v31, %v1609_v47  ;;  %v1628_v31 = vsel %vm7555_vm8, %v7493_v11, %v1624_v40 }
 0x2c4   : > { %v2102_v46 = vpop.permute.xlu0 %2101  ;;  %v1972_v17 = vpop.permute.xlu1 %1971  ;;  %v1617_v14 = vor.u32 1.1754944e-38, %v1616_v60  ;;  %v1638_v39 = vmul.f32 %v7513_v18, %v1637_v32 }
 0x2c5   : > { %v2186_v1 = vadd.f32 %v2102_v46, %v1866_v50  ;;  %v1631_v50 = vand.u32 2147483648, %v7448_v48 }
 0x2c6   : > { %2289 = vrot.lane.b32.xlu0 %v5500_v41, %s5858_s13  ;;  %v1629_v41 = vand.u32 2147483647, %v7448_v48  ;;  %v7564_v48 = vsel %vm1615_vm9, %v1617_v14, %v1613_v2  ;;  %v1639_v47 = vadd.f32 %v7513_v18, %v1638_v39  ;;  %v1659_v39 = vand.u32 2147483647, %v7521_v44 }
 0x2c7   : > { %5507 = vtanh.f32 %v2186_v1  ;;  %v2041_v45 = vmul.f32 %v1972_v17, %v7564_v48  ;;  %v1646_v17 = vand.u32 2147483648, %v7484_v61 }
 0x2c8   : > { %5509 = vpow2.f32 %v5183_v10  ;;  %vm1630_vm10 = vcmp.eq.f32.partialorder %v1629_v41, 8.507059e+37  ;;  %v1643_v60 = vsel %vm1642_vm13, %v7513_v18, %v1639_v47  ;;  %vm1660_vm2 = vcmp.eq.f32.partialorder %v1659_v39, 8.507059e+37 }
 0x2c9   : > { %5511 = vrcp.f32 %v7521_v44  ;;  %v1647_v40 = vor.u32 1.1754944e-38, %v1646_v17 }
 0x2ca   : > { %2129 = vrot.lane.b32.xlu2 %v2040_v37, %s5858_s13  ;;  %2291 = vrot.lane.b32.xlu1 %v5506_v36, %s5858_s13  ;;  %5513 = vpow2.f32 %v5184_v9  ;;  %v1632_v36 = vor.u32 1.1754944e-38, %v1631_v50 }
 0x2cc   : > { %v7524_v62 = vpop.permute.xlu2 %1979  ;;  %v2104_v16 = vpop.permute.xlu1 %2103  ;;  %v7571_v11 = vsel %vm1630_vm10, %v1632_v36, %v1628_v31 }
 0x2cd   : > { %v2187_v0 = vadd.f32 %v2104_v16, %v1867_v63  ;;  %v5508_v46 = vpop.eup %5507  ;;  %v2042_v28 = vmul.f32 %v7464_v52, %v7571_v11 }
 0x2ce   : > { %2613 = vrot.lane.b32.xlu0 %v2186_v1, %s5860_s28  ;;  %v5510_v25 = vpop.eup %5509  ;;  %v1868_v1 = vmul.f32 %v6487_v21, %v7167_v34 }
 0x2cf   : > { %v7567_v37 = vadd.f32 1.0, %v5510_v25  ;;  %v5512_v6 = vpop.eup %5511  ;;  %5515 = vtanh.f32 %v2187_v0 }
 0x2d0   : > { %v2188_v21 = vadd.f32 %v7503_v53, %v1868_v1  ;;  %v1651_v16 = vmul.f32 %v5512_v6, %v7521_v44  ;;  %v1644_v53 = vand.u32 2147483647, %v7484_v61  ;;  %v5514_v52 = vpop.eup %5513  ;;  %vm1656_vm15 = vweird.f32 %v5512_v6 }
 0x2d1   : > { %5517 = vrcp.f32 %v7567_v37  ;;  %v7591_v61 = vadd.f32 1.0, %v5514_v52  ;;  %v1661_v1 = vand.u32 2147483648, %v7521_v44  ;;  %vm1657_vm1 = vmor %vm1655_vm0, %vm1656_vm15  ;;  %vm1670_vm4 = vweird.f32 %v7567_v37 }
 0x2d2   : > { %2293 = vrot.lane.b32.xlu2 %v5508_v46, %s5858_s13  ;;  %2615 = vrot.lane.b32.xlu1 %v2187_v0, %s5860_s28  ;;  %5519 = vtanh.f32 %v2188_v21  ;;  %v1652_v0 = vsub.f32 1.0, %v1651_v16  ;;  %vm1645_vm14 = vcmp.eq.f32.partialorder %v1644_v53, 8.507059e+37  ;;  %v9744_v16 = vld [vmem:[#allocation10_spill] sm:$0xff] }
 0x2d3   : > { %v7593_v9 = vsel %vm1645_vm14, %v1647_v40, %v1643_v60  ;;  %5521 = vrcp.f32 %v7591_v61  ;;  %v1870_v53 = vmul.f32 %v9744_v16, %v7239_v59  ;;  %v1676_v40 = vand.u32 2147483648, %v7567_v37 }
 0x2d4   : > { %v1976_v10 = vpop.permute.xlu0 %1975  ;;  %v2594_v49 = vpop.permute.xlu2 %2593  ;;  %v1653_v25 = vmul.f32 %v5512_v6, %v1652_v0  ;;  %vm1685_vm8 = vweird.f32 %v7591_v61  ;;  %v1691_v39 = vand.u32 2147483648, %v7591_v61 }
 0x2d5   : > { %2688 = vst.msk [vmem:[#allocation3 + $0x8] sm:$0xff] %vm700_vm3, %v2594_v49  ;;  %v5516_v46 = vpop.eup %5515  ;;  %v2043_v18 = vmul.f32 %v1976_v10, %v7593_v9 }
 0x2d6   : > { %2131 = vrot.lane.b32.xlu0 %v2041_v45, %s5858_s13  ;;  %v1654_v14 = vadd.f32 %v5512_v6, %v1653_v25 }
 0x2d7   : > { %v5518_v19 = vpop.eup %5517 }
 0x2d8   : > { %v5520_v2 = vpop.eup %5519  ;;  %v1666_v54 = vmul.f32 %v5518_v19, %v7567_v37  ;;  %v1658_v36 = vsel %vm1657_vm1, %v5512_v6, %v1654_v14  ;;  %vm1671_vm5 = vweird.f32 %v5518_v19 }
 0x2d9   : > { %v7608_v10 = vpop.eup %5521  ;;  %vm1672_vm6 = vmor %vm1670_vm4, %vm1671_vm5 }
 0x2da   : > { %2617 = vrot.lane.b32.xlu2 %v2188_v21, %s5860_s28  ;;  %2133 = vrot.lane.b32.xlu1 %v2042_v28, %s5858_s13  ;;  %v1667_v31 = vsub.f32 1.0, %v1666_v54  ;;  %v1662_v28 = vor.u32 1.1754944e-38, %v1661_v1  ;;  %v1681_v44 = vmul.f32 %v7608_v10, %v7591_v61  ;;  %vm1686_vm9 = vweird.f32 %v7608_v10 }
 0x2db   : > { %vm1687_vm10 = vmor %vm1685_vm8, %vm1686_vm9 }
 0x2dc   : > { %v2108_v63 = vpop.permute.xlu0 %2107  ;;  %v7587_v51 = vpop.permute.xlu2 %2111  ;;  %v1668_v21 = vmul.f32 %v5518_v19, %v1667_v31  ;;  %v7611_v47 = vsel %vm1660_vm2, %v1662_v28, %v1658_v36 }
 0x2dd   : > { %v1978_v32 = vpop.permute.xlu1 %1977  ;;  %v2189_v50 = vadd.f32 %v2108_v63, %v1869_v38  ;;  %v1674_v38 = vand.u32 2147483647, %v7567_v37 }
 0x2de   : > { %2295 = vrot.lane.b32.xlu0 %v5516_v46, %s5858_s13  ;;  %v2044_v52 = vmul.f32 %v1978_v32, %v7611_v47  ;;  %v1669_v60 = vadd.f32 %v5518_v19, %v1668_v21  ;;  %v1682_v32 = vsub.f32 1.0, %v1681_v44  ;;  %v9746_v21 = vld [vmem:[#allocation56_spill] sm:$0xff] }
 0x2df   : > { %5523 = vtanh.f32 %v2189_v50  ;;  %vm1675_vm7 = vcmp.eq.f32.partialorder %v1674_v38, 8.507059e+37 }
 0x2e0   : > { %v1683_v54 = vmul.f32 %v7608_v10, %v1682_v32 }
 0x2e2   : > { %2135 = vrot.lane.b32.xlu2 %v2043_v18, %s5858_s13  ;;  %2297 = vrot.lane.b32.xlu1 %v5520_v2, %s5858_s13  ;;  %v1677_v18 = vor.u32 1.1754944e-38, %v1676_v40  ;;  %v9745_v2 = vld [vmem:[#allocation11_spill] sm:$0xff]  ;;  %v1684_v1 = vadd.f32 %v7608_v10, %v1683_v54 }
 0x2e3   : > { %v1871_v25 = vmul.f32 %v9745_v2, %v7262_v58 }
 0x2e4   : > { %v7601_v41 = vpop.permute.xlu2 %2275 }
 0x2e5   : > { %v2592_v5 = vpop.permute.xlu1 %2591  ;;  %v5524_v49 = vpop.eup %5523 }
 0x2e6   : > { %2687 = vst.msk [vmem:[#allocation3] sm:$0xff] %vm700_vm3, %v2592_v5  ;;  %2619 = vrot.lane.b32.xlu0 %v2189_v50, %s5860_s28  ;;  %v1673_v50 = vsel %vm1672_vm6, %v5518_v19, %v1669_v60 }
 0x2e7   : > { %v7629_v14 = vsel %vm1675_vm7, %v1677_v18, %v1673_v50  ;;  %v9749_v18 = vld [vmem:[#allocation13_spill] sm:$0xff] }
 0x2e8   : > { %v2272_v45 = vpop.permute.xlu0 %2271  ;;  %v2045_v19 = vmul.f32 %v7524_v62, %v7629_v14  ;;  %v1688_v62 = vsel %vm1687_vm10, %v7608_v10, %v1684_v1  ;;  %v9747_v10 = vld [vmem:[#allocation6_spill] sm:$0xff]  ;;  %v1874_v2 = vmul.f32 %v9749_v18, %v7344_v22  ;;  %v2822_v18 = vld [vmem:[%s9609_s3 + $0x38] sm:$0xff] }
 0x2e9   : > { %v2367_v0 = vmul.f32 %v2272_v45, %v6802_v35  ;;  %v2191_v35 = vadd.f32 %v7587_v51, %v1871_v25  ;;  %v1689_v51 = vand.u32 2147483647, %v7591_v61  ;;  %v1692_v45 = vor.u32 1.1754944e-38, %v1691_v39  ;;  %v9750_v39 = vld [vmem:[#allocation7_spill] sm:$0xff] }
 0x2ea   : > { %2299 = vrot.lane.b32.xlu2 %v5524_v49, %s5858_s13  ;;  %v1872_v44 = vmul.f32 %v9747_v10, %v7307_v15 }
 0x2eb   : > { %vm1690_vm11 = vcmp.eq.f32.partialorder %v1689_v51, 8.507059e+37  ;;  %v2829_v51 = vld [vmem:[%s9609_s3 + $0x70] sm:$0xff] }
 0x2ec   : > { %v2600_v17 = vpop.permute.xlu2 %2599 }
 0x2ed   : > { %2691 = vst.msk [vmem:[#allocation3 + $0x20] sm:$0xff] %vm700_vm3, %v2600_v17  ;;  %v2110_v6 = vpop.permute.xlu1 %2109 }
 0x2ee   : > { %v2190_v63 = vadd.f32 %v2110_v6, %v1870_v53  ;;  %2137 = vrot.lane.b32.xlu0 %v2044_v52, %s5858_s13  ;;  %v7648_v53 = vsel %vm1690_vm11, %v1692_v45, %v1688_v62  ;;  %v2828_v45 = vld [vmem:[%s9609_s3 + $0x68] sm:$0xff] }
 0x2f0   : > { %5525 = vtanh.f32 %v2190_v63  ;;  %2621 = vrot.lane.b32.xlu1 %v2190_v63, %s5860_s28  ;;  %v1982_v46 = vpop.permute.xlu0 %1981  ;;  %v9748_v63 = vld [vmem:[#allocation12_spill] sm:$0xff] }
 0x2f1   : > { %5527 = vtanh.f32 %v2191_v35  ;;  %v2046_v61 = vmul.f32 %v1982_v46, %v7648_v53  ;;  %v1873_v40 = vmul.f32 %v9748_v63, %v7319_v56 }
 0x2f2   : > { %2431 = vrot.lane.b32.xlu2 %v2367_v0, %s5861_s12  ;;  %v2369_v0 = vmul.f32 %v7601_v41, %v6863_v33 }
 0x2f4   : > { %v2118_v37 = vpop.permute.xlu2 %2117 }
 0x2f5   : > { %v2274_v5 = vpop.permute.xlu1 %2273  ;;  %v2194_v54 = vadd.f32 %v2118_v37, %v1874_v2  ;;  %v2821_v2 = vld [vmem:[%s9609_s3 + $0x30] sm:$0xff] }
 0x2f6   : > { %v5526_v31 = vpop.eup %5525  ;;  %v2368_v28 = vmul.f32 %v2274_v5, %v9746_v21 }
 0x2f7   : > { %2301 = vrot.lane.b32.xlu0 %v5526_v31, %s5858_s13  ;;  %v5528_v16 = vpop.eup %5527 }
 0x2f8   : > { %2139 = vrot.lane.b32.xlu1 %v2045_v19, %s5858_s13  ;;  %v2596_v49 = vpop.permute.xlu0 %2595 }
 0x2f9   : > { %2689 = vst.msk [vmem:[#allocation3 + $0x10] sm:$0xff] %vm700_vm3, %v2596_v49  ;;  %v2830_v49 = vld [vmem:[%s9609_s3 + $0x78] sm:$0xff] }
 0x2fa   : > { %2623 = vrot.lane.b32.xlu2 %v2191_v35, %s5860_s28  ;;  %2934 = vmatpush.msra.mxu2 %v2830_v49 }
 0x2fc   : > { %v7644_v36 = vpop.permute.xlu2 %2281  ;;  %2935 = vmatpush.msra.mxu2 %v2829_v51  ;;  %v2816_v51 = vld [vmem:[%s9609_s3 + $0x8] sm:$0xff] }
 0x2fd   : > { %v2598_v17 = vpop.permute.xlu1 %2597  ;;  %v2372_v10 = vmul.f32 %v7644_v36, %v6953_v20  ;;  %v2824_v20 = vld [vmem:[%s9609_s3 + $0x48] sm:$0xff]  ;;  %v9752_v36 = vld [vmem:[#allocation16_spill] sm:$0xff] }
 0x2fe   : > { %2690 = vst.msk [vmem:[#allocation3 + $0x18] sm:$0xff] %vm700_vm3, %v2598_v17  ;;  %2936 = vmatpush.msra.mxu2 %v2828_v45  ;;  %v9754_v45 = vld [vmem:[#allocation18_spill] sm:$0xff] }
 0x2ff   : > { %2433 = vrot.lane.b32.xlu0 %v2368_v28, %s5861_s12  ;;  %v9751_v28 = vld [vmem:[#allocation15_spill] sm:$0xff] }
 0x300   : > { %2303 = vrot.lane.b32.xlu1 %v5528_v16, %s5858_s13  ;;  %v2114_v52 = vpop.permute.xlu0 %2113  ;;  %v1876_v17 = vmul.f32 %v9751_v28, %v7401_v24  ;;  %v2827_v16 = vld [vmem:[%s9609_s3 + $0x60] sm:$0xff] }
 0x301   : > { %v2192_v6 = vadd.f32 %v2114_v52, %v1872_v44  ;;  %2937 = vmatpush.msra.mxu2 %v2827_v16  ;;  %v2826_v52 = vld [vmem:[%s9609_s3 + $0x58] sm:$0xff]  ;;  %v2815_v28 = vld [vmem:[%s9609_s3] sm:$0xff] }
 0x302   : > { %2141 = vrot.lane.b32.xlu2 %v2046_v61, %s5858_s13 }
 0x303   : > { %5529 = vtanh.f32 %v2192_v6  ;;  %2938 = vmatpush.msra.mxu2 %v2826_v52 }
 0x304   : > { %v2606_v60 = vpop.permute.xlu2 %2605 }
 0x305   : > { %2694 = vst.msk [vmem:[#allocation3 + $0x38] sm:$0xff] %vm700_vm3, %v2606_v60  ;;  %v2116_v38 = vpop.permute.xlu1 %2115 }
 0x306   : > { %v2193_v32 = vadd.f32 %v2116_v38, %v1873_v40  ;;  %v1877_v40 = vmul.f32 %v9752_v36, %v7427_v57 }
 0x307   : > { %2625 = vrot.lane.b32.xlu0 %v2192_v6, %s5860_s28  ;;  %v2825_v6 = vld [vmem:[%s9609_s3 + $0x50] sm:$0xff] }
 0x308   : > { %5531 = vtanh.f32 %v2193_v32  ;;  %2435 = vrot.lane.b32.xlu1 %v2369_v0, %s5861_s12  ;;  %v2278_v46 = vpop.permute.xlu0 %2277  ;;  %2939 = vmatpush.msra.mxu2 %v2825_v6  ;;  %v2823_v0 = vld [vmem:[%s9609_s3 + $0x40] sm:$0xff] }
 0x309   : > { %v5530_v50 = vpop.eup %5529  ;;  %5533 = vtanh.f32 %v2194_v54  ;;  %v2370_v33 = vmul.f32 %v2278_v46, %v6895_v26  ;;  %v1875_v26 = vmul.f32 %v9750_v39, %v7389_v27  ;;  %v2818_v39 = vld [vmem:[%s9609_s3 + $0x18] sm:$0xff] }
 0x30a   : > { %2305 = vrot.lane.b32.xlu2 %v5530_v50, %s5858_s13  ;;  %2940 = vmatpush.msra.mxu2 %v2824_v20 }
 0x30c   : > { %v2124_v25 = vpop.permute.xlu2 %2123  ;;  %2941 = vmatpush.msra.mxu2 %v2823_v0 }
 0x30d   : > { %v2280_v35 = vpop.permute.xlu1 %2279 }
 0x30e   : > { %v5532_v5 = vpop.eup %5531  ;;  %v2371_v19 = vmul.f32 %v2280_v35, %v6923_v23  ;;  %2942 = vmatpush.msra.mxu2 %v2822_v18  ;;  %v9756_v18 = vld [vmem:[#allocation9_spill] sm:$0xff] }
 0x30f   : > { %2307 = vrot.lane.b32.xlu0 %v5532_v5, %s5858_s13  ;;  %v5534_v37 = vpop.eup %5533  ;;  %v2820_v5 = vld [vmem:[%s9609_s3 + $0x28] sm:$0xff] }
 0x310   : > { %2627 = vrot.lane.b32.xlu1 %v2193_v32, %s5860_s28  ;;  %v2602_v41 = vpop.permute.xlu0 %2601  ;;  %v2197_v32 = vadd.f32 %v2124_v25, %v1877_v40  ;;  %2943 = vmatpush.msra.mxu2 %v2821_v2  ;;  %v1881_v2 = vmul.f32 %v9756_v18, %v7564_v48 }
 0x311   : > { %2692 = vst.msk [vmem:[#allocation3 + $0x28] sm:$0xff] %vm700_vm3, %v2602_v41 }
 0x312   : > { %2437 = vrot.lane.b32.xlu2 %v2370_v33, %s5861_s12  ;;  %v2819_v33 = vld [vmem:[%s9609_s3 + $0x20] sm:$0xff]  ;;  %2944 = vmatpush.msra.mxu2 %v2820_v5 }
 0x314   : > { %v7671_v31 = vpop.permute.xlu2 %2287  ;;  %2945 = vmatpush.msra.mxu2 %v2819_v33 }
 0x315   : > { %v2604_v1 = vpop.permute.xlu1 %2603  ;;  %v2375_v16 = vmul.f32 %v7671_v31, %v7041_v3  ;;  %v9755_v3 = vld [vmem:[#allocation19_spill] sm:$0xff] }
 0x316   : > { %2693 = vst.msk [vmem:[#allocation3 + $0x30] sm:$0xff] %vm700_vm3, %v2604_v1  ;;  %v9753_v1 = vld [vmem:[#allocation8_spill] sm:$0xff]  ;;  %2946 = vmatpush.msra.mxu2 %v2818_v39  ;;  %v1880_v31 = vmul.f32 %v9755_v3, %v7510_v43 }
 0x317   : > { %2439 = vrot.lane.b32.xlu0 %v2371_v19, %s5861_s12  ;;  %v9760_v3 = vld [vmem:[#allocation24_spill] sm:$0xff] }
 0x318   : > { %2309 = vrot.lane.b32.xlu1 %v5534_v37, %s5858_s13  ;;  %v2120_v23 = vpop.permute.xlu0 %2119  ;;  %v1878_v37 = vmul.f32 %v9753_v1, %v7474_v8 }
 0x319   : > { %v2195_v62 = vadd.f32 %v2120_v23, %v1875_v26  ;;  %v2832_v23 = vld [vmem:[%s9609_s3 + $0x88] sm:$0xff] }
 0x31a   : > { %2629 = vrot.lane.b32.xlu2 %v2194_v54, %s5860_s28  ;;  %3061 = vmatpush.msra.mxu3 %v2832_v23 }
 0x31b   : > { %5535 = vtanh.f32 %v2195_v62 }
 0x31c   : > { %v2612_v21 = vpop.permute.xlu2 %2611 }
 0x31d   : > { %2697 = vst.msk [vmem:[#allocation3 + $0x50] sm:$0xff] %vm700_vm3, %v2612_v21  ;;  %v2122_v61 = vpop.permute.xlu1 %2121  ;;  %v1879_v21 = vmul.f32 %v9754_v45, %v7486_v55  ;;  %v2754_v45 = vld [vmem:[#allocation4 + $0x18] sm:$0xff] }
 0x31e   : > { %v2196_v44 = vadd.f32 %v2122_v61, %v1876_v17 }
 0x31f   : > { %2631 = vrot.lane.b32.xlu0 %v2195_v62, %s5860_s28 }
 0x320   : > { %5537 = vtanh.f32 %v2196_v44  ;;  %2441 = vrot.lane.b32.xlu1 %v2372_v10, %s5861_s12  ;;  %v2284_v60 = vpop.permute.xlu0 %2283  ;;  %v2831_v10 = vld [vmem:[%s9609_s3 + $0x80] sm:$0xff] }
 0x321   : > { %v5536_v63 = vpop.eup %5535  ;;  %5539 = vtanh.f32 %v2197_v32  ;;  %v2373_v54 = vmul.f32 %v2284_v60, %v6981_v13  ;;  %3062 = vmatpush.msra.mxu3 %v2831_v10 }
 0x322   : > { %2311 = vrot.lane.b32.xlu2 %v5536_v63, %s5858_s13 }
 0x324   : > { %v7711_v38 = vpop.permute.xlu2 %2129 }
 0x325   : > { %v2286_v46 = vpop.permute.xlu1 %2285  ;;  %v2200_v63 = vadd.f32 %v7711_v38, %v1880_v31  ;;  %v1885_v31 = vmul.f32 %v9760_v3, %v7629_v14 }
 0x326   : > { %v5538_v50 = vpop.eup %5537  ;;  %v2374_v41 = vmul.f32 %v2286_v46, %v7013_v29  ;;  %v2817_v29 = vld [vmem:[%s9609_s3 + $0x10] sm:$0xff] }
 0x327   : > { %2313 = vrot.lane.b32.xlu0 %v5538_v50, %s5858_s13  ;;  %v5540_v19 = vpop.eup %5539  ;;  %2947 = vmatpush.msra.mxu2 %v2817_v29 }
 0x328   : > { %2633 = vrot.lane.b32.xlu1 %v2196_v44, %s5860_s28  ;;  %v2608_v25 = vpop.permute.xlu0 %2607  ;;  %v2752_v44 = vld [vmem:[#allocation4 + $0x8] sm:$0xff] }
 0x329   : > { %2695 = vst.msk [vmem:[#allocation3 + $0x40] sm:$0xff] %vm700_vm3, %v2608_v25  ;;  %2948 = vmatpush.msra.mxu2 %v2816_v51  ;;  %5185 = vmatmul.msk.f32.vlgmr.msra.gmra.mxu3 %vm2837_vm12, %v2752_v44  ;;  %v9757_v25 = vld [vmem:[#allocation21_spill] sm:$0xff]  ;;  %v2756_v44 = vld [vmem:[#allocation4 + $0x28] sm:$0xff] }
 0x32a   : > { %2443 = vrot.lane.b32.xlu2 %v2373_v54, %s5861_s12  ;;  %v1882_v5 = vmul.f32 %v9757_v25, %v7571_v11 }
 0x32b   : > { %2949 = vmatpush.msra.mxu2 %v2815_v28 }
 0x32c   : > { %v7727_v35 = vpop.permute.xlu2 %2293 }
 0x32d   : > { %v2610_v13 = vpop.permute.xlu1 %2609 }
 0x32e   : > { %2696 = vst.msk [vmem:[#allocation3 + $0x48] sm:$0xff] %vm700_vm3, %v2610_v13 }
 0x32f   : > { %2445 = vrot.lane.b32.xlu0 %v2374_v41, %s5861_s12  ;;  %v2378_v41 = vmul.f32 %v7727_v35, %v7118_v42 }
 0x330   : > { %2315 = vrot.lane.b32.xlu1 %v5540_v19, %s5858_s13  ;;  %v2126_v26 = vpop.permute.xlu0 %2125 }
 0x331   : > { %v2198_v49 = vadd.f32 %v2126_v26, %v1878_v37  ;;  %v9758_v37 = vld [vmem:[#allocation22_spill] sm:$0xff]  ;;  %5186 = vmatmul.msk.f32.gmra.mxu3 %vm2837_vm12, %v2754_v45 }
 0x332   : > { %2635 = vrot.lane.b32.xlu2 %v2197_v32, %s5860_s28  ;;  %v1883_v39 = vmul.f32 %v9758_v37, %v7593_v9 }
 0x333   : > { %5541 = vtanh.f32 %v2198_v49 }
 0x334   : > { %v2618_v62 = vpop.permute.xlu2 %2617 }
 0x335   : > { %2700 = vst.msk [vmem:[#allocation3 + $0x68] sm:$0xff] %vm700_vm3, %v2618_v62  ;;  %v2128_v17 = vpop.permute.xlu1 %2127 }
 0x336   : > { %v2199_v61 = vadd.f32 %v2128_v17, %v1879_v21  ;;  %v9759_v17 = vld [vmem:[#allocation14_spill] sm:$0xff] }
 0x337   : > { %2637 = vrot.lane.b32.xlu0 %v2198_v49, %s5860_s28 }
 0x338   : > { %5543 = vtanh.f32 %v2199_v61  ;;  %2447 = vrot.lane.b32.xlu1 %v2375_v16, %s5861_s12  ;;  %v2290_v52 = vpop.permute.xlu0 %2289 }
 0x339   : > { %v5542_v6 = vpop.eup %5541  ;;  %5545 = vtanh.f32 %v2200_v63  ;;  %v2376_v40 = vmul.f32 %v2290_v52, %v7068_v12  ;;  %5187 = vmatmul.msk.f32.gmra.mxu3 %vm2837_vm12, %v2756_v44 }
 0x33a   : > { %2317 = vrot.lane.b32.xlu2 %v5542_v6, %s5858_s13 }
 0x33c   : > { %v2136_v60 = vpop.permute.xlu2 %2135 }
 0x33d   : > { %v2292_v20 = vpop.permute.xlu1 %2291  ;;  %v2203_v26 = vadd.f32 %v2136_v60, %v1883_v39  ;;  %v2764_v39 = vld [vmem:[#allocation4 + $0x68] sm:$0xff] }
 0x33e   : > { %v5544_v36 = vpop.eup %5543  ;;  %v2377_v46 = vmul.f32 %v2292_v20, %v7093_v7  ;;  %v9761_v20 = vld [vmem:[#allocation25_spill] sm:$0xff] }
 0x33f   : > { %2319 = vrot.lane.b32.xlu0 %v5544_v36, %s5858_s13  ;;  %v5546_v38 = vpop.eup %5545  ;;  %v1886_v36 = vmul.f32 %v9761_v20, %v7648_v53 }
 0x340   : > { %2639 = vrot.lane.b32.xlu1 %v2199_v61, %s5860_s28  ;;  %v2614_v0 = vpop.permute.xlu0 %2613 }
 0x341   : > { %2698 = vst.msk [vmem:[#allocation3 + $0x58] sm:$0xff] %vm700_vm3, %v2614_v0  ;;  %v2758_v0 = vld [vmem:[#allocation4 + $0x38] sm:$0xff] }
 0x342   : > { %2449 = vrot.lane.b32.xlu2 %v2376_v40, %s5861_s12  ;;  %5188 = vmatmul.msk.f32.gmra.mxu3 %vm2837_vm12, %v2758_v0 }
 0x344   : > { %v2300_v32 = vpop.permute.xlu2 %2299 }
 0x345   : > { %v2616_v50 = vpop.permute.xlu1 %2615  ;;  %v2381_v52 = vmul.f32 %v2300_v32, %v7191_v30 }
 0x346   : > { %2699 = vst.msk [vmem:[#allocation3 + $0x60] sm:$0xff] %vm700_vm3, %v2616_v50 }
 0x347   : > { %2451 = vrot.lane.b32.xlu0 %v2377_v46, %s5861_s12 }
 0x348   : > { %2321 = vrot.lane.b32.xlu1 %v5546_v38, %s5858_s13  ;;  %v2132_v12 = vpop.permute.xlu0 %2131 }
 0x349   : > { %v2201_v54 = vadd.f32 %v2132_v12, %v1881_v2  ;;  %v2760_v2 = vld [vmem:[#allocation4 + $0x48] sm:$0xff] }
 0x34a   : > { %2641 = vrot.lane.b32.xlu2 %v2200_v63, %s5860_s28  ;;  %5189 = vmatmul.msk.f32.gmra.mxu3 %vm2837_vm12, %v2760_v2  ;;  %v2778_v2 = vld [vmem:[#allocation4 + $0xd8] sm:$0xff] }
 0x34b   : > { %5547 = vtanh.f32 %v2201_v54 }
 0x34c   : > { %v2432_v7 = vpop.permute.xlu2 %2431 }
 0x34d   : > { %v2134_v33 = vpop.permute.xlu1 %2133  ;;  %2527 = vst.msk [vmem:[#allocation2 + $0x8] sm:$0xff] %vm700_vm3, %v2432_v7 }
 0x34e   : > { %v2202_v13 = vadd.f32 %v2134_v33, %v1882_v5  ;;  %2719 = vst.msk [vmem:[#allocation4] sm:$0xff] %vm700_vm3, %v2432_v7  ;;  %v2762_v33 = vld [vmem:[#allocation4 + $0x58] sm:$0xff] }
 0x34f   : > { %2643 = vrot.lane.b32.xlu0 %v2201_v54, %s5860_s28 }
 0x350   : > { %5549 = vtanh.f32 %v2202_v13  ;;  %2453 = vrot.lane.b32.xlu1 %v2378_v41, %s5861_s12  ;;  %v2296_v19 = vpop.permute.xlu0 %2295 }
 0x351   : > { %v5548_v1 = vpop.eup %5547  ;;  %5551 = vtanh.f32 %v2203_v26  ;;  %v2379_v49 = vmul.f32 %v2296_v19, %v7144_v4  ;;  %v1884_v4 = vmul.f32 %v9759_v17, %v7611_v47 }
 0x352   : > { %2323 = vrot.lane.b32.xlu2 %v5548_v1, %s5858_s13  ;;  %5190 = vmatmul.msk.f32.gmra.mxu3 %vm2837_vm12, %v2762_v33 }
 0x354   : > { %v2624_v29 = vpop.permute.xlu2 %2623 }
 0x355   : > { %2703 = vst.msk [vmem:[#allocation3 + $0x80] sm:$0xff] %vm700_vm3, %v2624_v29  ;;  %v2751_v42 = vld [vmem:[#allocation4] sm:$0xff]  ;;  %v2298_v23 = vpop.permute.xlu1 %2297 }
 0x356   : > { %v5550_v35 = vpop.eup %5549  ;;  %2950 = vmatmul.f32.vlgmr.msra.gmra.mxu2 %v2751_v42  ;;  %v2380_v21 = vmul.f32 %v2298_v23, %v7167_v34 }
 0x357   : > { %2325 = vrot.lane.b32.xlu0 %v5550_v35, %s5858_s13  ;;  %v5552_v28 = vpop.eup %5551 }
 0x358   : > { %2645 = vrot.lane.b32.xlu1 %v2202_v13, %s5860_s28  ;;  %v2620_v51 = vpop.permute.xlu0 %2619 }
 0x359   : > { %2701 = vst.msk [vmem:[#allocation3 + $0x70] sm:$0xff] %vm700_vm3, %v2620_v51 }
 0x35a   : > { %2455 = vrot.lane.b32.xlu2 %v2379_v49, %s5861_s12  ;;  %5191 = vmatmul.msk.f32.gmra.mxu3 %vm2837_vm12, %v2764_v39  ;;  %v2766_v49 = vld [vmem:[#allocation4 + $0x78] sm:$0xff] }
 0x35c   : > { %v2142_v62 = vpop.permute.xlu2 %2141 }
 0x35d   : > { %v2206_v46 = vadd.f32 %v2142_v62, %v1886_v36 }
 0x35f   : > { %2457 = vrot.lane.b32.xlu0 %v2380_v21, %s5861_s12 }
 0x360   : > { %2327 = vrot.lane.b32.xlu1 %v5552_v28, %s5858_s13  ;;  %v2138_v16 = vpop.permute.xlu0 %2137 }
 0x361   : > { %v2204_v61 = vadd.f32 %v2138_v16, %v1884_v4 }
 0x362   : > { %v2622_v10 = vpop.permute.xlu1 %2621  ;;  %2647 = vrot.lane.b32.xlu2 %v2203_v26, %s5860_s28  ;;  %5192 = vmatmul.msk.f32.gmra.mxu3 %vm2837_vm12, %v2766_v49 }
 0x363   : > { %2702 = vst.msk [vmem:[#allocation3 + $0x78] sm:$0xff] %vm700_vm3, %v2622_v10  ;;  %5553 = vtanh.f32 %v2204_v61 }
 0x364   : > { %v2306_v34 = vpop.permute.xlu2 %2305 }
 0x365   : > { %v2384_v13 = vmul.f32 %v2306_v34, %v7307_v15 }
 0x367   : > { %2649 = vrot.lane.b32.xlu0 %v2204_v61, %s5860_s28  ;;  %v2770_v61 = vld [vmem:[#allocation4 + $0x98] sm:$0xff] }
 0x368   : > { %2459 = vrot.lane.b32.xlu1 %v2381_v52, %s5861_s12  ;;  %v2772_v52 = vld [vmem:[#allocation4 + $0xa8] sm:$0xff] }
 0x369   : > { %v2302_v6 = vpop.permute.xlu0 %2301  ;;  %v5554_v60 = vpop.eup %5553 }
 0x36a   : > { %v2140_v63 = vpop.permute.xlu1 %2139  ;;  %2329 = vrot.lane.b32.xlu2 %v5554_v60, %s5858_s13  ;;  %v2382_v32 = vmul.f32 %v2302_v6, %v7239_v59 }
 0x36b   : > { %v2205_v40 = vadd.f32 %v2140_v63, %v1885_v31 }
 0x36c   : > { %v2438_v30 = vpop.permute.xlu2 %2437 }
 0x36d   : > { %5555 = vtanh.f32 %v2205_v40  ;;  %2530 = vst.msk [vmem:[#allocation2 + $0x38] sm:$0xff] %vm700_vm3, %v2438_v30 }
 0x36e   : > { %2722 = vst.msk [vmem:[#allocation4 + $0x30] sm:$0xff] %vm700_vm3, %v2438_v30  ;;  %5557 = vtanh.f32 %v2206_v46  ;;  %v2776_v30 = vld [vmem:[#allocation4 + $0xc8] sm:$0xff] }
 0x370   : > { %2651 = vrot.lane.b32.xlu1 %v2205_v40, %s5860_s28 }
 0x371   : > { %v2434_v50 = vpop.permute.xlu0 %2433 }
 0x372   : > { %2528 = vst.msk [vmem:[#allocation2 + $0x18] sm:$0xff] %vm700_vm3, %v2434_v50  ;;  %v2304_v38 = vpop.permute.xlu1 %2303  ;;  %2461 = vrot.lane.b32.xlu2 %v2382_v32, %s5861_s12 }
 0x373   : > { %v5556_v18 = vpop.eup %5555  ;;  %2720 = vst.msk [vmem:[#allocation4 + $0x10] sm:$0xff] %vm700_vm3, %v2434_v50  ;;  %v2383_v25 = vmul.f32 %v2304_v38, %v7262_v58 }
 0x374   : > { %2331 = vrot.lane.b32.xlu0 %v5556_v18, %s5858_s13  ;;  %v2630_v12 = vpop.permute.xlu2 %2629  ;;  %v5558_v54 = vpop.eup %5557 }
 0x375   : > { %2706 = vst.msk [vmem:[#allocation3 + $0x98] sm:$0xff] %vm700_vm3, %v2630_v12  ;;  %v2757_v35 = vld [vmem:[#allocation4 + $0x30] sm:$0xff] }
 0x378   : > { %2333 = vrot.lane.b32.xlu1 %v5558_v54, %s5858_s13 }
 0x379   : > { %v2626_v59 = vpop.permute.xlu0 %2625 }
 0x37a   : > { %2704 = vst.msk [vmem:[#allocation3 + $0x88] sm:$0xff] %vm700_vm3, %v2626_v59  ;;  %v2436_v5 = vpop.permute.xlu1 %2435  ;;  %v2753_v7 = vld [vmem:[#allocation4 + $0x10] sm:$0xff]  ;;  %2653 = vrot.lane.b32.xlu2 %v2206_v46, %s5860_s28 }
 0x37b   : > { %2529 = vst.msk [vmem:[#allocation2 + $0x28] sm:$0xff] %vm700_vm3, %v2436_v5  ;;  %2953 = vmatmul.f32.gmra.mxu2 %v2753_v7 }
 0x37c   : > { %2721 = vst.msk [vmem:[#allocation4 + $0x20] sm:$0xff] %vm700_vm3, %v2436_v5  ;;  %2463 = vrot.lane.b32.xlu0 %v2383_v25, %s5861_s12  ;;  %v2312_v41 = vpop.permute.xlu2 %2311  ;;  %v2780_v5 = vld [vmem:[#allocation4 + $0xe8] sm:$0xff] }
 0x37d   : > { %v2387_v26 = vmul.f32 %v2312_v41, %v7389_v27 }
 0x380   : > { %2465 = vrot.lane.b32.xlu1 %v2384_v13, %s5861_s12 }
 0x381   : > { %v2308_v58 = vpop.permute.xlu0 %2307 }
 0x382   : > { %v2385_v19 = vmul.f32 %v2308_v58, %v7319_v56  ;;  %v2628_v1 = vpop.permute.xlu1 %2627  ;;  %v2782_v58 = vld [vmem:[#allocation4 + $0xf8] sm:$0xff] }
 0x383   : > { %2705 = vst.msk [vmem:[#allocation3 + $0x90] sm:$0xff] %vm700_vm3, %v2628_v1  ;;  %v2755_v37 = vld [vmem:[#allocation4 + $0x20] sm:$0xff] }
 0x384   : > { %2956 = vmatmul.f32.gmra.mxu2 %v2755_v37  ;;  %2467 = vrot.lane.b32.xlu2 %v2385_v19, %s5861_s12  ;;  %v2444_v29 = vpop.permute.xlu2 %2443 }
 0x385   : > { %2533 = vst.msk [vmem:[#allocation2 + $0x68] sm:$0xff] %vm700_vm3, %v2444_v29 }
 0x386   : > { %2725 = vst.msk [vmem:[#allocation4 + $0x60] sm:$0xff] %vm700_vm3, %v2444_v29 }
 0x388   : > { %2471 = vrot.lane.b32.xlu1 %v2387_v26, %s5861_s12  ;;  %v2784_v26 = vld [vmem:[#allocation4 + $0x108] sm:$0xff] }
 0x389   : > { %v2440_v15 = vpop.permute.xlu0 %2439 }
 0x38a   : > { %2531 = vst.msk [vmem:[#allocation2 + $0x48] sm:$0xff] %vm700_vm3, %v2440_v15  ;;  %v2310_v56 = vpop.permute.xlu1 %2309 }
 0x38b   : > { %2723 = vst.msk [vmem:[#allocation4 + $0x40] sm:$0xff] %vm700_vm3, %v2440_v15  ;;  %v2386_v42 = vmul.f32 %v2310_v56, %v7344_v22  ;;  %v2768_v22 = vld [vmem:[#allocation4 + $0x88] sm:$0xff]  ;;  %v7910_v56 = vld [vmem:[%s9610_s4] ss:$0 sm:$0xff] }
 0x38c   : > { %2959 = vmatmul.f32.gmra.mxu2 %v2757_v35  ;;  %v2636_v51 = vpop.permute.xlu2 %2635  ;;  %5193 = vmatmul.msk.f32.gmra.mxu3 %vm2837_vm12, %v2768_v22  ;;  %v2786_v22 = vld [vmem:[#allocation4 + $0x118] sm:$0xff] }
 0x38d   : > { %2469 = vrot.lane.b32.xlu0 %v2386_v42, %s5861_s12  ;;  %2709 = vst.msk [vmem:[#allocation3 + $0xb0] sm:$0xff] %vm700_vm3, %v2636_v51  ;;  %v2763_v34 = vld [vmem:[#allocation4 + $0x60] sm:$0xff] }
 0x391   : > { %v2632_v27 = vpop.permute.xlu0 %2631 }
 0x392   : > { %2707 = vst.msk [vmem:[#allocation3 + $0xa0] sm:$0xff] %vm700_vm3, %v2632_v27  ;;  %v2442_v23 = vpop.permute.xlu1 %2441  ;;  %v2759_v62 = vld [vmem:[#allocation4 + $0x40] sm:$0xff] }
 0x393   : > { %2532 = vst.msk [vmem:[#allocation2 + $0x58] sm:$0xff] %vm700_vm3, %v2442_v23 }
 0x394   : > { %2724 = vst.msk [vmem:[#allocation4 + $0x50] sm:$0xff] %vm700_vm3, %v2442_v23  ;;  %2962 = vmatmul.f32.gmra.mxu2 %v2759_v62  ;;  %v2318_v45 = vpop.permute.xlu2 %2317  ;;  %5194 = vmatmul.msk.f32.gmra.mxu3 %vm2837_vm12, %v2770_v61  ;;  %v2788_v61 = vld [vmem:[#allocation4 + $0x128] sm:$0xff] }
 0x395   : > { %v2390_v21 = vmul.f32 %v2318_v45, %v7474_v8 }
 0x397   : > { %2477 = vrot.lane.b32.xlu1 %v2390_v21, %s5861_s12 }
 0x399   : > { %v2314_v28 = vpop.permute.xlu0 %2313 }
 0x39a   : > { %v2388_v17 = vmul.f32 %v2314_v28, %v7401_v24  ;;  %v2634_v4 = vpop.permute.xlu1 %2633 }
 0x39b   : > { %2708 = vst.msk [vmem:[#allocation3 + $0xa8] sm:$0xff] %vm700_vm3, %v2634_v4  ;;  %v2761_v16 = vld [vmem:[#allocation4 + $0x50] sm:$0xff] }
 0x39c   : > { %2965 = vmatmul.f32.gmra.mxu2 %v2761_v16  ;;  %2473 = vrot.lane.b32.xlu2 %v2388_v17, %s5861_s12  ;;  %v2450_v10 = vpop.permute.xlu2 %2449 }
 0x39d   : > { %2536 = vst.msk [vmem:[#allocation2 + $0x98] sm:$0xff] %vm700_vm3, %v2450_v10  ;;  %5195 = vmatmul.msk.f32.gmra.mxu3 %vm2837_vm12, %v2772_v52  ;;  %v2790_v52 = vld [vmem:[#allocation4 + $0x138] sm:$0xff] }
 0x39e   : > { %2728 = vst.msk [vmem:[#allocation4 + $0x90] sm:$0xff] %vm700_vm3, %v2450_v10 }
 0x3a1   : > { %v2446_v8 = vpop.permute.xlu0 %2445 }
 0x3a2   : > { %2534 = vst.msk [vmem:[#allocation2 + $0x78] sm:$0xff] %vm700_vm3, %v2446_v8  ;;  %v2316_v44 = vpop.permute.xlu1 %2315 }
 0x3a3   : > { %2726 = vst.msk [vmem:[#allocation4 + $0x70] sm:$0xff] %vm700_vm3, %v2446_v8  ;;  %v2389_v24 = vmul.f32 %v2316_v44, %v7427_v57  ;;  %v2774_v57 = vld [vmem:[#allocation4 + $0xb8] sm:$0xff] }
 0x3a4   : > { %2968 = vmatmul.f32.gmra.mxu2 %v2763_v34  ;;  %v2642_v6 = vpop.permute.xlu2 %2641 }
 0x3a5   : > { %2475 = vrot.lane.b32.xlu0 %v2389_v24, %s5861_s12  ;;  %2712 = vst.msk [vmem:[#allocation3 + $0xc8] sm:$0xff] %vm700_vm3, %v2642_v6  ;;  %5196 = vmatmul.msk.f32.gmra.mxu3 %vm2837_vm12, %v2774_v57  ;;  %v2769_v38 = vld [vmem:[#allocation4 + $0x90] sm:$0xff] }
 0x3a9   : > { %v2638_v3 = vpop.permute.xlu0 %2637 }
 0x3aa   : > { %2710 = vst.msk [vmem:[#allocation3 + $0xb8] sm:$0xff] %vm700_vm3, %v2638_v3  ;;  %v2448_v31 = vpop.permute.xlu1 %2447  ;;  %v2765_v60 = vld [vmem:[#allocation4 + $0x70] sm:$0xff] }
 0x3ab   : > { %2535 = vst.msk [vmem:[#allocation2 + $0x88] sm:$0xff] %vm700_vm3, %v2448_v31 }
 0x3ac   : > { %2727 = vst.msk [vmem:[#allocation4 + $0x80] sm:$0xff] %vm700_vm3, %v2448_v31  ;;  %2971 = vmatmul.f32.gmra.mxu2 %v2765_v60  ;;  %v2324_v63 = vpop.permute.xlu2 %2323  ;;  %v3064_v29 = vpop.f32.mrf.mxu3  ;;  %v2792_v60 = vld [vmem:[#allocation4 + $0x148] sm:$0xff] }
 0x3ad   : > { %v2393_v20 = vmul.f32 %v2324_v63, %v7564_v48  ;;  %5197 = vmatmul.msk.f32.gmra.mxu3 %vm2837_vm12, %v2776_v30 }
 0x3af   : > { %2483 = vrot.lane.b32.xlu1 %v2393_v20, %s5861_s12 }
 0x3b1   : > { %v2320_v36 = vpop.permute.xlu0 %2319 }
 0x3b2   : > { %v2391_v40 = vmul.f32 %v2320_v36, %v7486_v55  ;;  %v2640_v0 = vpop.permute.xlu1 %2639 }
 0x3b3   : > { %2711 = vst.msk [vmem:[#allocation3 + $0xc0] sm:$0xff] %vm700_vm3, %v2640_v0  ;;  %v2767_v46 = vld [vmem:[#allocation4 + $0x80] sm:$0xff] }
 0x3b4   : > { %2974 = vmatmul.f32.gmra.mxu2 %v2767_v46  ;;  %2479 = vrot.lane.b32.xlu2 %v2391_v40, %s5861_s12  ;;  %v2456_v32 = vpop.permute.xlu2 %2455  ;;  %v3067_v27 = vpop.f32.mrf.mxu3  ;;  %v2794_v46 = vld [vmem:[#allocation4 + $0x158] sm:$0xff] }
 0x3b5   : > { %2539 = vst.msk [vmem:[#allocation2 + $0xc8] sm:$0xff] %vm700_vm3, %v2456_v32  ;;  %5198 = vmatmul.msk.f32.gmra.mxu3 %vm2837_vm12, %v2778_v2  ;;  %v2796_v2 = vld [vmem:[#allocation4 + $0x168] sm:$0xff] }
 0x3b6   : > { %2731 = vst.msk [vmem:[#allocation4 + $0xc0] sm:$0xff] %vm700_vm3, %v2456_v32 }
 0x3b9   : > { %v2452_v48 = vpop.permute.xlu0 %2451 }
 0x3ba   : > { %2537 = vst.msk [vmem:[#allocation2 + $0xa8] sm:$0xff] %vm700_vm3, %v2452_v48  ;;  %v2322_v50 = vpop.permute.xlu1 %2321 }
 0x3bb   : > { %2729 = vst.msk [vmem:[#allocation4 + $0xa0] sm:$0xff] %vm700_vm3, %v2452_v48  ;;  %v2392_v55 = vmul.f32 %v2322_v50, %v7510_v43 }
 0x3bc   : > { %2977 = vmatmul.f32.gmra.mxu2 %v2769_v38  ;;  %v2648_v18 = vpop.permute.xlu2 %2647  ;;  %v3070_v16 = vpop.f32.mrf.mxu3 }
 0x3bd   : > { %2481 = vrot.lane.b32.xlu0 %v2392_v55, %s5861_s12  ;;  %2715 = vst.msk [vmem:[#allocation3 + $0xe0] sm:$0xff] %vm700_vm3, %v2648_v18  ;;  %5199 = vmatmul.msk.f32.gmra.mxu3 %vm2837_vm12, %v2780_v5  ;;  %v2775_v37 = vld [vmem:[#allocation4 + $0xc0] sm:$0xff] }
 0x3c1   : > { %v2644_v12 = vpop.permute.xlu0 %2643 }
 0x3c2   : > { %2713 = vst.msk [vmem:[#allocation3 + $0xd0] sm:$0xff] %vm700_vm3, %v2644_v12  ;;  %v2454_v54 = vpop.permute.xlu1 %2453  ;;  %v2771_v59 = vld [vmem:[#allocation4 + $0xa0] sm:$0xff] }
 0x3c3   : > { %2538 = vst.msk [vmem:[#allocation2 + $0xb8] sm:$0xff] %vm700_vm3, %v2454_v54 }
 0x3c4   : > { %2730 = vst.msk [vmem:[#allocation4 + $0xb0] sm:$0xff] %vm700_vm3, %v2454_v54  ;;  %2980 = vmatmul.f32.gmra.mxu2 %v2771_v59  ;;  %v2330_v43 = vpop.permute.xlu2 %2329 }
 0x3c5   : > { %v2396_v25 = vmul.f32 %v2330_v43, %v7611_v47  ;;  %5200 = vmatmul.msk.f32.gmra.mxu3 %vm2837_vm12, %v2782_v58  ;;  %v3073_v34 = vpop.f32.mrf.mxu3 }
 0x3c7   : > { %2489 = vrot.lane.b32.xlu1 %v2396_v25, %s5861_s12 }
 0x3c9   : > { %v2326_v7 = vpop.permute.xlu0 %2325 }
 0x3ca   : > { %v2394_v33 = vmul.f32 %v2326_v7, %v7571_v11  ;;  %v2646_v41 = vpop.permute.xlu1 %2645 }
 0x3cb   : > { %2714 = vst.msk [vmem:[#allocation3 + $0xd8] sm:$0xff] %vm700_vm3, %v2646_v41  ;;  %v2773_v13 = vld [vmem:[#allocation4 + $0xb0] sm:$0xff]  ;;  %v2798_v41 = vld [vmem:[#allocation4 + $0x178] sm:$0xff] }
 0x3cc   : > { %2983 = vmatmul.f32.gmra.mxu2 %v2773_v13  ;;  %2485 = vrot.lane.b32.xlu2 %v2394_v33, %s5861_s12  ;;  %v2462_v19 = vpop.permute.xlu2 %2461 }
 0x3cd   : > { %2542 = vst.msk [vmem:[#allocation2 + $0xf8] sm:$0xff] %vm700_vm3, %v2462_v19  ;;  %5201 = vmatmul.msk.f32.gmra.mxu3 %vm2837_vm12, %v2784_v26  ;;  %v3076_v31 = vpop.f32.mrf.mxu3 }
 0x3ce   : > { %2734 = vst.msk [vmem:[#allocation4 + $0xf0] sm:$0xff] %vm700_vm3, %v2462_v19 }
 0x3d1   : > { %v2458_v47 = vpop.permute.xlu0 %2457 }
 0x3d2   : > { %2540 = vst.msk [vmem:[#allocation2 + $0xd8] sm:$0xff] %vm700_vm3, %v2458_v47  ;;  %v2328_v1 = vpop.permute.xlu1 %2327 }
 0x3d3   : > { %2732 = vst.msk [vmem:[#allocation4 + $0xd0] sm:$0xff] %vm700_vm3, %v2458_v47  ;;  %v2395_v11 = vmul.f32 %v2328_v1, %v7593_v9 }
 0x3d4   : > { %2986 = vmatmul.f32.gmra.mxu2 %v2775_v37  ;;  %v2654_v39 = vpop.permute.xlu2 %2653 }
 0x3d5   : > { %2487 = vrot.lane.b32.xlu0 %v2395_v11, %s5861_s12  ;;  %2718 = vst.msk [vmem:[#allocation3 + $0xf8] sm:$0xff] %vm700_vm3, %v2654_v39  ;;  %5202 = vmatmul.msk.f32.gmra.mxu3 %vm2837_vm12, %v2786_v22  ;;  %v2781_v8 = vld [vmem:[#allocation4 + $0xf0] sm:$0xff]  ;;  %v3079_v0 = vpop.f32.mrf.mxu3 }
 0x3d9   : > { %v2650_v15 = vpop.permute.xlu0 %2649  ;;  %v2951_v35 = vpop.f32.mrf.mxu2 }
 0x3da   : > { %2716 = vst.msk [vmem:[#allocation3 + $0xe8] sm:$0xff] %vm700_vm3, %v2650_v15  ;;  %v2460_v9 = vpop.permute.xlu1 %2459  ;;  %v2777_v42 = vld [vmem:[#allocation4 + $0xd0] sm:$0xff]  ;;  %v2952_v49 = vadd.f32 %v7910_v56, %v2951_v35 }
 0x3db   : > { %2541 = vst.msk [vmem:[#allocation2 + $0xe8] sm:$0xff] %vm700_vm3, %v2460_v9 }
 0x3dc   : > { %2733 = vst.msk [vmem:[#allocation4 + $0xe0] sm:$0xff] %vm700_vm3, %v2460_v9  ;;  %2989 = vmatmul.f32.gmra.mxu2 %v2777_v42  ;;  %v7918_v23 = vadd.f32 %v3064_v29, %v2952_v49  ;;  %v2800_v29 = vld [vmem:[#allocation4 + $0x188] sm:$0xff] }
 0x3dd   : > { %5203 = vmatmul.msk.f32.gmra.mxu3 %vm2837_vm12, %v2788_v61  ;;  %v3082_v18 = vpop.f32.mrf.mxu3 }
 0x3de   : > { %v2468_v51 = vpop.permute.xlu2 %2467  ;;  %v3160_v21 = vmax.f32 %v7918_v23, 0.0 }
 0x3df   : > { %2545 = vst.msk [vmem:[#allocation2 + $0x128] sm:$0xff] %vm700_vm3, %v2468_v51 }
 0x3e0   : > { %2737 = vst.msk [vmem:[#allocation4 + $0x120] sm:$0xff] %vm700_vm3, %v2468_v51  ;;  %5559 = vtanh.f32 %v3160_v21 }
 0x3e2   : > { %v2652_v62 = vpop.permute.xlu1 %2651 }
 0x3e3   : > { %2717 = vst.msk [vmem:[#allocation3 + $0xf0] sm:$0xff] %vm700_vm3, %v2652_v62  ;;  %v2779_v45 = vld [vmem:[#allocation4 + $0xe0] sm:$0xff]  ;;  %v2802_v62 = vld [vmem:[#allocation4 + $0x198] sm:$0xff] }
 0x3e4   : > { %2992 = vmatmul.f32.gmra.mxu2 %v2779_v45 }
 0x3e5   : > { %5204 = vmatmul.msk.f32.gmra.mxu3 %vm2837_vm12, %v2790_v52  ;;  %v3085_v33 = vpop.f32.mrf.mxu3 }
 0x3e6   : > { %v2332_v28 = vpop.permute.xlu0 %2331 }
 0x3e7   : > { %v2397_v17 = vmul.f32 %v2332_v28, %v7629_v14  ;;  %v5560_v14 = vpop.eup %5559  ;;  %v2787_v48 = vld [vmem:[#allocation4 + $0x120] sm:$0xff] }
 0x3e9   : > { %2491 = vrot.lane.b32.xlu2 %v2397_v17, %s5861_s12 }
 0x3ea   : > { %v2334_v4 = vpop.permute.xlu1 %2333 }
 0x3eb   : > { %v2398_v10 = vmul.f32 %v2334_v4, %v7648_v53 }
 0x3ec   : > { %2995 = vmatmul.f32.gmra.mxu2 %v2781_v8  ;;  %v2804_v8 = vld [vmem:[#allocation4 + $0x1a8] sm:$0xff] }
 0x3ed   : > { %2493 = vrot.lane.b32.xlu0 %v2398_v10, %s5861_s12  ;;  %5205 = vmatmul.msk.f32.gmra.mxu3 %vm2837_vm12, %v2792_v60 }
 0x3ee   : > { %v2464_v44 = vpop.permute.xlu0 %2463 }
 0x3ef   : > { %2543 = vst.msk [vmem:[#allocation2 + $0x108] sm:$0xff] %vm700_vm3, %v2464_v44 }
 0x3f0   : > { %2735 = vst.msk [vmem:[#allocation4 + $0x100] sm:$0xff] %vm700_vm3, %v2464_v44 }
 0x3f1   : > { %4056 = vrot.lane.b32.xlu2 %v5560_v14, %s5862_s24 }
 0x3f2   : > { %v2466_v24 = vpop.permute.xlu1 %2465 }
 0x3f3   : > { %2544 = vst.msk [vmem:[#allocation2 + $0x118] sm:$0xff] %vm700_vm3, %v2466_v24 }
 0x3f4   : > { %2736 = vst.msk [vmem:[#allocation4 + $0x110] sm:$0xff] %vm700_vm3, %v2466_v24 }
 0x3f5   : > { %5206 = vmatmul.msk.f32.gmra.mxu3 %vm2837_vm12, %v2794_v46 }
 0x3f6   : > { %v2474_v53 = vpop.permute.xlu2 %2473 }
 0x3f7   : > { %2548 = vst.msk [vmem:[#allocation2 + $0x158] sm:$0xff] %vm700_vm3, %v2474_v53  ;;  %v2783_v6 = vld [vmem:[#allocation4 + $0x100] sm:$0xff] }
 0x3f8   : > { %2740 = vst.msk [vmem:[#allocation4 + $0x150] sm:$0xff] %vm700_vm3, %v2474_v53  ;;  %2998 = vmatmul.f32.gmra.mxu2 %v2783_v6 }
 0x3fa   : > { %v2472_v3 = vpop.permute.xlu1 %2471 }
 0x3fb   : > { %2547 = vst.msk [vmem:[#allocation2 + $0x148] sm:$0xff] %vm700_vm3, %v2472_v3  ;;  %v2785_v20 = vld [vmem:[#allocation4 + $0x110] sm:$0xff] }
 0x3fc   : > { %2739 = vst.msk [vmem:[#allocation4 + $0x140] sm:$0xff] %vm700_vm3, %v2472_v3 }
 0x3fd   : > { %5207 = vmatmul.msk.f32.gmra.mxu3 %vm2837_vm12, %v2796_v2 }
 0x3fe   : > { %v2954_v57 = vpop.f32.mrf.mxu2 }
 0x3ff   : > { %v2955_v63 = vadd.f32 %v7910_v56, %v2954_v57  ;;  %v2470_v36 = vpop.permute.xlu0 %2469  ;;  %v2793_v42 = vld [vmem:[#allocation4 + $0x150] sm:$0xff] }
 0x400   : > { %3001 = vmatmul.f32.gmra.mxu2 %v2785_v20  ;;  %2546 = vst.msk [vmem:[#allocation2 + $0x138] sm:$0xff] %vm700_vm3, %v2470_v36 }
 0x401   : > { %v7943_v40 = vadd.f32 %v3067_v27, %v2955_v63  ;;  %2738 = vst.msk [vmem:[#allocation4 + $0x130] sm:$0xff] %vm700_vm3, %v2470_v36 }
 0x403   : > { %v3161_v30 = vmax.f32 %v7943_v40, 0.0  ;;  %v2791_v47 = vld [vmem:[#allocation4 + $0x140] sm:$0xff] }
 0x405   : > { %5561 = vtanh.f32 %v3161_v30  ;;  %5208 = vmatmul.msk.f32.gmra.mxu3 %vm2837_vm12, %v2798_v41  ;;  %v5218_v23 = vmul.f32 -1.442695, %v3161_v30 }
 0x407   : > { %v2957_v32 = vpop.f32.mrf.mxu2 }
 0x408   : > { %v2958_v50 = vadd.f32 %v7910_v56, %v2957_v32  ;;  %3004 = vmatmul.f32.gmra.mxu2 %v2787_v48  ;;  %v2789_v25 = vld [vmem:[#allocation4 + $0x130] sm:$0xff]  ;;  %v2808_v48 = vld [vmem:[#allocation4 + $0x1c8] sm:$0xff] }
 0x409   : > { %v2478_v38 = vpop.permute.xlu1 %2477 }
 0x40a   : > { %v7951_v55 = vadd.f32 %v3070_v16, %v2958_v50  ;;  %2550 = vst.msk [vmem:[#allocation2 + $0x178] sm:$0xff] %vm700_vm3, %v2478_v38 }
 0x40b   : > { %v5562_v12 = vpop.eup %5561  ;;  %2742 = vst.msk [vmem:[#allocation4 + $0x170] sm:$0xff] %vm700_vm3, %v2478_v38 }
 0x40c   : > { %v3162_v54 = vmax.f32 %v7951_v55, 0.0  ;;  %4058 = vrot.lane.b32.xlu0 %v5562_v12, %s5862_s24 }
 0x40d   : > { %5209 = vmatmul.msk.f32.gmra.mxu3 %vm2837_vm12, %v2800_v29 }
 0x40e   : > { %5563 = vtanh.f32 %v3162_v54  ;;  %v2480_v59 = vpop.permute.xlu2 %2479 }
 0x40f   : > { %v2960_v43 = vpop.f32.mrf.mxu2  ;;  %2551 = vst.msk [vmem:[#allocation2 + $0x188] sm:$0xff] %vm700_vm3, %v2480_v59  ;;  %v3088_v39 = vpop.f32.mrf.mxu3 }
 0x410   : > { %v2961_v5 = vadd.f32 %v7910_v56, %v2960_v43  ;;  %2743 = vst.msk [vmem:[#allocation4 + $0x180] sm:$0xff] %vm700_vm3, %v2480_v59  ;;  %3007 = vmatmul.f32.gmra.mxu2 %v2789_v25  ;;  %v2810_v25 = vld [vmem:[#allocation4 + $0x1d8] sm:$0xff] }
 0x412   : > { %v7963_v7 = vadd.f32 %v3073_v34, %v2961_v5  ;;  %v2797_v34 = vld [vmem:[#allocation4 + $0x170] sm:$0xff] }
 0x414   : > { %v5564_v13 = vpop.eup %5563  ;;  %v3163_v58 = vmax.f32 %v7963_v7, 0.0 }
 0x415   : > { %4060 = vrot.lane.b32.xlu1 %v5564_v13, %s5862_s24  ;;  %5210 = vmatmul.msk.f32.gmra.mxu3 %vm2837_vm12, %v2802_v62 }
 0x416   : > { %5565 = vtanh.f32 %v3163_v58 }
 0x417   : > { %v2963_v19 = vpop.f32.mrf.mxu2  ;;  %v2476_v1 = vpop.permute.xlu0 %2475  ;;  %v2799_v20 = vld [vmem:[#allocation4 + $0x180] sm:$0xff] }
 0x418   : > { %v2964_v11 = vadd.f32 %v7910_v56, %v2963_v19  ;;  %3010 = vmatmul.f32.gmra.mxu2 %v2791_v47  ;;  %2549 = vst.msk [vmem:[#allocation2 + $0x168] sm:$0xff] %vm700_vm3, %v2476_v1  ;;  %v3091_v27 = vpop.f32.mrf.mxu3 }
 0x419   : > { %2741 = vst.msk [vmem:[#allocation4 + $0x160] sm:$0xff] %vm700_vm3, %v2476_v1 }
 0x41a   : > { %v7973_v37 = vadd.f32 %v3076_v31, %v2964_v11  ;;  %v2806_v31 = vld [vmem:[#allocation4 + $0x1b8] sm:$0xff] }
 0x41c   : > { %v5566_v26 = vpop.eup %5565  ;;  %v3164_v15 = vmax.f32 %v7973_v37, 0.0 }
 0x41d   : > { %4062 = vrot.lane.b32.xlu2 %v5566_v26, %s5862_s24  ;;  %5211 = vmatmul.msk.f32.gmra.mxu3 %vm2837_vm12, %v2804_v8  ;;  %v5217_v26 = vmul.f32 -1.442695, %v3160_v21 }
 0x41e   : > { %5567 = vtanh.f32 %v3164_v15 }
 0x41f   : > { %v2966_v9 = vpop.f32.mrf.mxu2 }
 0x420   : > { %v2967_v35 = vadd.f32 %v7910_v56, %v2966_v9  ;;  %3013 = vmatmul.f32.gmra.mxu2 %v2793_v42  ;;  %v2795_v4 = vld [vmem:[#allocation4 + $0x160] sm:$0xff]  ;;  %v3094_v10 = vpop.f32.mrf.mxu3 }
 0x421   : > { %v2484_v51 = vpop.permute.xlu1 %2483 }
 0x422   : > { %v7981_v49 = vadd.f32 %v3079_v0, %v2967_v35  ;;  %2553 = vst.msk [vmem:[#allocation2 + $0x1a8] sm:$0xff] %vm700_vm3, %v2484_v51 }
 0x423   : > { %2745 = vst.msk [vmem:[#allocation4 + $0x1a0] sm:$0xff] %vm700_vm3, %v2484_v51 }
 0x424   : > { %v5568_v22 = vpop.eup %5567  ;;  %v3165_v45 = vmax.f32 %v7981_v49, 0.0 }
 0x425   : > { %4064 = vrot.lane.b32.xlu0 %v5568_v22, %s5862_s24  ;;  %5212 = vmatmul.msk.f32.gmra.mxu3 %vm2837_vm12, %v2806_v31  ;;  %v2814_v22 = vld [vmem:[#allocation4 + $0x1f8] sm:$0xff] }
 0x426   : > { %5569 = vtanh.f32 %v3165_v45  ;;  %v2486_v28 = vpop.permute.xlu2 %2485 }
 0x427   : > { %v2969_v17 = vpop.f32.mrf.mxu2  ;;  %2554 = vst.msk [vmem:[#allocation2 + $0x1b8] sm:$0xff] %vm700_vm3, %v2486_v28 }
 0x428   : > { %v2970_v16 = vadd.f32 %v7910_v56, %v2969_v17  ;;  %2746 = vst.msk [vmem:[#allocation4 + $0x1b0] sm:$0xff] %vm700_vm3, %v2486_v28  ;;  %3016 = vmatmul.f32.gmra.mxu2 %v2795_v4  ;;  %v3097_v3 = vpop.f32.mrf.mxu3 }
 0x42a   : > { %v7993_v61 = vadd.f32 %v3082_v18, %v2970_v16  ;;  %v2803_v19 = vld [vmem:[#allocation4 + $0x1a0] sm:$0xff] }
 0x42c   : > { %v5570_v44 = vpop.eup %5569  ;;  %v3166_v14 = vmax.f32 %v7993_v61, 0.0 }
 0x42d   : > { %4066 = vrot.lane.b32.xlu1 %v5570_v44, %s5862_s24  ;;  %5213 = vmatmul.msk.f32.gmra.mxu3 %vm2837_vm12, %v2808_v48 }
 0x42e   : > { %5571 = vtanh.f32 %v3166_v14 }
 0x42f   : > { %v2972_v24 = vpop.f32.mrf.mxu2  ;;  %v2482_v52 = vpop.permute.xlu0 %2481  ;;  %v2805_v51 = vld [vmem:[#allocation4 + $0x1b0] sm:$0xff] }
 0x430   : > { %v2973_v53 = vadd.f32 %v7910_v56, %v2972_v24  ;;  %3019 = vmatmul.f32.gmra.mxu2 %v2797_v34  ;;  %2552 = vst.msk [vmem:[#allocation2 + $0x198] sm:$0xff] %vm700_vm3, %v2482_v52  ;;  %v3100_v32 = vpop.f32.mrf.mxu3 }
 0x431   : > { %2744 = vst.msk [vmem:[#allocation4 + $0x190] sm:$0xff] %vm700_vm3, %v2482_v52 }
 0x432   : > { %v8003_v6 = vadd.f32 %v3085_v33, %v2973_v53 }
 0x434   : > { %v5572_v60 = vpop.eup %5571  ;;  %v3167_v57 = vmax.f32 %v8003_v6, 0.0 }
 0x435   : > { %4068 = vrot.lane.b32.xlu2 %v5572_v60, %s5862_s24  ;;  %5214 = vmatmul.msk.f32.gmra.mxu3 %vm2837_vm12, %v2810_v25 }
 0x436   : > { %5573 = vtanh.f32 %v3167_v57 }
 0x437   : > { %v2975_v63 = vpop.f32.mrf.mxu2 }
 0x438   : > { %v2976_v36 = vadd.f32 %v7910_v56, %v2975_v63  ;;  %3022 = vmatmul.f32.gmra.mxu2 %v2799_v20  ;;  %v2801_v2 = vld [vmem:[#allocation4 + $0x190] sm:$0xff]  ;;  %v8023_v43 = vpop.f32.mrf.mxu3  ;;  %v5219_v20 = vmul.f32 -1.442695, %v3162_v54 }
 0x439   : > { %v2490_v46 = vpop.permute.xlu1 %2489 }
 0x43a   : > { %v8011_v0 = vadd.f32 %v3088_v39, %v2976_v36  ;;  %2556 = vst.msk [vmem:[#allocation2 + $0x1d8] sm:$0xff] %vm700_vm3, %v2490_v46  ;;  %v2812_v39 = vld [vmem:[#allocation4 + $0x1e8] sm:$0xff] }
 0x43b   : > { %2748 = vst.msk [vmem:[#allocation4 + $0x1d0] sm:$0xff] %vm700_vm3, %v2490_v46 }
 0x43c   : > { %v5574_v50 = vpop.eup %5573  ;;  %v3168_v38 = vmax.f32 %v8011_v0, 0.0 }
 0x43d   : > { %4070 = vrot.lane.b32.xlu0 %v5574_v50, %s5862_s24  ;;  %5215 = vmatmul.msk.f32.gmra.mxu3 %vm2837_vm12, %v2812_v39 }
 0x43e   : > { %5575 = vtanh.f32 %v3168_v38 }
 0x43f   : > { %v2978_v18 = vpop.f32.mrf.mxu2 }
 0x440   : > { %v2979_v12 = vadd.f32 %v7910_v56, %v2978_v18  ;;  %3025 = vmatmul.f32.gmra.mxu2 %v2801_v2  ;;  %v3106_v42 = vpop.f32.mrf.mxu3  ;;  %v5220_v2 = vmul.f32 -1.442695, %v3163_v58 }
 0x442   : > { %v8021_v59 = vadd.f32 %v3091_v27, %v2979_v12 }
 0x443   : > { %v2492_v5 = vpop.permute.xlu2 %2491 }
 0x444   : > { %v5576_v33 = vpop.eup %5575  ;;  %v3169_v41 = vmax.f32 %v8021_v59, 0.0  ;;  %2557 = vst.msk [vmem:[#allocation2 + $0x1e8] sm:$0xff] %vm700_vm3, %v2492_v5 }
 0x445   : > { %2749 = vst.msk [vmem:[#allocation4 + $0x1e0] sm:$0xff] %vm700_vm3, %v2492_v5  ;;  %4072 = vrot.lane.b32.xlu1 %v5576_v33, %s5862_s24  ;;  %5216 = vmatmul.msk.f32.gmra.mxu3 %vm2837_vm12, %v2814_v22 }
 0x446   : > { %5577 = vtanh.f32 %v3169_v41 }
 0x447   : > { %v2981_v13 = vpop.f32.mrf.mxu2  ;;  %v2488_v47 = vpop.permute.xlu0 %2487 }
 0x448   : > { %v2982_v1 = vadd.f32 %v7910_v56, %v2981_v13  ;;  %3028 = vmatmul.f32.gmra.mxu2 %v2803_v19  ;;  %2555 = vst.msk [vmem:[#allocation2 + $0x1c8] sm:$0xff] %vm700_vm3, %v2488_v47  ;;  %v3109_v4 = vpop.f32.mrf.mxu3 }
 0x449   : > { %2747 = vst.msk [vmem:[#allocation4 + $0x1c0] sm:$0xff] %vm700_vm3, %v2488_v47 }
 0x44a   : > { %v8035_v11 = vadd.f32 %v3094_v10, %v2982_v1 }
 0x44c   : > { %v5578_v29 = vpop.eup %5577  ;;  %v3170_v9 = vmax.f32 %v8035_v11, 0.0  ;;  %v2811_v50 = vld [vmem:[#allocation4 + $0x1e0] sm:$0xff] }
 0x44d   : > { %4074 = vrot.lane.b32.xlu2 %v5578_v29, %s5862_s24  ;;  %v5221_v29 = vmul.f32 -1.442695, %v3164_v15 }
 0x44e   : > { %5579 = vtanh.f32 %v3170_v9 }
 0x44f   : > { %v2984_v35 = vpop.f32.mrf.mxu2  ;;  %5581 = vpow2.f32 %v5217_v26 }
 0x450   : > { %v2985_v27 = vadd.f32 %v7910_v56, %v2984_v35  ;;  %3031 = vmatmul.f32.gmra.mxu2 %v2805_v51  ;;  %v2807_v10 = vld [vmem:[#allocation4 + $0x1c0] sm:$0xff]  ;;  %v8064_v52 = vpop.f32.mrf.mxu3 }
 0x452   : > { %v8045_v62 = vadd.f32 %v3097_v3, %v2985_v27  ;;  %v2809_v3 = vld [vmem:[#allocation4 + $0x1d0] sm:$0xff] }
 0x454   : > { %v5580_v21 = vpop.eup %5579  ;;  %v3171_v28 = vmax.f32 %v8045_v62, 0.0 }
 0x455   : > { %4076 = vrot.lane.b32.xlu0 %v5580_v21, %s5862_s24  ;;  %v5582_v17 = vpop.eup %5581 }
 0x456   : > { %5583 = vtanh.f32 %v3171_v28  ;;  %v8055_v40 = vadd.f32 1.0, %v5582_v17 }
 0x457   : > { %5585 = vpow2.f32 %v5218_v23  ;;  %v2987_v16 = vpop.f32.mrf.mxu2 }
 0x458   : > { %v2988_v8 = vadd.f32 %v7910_v56, %v2987_v16  ;;  %3034 = vmatmul.f32.gmra.mxu2 %v2807_v10  ;;  %5587 = vrcp.f32 %v8055_v40  ;;  %v8085_v12 = vpop.f32.mrf.mxu3  ;;  %v3363_v21 = vand.u32 2147483648, %v8055_v40  ;;  %vm3357_vm13 = vweird.f32 %v8055_v40 }
 0x459   : > { %v3361_v15 = vand.u32 2147483647, %v8055_v40 }
 0x45a   : > { %v8057_v30 = vadd.f32 %v3100_v32, %v2988_v8  ;;  %v5222_v8 = vmul.f32 -1.442695, %v3165_v45 }
 0x45b   : > { %vm3362_vm15 = vcmp.eq.f32.partialorder %v3361_v15, 8.507059e+37  ;;  %v5224_v15 = vmul.f32 -1.442695, %v3167_v57 }
 0x45c   : > { %v5584_v44 = vpop.eup %5583  ;;  %v3172_v24 = vmax.f32 %v8057_v30, 0.0 }
 0x45d   : > { %v5586_v34 = vpop.eup %5585  ;;  %4078 = vrot.lane.b32.xlu1 %v5584_v44, %s5862_s24  ;;  %v3364_v44 = vor.u32 1.1754944e-38, %v3363_v21 }
 0x45e   : > { %5589 = vtanh.f32 %v3172_v24  ;;  %v8066_v60 = vadd.f32 1.0, %v5586_v34  ;;  %v5588_v46 = vpop.eup %5587  ;;  %v4057_v34 = vpop.permute.xlu2 %4056 }
 0x45f   : > { %v2990_v53 = vpop.f32.mrf.mxu2  ;;  %v2494_v31 = vpop.permute.xlu0 %2493  ;;  %v3353_v55 = vmul.f32 %v5588_v46, %v8055_v40 }
 0x460   : > { %v2991_v63 = vadd.f32 %v7910_v56, %v2990_v53  ;;  %3037 = vmatmul.f32.gmra.mxu2 %v2809_v3  ;;  %2558 = vst.msk [vmem:[#allocation2 + $0x1f8] sm:$0xff] %vm700_vm3, %v2494_v31  ;;  %5591 = vrcp.f32 %v8066_v60  ;;  %v8105_v22 = vpop.f32.mrf.mxu3  ;;  %vm3372_vm1 = vweird.f32 %v8066_v60 }
 0x461   : > { %2750 = vst.msk [vmem:[#allocation4 + $0x1f0] sm:$0xff] %vm700_vm3, %v2494_v31  ;;  %5593 = vpow2.f32 %v5219_v20  ;;  %v3354_v33 = vsub.f32 1.0, %v3353_v55  ;;  %vm3358_vm3 = vweird.f32 %v5588_v46  ;;  %v3376_v55 = vand.u32 2147483647, %v8066_v60 }
 0x462   : > { %v8074_v36 = vadd.f32 %v8023_v43, %v2991_v63  ;;  %vm3359_vm14 = vmor %vm3357_vm13, %vm3358_vm3 }
 0x463   : > { %v3355_v7 = vmul.f32 %v5588_v46, %v3354_v33  ;;  %v5223_v33 = vmul.f32 -1.442695, %v3166_v14  ;;  %vm3377_vm4 = vcmp.eq.f32.partialorder %v3376_v55, 8.507059e+37 }
 0x464   : > { %v5590_v32 = vpop.eup %5589  ;;  %v3173_v48 = vmax.f32 %v8074_v36, 0.0 }
 0x465   : > { %4080 = vrot.lane.b32.xlu2 %v5590_v32, %s5862_s24  ;;  %v3356_v51 = vadd.f32 %v5588_v46, %v3355_v7 }
 0x466   : > { %5595 = vtanh.f32 %v3173_v48  ;;  %v8087_v43 = vpop.eup %5591 }
 0x467   : > { %v2993_v54 = vpop.f32.mrf.mxu2  ;;  %v5594_v5 = vpop.eup %5593  ;;  %5597 = vpow2.f32 %v5220_v2  ;;  %v3368_v39 = vmul.f32 %v8087_v43, %v8066_v60  ;;  %vm3373_vm0 = vweird.f32 %v8087_v43 }
 0x468   : > { %v2994_v18 = vadd.f32 %v7910_v56, %v2993_v54  ;;  %3040 = vmatmul.f32.gmra.mxu2 %v2811_v50  ;;  %v8093_v47 = vadd.f32 1.0, %v5594_v5  ;;  %v2813_v1 = vld [vmem:[#allocation4 + $0x1f0] sm:$0xff]  ;;  %v8137_v54 = vpop.f32.mrf.mxu3  ;;  %vm3374_vm2 = vmor %vm3372_vm1, %vm3373_vm0 }
 0x469   : > { %v3369_v27 = vsub.f32 1.0, %v3368_v39 }
 0x46a   : > { %v8089_v25 = vadd.f32 %v3106_v42, %v2994_v18  ;;  %vm3387_vm6 = vweird.f32 %v8093_v47 }
 0x46b   : > { %v3370_v16 = vmul.f32 %v8087_v43, %v3369_v27 }
 0x46c   : > { %v5596_v13 = vpop.eup %5595  ;;  %v3174_v19 = vmax.f32 %v8089_v25, 0.0 }
 0x46d   : > { %4082 = vrot.lane.b32.xlu0 %v5596_v13, %s5862_s24  ;;  %v5598_v35 = vpop.eup %5597  ;;  %v3371_v63 = vadd.f32 %v8087_v43, %v3370_v16  ;;  %v3393_v16 = vand.u32 2147483648, %v8093_v47 }
 0x46e   : > { %5599 = vtanh.f32 %v3174_v19  ;;  %v8112_v17 = vadd.f32 1.0, %v5598_v35 }
 0x46f   : > { %v2996_v58 = vpop.f32.mrf.mxu2  ;;  %5601 = vrcp.f32 %v8093_v47  ;;  %v3375_v18 = vsel %vm3374_vm2, %v8087_v43, %v3371_v63 }
 0x470   : > { %v2997_v26 = vadd.f32 %v7910_v56, %v2996_v58  ;;  %3043 = vmatmul.f32.gmra.mxu2 %v2813_v1  ;;  %5603 = vpow2.f32 %v5221_v29  ;;  %vm3402_vm10 = vweird.f32 %v8112_v17 }
 0x472   : > { %v8103_v42 = vadd.f32 %v3109_v4, %v2997_v26  ;;  %v3360_v4 = vsel %vm3359_vm14, %v5588_v46, %v3356_v51  ;;  %v3378_v46 = vand.u32 2147483648, %v8066_v60 }
 0x473   : > { %v8122_v53 = vsel %vm3362_vm15, %v3364_v44, %v3360_v4 }
 0x474   : > { %v5600_v23 = vpop.eup %5599  ;;  %v3175_v37 = vmax.f32 %v8103_v42, 0.0  ;;  %v4152_v3 = vmul.f32 %v4057_v34, %v8122_v53  ;;  %v3379_v7 = vor.u32 1.1754944e-38, %v3378_v46 }
 0x475   : > { %4084 = vrot.lane.b32.xlu1 %v5600_v23, %s5862_s24  ;;  %v8117_v10 = vpop.eup %5601  ;;  %v8168_v23 = vpop.f32.mrf.mxu3 }
 0x476   : > { %5605 = vtanh.f32 %v3175_v37  ;;  %v5604_v40 = vpop.eup %5603  ;;  %v3383_v20 = vmul.f32 %v8117_v10, %v8093_v47  ;;  %vm3388_vm5 = vweird.f32 %v8117_v10 }
 0x477   : > { %5607 = vrcp.f32 %v8112_v17  ;;  %v8131_v32 = vadd.f32 1.0, %v5604_v40  ;;  %vm3389_vm7 = vmor %vm3387_vm6, %vm3388_vm5 }
 0x478   : > { %5609 = vpow2.f32 %v5222_v8  ;;  %v3384_v2 = vsub.f32 1.0, %v3383_v20 }
 0x479   : > { %5611 = vrcp.f32 %v8131_v32  ;;  %vm3417_vm14 = vweird.f32 %v8131_v32 }
 0x47a   : > { %v3385_v14 = vmul.f32 %v8117_v10, %v3384_v2  ;;  %v3408_v2 = vand.u32 2147483648, %v8112_v17 }
 0x47b   : > { %v2999_v31 = vpop.f32.mrf.mxu2 }
 0x47c   : > { %v5606_v49 = vpop.eup %5605  ;;  %v3000_v45 = vadd.f32 %v7910_v56, %v2999_v31  ;;  %v3386_v27 = vadd.f32 %v8117_v10, %v3385_v14 }
 0x47d   : > { %4086 = vrot.lane.b32.xlu2 %v5606_v49, %s5862_s24  ;;  %4216 = vrot.lane.b32.xlu1 %v4152_v3, %s5859_s16  ;;  %v8143_v5 = vpop.eup %5607  ;;  %v3394_v3 = vor.u32 1.1754944e-38, %v3393_v16 }
 0x47e   : > { %v8140_v50 = vadd.f32 %v8064_v52, %v3000_v45  ;;  %v4059_v58 = vpop.permute.xlu0 %4058  ;;  %v5610_v60 = vpop.eup %5609  ;;  %v8151_v52 = vsel %vm3377_vm4, %v3379_v7, %v3375_v18  ;;  %v3398_v43 = vmul.f32 %v8143_v5, %v8112_v17  ;;  %v3390_v57 = vsel %vm3389_vm7, %v8117_v10, %v3386_v27 }
 0x47f   : > { %v4153_v1 = vmul.f32 %v4059_v58, %v8151_v52  ;;  %v8158_v29 = vadd.f32 1.0, %v5610_v60  ;;  %v8164_v35 = vpop.eup %5611  ;;  %vm3403_vm9 = vweird.f32 %v8143_v5  ;;  %v5225_v18 = vmul.f32 -1.442695, %v3168_v38  ;;  %v8206_v7 = vpop.f32.mrf.mxu3 }
 0x480   : > { %v3176_v13 = vmax.f32 %v8140_v50, 0.0  ;;  %v3399_v51 = vsub.f32 1.0, %v3398_v43  ;;  %v3413_v34 = vmul.f32 %v8164_v35, %v8131_v32  ;;  %vm3404_vm11 = vmor %vm3402_vm10, %vm3403_vm9  ;;  %vm3418_vm13 = vweird.f32 %v8164_v35 }
 0x481   : > { %vm3419_vm15 = vmor %vm3417_vm14, %vm3418_vm13  ;;  %vm3432_vm2 = vweird.f32 %v8158_v29 }
 0x482   : > { %5613 = vtanh.f32 %v3176_v13  ;;  %v3400_v6 = vmul.f32 %v8143_v5, %v3399_v51  ;;  %v3414_v46 = vsub.f32 1.0, %v3413_v34 }
 0x483   : > { %v3002_v61 = vpop.f32.mrf.mxu2  ;;  %5615 = vpow2.f32 %v5223_v33 }
 0x484   : > { %v3003_v39 = vadd.f32 %v7910_v56, %v3002_v61  ;;  %5617 = vrcp.f32 %v8158_v29  ;;  %v3401_v10 = vadd.f32 %v8143_v5, %v3400_v6  ;;  %v3415_v60 = vmul.f32 %v8164_v35, %v3414_v46 }
 0x485   : > { %4218 = vrot.lane.b32.xlu2 %v4153_v1, %s5859_s16  ;;  %v4063_v1 = vpop.permute.xlu2 %4062  ;;  %v3423_v6 = vand.u32 2147483648, %v8131_v32 }
 0x486   : > { %v8162_v26 = vadd.f32 %v8085_v12, %v3003_v39  ;;  %v3391_v12 = vand.u32 2147483647, %v8093_v47  ;;  %v3405_v0 = vsel %vm3404_vm11, %v8143_v5, %v3401_v10 }
 0x487   : > { %v4061_v40 = vpop.permute.xlu1 %4060 }
 0x488   : > { %v5614_v21 = vpop.eup %5613  ;;  %v3177_v4 = vmax.f32 %v8162_v26, 0.0  ;;  %vm3392_vm8 = vcmp.eq.f32.partialorder %v3391_v12, 8.507059e+37  ;;  %v5226_v12 = vmul.f32 -1.442695, %v3169_v41 }
 0x489   : > { %4088 = vrot.lane.b32.xlu0 %v5614_v21, %s5862_s24  ;;  %v5616_v8 = vpop.eup %5615  ;;  %v8187_v63 = vsel %vm3392_vm8, %v3394_v3, %v3390_v57  ;;  %v3416_v21 = vadd.f32 %v8164_v35, %v3415_v60 }
 0x48a   : > { %5619 = vtanh.f32 %v3177_v4  ;;  %v8185_v31 = vadd.f32 1.0, %v5616_v8  ;;  %v8192_v49 = vpop.eup %5617  ;;  %v4154_v45 = vmul.f32 %v4061_v40, %v8187_v63  ;;  %v8242_v40 = vpop.f32.mrf.mxu3 }
 0x48b   : > { %v3005_v44 = vpop.f32.mrf.mxu2  ;;  %5621 = vpow2.f32 %v5224_v15  ;;  %v3428_v43 = vmul.f32 %v8192_v49, %v8158_v29  ;;  %v3420_v41 = vsel %vm3419_vm15, %v8164_v35, %v3416_v21  ;;  %vm3433_vm1 = vweird.f32 %v8192_v49 }
 0x48c   : > { %v3006_v47 = vadd.f32 %v7910_v56, %v3005_v44  ;;  %5623 = vrcp.f32 %v8185_v31  ;;  %vm3434_vm4 = vmor %vm3432_vm2, %vm3433_vm1  ;;  %vm3447_vm7 = vweird.f32 %v8185_v31 }
 0x48d   : > { %v3429_v15 = vsub.f32 1.0, %v3428_v43 }
 0x48e   : > { %v8190_v20 = vadd.f32 %v8105_v22, %v3006_v47  ;;  %v3406_v22 = vand.u32 2147483647, %v8112_v17  ;;  %v3409_v17 = vor.u32 1.1754944e-38, %v3408_v2 }
 0x48f   : > { %v3430_v34 = vmul.f32 %v8192_v49, %v3429_v15 }
 0x490   : > { %v5620_v55 = vpop.eup %5619  ;;  %v3178_v33 = vmax.f32 %v8190_v20, 0.0  ;;  %vm3407_vm3 = vcmp.eq.f32.partialorder %v3406_v22, 8.507059e+37 }
 0x491   : > { %4090 = vrot.lane.b32.xlu1 %v5620_v55, %s5862_s24  ;;  %4220 = vrot.lane.b32.xlu0 %v4154_v45, %s5859_s16  ;;  %v5622_v58 = vpop.eup %5621  ;;  %v8217_v39 = vsel %vm3407_vm3, %v3409_v17, %v3405_v0  ;;  %v3431_v2 = vadd.f32 %v8192_v49, %v3430_v34 }
 0x492   : > { %5625 = vtanh.f32 %v3178_v33  ;;  %v8215_v14 = vadd.f32 1.0, %v5622_v58  ;;  %v8222_v5 = vpop.eup %5623  ;;  %v4155_v27 = vmul.f32 %v4063_v1, %v8217_v39  ;;  %v5227_v58 = vmul.f32 -1.442695, %v3170_v9  ;;  %v8275_v21 = vpop.f32.mrf.mxu3 }
 0x493   : > { %v3008_v38 = vpop.f32.mrf.mxu2  ;;  %5627 = vpow2.f32 %v5225_v18  ;;  %v3443_v59 = vmul.f32 %v8222_v5, %v8185_v31  ;;  %v3435_v9 = vsel %vm3434_vm4, %v8192_v49, %v3431_v2  ;;  %vm3448_vm6 = vweird.f32 %v8222_v5 }
 0x494   : > { %v3009_v61 = vadd.f32 %v7910_v56, %v3008_v38  ;;  %5629 = vrcp.f32 %v8215_v14  ;;  %v3438_v38 = vand.u32 2147483648, %v8158_v29  ;;  %vm3449_vm8 = vmor %vm3447_vm7, %vm3448_vm6  ;;  %vm3462_vm11 = vweird.f32 %v8215_v14 }
 0x495   : > { %v3444_v35 = vsub.f32 1.0, %v3443_v59  ;;  %v5228_v59 = vmul.f32 -1.442695, %v3171_v28  ;;  %v5235_v26 = vmul.f32 -1.442695, %v3178_v33 }
 0x496   : > { %v8220_v51 = vadd.f32 %v8137_v54, %v3009_v61  ;;  %v3421_v54 = vand.u32 2147483647, %v8131_v32  ;;  %v3424_v32 = vor.u32 1.1754944e-38, %v3423_v6 }
 0x497   : > { %v4065_v3 = vpop.permute.xlu0 %4064  ;;  %v3445_v11 = vmul.f32 %v8222_v5, %v3444_v35 }
 0x498   : > { %v5626_v16 = vpop.eup %5625  ;;  %v3179_v8 = vmax.f32 %v8220_v51, 0.0  ;;  %vm3422_vm0 = vcmp.eq.f32.partialorder %v3421_v54, 8.507059e+37 }
 0x499   : > { %4222 = vrot.lane.b32.xlu1 %v4155_v27, %s5859_s16  ;;  %4092 = vrot.lane.b32.xlu2 %v5626_v16, %s5862_s24  ;;  %v5628_v57 = vpop.eup %5627  ;;  %v8247_v45 = vsel %vm3422_vm0, %v3424_v32, %v3420_v41  ;;  %v3453_v41 = vand.u32 2147483648, %v8185_v31 }
 0x49a   : > { %5631 = vtanh.f32 %v3179_v8  ;;  %v8245_v10 = vadd.f32 1.0, %v5628_v57  ;;  %v8252_v55 = vpop.eup %5629  ;;  %v4156_v18 = vmul.f32 %v4065_v3, %v8247_v45 }
 0x49b   : > { %v3011_v44 = vpop.f32.mrf.mxu2  ;;  %5633 = vpow2.f32 %v5226_v12  ;;  %v3458_v17 = vmul.f32 %v8252_v55, %v8215_v14  ;;  %v3446_v12 = vadd.f32 %v8222_v5, %v3445_v11  ;;  %vm3463_vm10 = vweird.f32 %v8252_v55 }
 0x49c   : > { %v3012_v47 = vadd.f32 %v7910_v56, %v3011_v44  ;;  %5635 = vrcp.f32 %v8245_v10  ;;  %vm3464_vm3 = vmor %vm3462_vm11, %vm3463_vm10  ;;  %vm3477_vm15 = vweird.f32 %v8245_v10 }
 0x49d   : > { %v3459_v54 = vsub.f32 1.0, %v3458_v17  ;;  %v3450_v62 = vsel %vm3449_vm8, %v8222_v5, %v3446_v12  ;;  %v8333_v12 = vld [vmem:[%s9610_s4] ss:$0 sm:$0xff] }
 0x49e   : > { %v8250_v46 = vadd.f32 %v8168_v23, %v3012_v47  ;;  %v3436_v23 = vand.u32 2147483647, %v8158_v29  ;;  %v3439_v29 = vor.u32 1.1754944e-38, %v3438_v38  ;;  %v3454_v47 = vor.u32 1.1754944e-38, %v3453_v41 }
 0x49f   : > { %v4067_v1 = vpop.permute.xlu1 %4066  ;;  %v3460_v32 = vmul.f32 %v8252_v55, %v3459_v54 }
 0x4a0   : > { %v5632_v22 = vpop.eup %5631  ;;  %v3180_v0 = vmax.f32 %v8250_v46, 0.0  ;;  %vm3437_vm5 = vcmp.eq.f32.partialorder %v3436_v23, 8.507059e+37 }
 0x4a1   : > { %4094 = vrot.lane.b32.xlu0 %v5632_v22, %s5862_s24  ;;  %4224 = vrot.lane.b32.xlu2 %v4156_v18, %s5859_s16  ;;  %v5634_v60 = vpop.eup %5633  ;;  %v8277_v15 = vsel %vm3437_vm5, %v3439_v29, %v3435_v9  ;;  %v3461_v38 = vadd.f32 %v8252_v55, %v3460_v32 }
 0x4a2   : > { %5637 = vtanh.f32 %v3180_v0  ;;  %v8273_v27 = vadd.f32 1.0, %v5634_v60  ;;  %v8282_v49 = vpop.eup %5635  ;;  %v4157_v6 = vmul.f32 %v4067_v1, %v8277_v15  ;;  %v3136_v60 = vpop.f32.mrf.mxu3 }
 0x4a3   : > { %v3014_v43 = vpop.f32.mrf.mxu2  ;;  %5639 = vpow2.f32 %v5227_v58  ;;  %v3473_v3 = vmul.f32 %v8282_v49, %v8245_v10  ;;  %vm3478_vm14 = vweird.f32 %v8282_v49 }
 0x4a4   : > { %v3015_v61 = vadd.f32 %v7910_v56, %v3014_v43  ;;  %5641 = vrcp.f32 %v8273_v27  ;;  %v3468_v43 = vand.u32 2147483648, %v8215_v14  ;;  %vm3479_vm0 = vmor %vm3477_vm15, %vm3478_vm14  ;;  %vm3492_vm4 = vweird.f32 %v8273_v27 }
 0x4a5   : > { %v3474_v23 = vsub.f32 1.0, %v3473_v3  ;;  %v3483_v3 = vand.u32 2147483648, %v8245_v10 }
 0x4a6   : > { %v8280_v16 = vadd.f32 %v8206_v7, %v3015_v61  ;;  %v3451_v7 = vand.u32 2147483647, %v8185_v31  ;;  %v4069_v31 = vpop.permute.xlu2 %4068  ;;  %v3469_v61 = vor.u32 1.1754944e-38, %v3468_v43 }
 0x4a7   : > { %v3475_v29 = vmul.f32 %v8282_v49, %v3474_v23 }
 0x4a8   : > { %v5638_v57 = vpop.eup %5637  ;;  %v3181_v44 = vmax.f32 %v8280_v16, 0.0  ;;  %vm3452_vm9 = vcmp.eq.f32.partialorder %v3451_v7, 8.507059e+37 }
 0x4a9   : > { %4096 = vrot.lane.b32.xlu1 %v5638_v57, %s5862_s24  ;;  %4226 = vrot.lane.b32.xlu0 %v4157_v6, %s5859_s16  ;;  %v5640_v34 = vpop.eup %5639  ;;  %v8305_v2 = vsel %vm3452_vm9, %v3454_v47, %v3450_v62 }
 0x4aa   : > { %5643 = vtanh.f32 %v3181_v44  ;;  %v8303_v18 = vadd.f32 1.0, %v5640_v34  ;;  %v8310_v5 = vpop.eup %5641  ;;  %v4158_v58 = vmul.f32 %v4069_v31, %v8305_v2  ;;  %v3476_v34 = vadd.f32 %v8282_v49, %v3475_v29  ;;  %v3139_v47 = vpop.f32.mrf.mxu3 }
 0x4ab   : > { %v3017_v28 = vpop.f32.mrf.mxu2  ;;  %5645 = vpow2.f32 %v5228_v59  ;;  %v3488_v30 = vmul.f32 %v8310_v5, %v8273_v27  ;;  %vm3493_vm2 = vweird.f32 %v8310_v5  ;;  %v3498_v29 = vand.u32 2147483648, %v8273_v27 }
 0x4ac   : > { %v3018_v35 = vadd.f32 %v7910_v56, %v3017_v28  ;;  %v5229_v56 = vmul.f32 -1.442695, %v3172_v24  ;;  %5647 = vrcp.f32 %v8303_v18  ;;  %v3465_v24 = vsel %vm3464_vm3, %v8252_v55, %v3461_v38  ;;  %vm3494_vm5 = vmor %vm3492_vm4, %vm3493_vm2 }
 0x4ad   : > { %v3489_v41 = vsub.f32 1.0, %v3488_v30  ;;  %v5230_v28 = vmul.f32 -1.442695, %v3173_v48  ;;  %v3480_v48 = vsel %vm3479_vm0, %v8282_v49, %v3476_v34  ;;  %v3484_v38 = vor.u32 1.1754944e-38, %v3483_v3 }
 0x4ae   : > { %v8308_v22 = vadd.f32 %v8242_v40, %v3018_v35  ;;  %v3466_v40 = vand.u32 2147483647, %v8215_v14  ;;  %v4075_v34 = vpop.permute.xlu2 %4074  ;;  %vm3507_vm8 = vweird.f32 %v8303_v18 }
 0x4af   : > { %v4071_v14 = vpop.permute.xlu0 %4070  ;;  %v3490_v36 = vmul.f32 %v8310_v5, %v3489_v41 }
 0x4b0   : > { %v5644_v11 = vpop.eup %5643  ;;  %v3182_v9 = vmax.f32 %v8308_v22, 0.0  ;;  %vm3467_vm13 = vcmp.eq.f32.partialorder %v3466_v40, 8.507059e+37 }
 0x4b1   : > { %4228 = vrot.lane.b32.xlu1 %v4158_v58, %s5859_s16  ;;  %4098 = vrot.lane.b32.xlu2 %v5644_v11, %s5862_s24  ;;  %v5646_v17 = vpop.eup %5645  ;;  %v8338_v57 = vsel %vm3467_vm13, %v3469_v61, %v3465_v24  ;;  %v3491_v49 = vadd.f32 %v8310_v5, %v3490_v36 }
 0x4b2   : > { %5649 = vtanh.f32 %v3182_v9  ;;  %v8336_v54 = vadd.f32 1.0, %v5646_v17  ;;  %v8343_v59 = vpop.eup %5647  ;;  %v4159_v7 = vmul.f32 %v4071_v14, %v8338_v57  ;;  %v3142_v41 = vpop.f32.mrf.mxu3 }
 0x4b3   : > { %v3020_v1 = vpop.f32.mrf.mxu2  ;;  %5651 = vpow2.f32 %v5229_v56  ;;  %v3503_v58 = vmul.f32 %v8343_v59, %v8303_v18  ;;  %v3495_v25 = vsel %vm3494_vm5, %v8310_v5, %v3491_v49  ;;  %vm3508_vm7 = vweird.f32 %v8343_v59 }
 0x4b4   : > { %v3021_v6 = vadd.f32 %v8333_v12, %v3020_v1  ;;  %5653 = vrcp.f32 %v8336_v54  ;;  %v5231_v1 = vmul.f32 -1.442695, %v3174_v19  ;;  %vm3509_vm9 = vmor %vm3507_vm8, %vm3508_vm7  ;;  %vm3522_vm3 = vweird.f32 %v8336_v54 }
 0x4b5   : > { %v3504_v30 = vsub.f32 1.0, %v3503_v58  ;;  %v5232_v58 = vmul.f32 -1.442695, %v3175_v37 }
 0x4b6   : > { %v8341_v55 = vadd.f32 %v8275_v21, %v3021_v6  ;;  %v3481_v21 = vand.u32 2147483647, %v8245_v10 }
 0x4b7   : > { %v4073_v10 = vpop.permute.xlu1 %4072  ;;  %v3505_v6 = vmul.f32 %v8343_v59, %v3504_v30 }
 0x4b8   : > { %v5650_v62 = vpop.eup %5649  ;;  %v3183_v32 = vmax.f32 %v8341_v55, 0.0  ;;  %vm3482_vm1 = vcmp.eq.f32.partialorder %v3481_v21, 8.507059e+37 }
 0x4b9   : > { %4100 = vrot.lane.b32.xlu0 %v5650_v62, %s5862_s24  ;;  %4230 = vrot.lane.b32.xlu2 %v4159_v7, %s5859_s16  ;;  %v5652_v31 = vpop.eup %5651  ;;  %v8366_v56 = vsel %vm3482_vm1, %v3484_v38, %v3480_v48  ;;  %v3506_v36 = vadd.f32 %v8343_v59, %v3505_v6  ;;  %v3513_v38 = vand.u32 2147483648, %v8303_v18 }
 0x4ba   : > { %5655 = vtanh.f32 %v3183_v32  ;;  %v8364_v11 = vadd.f32 1.0, %v5652_v31  ;;  %v8370_v40 = vpop.eup %5653  ;;  %v4160_v17 = vmul.f32 %v4073_v10, %v8366_v56 }
 0x4bb   : > { %v3023_v35 = vpop.f32.mrf.mxu2  ;;  %5657 = vpow2.f32 %v5230_v28  ;;  %v3518_v7 = vmul.f32 %v8370_v40, %v8336_v54  ;;  %v3510_v37 = vsel %vm3509_vm9, %v8343_v59, %v3506_v36  ;;  %v3514_v30 = vor.u32 1.1754944e-38, %v3513_v38 }
 0x4bc   : > { %v3024_v23 = vadd.f32 %v8333_v12, %v3023_v35  ;;  %5659 = vrcp.f32 %v8364_v11  ;;  %vm3523_vm11 = vweird.f32 %v8370_v40  ;;  %vm3537_vm0 = vweird.f32 %v8364_v11 }
 0x4bd   : > { %v3519_v48 = vsub.f32 1.0, %v3518_v7  ;;  %vm3524_vm13 = vmor %vm3522_vm3, %vm3523_vm11 }
 0x4be   : > { %v8368_v43 = vadd.f32 %v3136_v60, %v3024_v23  ;;  %v3496_v60 = vand.u32 2147483647, %v8273_v27  ;;  %v3499_v27 = vor.u32 1.1754944e-38, %v3498_v29  ;;  %v3145_v29 = vpop.f32.mrf.mxu3 }
 0x4c0   : > { %v5656_v24 = vpop.eup %5655  ;;  %v3184_v61 = vmax.f32 %v8368_v43, 0.0  ;;  %vm3497_vm6 = vcmp.eq.f32.partialorder %v3496_v60, 8.507059e+37 }
 0x4c1   : > { %4102 = vrot.lane.b32.xlu1 %v5656_v24, %s5862_s24  ;;  %4232 = vrot.lane.b32.xlu0 %v4160_v17, %s5859_s16  ;;  %v5658_v14 = vpop.eup %5657  ;;  %v8393_v3 = vsel %vm3497_vm6, %v3499_v27, %v3495_v25  ;;  %v3520_v17 = vmul.f32 %v8370_v40, %v3519_v48 }
 0x4c2   : > { %5661 = vtanh.f32 %v3184_v61  ;;  %v8391_v28 = vadd.f32 1.0, %v5658_v14  ;;  %v8397_v5 = vpop.eup %5659  ;;  %v4161_v31 = vmul.f32 %v4075_v34, %v8393_v3  ;;  %v3528_v34 = vand.u32 2147483648, %v8336_v54 }
 0x4c3   : > { %v3026_v19 = vpop.f32.mrf.mxu2  ;;  %5663 = vpow2.f32 %v5231_v1  ;;  %v3533_v42 = vmul.f32 %v8397_v5, %v8364_v11  ;;  %v3521_v6 = vadd.f32 %v8370_v40, %v3520_v17  ;;  %vm3538_vm15 = vweird.f32 %v8397_v5 }
 0x4c4   : > { %v3027_v62 = vadd.f32 %v8333_v12, %v3026_v19  ;;  %5665 = vrcp.f32 %v8391_v28  ;;  %v3529_v38 = vor.u32 1.1754944e-38, %v3528_v34  ;;  %vm3539_vm1 = vmor %vm3537_vm0, %vm3538_vm15  ;;  %vm3552_vm5 = vweird.f32 %v8391_v28 }
 0x4c5   : > { %v3534_v19 = vsub.f32 1.0, %v3533_v42  ;;  %v3525_v48 = vsel %vm3524_vm13, %v8370_v40, %v3521_v6 }
 0x4c6   : > { %v8395_v21 = vadd.f32 %v3139_v47, %v3027_v62  ;;  %v3511_v47 = vand.u32 2147483647, %v8303_v18 }
 0x4c7   : > { %v4077_v18 = vpop.permute.xlu0 %4076  ;;  %v3535_v36 = vmul.f32 %v8397_v5, %v3534_v19 }
 0x4c8   : > { %v5662_v35 = vpop.eup %5661  ;;  %v3185_v10 = vmax.f32 %v8395_v21, 0.0  ;;  %vm3512_vm10 = vcmp.eq.f32.partialorder %v3511_v47, 8.507059e+37 }
 0x4c9   : > { %4234 = vrot.lane.b32.xlu1 %v4161_v31, %s5859_s16  ;;  %4104 = vrot.lane.b32.xlu2 %v5662_v35, %s5862_s24  ;;  %v5664_v23 = vpop.eup %5663  ;;  %v8420_v60 = vsel %vm3512_vm10, %v3514_v30, %v3510_v37  ;;  %v5233_v31 = vmul.f32 -1.442695, %v3176_v13  ;;  %v3536_v40 = vadd.f32 %v8397_v5, %v3535_v36 }
 0x4ca   : > { %5667 = vtanh.f32 %v3185_v10  ;;  %v8418_v1 = vadd.f32 1.0, %v5664_v23  ;;  %v8424_v25 = vpop.eup %5665  ;;  %v4162_v59 = vmul.f32 %v4077_v18, %v8420_v60  ;;  %v3543_v18 = vand.u32 2147483648, %v8364_v11 }
 0x4cb   : > { %v3029_v49 = vpop.f32.mrf.mxu2  ;;  %5669 = vpow2.f32 %v5232_v58  ;;  %v3540_v19 = vsel %vm3539_vm1, %v8397_v5, %v3536_v40  ;;  %vm3553_vm4 = vweird.f32 %v8424_v25  ;;  %v3558_v40 = vand.u32 2147483648, %v8391_v28 }
 0x4cc   : > { %v3030_v24 = vadd.f32 %v8333_v12, %v3029_v49  ;;  %5671 = vrcp.f32 %v8418_v1  ;;  %v3148_v49 = vpop.f32.mrf.mxu3  ;;  %vm3554_vm6 = vmor %vm3552_vm5, %vm3553_vm4  ;;  %vm3567_vm9 = vweird.f32 %v8418_v1 }
 0x4ce   : > { %v8422_v14 = vadd.f32 %v3142_v41, %v3030_v24  ;;  %v3526_v41 = vand.u32 2147483647, %v8336_v54  ;;  %v3548_v54 = vmul.f32 %v8424_v25, %v8391_v28 }
 0x4cf   : > { %v4079_v58 = vpop.permute.xlu1 %4078 }
 0x4d0   : > { %v5668_v7 = vpop.eup %5667  ;;  %v3186_v27 = vmax.f32 %v8422_v14, 0.0  ;;  %vm3527_vm14 = vcmp.eq.f32.partialorder %v3526_v41, 8.507059e+37  ;;  %v3549_v17 = vsub.f32 1.0, %v3548_v54  ;;  %v3544_v41 = vor.u32 1.1754944e-38, %v3543_v18 }
 0x4d1   : > { %4106 = vrot.lane.b32.xlu0 %v5668_v7, %s5862_s24  ;;  %4236 = vrot.lane.b32.xlu2 %v4162_v59, %s5859_s16  ;;  %v5670_v62 = vpop.eup %5669  ;;  %v8447_v50 = vsel %vm3527_vm14, %v3529_v38, %v3525_v48 }
 0x4d2   : > { %5673 = vtanh.f32 %v3186_v27  ;;  %v8445_v23 = vadd.f32 1.0, %v5670_v62  ;;  %v8451_v42 = vpop.eup %5671  ;;  %v4163_v37 = vmul.f32 %v4079_v58, %v8447_v50  ;;  %v3550_v6 = vmul.f32 %v8424_v25, %v3549_v17  ;;  %v4081_v62 = vpop.permute.xlu2 %4080 }
 0x4d3   : > { %v3032_v35 = vpop.f32.mrf.mxu2  ;;  %5675 = vpow2.f32 %v5233_v31  ;;  %v3563_v7 = vmul.f32 %v8451_v42, %v8418_v1  ;;  %v5234_v31 = vmul.f32 -1.442695, %v3177_v4  ;;  %vm3568_vm8 = vweird.f32 %v8451_v42 }
 0x4d4   : > { %v3033_v47 = vadd.f32 %v8333_v12, %v3032_v35  ;;  %5677 = vrcp.f32 %v8445_v23  ;;  %v3551_v58 = vadd.f32 %v8424_v25, %v3550_v6  ;;  %vm3569_vm10 = vmor %vm3567_vm9, %vm3568_vm8  ;;  %vm3582_vm13 = vweird.f32 %v8445_v23 }
 0x4d5   : > { %v3564_v38 = vsub.f32 1.0, %v3563_v7 }
 0x4d6   : > { %v8449_v13 = vadd.f32 %v3145_v29, %v3033_v47  ;;  %v3541_v29 = vand.u32 2147483647, %v8364_v11  ;;  %v3555_v33 = vsel %vm3554_vm6, %v8424_v25, %v3551_v58  ;;  %v3571_v58 = vand.u32 2147483647, %v8418_v1 }
 0x4d8   : > { %v5674_v30 = vpop.eup %5673  ;;  %v3187_v24 = vmax.f32 %v8449_v13, 0.0  ;;  %vm3542_vm2 = vcmp.eq.f32.partialorder %v3541_v29, 8.507059e+37  ;;  %vm3572_vm11 = vcmp.eq.f32.partialorder %v3571_v58, 8.507059e+37 }
 0x4d9   : > { %4108 = vrot.lane.b32.xlu1 %v5674_v30, %s5862_s24  ;;  %4238 = vrot.lane.b32.xlu0 %v4163_v37, %s5859_s16  ;;  %v5676_v34 = vpop.eup %5675  ;;  %v8472_v36 = vsel %vm3542_vm2, %v3544_v41, %v3540_v19  ;;  %v3556_v37 = vand.u32 2147483647, %v8391_v28  ;;  %v3565_v28 = vmul.f32 %v8451_v42, %v3564_v38  ;;  %v3559_v30 = vor.u32 1.1754944e-38, %v3558_v40 }
 0x4da   : > { %5679 = vtanh.f32 %v3187_v24  ;;  %v8477_v5 = vpop.eup %5677  ;;  %v8479_v35 = vadd.f32 1.0, %v5676_v34  ;;  %v4164_v54 = vmul.f32 %v4081_v62, %v8472_v36 }
 0x4db   : > { %v3035_v59 = vpop.f32.mrf.mxu2  ;;  %5681 = vpow2.f32 %v5234_v31  ;;  %v3578_v20 = vmul.f32 %v8477_v5, %v8445_v23  ;;  %vm3557_vm7 = vcmp.eq.f32.partialorder %v3556_v37, 8.507059e+37  ;;  %v3566_v41 = vadd.f32 %v8451_v42, %v3565_v28 }
 0x4dc   : > { %v3036_v11 = vadd.f32 %v8333_v12, %v3035_v59  ;;  %v8501_v19 = vsel %vm3557_vm7, %v3559_v30, %v3555_v33  ;;  %vm3583_vm3 = vweird.f32 %v8477_v5  ;;  %vm3597_vm1 = vweird.f32 %v8479_v35 }
 0x4dd   : > { %v3579_v7 = vsub.f32 1.0, %v3578_v20  ;;  %v3570_v40 = vsel %vm3569_vm10, %v8451_v42, %v3566_v41  ;;  %v3586_v41 = vand.u32 2147483647, %v8445_v23  ;;  %vm3584_vm14 = vmor %vm3582_vm13, %vm3583_vm3  ;;  %v3601_v46 = vand.u32 2147483647, %v8479_v35 }
 0x4de   : > { %v8474_v48 = vadd.f32 %v3148_v49, %v3036_v11  ;;  %v3151_v49 = vpop.f32.mrf.mxu3  ;;  %v3573_v11 = vand.u32 2147483648, %v8418_v1 }
 0x4df   : > { %v4083_v18 = vpop.permute.xlu0 %4082  ;;  %vm3587_vm15 = vcmp.eq.f32.partialorder %v3586_v41, 8.507059e+37  ;;  %vm3602_vm4 = vcmp.eq.f32.partialorder %v3601_v46, 8.507059e+37  ;;  %v9764_v46 = vld [vmem:[#allocation17_spill] sm:$0xff] }
 0x4e0   : > { %v5680_v47 = vpop.eup %5679  ;;  %v3188_v4 = vmax.f32 %v8474_v48, 0.0  ;;  %v4165_v34 = vmul.f32 %v4083_v18, %v8501_v19  ;;  %v3574_v1 = vor.u32 1.1754944e-38, %v3573_v11  ;;  %v3994_v22 = vmul.f32 %v9764_v46, %v8187_v63 }
 0x4e1   : > { %4240 = vrot.lane.b32.xlu1 %v4164_v54, %s5859_s16  ;;  %4110 = vrot.lane.b32.xlu2 %v5680_v47, %s5862_s24  ;;  %v5682_v6 = vpop.eup %5681  ;;  %v5236_v47 = vmul.f32 -1.442695, %v3179_v8 }
 0x4e2   : > { %5683 = vtanh.f32 %v3188_v4  ;;  %v8522_v20 = vadd.f32 1.0, %v5682_v6  ;;  %v8529_v8 = vsel %vm3572_vm11, %v3574_v1, %v3570_v40  ;;  %v4087_v6 = vpop.permute.xlu2 %4086 }
 0x4e3   : > { %5685 = vrcp.f32 %v8479_v35  ;;  %v3038_v17 = vpop.f32.mrf.mxu2 }
 0x4e4   : > { %5687 = vpow2.f32 %v5235_v26  ;;  %v3039_v29 = vadd.f32 %v8333_v12, %v3038_v17  ;;  %v3580_v26 = vmul.f32 %v8477_v5, %v3579_v7  ;;  %vm3612_vm7 = vweird.f32 %v8522_v20 }
 0x4e6   : > { %v8503_v59 = vadd.f32 %v3151_v49, %v3039_v29  ;;  %v3154_v49 = vpop.f32.mrf.mxu3  ;;  %v3581_v42 = vadd.f32 %v8477_v5, %v3580_v26  ;;  %v3588_v29 = vand.u32 2147483648, %v8445_v23 }
 0x4e7   : > { %v4085_v54 = vpop.permute.xlu1 %4084 }
 0x4e8   : > { %v5684_v25 = vpop.eup %5683  ;;  %v3189_v62 = vmax.f32 %v8503_v59, 0.0  ;;  %v4166_v30 = vmul.f32 %v4085_v54, %v8529_v8 }
 0x4e9   : > { %v8510_v31 = vpop.eup %5685  ;;  %4112 = vrot.lane.b32.xlu0 %v5684_v25, %s5862_s24  ;;  %4242 = vrot.lane.b32.xlu2 %v4165_v34, %s5859_s16  ;;  %v3585_v25 = vsel %vm3584_vm14, %v8477_v5, %v3581_v42 }
 0x4ea   : > { %v5688_v38 = vpop.eup %5687  ;;  %5689 = vtanh.f32 %v3189_v62  ;;  %v3593_v17 = vmul.f32 %v8510_v31, %v8479_v35  ;;  %vm3598_vm0 = vweird.f32 %v8510_v31 }
 0x4eb   : > { %v3041_v37 = vpop.f32.mrf.mxu2  ;;  %v8527_v51 = vadd.f32 1.0, %v5688_v38  ;;  %5691 = vpow2.f32 %v5236_v47  ;;  %v3589_v38 = vor.u32 1.1754944e-38, %v3588_v29  ;;  %v9762_v47 = vld [vmem:[#allocation26_spill] sm:$0xff]  ;;  %vm3599_vm2 = vmor %vm3597_vm1, %vm3598_vm0 }
 0x4ec   : > { %v3042_v33 = vadd.f32 %v8333_v12, %v3041_v37  ;;  %5693 = vrcp.f32 %v8522_v20  ;;  %v3594_v34 = vsub.f32 1.0, %v3593_v17  ;;  %v3992_v26 = vmul.f32 %v9762_v47, %v8122_v53 }
 0x4ed   : > { %5695 = vrcp.f32 %v8527_v51  ;;  %v8552_v37 = vsel %vm3587_vm15, %v3589_v38, %v3585_v25  ;;  %vm3627_vm8 = vweird.f32 %v8527_v51 }
 0x4ee   : > { %v8531_v28 = vadd.f32 %v3154_v49, %v3042_v33  ;;  %v3595_v40 = vmul.f32 %v8510_v31, %v3594_v34  ;;  %v4167_v17 = vmul.f32 %v4087_v6, %v8552_v37  ;;  %v3157_v42 = vpop.f32.mrf.mxu3  ;;  %v5238_v34 = vmul.f32 -1.442695, %v3181_v44  ;;  %v4219_v6 = vpop.permute.xlu2 %4218 }
 0x4ef   : > { %v4217_v11 = vpop.permute.xlu1 %4216 }
 0x4f0   : > { %v5690_v18 = vpop.eup %5689  ;;  %v3190_v7 = vmax.f32 %v8531_v28, 0.0  ;;  %v4312_v49 = vadd.f32 %v4217_v11, %v3992_v26  ;;  %v3596_v29 = vadd.f32 %v8510_v31, %v3595_v40  ;;  %v9777_v28 = vld [vmem:[#allocation36_spill] sm:$0xff] }
 0x4f1   : > { %4114 = vrot.lane.b32.xlu1 %v5690_v18, %s5862_s24  ;;  %4244 = vrot.lane.b32.xlu0 %v4166_v30, %s5859_s16  ;;  %v5692_v58 = vpop.eup %5691  ;;  %v5237_v18 = vmul.f32 -1.442695, %v3180_v0  ;;  %v9763_v0 = vld [vmem:[#allocation27_spill] sm:$0xff] }
 0x4f2   : > { %5697 = vtanh.f32 %v3190_v7  ;;  %v8550_v23 = vpop.eup %5693  ;;  %v8557_v5 = vadd.f32 1.0, %v5692_v58  ;;  %v3993_v16 = vmul.f32 %v9763_v0, %v8151_v52 }
 0x4f3   : > { %v3044_v54 = vpop.f32.mrf.mxu2  ;;  %v8555_v33 = vpop.eup %5695  ;;  %5699 = vtanh.f32 %v4312_v49  ;;  %v3608_v11 = vmul.f32 %v8550_v23, %v8522_v20  ;;  %vm3613_vm5 = vweird.f32 %v8550_v23 }
 0x4f4   : > { %v3045_v1 = vadd.f32 %v8333_v12, %v3044_v54  ;;  %v3603_v12 = vand.u32 2147483648, %v8479_v35  ;;  %5701 = vrcp.f32 %v8557_v5  ;;  %v3623_v44 = vmul.f32 %v8555_v33, %v8527_v51  ;;  %vm8619_vm9 = vmor %vm3612_vm7, %vm3613_vm5 }
 0x4f5   : > { %5703 = vpow2.f32 %v5237_v18  ;;  %v3600_v54 = vsel %vm3599_vm2, %v8510_v31, %v3596_v29  ;;  %v4313_v35 = vadd.f32 %v4219_v6, %v3993_v16  ;;  %v3609_v40 = vsub.f32 1.0, %v3608_v11 }
 0x4f6   : > { %v8569_v41 = vadd.f32 %v3157_v42, %v3045_v1  ;;  %5705 = vpow2.f32 %v5238_v34  ;;  %v3604_v58 = vor.u32 1.1754944e-38, %v3603_v12  ;;  %v3624_v47 = vsub.f32 1.0, %v3623_v44 }
 0x4f7   : > { %5707 = vtanh.f32 %v4313_v35  ;;  %v5239_v42 = vmul.f32 -1.442695, %v3182_v9  ;;  %v3610_v29 = vmul.f32 %v8550_v23, %v3609_v40  ;;  %vm3628_vm6 = vweird.f32 %v8555_v33 }
 0x4f8   : > { %v5698_v30 = vpop.eup %5697  ;;  %v3191_v38 = vmax.f32 %v8569_v41, 0.0  ;;  %v8585_v26 = vsel %vm3602_vm4, %v3604_v58, %v3600_v54  ;;  %v3625_v18 = vmul.f32 %v8555_v33, %v3624_v47  ;;  %v3633_v54 = vand.u32 2147483648, %v8527_v51  ;;  %vm3629_vm10 = vmor %vm3627_vm8, %vm3628_vm6 }
 0x4f9   : > { %4246 = vrot.lane.b32.xlu1 %v4167_v17, %s5859_s16  ;;  %4804 = vrot.lane.b32.xlu0 %v4312_v49, %s5863_s25  ;;  %v5700_v49 = vpop.eup %5699  ;;  %v3611_v44 = vadd.f32 %v8550_v23, %v3610_v29  ;;  %v3618_v58 = vand.u32 2147483648, %v8522_v20  ;;  %v3631_v40 = vand.u32 2147483647, %v8527_v51  ;;  %vm3642_vm14 = vweird.f32 %v8557_v5 }
 0x4fa   : > { %4116 = vrot.lane.b32.xlu2 %v5698_v30, %s5862_s24  ;;  %v8588_v17 = vpop.eup %5701  ;;  %5709 = vtanh.f32 %v3191_v38  ;;  %v3626_v16 = vadd.f32 %v8555_v33, %v3625_v18  ;;  %v3646_v55 = vand.u32 2147483647, %v8557_v5 }
 0x4fb   : > { %v4089_v25 = vpop.permute.xlu0 %4088  ;;  %v5704_v31 = vpop.eup %5703  ;;  %v3638_v12 = vmul.f32 %v8588_v17, %v8557_v5  ;;  %5711 = vpow2.f32 %v5239_v42  ;;  %v3615_v42 = vsel %vm8619_vm9, %v8550_v23, %v3611_v44  ;;  %v3619_v18 = vor.u32 1.1754944e-38, %v3618_v58 }
 0x4fc   : > { %v4168_v1 = vmul.f32 %v4089_v25, %v8585_v26  ;;  %v5706_v30 = vpop.eup %5705  ;;  %v8601_v6 = vadd.f32 1.0, %v5704_v31  ;;  %v3616_v31 = vand.u32 2147483647, %v8522_v20  ;;  %v3630_v51 = vsel %vm3629_vm10, %v8555_v33, %v3626_v16 }
 0x4fd   : > { %v8605_v9 = vadd.f32 1.0, %v5706_v30  ;;  %v5708_v0 = vpop.eup %5707  ;;  %v3639_v47 = vsub.f32 1.0, %v3638_v12  ;;  %v3634_v20 = vor.u32 1.1754944e-38, %v3633_v54  ;;  %vm3632_vm11 = vcmp.eq.f32.partialorder %v3631_v40, 8.507059e+37 }
 0x4fe   : > { %5713 = vrcp.f32 %v8601_v6  ;;  %vm3617_vm3 = vcmp.eq.f32.partialorder %v3616_v31, 8.507059e+37  ;;  %v5240_v16 = vmul.f32 -1.442695, %v3183_v32  ;;  %vm3643_vm13 = vweird.f32 %v8588_v17  ;;  %v9767_v32 = vld [vmem:[#allocation30_spill] sm:$0xff] }
 0x4ff   : > { %5715 = vrcp.f32 %v8605_v9  ;;  %v3640_v29 = vmul.f32 %v8588_v17, %v3639_v47  ;;  %v8637_v12 = vsel %vm3617_vm3, %v3619_v18, %v3615_v42  ;;  %v3648_v54 = vand.u32 2147483648, %v8557_v5  ;;  %vm3644_vm15 = vmor %vm3642_vm14, %vm3643_vm13 }
 0x500   : > { %v5710_v11 = vpop.eup %5709  ;;  %v3996_v58 = vmul.f32 %v9767_v32, %v8247_v45  ;;  %vm3647_vm0 = vcmp.eq.f32.partialorder %v3646_v55, 8.507059e+37  ;;  %v9769_v55 = vld [vmem:[#allocation20_spill] sm:$0xff]  ;;  %vm3657_vm4 = vweird.f32 %v8601_v6  ;;  %vm3672_vm5 = vweird.f32 %v8605_v9 }
 0x501   : > { %4408 = vrot.lane.b32.xlu0 %v5700_v49, %s5859_s16  ;;  %4806 = vrot.lane.b32.xlu1 %v4313_v35, %s5863_s25  ;;  %v4093_v35 = vpop.permute.xlu2 %4092  ;;  %v5712_v30 = vpop.eup %5711  ;;  %v3641_v44 = vadd.f32 %v8588_v17, %v3640_v29  ;;  %v3997_v32 = vmul.f32 %v9769_v55, %v8277_v15  ;;  %v5243_v55 = vmul.f32 -1.442695, %v3186_v27  ;;  %v9772_v27 = vld [vmem:[#allocation33_spill] sm:$0xff] }
 0x502   : > { %4248 = vrot.lane.b32.xlu2 %v4168_v1, %s5859_s16 }
 0x503   : > { %v4221_v34 = vpop.permute.xlu0 %4220  ;;  %v4091_v49 = vpop.permute.xlu1 %4090  ;;  %v3645_v5 = vsel %vm3644_vm15, %v8588_v17, %v3641_v44  ;;  %v5242_v17 = vmul.f32 -1.442695, %v3185_v10 }
 0x504   : > { %v4314_v25 = vadd.f32 %v4221_v34, %v3994_v22  ;;  %v8635_v34 = vsel %vm3632_vm11, %v3634_v20, %v3630_v51  ;;  %v8639_v46 = vpop.eup %5713  ;;  %v8641_v22 = vadd.f32 1.0, %v5712_v30  ;;  %v4169_v23 = vmul.f32 %v4091_v49, %v8637_v12  ;;  %v9768_v49 = vld [vmem:[#allocation29_spill] sm:$0xff] }
 0x505   : > { %v4170_v33 = vmul.f32 %v4093_v35, %v8635_v34  ;;  %v3653_v40 = vmul.f32 %v8639_v46, %v8601_v6  ;;  %v3995_v1 = vmul.f32 %v9768_v49, %v8217_v39  ;;  %v3649_v51 = vor.u32 1.1754944e-38, %v3648_v54 }
 0x506   : > { %5717 = vtanh.f32 %v4314_v25  ;;  %vm3658_vm1 = vweird.f32 %v8639_v46  ;;  %v3678_v49 = vand.u32 2147483648, %v8605_v9  ;;  %vm3687_vm11 = vweird.f32 %v8641_v22 }
 0x507   : > { %5719 = vrcp.f32 %v8641_v22  ;;  %v8669_v20 = vsel %vm3647_vm0, %v3649_v51, %v3645_v5  ;;  %v3654_v18 = vsub.f32 1.0, %v3653_v40  ;;  %vm8701_vm6 = vmor %vm3657_vm4, %vm3658_vm1  ;;  %v3691_v14 = vand.u32 2147483647, %v8641_v22 }
 0x508   : > { %5721 = vpow2.f32 %v5240_v16 }
 0x509   : > { %4118 = vrot.lane.b32.xlu0 %v5710_v11, %s5862_s24  ;;  %4410 = vrot.lane.b32.xlu1 %v5708_v0, %s5859_s16  ;;  %v8645_v0 = vpop.eup %5715  ;;  %v5241_v11 = vmul.f32 -1.442695, %v3184_v61  ;;  %v4225_v35 = vpop.permute.xlu2 %4224  ;;  %vm3692_vm13 = vcmp.eq.f32.partialorder %v3691_v14, 8.507059e+37 }
 0x50a   : > { %4808 = vrot.lane.b32.xlu2 %v4314_v25, %s5863_s25  ;;  %v3668_v61 = vmul.f32 %v8645_v0, %v8605_v9  ;;  %v4316_v31 = vadd.f32 %v4225_v35, %v3996_v58  ;;  %vm3673_vm2 = vweird.f32 %v8645_v0 }
 0x50b   : > { %v4223_v43 = vpop.permute.xlu1 %4222  ;;  %5723 = vpow2.f32 %v5241_v11  ;;  %vm3674_vm7 = vmor %vm3672_vm5, %vm3673_vm2 }
 0x50c   : > { %v5718_v25 = vpop.eup %5717  ;;  %v4315_v42 = vadd.f32 %v4223_v43, %v3995_v1  ;;  %v3669_v30 = vsub.f32 1.0, %v3668_v61  ;;  %5725 = vtanh.f32 %v4316_v31  ;;  %v3663_v1 = vand.u32 2147483648, %v8601_v6 }
 0x50e   : > { %5727 = vtanh.f32 %v4315_v42  ;;  %v3670_v44 = vmul.f32 %v8645_v0, %v3669_v30  ;;  %v3661_v30 = vand.u32 2147483647, %v8601_v6  ;;  %v3679_v6 = vor.u32 1.1754944e-38, %v3678_v49 }
 0x50f   : > { %5729 = vpow2.f32 %v5242_v17 }
 0x510   : > { %v3671_v43 = vadd.f32 %v8645_v0, %v3670_v44  ;;  %vm3662_vm9 = vcmp.eq.f32.partialorder %v3661_v30, 8.507059e+37 }
 0x511   : > { %4250 = vrot.lane.b32.xlu0 %v4169_v23, %s5859_s16  ;;  %4252 = vrot.lane.b32.xlu1 %v4170_v33, %s5859_s16  ;;  %v8672_v33 = vpop.eup %5719  ;;  %v4099_v21 = vpop.permute.xlu2 %4098 }
 0x512   : > { %4412 = vrot.lane.b32.xlu2 %v5718_v25, %s5859_s16  ;;  %v5722_v23 = vpop.eup %5721  ;;  %v3655_v25 = vmul.f32 %v8639_v46, %v3654_v18  ;;  %v3683_v54 = vmul.f32 %v8672_v33, %v8641_v22  ;;  %vm3688_vm10 = vweird.f32 %v8672_v33 }
 0x513   : > { %v4095_v47 = vpop.permute.xlu0 %4094  ;;  %v5724_v16 = vpop.eup %5723  ;;  %v8683_v35 = vadd.f32 1.0, %v5722_v23  ;;  %v3664_v23 = vor.u32 1.1754944e-38, %v3663_v1  ;;  %vm3689_vm3 = vmor %vm3687_vm11, %vm3688_vm10  ;;  %v9773_v1 = vld [vmem:[#allocation32_spill] sm:$0xff] }
 0x514   : > { %v4171_v29 = vmul.f32 %v4095_v47, %v8669_v20  ;;  %v8687_v58 = vadd.f32 1.0, %v5724_v16  ;;  %v5726_v10 = vpop.eup %5725  ;;  %v3656_v61 = vadd.f32 %v8639_v46, %v3655_v25  ;;  %v3684_v5 = vsub.f32 1.0, %v3683_v54 }
 0x515   : > { %v5728_v40 = vpop.eup %5727  ;;  %5731 = vrcp.f32 %v8683_v35  ;;  %vm3702_vm0 = vweird.f32 %v8683_v35 }
 0x516   : > { %5733 = vrcp.f32 %v8687_v58  ;;  %v3660_v18 = vsel %vm8701_vm6, %v8639_v46, %v3656_v61  ;;  %v3685_v17 = vmul.f32 %v8672_v33, %v3684_v5  ;;  %v5244_v61 = vmul.f32 -1.442695, %v3187_v24 }
 0x517   : > { %v8719_v44 = vsel %vm3662_vm9, %v3664_v23, %v3660_v18  ;;  %v3998_v5 = vmul.f32 %v9773_v1, %v8305_v2  ;;  %vm3717_vm1 = vweird.f32 %v8687_v58  ;;  %v3721_v1 = vand.u32 2147483647, %v8687_v58 }
 0x519   : > { %4810 = vrot.lane.b32.xlu0 %v4315_v42, %s5863_s25  ;;  %4812 = vrot.lane.b32.xlu1 %v4316_v31, %s5863_s25  ;;  %v3676_v31 = vand.u32 2147483647, %v8605_v9  ;;  %v3675_v9 = vsel %vm3674_vm7, %v8645_v0, %v3671_v43  ;;  %vm3722_vm5 = vcmp.eq.f32.partialorder %v3721_v1, 8.507059e+37 }
 0x51a   : > { %4254 = vrot.lane.b32.xlu2 %v4171_v29, %s5859_s16  ;;  %v5730_v29 = vpop.eup %5729 }
 0x51b   : > { %v4227_v11 = vpop.permute.xlu0 %4226  ;;  %v4097_v51 = vpop.permute.xlu1 %4096  ;;  %vm3677_vm8 = vcmp.eq.f32.partialorder %v3676_v31, 8.507059e+37 }
 0x51c   : > { %v4317_v47 = vadd.f32 %v4227_v11, %v3997_v32  ;;  %v8717_v16 = vsel %vm3677_vm8, %v3679_v6, %v3675_v9  ;;  %v8721_v25 = vpop.eup %5731  ;;  %v8723_v11 = vadd.f32 1.0, %v5730_v29  ;;  %v4172_v46 = vmul.f32 %v4097_v51, %v8719_v44  ;;  %v4231_v32 = vpop.permute.xlu2 %4230 }
 0x51d   : > { %v4173_v0 = vmul.f32 %v4099_v21, %v8717_v16  ;;  %v8727_v54 = vpop.eup %5733  ;;  %v3693_v21 = vand.u32 2147483648, %v8641_v22  ;;  %v3698_v49 = vmul.f32 %v8721_v25, %v8683_v35  ;;  %vm3703_vm14 = vweird.f32 %v8721_v25 }
 0x51e   : > { %5735 = vtanh.f32 %v4317_v47  ;;  %v3713_v13 = vmul.f32 %v8727_v54, %v8687_v58  ;;  %vm3718_vm15 = vweird.f32 %v8727_v54  ;;  %vm8783_vm2 = vmor %vm3702_vm0, %vm3703_vm14  ;;  %vm3732_vm8 = vweird.f32 %v8723_v11 }
 0x51f   : > { %5737 = vrcp.f32 %v8723_v11  ;;  %v3694_v51 = vor.u32 1.1754944e-38, %v3693_v21  ;;  %v3699_v18 = vsub.f32 1.0, %v3698_v49  ;;  %vm3719_vm4 = vmor %vm3717_vm1, %vm3718_vm15 }
 0x520   : > { %5739 = vpow2.f32 %v5243_v55  ;;  %v3714_v30 = vsub.f32 1.0, %v3713_v13  ;;  %v3723_v13 = vand.u32 2147483648, %v8687_v58 }
 0x521   : > { %4414 = vrot.lane.b32.xlu0 %v5728_v40, %s5859_s16  ;;  %4416 = vrot.lane.b32.xlu1 %v5726_v10, %s5859_s16  ;;  %v3686_v10 = vadd.f32 %v8672_v33, %v3685_v17  ;;  %5741 = vpow2.f32 %v5244_v61  ;;  %v5245_v17 = vmul.f32 -1.442695, %v3188_v4  ;;  %v3700_v55 = vmul.f32 %v8721_v25, %v3699_v18  ;;  %v9774_v61 = vld [vmem:[#allocation23_spill] sm:$0xff] }
 0x522   : > { %4814 = vrot.lane.b32.xlu2 %v4317_v47, %s5863_s25  ;;  %v3999_v47 = vmul.f32 %v9772_v27, %v8338_v57  ;;  %v4000_v21 = vmul.f32 %v9774_v61, %v8366_v56  ;;  %v3738_v61 = vand.u32 2147483648, %v8723_v11 }
 0x523   : > { %v4229_v40 = vpop.permute.xlu1 %4228  ;;  %v3690_v22 = vsel %vm3689_vm3, %v8672_v33, %v3686_v10  ;;  %v3701_v27 = vadd.f32 %v8721_v25, %v3700_v55 }
 0x524   : > { %v5736_v43 = vpop.eup %5735  ;;  %v4319_v31 = vadd.f32 %v4231_v32, %v3999_v47  ;;  %v4318_v42 = vadd.f32 %v4229_v40, %v3998_v5  ;;  %v8751_v9 = vsel %vm3692_vm13, %v3694_v51, %v3690_v22  ;;  %v4105_v29 = vpop.permute.xlu2 %4104 }
 0x525   : > { %v8754_v23 = vpop.eup %5737 }
 0x526   : > { %5743 = vtanh.f32 %v4319_v31  ;;  %v5740_v33 = vpop.eup %5739  ;;  %v3728_v10 = vmul.f32 %v8754_v23, %v8723_v11  ;;  %vm3733_vm7 = vweird.f32 %v8754_v23 }
 0x527   : > { %5745 = vtanh.f32 %v4318_v42  ;;  %vm3734_vm9 = vmor %vm3732_vm8, %vm3733_vm7 }
 0x528   : > { %5747 = vpow2.f32 %v5245_v17  ;;  %v3729_v49 = vsub.f32 1.0, %v3728_v10 }
 0x529   : > { %4256 = vrot.lane.b32.xlu0 %v4172_v46, %s5859_s16  ;;  %4258 = vrot.lane.b32.xlu1 %v4173_v0, %s5859_s16  ;;  %v5742_v0 = vpop.eup %5741  ;;  %v3715_v46 = vmul.f32 %v8727_v54, %v3714_v30  ;;  %v3724_v30 = vor.u32 1.1754944e-38, %v3723_v13 }
 0x52a   : > { %4418 = vrot.lane.b32.xlu2 %v5736_v43, %s5859_s16  ;;  %v8765_v43 = vadd.f32 1.0, %v5740_v33  ;;  %v8769_v14 = vadd.f32 1.0, %v5742_v0  ;;  %v5246_v33 = vmul.f32 -1.442695, %v3189_v62  ;;  %v5247_v62 = vmul.f32 -1.442695, %v3190_v7 }
 0x52b   : > { %v4101_v24 = vpop.permute.xlu0 %4100  ;;  %v3716_v4 = vadd.f32 %v8727_v54, %v3715_v46  ;;  %v4002_v7 = vmul.f32 %v9777_v28, %v8420_v60 }
 0x52c   : > { %v4174_v6 = vmul.f32 %v4101_v24, %v8751_v9  ;;  %v5744_v48 = vpop.eup %5743  ;;  %v3708_v24 = vand.u32 2147483648, %v8683_v35  ;;  %5749 = vrcp.f32 %v8765_v43  ;;  %v4237_v51 = vpop.permute.xlu2 %4236  ;;  %vm3747_vm11 = vweird.f32 %v8765_v43 }
 0x52d   : > { %v5746_v40 = vpop.eup %5745  ;;  %5751 = vrcp.f32 %v8769_v14  ;;  %v3720_v58 = vsel %vm3719_vm4, %v8727_v54, %v3716_v4  ;;  %v3768_v41 = vand.u32 2147483648, %v8769_v14  ;;  %vm3762_vm14 = vweird.f32 %v8769_v14 }
 0x52e   : > { %v3709_v18 = vor.u32 1.1754944e-38, %v3708_v24  ;;  %v8801_v17 = vsel %vm3722_vm5, %v3724_v30, %v3720_v58  ;;  %v4322_v24 = vadd.f32 %v4237_v51, %v4002_v7 }
 0x531   : > { %4816 = vrot.lane.b32.xlu0 %v4318_v42, %s5863_s25  ;;  %4818 = vrot.lane.b32.xlu1 %v4319_v31, %s5863_s25  ;;  %v3706_v31 = vand.u32 2147483647, %v8683_v35  ;;  %v3705_v42 = vsel %vm8783_vm2, %v8721_v25, %v3701_v27  ;;  %v5748_v35 = vpop.eup %5747  ;;  %v4176_v25 = vmul.f32 %v4105_v29, %v8801_v17 }
 0x532   : > { %4260 = vrot.lane.b32.xlu2 %v4174_v6, %s5859_s16  ;;  %v3730_v6 = vmul.f32 %v8754_v23, %v3729_v49  ;;  %v8805_v54 = vpop.eup %5749  ;;  %v8807_v46 = vadd.f32 1.0, %v5748_v35  ;;  %v3739_v49 = vor.u32 1.1754944e-38, %v3738_v61 }
 0x533   : > { %v4233_v32 = vpop.permute.xlu0 %4232  ;;  %v4103_v5 = vpop.permute.xlu1 %4102  ;;  %vm3707_vm6 = vcmp.eq.f32.partialorder %v3706_v31, 8.507059e+37  ;;  %vm3748_vm3 = vweird.f32 %v8805_v54 }
 0x534   : > { %v4320_v47 = vadd.f32 %v4233_v32, %v4000_v21  ;;  %v8803_v0 = vsel %vm3707_vm6, %v3709_v18, %v3705_v42  ;;  %v8811_v32 = vpop.eup %5751  ;;  %v3731_v10 = vadd.f32 %v8754_v23, %v3730_v6  ;;  %v3736_v21 = vand.u32 2147483647, %v8723_v11  ;;  %vm8873_vm15 = vmor %vm3747_vm11, %vm3748_vm3 }
 0x535   : > { %v4175_v55 = vmul.f32 %v4103_v5, %v8803_v0  ;;  %v3758_v4 = vmul.f32 %v8811_v32, %v8769_v14  ;;  %vm3763_vm13 = vweird.f32 %v8811_v32  ;;  %vm3777_vm5 = vweird.f32 %v8807_v46 }
 0x536   : > { %5753 = vtanh.f32 %v4320_v47  ;;  %v3735_v11 = vsel %vm3734_vm9, %v8754_v23, %v3731_v10  ;;  %vm3737_vm10 = vcmp.eq.f32.partialorder %v3736_v21, 8.507059e+37  ;;  %v9779_v10 = vld [vmem:[#allocation28_spill] sm:$0xff]  ;;  %vm3764_vm0 = vmor %vm3762_vm14, %vm3763_vm13 }
 0x537   : > { %5755 = vpow2.f32 %v5246_v33  ;;  %v3759_v5 = vsub.f32 1.0, %v3758_v4  ;;  %v8837_v22 = vsel %vm3737_vm10, %v3739_v49, %v3735_v11 }
 0x538   : > { %5757 = vrcp.f32 %v8807_v46 }
 0x539   : > { %4420 = vrot.lane.b32.xlu0 %v5746_v40, %s5859_s16  ;;  %4422 = vrot.lane.b32.xlu1 %v5744_v48, %s5859_s16  ;;  %v9778_v40 = vld [vmem:[#allocation35_spill] sm:$0xff]  ;;  %5759 = vpow2.f32 %v5247_v62  ;;  %v3760_v51 = vmul.f32 %v8811_v32, %v3759_v5 }
 0x53a   : > { %4820 = vrot.lane.b32.xlu2 %v4320_v47, %s5863_s25  ;;  %v3743_v47 = vmul.f32 %v8805_v54, %v8765_v43  ;;  %v4001_v13 = vmul.f32 %v9778_v40, %v8393_v3  ;;  %5761 = vtanh.f32 %v4322_v24 }
 0x53b   : > { %v8820_v29 = vpop.permute.xlu2 %4110  ;;  %v4235_v48 = vpop.permute.xlu1 %4234  ;;  %v3761_v21 = vadd.f32 %v8811_v32, %v3760_v51 }
 0x53c   : > { %v5754_v59 = vpop.eup %5753  ;;  %v4321_v1 = vadd.f32 %v4235_v48, %v4001_v13  ;;  %v3744_v31 = vsub.f32 1.0, %v3743_v47  ;;  %v3751_v13 = vand.u32 2147483647, %v8765_v43 }
 0x53d   : > { %v5756_v58 = vpop.eup %5755 }
 0x53e   : > { %v8840_v35 = vpop.eup %5757  ;;  %5763 = vtanh.f32 %v4321_v1  ;;  %v3745_v30 = vmul.f32 %v8805_v54, %v3744_v31  ;;  %v8847_v18 = vadd.f32 1.0, %v5756_v58  ;;  %vm3752_vm2 = vcmp.eq.f32.partialorder %v3751_v13, 8.507059e+37 }
 0x53f   : > { %v5760_v23 = vpop.eup %5759  ;;  %vm3778_vm4 = vweird.f32 %v8840_v35 }
 0x540   : > { %v8857_v62 = vadd.f32 1.0, %v5760_v23  ;;  %v5762_v61 = vpop.eup %5761  ;;  %v3746_v28 = vadd.f32 %v8805_v54, %v3745_v30  ;;  %5765 = vrcp.f32 %v8847_v18  ;;  %vm3779_vm6 = vmor %vm3777_vm5, %vm3778_vm4  ;;  %vm3792_vm10 = vweird.f32 %v8847_v18 }
 0x541   : > { %4262 = vrot.lane.b32.xlu0 %v4175_v55, %s5859_s16  ;;  %4264 = vrot.lane.b32.xlu1 %v4176_v25, %s5859_s16  ;;  %v3773_v25 = vmul.f32 %v8840_v35, %v8807_v46  ;;  %v5248_v55 = vmul.f32 -1.442695, %v3191_v38  ;;  %v3753_v38 = vand.u32 2147483648, %v8765_v43 }
 0x542   : > { %4424 = vrot.lane.b32.xlu2 %v5754_v59, %s5859_s16  ;;  %v4003_v59 = vmul.f32 %v9779_v10, %v8447_v50  ;;  %v3750_v11 = vsel %vm8873_vm15, %v8805_v54, %v3746_v28  ;;  %vm3807_vm11 = vweird.f32 %v8857_v62 }
 0x543   : > { %v4107_v27 = vpop.permute.xlu0 %4106  ;;  %v8849_v6 = vpop.permute.xlu2 %4242  ;;  %v3774_v4 = vsub.f32 1.0, %v3773_v25  ;;  %5767 = vpow2.f32 %v5248_v55  ;;  %v3754_v43 = vor.u32 1.1754944e-38, %v3753_v38  ;;  %v9782_v55 = vld [vmem:[#allocation39_spill] sm:$0xff] }
 0x544   : > { %v4177_v42 = vmul.f32 %v4107_v27, %v8837_v22  ;;  %v5764_v48 = vpop.eup %5763  ;;  %v3766_v27 = vand.u32 2147483647, %v8769_v14  ;;  %5769 = vrcp.f32 %v8857_v62  ;;  %v3765_v14 = vsel %vm3764_vm0, %v8811_v32, %v3761_v21 }
 0x545   : > { %v8895_v58 = vsel %vm3752_vm2, %v3754_v43, %v3750_v11  ;;  %v4005_v10 = vmul.f32 %v9782_v55, %v8501_v19  ;;  %v3813_v55 = vand.u32 2147483648, %v8857_v62 }
 0x546   : > { %vm3767_vm1 = vcmp.eq.f32.partialorder %v3766_v27, 8.507059e+37  ;;  %v8891_v5 = vpop.eup %5765 }
 0x547   : > { %v3788_v28 = vmul.f32 %v8891_v5, %v8847_v18  ;;  %v4325_v38 = vadd.f32 %v8849_v6, %v4005_v10  ;;  %vm3793_vm8 = vweird.f32 %v8891_v5  ;;  %v3798_v10 = vand.u32 2147483648, %v8847_v18 }
 0x548   : > { %vm8952_vm3 = vmor %vm3792_vm10, %vm3793_vm8 }
 0x549   : > { %4822 = vrot.lane.b32.xlu0 %v4321_v1, %s5863_s25  ;;  %4824 = vrot.lane.b32.xlu1 %v4322_v24, %s5863_s25  ;;  %v3769_v24 = vor.u32 1.1754944e-38, %v3768_v41  ;;  %v3775_v1 = vmul.f32 %v8840_v35, %v3774_v4  ;;  %v5768_v32 = vpop.eup %5767  ;;  %v3789_v13 = vsub.f32 1.0, %v3788_v28  ;;  %v3796_v28 = vand.u32 2147483647, %v8847_v18 }
 0x54a   : > { %4266 = vrot.lane.b32.xlu2 %v4177_v42, %s5859_s16  ;;  %v8900_v23 = vpop.eup %5769  ;;  %v8910_v25 = vadd.f32 1.0, %v5768_v32  ;;  %v9784_v32 = vld [vmem:[#allocation31_spill] sm:$0xff] }
 0x54b   : > { %v4239_v33 = vpop.permute.xlu0 %4238  ;;  %v4109_v47 = vpop.permute.xlu1 %4108  ;;  %v8893_v31 = vsel %vm3767_vm1, %v3769_v24, %v3765_v14  ;;  %v3776_v51 = vadd.f32 %v8840_v35, %v3775_v1  ;;  %v3790_v11 = vmul.f32 %v8891_v5, %v3789_v13  ;;  %vm3808_vm9 = vweird.f32 %v8900_v23 }
 0x54c   : > { %v4323_v7 = vadd.f32 %v4239_v33, %v4003_v59  ;;  %v4179_v42 = vmul.f32 %v8820_v29, %v8893_v31  ;;  %v4178_v54 = vmul.f32 %v4109_v47, %v8895_v58  ;;  %v3783_v33 = vand.u32 2147483648, %v8807_v46  ;;  %vm3809_vm13 = vmor %vm3807_vm11, %vm3808_vm9 }
 0x54d   : > { %v3781_v29 = vand.u32 2147483647, %v8807_v46  ;;  %v3780_v46 = vsel %vm3779_vm6, %v8840_v35, %v3776_v51  ;;  %vm3797_vm15 = vcmp.eq.f32.partialorder %v3796_v28, 8.507059e+37  ;;  %vm3822_vm1 = vweird.f32 %v8910_v25 }
 0x54e   : > { %5771 = vtanh.f32 %v4323_v7  ;;  %v3784_v4 = vor.u32 1.1754944e-38, %v3783_v33 }
 0x54f   : > { %vm3782_vm7 = vcmp.eq.f32.partialorder %v3781_v29, 8.507059e+37  ;;  %5773 = vrcp.f32 %v8910_v25 }
 0x550   : > { %v8925_v40 = vsel %vm3782_vm7, %v3784_v4, %v3780_v46  ;;  %5775 = vtanh.f32 %v4325_v38  ;;  %v3799_v4 = vor.u32 1.1754944e-38, %v3798_v10  ;;  %v9789_v10 = vld [vmem:[#allocation57_spill] sm:$0xff] }
 0x551   : > { %4426 = vrot.lane.b32.xlu0 %v5764_v48, %s5859_s16  ;;  %4428 = vrot.lane.b32.xlu1 %v5762_v61, %s5859_s16  ;;  %v3803_v61 = vmul.f32 %v8900_v23, %v8857_v62 }
 0x552   : > { %4826 = vrot.lane.b32.xlu2 %v4323_v7, %s5863_s25  ;;  %v9783_v7 = vld [vmem:[#allocation38_spill] sm:$0xff] }
 0x553   : > { %v4241_v59 = vpop.permute.xlu1 %4240  ;;  %v4004_v48 = vmul.f32 %v9783_v7, %v8472_v36  ;;  %v3804_v47 = vsub.f32 1.0, %v3803_v61  ;;  %v3811_v61 = vand.u32 2147483647, %v8857_v62 }
 0x554   : > { %v8888_v49 = vpop.permute.xlu2 %4116  ;;  %v5772_v30 = vpop.eup %5771 }
 0x555   : > { %v4324_v27 = vadd.f32 %v4241_v59, %v4004_v48  ;;  %v3805_v35 = vmul.f32 %v8900_v23, %v3804_v47  ;;  %v8935_v1 = vpop.eup %5773  ;;  %vm3812_vm14 = vcmp.eq.f32.partialorder %v3811_v61, 8.507059e+37 }
 0x556   : > { %v3818_v59 = vmul.f32 %v8935_v1, %v8910_v25  ;;  %vm3823_vm0 = vweird.f32 %v8935_v1 }
 0x557   : > { %5777 = vtanh.f32 %v4324_v27  ;;  %v3806_v51 = vadd.f32 %v8900_v23, %v3805_v35  ;;  %vm3824_vm2 = vmor %vm3822_vm1, %vm3823_vm0 }
 0x559   : > { %4268 = vrot.lane.b32.xlu0 %v4178_v54, %s5859_s16  ;;  %4270 = vrot.lane.b32.xlu1 %v4179_v42, %s5859_s16  ;;  %v4006_v42 = vmul.f32 %v9784_v32, %v8529_v8  ;;  %v5776_v54 = vpop.eup %5775  ;;  %v3810_v7 = vsel %vm3809_vm13, %v8900_v23, %v3806_v51  ;;  %v9787_v32 = vld [vmem:[#allocation40_spill] sm:$0xff]  ;;  %v3828_v51 = vand.u32 2147483648, %v8910_v25 }
 0x55a   : > { %4430 = vrot.lane.b32.xlu2 %v5772_v30, %s5859_s16  ;;  %v3791_v30 = vadd.f32 %v8891_v5, %v3790_v11 }
 0x55b   : > { %v4113_v21 = vpop.permute.xlu0 %4112 }
 0x55c   : > { %v8920_v41 = vpop.permute.xlu2 %4248  ;;  %v4180_v14 = vmul.f32 %v4113_v21, %v8925_v40  ;;  %v3795_v48 = vsel %vm8952_vm3, %v8891_v5, %v3791_v30 }
 0x55d   : > { %v5778_v29 = vpop.eup %5777  ;;  %v8970_v23 = vsel %vm3797_vm15, %v3799_v4, %v3795_v48 }
 0x561   : > { %4828 = vrot.lane.b32.xlu0 %v4324_v27, %s5863_s25  ;;  %4830 = vrot.lane.b32.xlu1 %v4325_v38, %s5863_s25  ;;  %v3814_v38 = vor.u32 1.1754944e-38, %v3813_v55  ;;  %v3819_v27 = vsub.f32 1.0, %v3818_v59  ;;  %v3826_v55 = vand.u32 2147483647, %v8910_v25 }
 0x562   : > { %4272 = vrot.lane.b32.xlu2 %v4180_v14, %s5859_s16 }
 0x563   : > { %v4115_v6 = vpop.permute.xlu1 %4114  ;;  %v4245_v24 = vpop.permute.xlu0 %4244  ;;  %v8968_v47 = vsel %vm3812_vm14, %v3814_v38, %v3810_v7  ;;  %v3820_v14 = vmul.f32 %v8935_v1, %v3819_v27  ;;  %vm3827_vm4 = vcmp.eq.f32.partialorder %v3826_v55, 8.507059e+37  ;;  %v9790_v38 = vld [vmem:[#allocation41_spill] sm:$0xff] }
 0x564   : > { %v8933_v43 = vpop.permute.xlu2 %4808  ;;  %v4326_v33 = vadd.f32 %v4245_v24, %v4006_v42  ;;  %v4182_v5 = vmul.f32 %v8888_v49, %v8968_v47  ;;  %v4181_v13 = vmul.f32 %v4115_v6, %v8970_v23  ;;  %v4007_v42 = vmul.f32 %v9787_v32, %v8552_v37 }
 0x565   : > { %4902 = vst.msk [vmem:[#allocation5 + $0x10] sm:$0xff] %vm2837_vm12, %v8933_v43 }
 0x566   : > { %5779 = vtanh.f32 %v4326_v33 }
 0x569   : > { %4432 = vrot.lane.b32.xlu0 %v5778_v29, %s5859_s16  ;;  %4434 = vrot.lane.b32.xlu1 %v5776_v54, %s5859_s16  ;;  %v3821_v54 = vadd.f32 %v8935_v1, %v3820_v14 }
 0x56a   : > { %4832 = vrot.lane.b32.xlu2 %v4326_v33, %s5863_s25  ;;  %v9788_v33 = vld [vmem:[#allocation51_spill] sm:$0xff] }
 0x56b   : > { %v4247_v62 = vpop.permute.xlu1 %4246  ;;  %v8964_v46 = vpop.permute.xlu0 %4804  ;;  %v3825_v61 = vsel %vm3824_vm2, %v8935_v1, %v3821_v54  ;;  %v4008_v1 = vmul.f32 %v9790_v38, %v8585_v26 }
 0x56c   : > { %v4413_v18 = vpop.permute.xlu2 %4412  ;;  %4900 = vst.msk [vmem:[#allocation5] sm:$0xff] %vm2837_vm12, %v8964_v46  ;;  %v5780_v35 = vpop.eup %5779  ;;  %v4327_v30 = vadd.f32 %v4247_v62, %v4007_v42 }
 0x56d   : > { %v4328_v4 = vadd.f32 %v8920_v41, %v4008_v1  ;;  %v4506_v27 = vmul.f32 %v4413_v18, %v8187_v63  ;;  %v9791_v18 = vld [vmem:[#allocation34_spill] sm:$0xff] }
 0x56e   : > { %5781 = vtanh.f32 %v4327_v30  ;;  %v4009_v42 = vmul.f32 %v9791_v18, %v8637_v12 }
 0x56f   : > { %5783 = vtanh.f32 %v4328_v4 }
 0x571   : > { %4274 = vrot.lane.b32.xlu0 %v4181_v13, %s5859_s16  ;;  %4276 = vrot.lane.b32.xlu1 %v4182_v5, %s5859_s16 }
 0x572   : > { %4436 = vrot.lane.b32.xlu2 %v5780_v35, %s5859_s16 }
 0x573   : > { %v8979_v11 = vpop.permute.xlu1 %4806  ;;  %v4409_v24 = vpop.permute.xlu0 %4408 }
 0x574   : > { %4901 = vst.msk [vmem:[#allocation5 + $0x8] sm:$0xff] %vm2837_vm12, %v8979_v11  ;;  %v8985_v49 = vpop.permute.xlu2 %4254  ;;  %v4504_v6 = vmul.f32 %v4409_v24, %v8122_v53  ;;  %v3829_v53 = vor.u32 1.1754944e-38, %v3828_v51  ;;  %v5782_v5 = vpop.eup %5781 }
 0x575   : > { %v5784_v63 = vpop.eup %5783 }
 0x576   : > { %v4542_v29 = vmul.f32 %v9788_v33, %v4504_v6  ;;  %v8998_v28 = vsel %vm3827_vm4, %v3829_v53, %v3825_v61 }
 0x578   : > { %v4580_v59 = vadd.f32 %v9789_v10, %v4542_v29 }
 0x579   : > { %4834 = vrot.lane.b32.xlu0 %v4327_v30, %s5863_s25  ;;  %v9792_v30 = vld [vmem:[#allocation43_spill] sm:$0xff] }
 0x57a   : > { %4644 = vrot.lane.b32.xlu1 %v4580_v59, %s5860_s28  ;;  %v4010_v29 = vmul.f32 %v9792_v30, %v8635_v34  ;;  %v9795_v30 = vld [vmem:[#allocation46_spill] sm:$0xff] }
 0x57b   : > { %v4411_v21 = vpop.permute.xlu1 %4410  ;;  %v4119_v7 = vpop.permute.xlu0 %4118 }
 0x57c   : > { %v4505_v48 = vmul.f32 %v4411_v21, %v8151_v52  ;;  %v9001_v62 = vpop.permute.xlu2 %4814  ;;  %v4183_v25 = vmul.f32 %v4119_v7, %v8998_v28  ;;  %v4544_v52 = vmul.f32 %v9788_v33, %v4506_v27 }
 0x57d   : > { %4905 = vst.msk [vmem:[#allocation5 + $0x28] sm:$0xff] %vm2837_vm12, %v9001_v62 }
 0x57e   : > { %4278 = vrot.lane.b32.xlu2 %v4183_v25, %s5859_s16  ;;  %v4543_v13 = vmul.f32 %v9788_v33, %v4505_v48  ;;  %v4582_v41 = vadd.f32 %v9789_v10, %v4544_v52 }
 0x580   : > { %v4581_v24 = vadd.f32 %v9789_v10, %v4543_v13 }
 0x581   : > { %4438 = vrot.lane.b32.xlu0 %v5782_v5, %s5859_s16 }
 0x582   : > { %4836 = vrot.lane.b32.xlu1 %v4328_v4, %s5863_s25 }
 0x583   : > { %v4253_v14 = vpop.permute.xlu1 %4252  ;;  %v4251_v35 = vpop.permute.xlu0 %4250 }
 0x584   : > { %v4419_v32 = vpop.permute.xlu2 %4418  ;;  %v4329_v6 = vadd.f32 %v4251_v35, %v4009_v42  ;;  %v4330_v59 = vadd.f32 %v4253_v14, %v4010_v29  ;;  %v9793_v35 = vld [vmem:[#allocation44_spill] sm:$0xff]  ;;  %v4013_v29 = vmul.f32 %v9795_v30, %v8717_v16 }
 0x585   : > { %v4509_v1 = vmul.f32 %v4419_v32, %v8277_v15 }
 0x586   : > { %4646 = vrot.lane.b32.xlu2 %v4581_v24, %s5860_s28  ;;  %5785 = vtanh.f32 %v4329_v6  ;;  %v4011_v24 = vmul.f32 %v9793_v35, %v8669_v20 }
 0x587   : > { %5787 = vtanh.f32 %v4330_v59 }
 0x588   : > { %v4331_v15 = vadd.f32 %v8985_v49, %v4011_v24  ;;  %v9796_v24 = vld [vmem:[#allocation47_spill] sm:$0xff] }
 0x589   : > { %4648 = vrot.lane.b32.xlu0 %v4582_v41, %s5860_s28  ;;  %v9794_v41 = vld [vmem:[#allocation37_spill] sm:$0xff] }
 0x58a   : > { %4440 = vrot.lane.b32.xlu1 %v5784_v63, %s5859_s16  ;;  %v4012_v63 = vmul.f32 %v9794_v41, %v8719_v44  ;;  %5789 = vtanh.f32 %v4331_v15 }
 0x58b   : > { %v9022_v54 = vpop.permute.xlu1 %4812  ;;  %v9024_v51 = vpop.permute.xlu0 %4810 }
 0x58c   : > { %4904 = vst.msk [vmem:[#allocation5 + $0x20] sm:$0xff] %vm2837_vm12, %v9022_v54  ;;  %v9030_v55 = vpop.permute.xlu2 %4260  ;;  %v5786_v25 = vpop.eup %5785 }
 0x58d   : > { %4903 = vst.msk [vmem:[#allocation5 + $0x18] sm:$0xff] %vm2837_vm12, %v9024_v51  ;;  %v5788_v4 = vpop.eup %5787 }
 0x58e   : > { %4838 = vrot.lane.b32.xlu2 %v4329_v6, %s5863_s25 }
 0x591   : > { %4840 = vrot.lane.b32.xlu0 %v4330_v59, %s5863_s25 }
 0x593   : > { %v4417_v61 = vpop.permute.xlu1 %4416  ;;  %v4415_v53 = vpop.permute.xlu0 %4414 }
 0x594   : > { %v4508_v21 = vmul.f32 %v4417_v61, %v8247_v45  ;;  %v9037_v7 = vpop.permute.xlu2 %4820  ;;  %v4507_v48 = vmul.f32 %v4415_v53, %v8217_v39  ;;  %v4547_v39 = vmul.f32 %v9788_v33, %v4509_v1  ;;  %v5790_v61 = vpop.eup %5789 }
 0x595   : > { %4908 = vst.msk [vmem:[#allocation5 + $0x40] sm:$0xff] %vm2837_vm12, %v9037_v7 }
 0x596   : > { %v4545_v38 = vmul.f32 %v9788_v33, %v4507_v48  ;;  %4442 = vrot.lane.b32.xlu2 %v5786_v25, %s5859_s16  ;;  %v4546_v27 = vmul.f32 %v9788_v33, %v4508_v21  ;;  %v4585_v32 = vadd.f32 %v9789_v10, %v4547_v39 }
 0x598   : > { %v4583_v5 = vadd.f32 %v9789_v10, %v4545_v38  ;;  %v4584_v52 = vadd.f32 %v9789_v10, %v4546_v27 }
 0x599   : > { %4444 = vrot.lane.b32.xlu0 %v5788_v4, %s5859_s16 }
 0x59a   : > { %4650 = vrot.lane.b32.xlu1 %v4583_v5, %s5860_s28 }
 0x59b   : > { %v4259_v45 = vpop.permute.xlu1 %4258  ;;  %v4257_v13 = vpop.permute.xlu0 %4256 }
 0x59c   : > { %v4425_v14 = vpop.permute.xlu2 %4424  ;;  %v4332_v18 = vadd.f32 %v4257_v13, %v4012_v63  ;;  %v4333_v59 = vadd.f32 %v4259_v45, %v4013_v29  ;;  %v9798_v29 = vld [vmem:[#allocation49_spill] sm:$0xff] }
 0x59d   : > { %v4512_v27 = vmul.f32 %v4425_v14, %v8366_v56 }
 0x59e   : > { %4652 = vrot.lane.b32.xlu2 %v4584_v52, %s5860_s28  ;;  %5791 = vtanh.f32 %v4332_v18 }
 0x59f   : > { %5793 = vtanh.f32 %v4333_v59 }
 0x5a1   : > { %4654 = vrot.lane.b32.xlu0 %v4585_v32, %s5860_s28  ;;  %v9797_v32 = vld [vmem:[#allocation42_spill] sm:$0xff] }
 0x5a2   : > { %4842 = vrot.lane.b32.xlu1 %v4331_v15, %s5863_s25  ;;  %v4014_v15 = vmul.f32 %v9796_v24, %v8751_v9  ;;  %v4015_v41 = vmul.f32 %v9797_v32, %v8803_v0  ;;  %v9799_v24 = vld [vmem:[#allocation50_spill] sm:$0xff] }
 0x5a3   : > { %v9060_v42 = vpop.permute.xlu1 %4818  ;;  %v9062_v6 = vpop.permute.xlu0 %4816 }
 0x5a4   : > { %4907 = vst.msk [vmem:[#allocation5 + $0x38] sm:$0xff] %vm2837_vm12, %v9060_v42  ;;  %v9068_v49 = vpop.permute.xlu2 %4266  ;;  %v5792_v1 = vpop.eup %5791  ;;  %v4334_v56 = vadd.f32 %v9030_v55, %v4014_v15  ;;  %v4017_v15 = vmul.f32 %v9799_v24, %v8837_v22 }
 0x5a5   : > { %4906 = vst.msk [vmem:[#allocation5 + $0x30] sm:$0xff] %vm2837_vm12, %v9062_v6  ;;  %v5794_v5 = vpop.eup %5793 }
 0x5a6   : > { %4844 = vrot.lane.b32.xlu2 %v4332_v18, %s5863_s25  ;;  %5795 = vtanh.f32 %v4334_v56 }
 0x5a9   : > { %4846 = vrot.lane.b32.xlu0 %v4333_v59, %s5863_s25  ;;  %v4016_v59 = vmul.f32 %v9798_v29, %v8801_v17 }
 0x5aa   : > { %4446 = vrot.lane.b32.xlu1 %v5790_v61, %s5859_s16 }
 0x5ab   : > { %v4423_v53 = vpop.permute.xlu1 %4422  ;;  %v4421_v21 = vpop.permute.xlu0 %4420 }
 0x5ac   : > { %v4511_v48 = vmul.f32 %v4423_v53, %v8338_v57  ;;  %v9076_v25 = vpop.permute.xlu2 %4826  ;;  %v4510_v38 = vmul.f32 %v4421_v21, %v8305_v2  ;;  %v4550_v2 = vmul.f32 %v9788_v33, %v4512_v27  ;;  %v5796_v53 = vpop.eup %5795 }
 0x5ad   : > { %4911 = vst.msk [vmem:[#allocation5 + $0x58] sm:$0xff] %vm2837_vm12, %v9076_v25 }
 0x5ae   : > { %v4548_v4 = vmul.f32 %v9788_v33, %v4510_v38  ;;  %4448 = vrot.lane.b32.xlu2 %v5792_v1, %s5859_s16  ;;  %v4549_v39 = vmul.f32 %v9788_v33, %v4511_v48  ;;  %v4588_v14 = vadd.f32 %v9789_v10, %v4550_v2 }
 0x5b0   : > { %v4586_v45 = vadd.f32 %v9789_v10, %v4548_v4  ;;  %v4587_v52 = vadd.f32 %v9789_v10, %v4549_v39 }
 0x5b1   : > { %4450 = vrot.lane.b32.xlu0 %v5794_v5, %s5859_s16 }
 0x5b2   : > { %4656 = vrot.lane.b32.xlu1 %v4586_v45, %s5860_s28 }
 0x5b3   : > { %v4265_v57 = vpop.permute.xlu1 %4264  ;;  %v4263_v13 = vpop.permute.xlu0 %4262 }
 0x5b4   : > { %v4431_v35 = vpop.permute.xlu2 %4430  ;;  %v4335_v63 = vadd.f32 %v4263_v13, %v4015_v41  ;;  %v4336_v61 = vadd.f32 %v4265_v57, %v4016_v59  ;;  %v9801_v59 = vld [vmem:[#allocation52_spill] sm:$0xff] }
 0x5b5   : > { %v4515_v39 = vmul.f32 %v4431_v35, %v8447_v50  ;;  %v4337_v50 = vadd.f32 %v9068_v49, %v4017_v15  ;;  %v9803_v15 = vld [vmem:[#allocation54_spill] sm:$0xff] }
 0x5b6   : > { %4658 = vrot.lane.b32.xlu2 %v4587_v52, %s5860_s28  ;;  %5797 = vtanh.f32 %v4335_v63 }
 0x5b7   : > { %5799 = vtanh.f32 %v4336_v61 }
 0x5b8   : > { %5801 = vtanh.f32 %v4337_v50 }
 0x5b9   : > { %4660 = vrot.lane.b32.xlu0 %v4588_v14, %s5860_s28  ;;  %v9800_v14 = vld [vmem:[#allocation45_spill] sm:$0xff] }
 0x5ba   : > { %4848 = vrot.lane.b32.xlu1 %v4334_v56, %s5863_s25  ;;  %v4018_v32 = vmul.f32 %v9800_v14, %v8895_v58 }
 0x5bb   : > { %v9099_v18 = vpop.permute.xlu1 %4824  ;;  %v9101_v30 = vpop.permute.xlu0 %4822 }
 0x5bc   : > { %4910 = vst.msk [vmem:[#allocation5 + $0x50] sm:$0xff] %vm2837_vm12, %v9099_v18  ;;  %v9107_v55 = vpop.permute.xlu2 %4272  ;;  %v5798_v27 = vpop.eup %5797 }
 0x5bd   : > { %4909 = vst.msk [vmem:[#allocation5 + $0x48] sm:$0xff] %vm2837_vm12, %v9101_v30  ;;  %v5800_v45 = vpop.eup %5799 }
 0x5be   : > { %4850 = vrot.lane.b32.xlu2 %v4335_v63, %s5863_s25 }
 0x5c1   : > { %4852 = vrot.lane.b32.xlu0 %v4336_v61, %s5863_s25  ;;  %v4019_v61 = vmul.f32 %v9801_v59, %v8893_v31 }
 0x5c2   : > { %4452 = vrot.lane.b32.xlu1 %v5796_v53, %s5859_s16 }
 0x5c3   : > { %v4429_v21 = vpop.permute.xlu1 %4428  ;;  %v4427_v48 = vpop.permute.xlu0 %4426 }
 0x5c4   : > { %v4514_v38 = vmul.f32 %v4429_v21, %v8420_v60  ;;  %v9115_v1 = vpop.permute.xlu2 %4832  ;;  %v4513_v4 = vmul.f32 %v4427_v48, %v8393_v3  ;;  %v4553_v3 = vmul.f32 %v9788_v33, %v4515_v39  ;;  %v5802_v21 = vpop.eup %5801 }
 0x5c5   : > { %4914 = vst.msk [vmem:[#allocation5 + $0x70] sm:$0xff] %vm2837_vm12, %v9115_v1 }
 0x5c6   : > { %v4551_v5 = vmul.f32 %v9788_v33, %v4513_v4  ;;  %4454 = vrot.lane.b32.xlu2 %v5798_v27, %s5859_s16  ;;  %v4552_v2 = vmul.f32 %v9788_v33, %v4514_v38  ;;  %v4591_v35 = vadd.f32 %v9789_v10, %v4553_v3 }
 0x5c8   : > { %v4589_v57 = vadd.f32 %v9789_v10, %v4551_v5  ;;  %v4590_v52 = vadd.f32 %v9789_v10, %v4552_v2 }
 0x5c9   : > { %4456 = vrot.lane.b32.xlu0 %v5800_v45, %s5859_s16 }
 0x5ca   : > { %4662 = vrot.lane.b32.xlu1 %v4589_v57, %s5860_s28 }
 0x5cb   : > { %v4271_v60 = vpop.permute.xlu1 %4270  ;;  %v4269_v13 = vpop.permute.xlu0 %4268 }
 0x5cc   : > { %v4437_v56 = vpop.permute.xlu2 %4436  ;;  %v4338_v41 = vadd.f32 %v4269_v13, %v4018_v32  ;;  %v4339_v49 = vadd.f32 %v4271_v60, %v4019_v61 }
 0x5cd   : > { %v4518_v45 = vmul.f32 %v4437_v56, %v8529_v8  ;;  %v9804_v56 = vld [vmem:[#allocation53_spill] sm:$0xff] }
 0x5ce   : > { %4664 = vrot.lane.b32.xlu2 %v4590_v52, %s5860_s28  ;;  %5803 = vtanh.f32 %v4338_v41  ;;  %v4020_v14 = vmul.f32 %v9804_v56, %v8925_v40 }
 0x5cf   : > { %5805 = vtanh.f32 %v4339_v49  ;;  %v4556_v13 = vmul.f32 %v9788_v33, %v4518_v45 }
 0x5d1   : > { %4666 = vrot.lane.b32.xlu0 %v4591_v35, %s5860_s28  ;;  %v4594_v59 = vadd.f32 %v9789_v10, %v4556_v13 }
 0x5d2   : > { %4854 = vrot.lane.b32.xlu1 %v4337_v50, %s5863_s25  ;;  %v4022_v50 = vmul.f32 %v9803_v15, %v8968_v47 }
 0x5d3   : > { %v9138_v63 = vpop.permute.xlu1 %4830  ;;  %v9140_v29 = vpop.permute.xlu0 %4828 }
 0x5d4   : > { %4913 = vst.msk [vmem:[#allocation5 + $0x68] sm:$0xff] %vm2837_vm12, %v9138_v63  ;;  %v5804_v5 = vpop.eup %5803 }
 0x5d5   : > { %4912 = vst.msk [vmem:[#allocation5 + $0x60] sm:$0xff] %vm2837_vm12, %v9140_v29  ;;  %v5806_v2 = vpop.eup %5805 }
 0x5d6   : > { %4856 = vrot.lane.b32.xlu2 %v4338_v41, %s5863_s25  ;;  %v4340_v41 = vadd.f32 %v9107_v55, %v4020_v14 }
 0x5d8   : > { %v4279_v53 = vpop.permute.xlu2 %4278 }
 0x5d9   : > { %4858 = vrot.lane.b32.xlu0 %v4339_v49, %s5863_s25 }
 0x5da   : > { %4458 = vrot.lane.b32.xlu1 %v5802_v21, %s5859_s16 }
 0x5db   : > { %v4435_v48 = vpop.permute.xlu1 %4434  ;;  %v4433_v38 = vpop.permute.xlu0 %4432 }
 0x5dc   : > { %v4517_v4 = vmul.f32 %v4435_v48, %v8501_v19  ;;  %v4516_v27 = vmul.f32 %v4433_v38, %v8472_v36  ;;  %v9802_v36 = vld [vmem:[#allocation48_spill] sm:$0xff] }
 0x5dd   : > { %v4021_v19 = vmul.f32 %v9802_v36, %v8970_v23 }
 0x5de   : > { %v4554_v39 = vmul.f32 %v9788_v33, %v4516_v27  ;;  %4460 = vrot.lane.b32.xlu2 %v5804_v5, %s5859_s16  ;;  %v4555_v57 = vmul.f32 %v9788_v33, %v4517_v4 }
 0x5e0   : > { %v4592_v3 = vadd.f32 %v9789_v10, %v4554_v39  ;;  %v9158_v60 = vpop.permute.xlu2 %4646  ;;  %v4593_v24 = vadd.f32 %v9789_v10, %v4555_v57  ;;  %v9805_v57 = vld [vmem:[#allocation55_spill] sm:$0xff] }
 0x5e1   : > { %4741 = vst.msk [vmem:[#allocation4 + $0x18] sm:$0xff] %vm2837_vm12, %v9158_v60  ;;  %4462 = vrot.lane.b32.xlu0 %v5806_v2, %s5859_s16 }
 0x5e2   : > { %4668 = vrot.lane.b32.xlu1 %v4592_v3, %s5860_s28  ;;  %v4023_v3 = vmul.f32 %v9805_v57, %v8998_v28 }
 0x5e3   : > { %v4277_v8 = vpop.permute.xlu1 %4276  ;;  %v4275_v52 = vpop.permute.xlu0 %4274 }
 0x5e4   : > { %v9170_v35 = vadd.f32 %v4275_v52, %v4021_v19  ;;  %v9174_v32 = vadd.f32 %v4277_v8, %v4022_v50 }
 0x5e6   : > { %4670 = vrot.lane.b32.xlu2 %v4593_v24, %s5860_s28  ;;  %5807 = vtanh.f32 %v9170_v35 }
 0x5e7   : > { %5809 = vtanh.f32 %v9174_v32 }
 0x5e8   : > { %v9180_v61 = vpop.permute.xlu2 %4838  ;;  %5811 = vtanh.f32 %v4340_v41 }
 0x5e9   : > { %4917 = vst.msk [vmem:[#allocation5 + $0x88] sm:$0xff] %vm2837_vm12, %v9180_v61  ;;  %4672 = vrot.lane.b32.xlu0 %v4594_v59, %s5860_s28 }
 0x5ea   : > { %4860 = vrot.lane.b32.xlu1 %v4340_v41, %s5863_s25 }
 0x5eb   : > { %v9187_v49 = vpop.permute.xlu0 %4834 }
 0x5ec   : > { %4915 = vst.msk [vmem:[#allocation5 + $0x78] sm:$0xff] %vm2837_vm12, %v9187_v49  ;;  %v9191_v55 = vpop.permute.xlu1 %4644  ;;  %v5808_v21 = vpop.eup %5807 }
 0x5ed   : > { %4740 = vst.msk [vmem:[#allocation4 + $0x8] sm:$0xff] %vm2837_vm12, %v9191_v55  ;;  %v5810_v48 = vpop.eup %5809 }
 0x5ee   : > { %4466 = vrot.lane.b32.xlu2 %v5808_v21, %s5859_s16  ;;  %v5812_v4 = vpop.eup %5811 }
 0x5f0   : > { %v4443_v38 = vpop.permute.xlu2 %4442 }
 0x5f1   : > { %v4521_v27 = vmul.f32 %v4443_v38, %v8637_v12  ;;  %4468 = vrot.lane.b32.xlu0 %v5810_v48, %s5859_s16  ;;  %v9208_v12 = vadd.f32 %v4279_v53, %v4023_v3 }
 0x5f2   : > { %4464 = vrot.lane.b32.xlu1 %v5812_v4, %s5859_s16 }
 0x5f3   : > { %v4559_v5 = vmul.f32 %v9788_v33, %v4521_v27  ;;  %v4439_v39 = vpop.permute.xlu0 %4438  ;;  %5813 = vtanh.f32 %v9208_v12 }
 0x5f4   : > { %v4519_v45 = vmul.f32 %v4439_v39, %v8552_v37  ;;  %v9201_v2 = vpop.permute.xlu1 %4836 }
 0x5f5   : > { %4916 = vst.msk [vmem:[#allocation5 + $0x80] sm:$0xff] %vm2837_vm12, %v9201_v2  ;;  %v4597_v19 = vadd.f32 %v9789_v10, %v4559_v5 }
 0x5f6   : > { %v4557_v36 = vmul.f32 %v9788_v33, %v4519_v45 }
 0x5f8   : > { %v4595_v13 = vadd.f32 %v9789_v10, %v4557_v36  ;;  %v9212_v8 = vpop.permute.xlu2 %4652 }
 0x5f9   : > { %4744 = vst.msk [vmem:[#allocation4 + $0x48] sm:$0xff] %vm2837_vm12, %v9212_v8  ;;  %4678 = vrot.lane.b32.xlu0 %v4597_v19, %s5860_s28  ;;  %v5814_v50 = vpop.eup %5813 }
 0x5fa   : > { %4674 = vrot.lane.b32.xlu1 %v4595_v13, %s5860_s28 }
 0x5fb   : > { %v9219_v37 = vpop.permute.xlu0 %4648 }
 0x5fc   : > { %4742 = vst.msk [vmem:[#allocation4 + $0x28] sm:$0xff] %vm2837_vm12, %v9219_v37  ;;  %v4441_v53 = vpop.permute.xlu1 %4440 }
 0x5fd   : > { %v4520_v52 = vmul.f32 %v4441_v53, %v8585_v26 }
 0x5ff   : > { %v4558_v24 = vmul.f32 %v9788_v33, %v4520_v52 }
 0x600   : > { %v9225_v15 = vpop.permute.xlu2 %4844 }
 0x601   : > { %v4596_v56 = vadd.f32 %v9789_v10, %v4558_v24  ;;  %4920 = vst.msk [vmem:[#allocation5 + $0xa0] sm:$0xff] %vm2837_vm12, %v9225_v15 }
 0x602   : > { %4470 = vrot.lane.b32.xlu1 %v5814_v50, %s5859_s16 }
 0x603   : > { %4676 = vrot.lane.b32.xlu2 %v4596_v56, %s5860_s28  ;;  %v9232_v14 = vpop.permute.xlu0 %4840 }
 0x604   : > { %4918 = vst.msk [vmem:[#allocation5 + $0x90] sm:$0xff] %vm2837_vm12, %v9232_v14 }
 0x608   : > { %v4449_v26 = vpop.permute.xlu2 %4448 }
 0x609   : > { %v4524_v41 = vmul.f32 %v4449_v26, %v8719_v44 }
 0x60b   : > { %v4562_v59 = vmul.f32 %v9788_v33, %v4524_v41  ;;  %v4445_v21 = vpop.permute.xlu0 %4444 }
 0x60c   : > { %v4522_v48 = vmul.f32 %v4445_v21, %v8635_v34  ;;  %v9239_v38 = vpop.permute.xlu1 %4650 }
 0x60d   : > { %v4600_v4 = vadd.f32 %v9789_v10, %v4562_v59  ;;  %4743 = vst.msk [vmem:[#allocation4 + $0x38] sm:$0xff] %vm2837_vm12, %v9239_v38 }
 0x60e   : > { %v4560_v27 = vmul.f32 %v9788_v33, %v4522_v48 }
 0x60f   : > { %4684 = vrot.lane.b32.xlu0 %v4600_v4, %s5860_s28 }
 0x610   : > { %v4598_v5 = vadd.f32 %v9789_v10, %v4560_v27  ;;  %v9247_v39 = vpop.permute.xlu2 %4658 }
 0x611   : > { %4747 = vst.msk [vmem:[#allocation4 + $0x78] sm:$0xff] %vm2837_vm12, %v9247_v39 }
 0x612   : > { %4680 = vrot.lane.b32.xlu1 %v4598_v5, %s5860_s28 }
 0x613   : > { %v9252_v34 = vpop.permute.xlu0 %4654 }
 0x614   : > { %4745 = vst.msk [vmem:[#allocation4 + $0x58] sm:$0xff] %vm2837_vm12, %v9252_v34  ;;  %v9256_v44 = vpop.permute.xlu1 %4842 }
 0x615   : > { %4919 = vst.msk [vmem:[#allocation5 + $0x98] sm:$0xff] %vm2837_vm12, %v9256_v44 }
 0x618   : > { %v9260_v45 = vpop.permute.xlu2 %4850 }
 0x619   : > { %4923 = vst.msk [vmem:[#allocation5 + $0xb8] sm:$0xff] %vm2837_vm12, %v9260_v45 }
 0x61b   : > { %v9264_v57 = vpop.permute.xlu0 %4846 }
 0x61c   : > { %4921 = vst.msk [vmem:[#allocation5 + $0xa8] sm:$0xff] %vm2837_vm12, %v9264_v57  ;;  %v4447_v3 = vpop.permute.xlu1 %4446 }
 0x61d   : > { %v4523_v36 = vmul.f32 %v4447_v3, %v8669_v20 }
 0x61f   : > { %v4561_v19 = vmul.f32 %v9788_v33, %v4523_v36 }
 0x620   : > { %v4455_v13 = vpop.permute.xlu2 %4454 }
 0x621   : > { %v4599_v53 = vadd.f32 %v9789_v10, %v4561_v19  ;;  %v4527_v52 = vmul.f32 %v4455_v13, %v8803_v0 }
 0x623   : > { %v4565_v24 = vmul.f32 %v9788_v33, %v4527_v52  ;;  %4682 = vrot.lane.b32.xlu2 %v4599_v53, %s5860_s28  ;;  %v4451_v50 = vpop.permute.xlu0 %4450 }
 0x624   : > { %v4525_v56 = vmul.f32 %v4451_v50, %v8717_v16  ;;  %v9275_v26 = vpop.permute.xlu1 %4656 }
 0x625   : > { %v4603_v41 = vadd.f32 %v9789_v10, %v4565_v24  ;;  %4746 = vst.msk [vmem:[#allocation4 + $0x68] sm:$0xff] %vm2837_vm12, %v9275_v26 }
 0x626   : > { %v4563_v20 = vmul.f32 %v9788_v33, %v4525_v56 }
 0x627   : > { %4690 = vrot.lane.b32.xlu0 %v4603_v41, %s5860_s28 }
 0x628   : > { %v4601_v0 = vadd.f32 %v9789_v10, %v4563_v20  ;;  %v9283_v59 = vpop.permute.xlu2 %4664 }
 0x629   : > { %4750 = vst.msk [vmem:[#allocation4 + $0xa8] sm:$0xff] %vm2837_vm12, %v9283_v59 }
 0x62a   : > { %4686 = vrot.lane.b32.xlu1 %v4601_v0, %s5860_s28 }
 0x62b   : > { %v9288_v16 = vpop.permute.xlu0 %4660 }
 0x62c   : > { %4748 = vst.msk [vmem:[#allocation4 + $0x88] sm:$0xff] %vm2837_vm12, %v9288_v16  ;;  %v9292_v21 = vpop.permute.xlu1 %4848 }
 0x62d   : > { %4922 = vst.msk [vmem:[#allocation5 + $0xb0] sm:$0xff] %vm2837_vm12, %v9292_v21 }
 0x630   : > { %v9296_v48 = vpop.permute.xlu2 %4856 }
 0x631   : > { %4926 = vst.msk [vmem:[#allocation5 + $0xd0] sm:$0xff] %vm2837_vm12, %v9296_v48 }
 0x633   : > { %v9300_v4 = vpop.permute.xlu0 %4852 }
 0x634   : > { %4924 = vst.msk [vmem:[#allocation5 + $0xc0] sm:$0xff] %vm2837_vm12, %v9300_v4  ;;  %v4453_v27 = vpop.permute.xlu1 %4452 }
 0x635   : > { %v4526_v5 = vmul.f32 %v4453_v27, %v8751_v9 }
 0x637   : > { %v4564_v3 = vmul.f32 %v9788_v33, %v4526_v5 }
 0x638   : > { %v4461_v36 = vpop.permute.xlu2 %4460 }
 0x639   : > { %v4602_v19 = vadd.f32 %v9789_v10, %v4564_v3  ;;  %v4530_v13 = vmul.f32 %v4461_v36, %v8895_v58 }
 0x63b   : > { %v4568_v53 = vmul.f32 %v9788_v33, %v4530_v13  ;;  %4688 = vrot.lane.b32.xlu2 %v4602_v19, %s5860_s28  ;;  %v4457_v52 = vpop.permute.xlu0 %4456 }
 0x63c   : > { %v4528_v24 = vmul.f32 %v4457_v52, %v8801_v17  ;;  %v9311_v50 = vpop.permute.xlu1 %4662 }
 0x63d   : > { %v4606_v56 = vadd.f32 %v9789_v10, %v4568_v53  ;;  %4749 = vst.msk [vmem:[#allocation4 + $0x98] sm:$0xff] %vm2837_vm12, %v9311_v50 }
 0x63e   : > { %v4566_v9 = vmul.f32 %v9788_v33, %v4528_v24 }
 0x63f   : > { %4696 = vrot.lane.b32.xlu0 %v4606_v56, %s5860_s28 }
 0x640   : > { %v4604_v58 = vadd.f32 %v9789_v10, %v4566_v9  ;;  %v9319_v41 = vpop.permute.xlu2 %4670 }
 0x641   : > { %4753 = vst.msk [vmem:[#allocation4 + $0xd8] sm:$0xff] %vm2837_vm12, %v9319_v41 }
 0x642   : > { %4692 = vrot.lane.b32.xlu1 %v4604_v58, %s5860_s28 }
 0x643   : > { %v9324_v17 = vpop.permute.xlu0 %4666 }
 0x644   : > { %4751 = vst.msk [vmem:[#allocation4 + $0xb8] sm:$0xff] %vm2837_vm12, %v9324_v17  ;;  %v9328_v20 = vpop.permute.xlu1 %4854 }
 0x645   : > { %4925 = vst.msk [vmem:[#allocation5 + $0xc8] sm:$0xff] %vm2837_vm12, %v9328_v20 }
 0x648   : > { %v4467_v0 = vpop.permute.xlu2 %4466 }
 0x649   : > { %v4533_v27 = vmul.f32 %v4467_v0, %v8970_v23 }
 0x64b   : > { %v4571_v5 = vmul.f32 %v9788_v33, %v4533_v27  ;;  %v9334_v3 = vpop.permute.xlu0 %4858 }
 0x64c   : > { %4927 = vst.msk [vmem:[#allocation5 + $0xd8] sm:$0xff] %vm2837_vm12, %v9334_v3  ;;  %v4459_v36 = vpop.permute.xlu1 %4458 }
 0x64d   : > { %v4609_v19 = vadd.f32 %v9789_v10, %v4571_v5  ;;  %v4529_v13 = vmul.f32 %v4459_v36, %v8837_v22 }
 0x64f   : > { %v4567_v53 = vmul.f32 %v9788_v33, %v4529_v13  ;;  %4702 = vrot.lane.b32.xlu0 %v4609_v19, %s5860_s28 }
 0x651   : > { %v4605_v52 = vadd.f32 %v9789_v10, %v4567_v53 }
 0x653   : > { %4694 = vrot.lane.b32.xlu2 %v4605_v52, %s5860_s28  ;;  %v4463_v23 = vpop.permute.xlu0 %4462 }
 0x654   : > { %v4531_v24 = vmul.f32 %v4463_v23, %v8893_v31  ;;  %v9345_v56 = vpop.permute.xlu1 %4668 }
 0x655   : > { %4752 = vst.msk [vmem:[#allocation4 + $0xc8] sm:$0xff] %vm2837_vm12, %v9345_v56 }
 0x656   : > { %v4569_v9 = vmul.f32 %v9788_v33, %v4531_v24 }
 0x657   : > { %4864 = vrot.lane.b32.xlu0 %v9174_v32, %s5863_s25 }
 0x658   : > { %v4607_v22 = vadd.f32 %v9789_v10, %v4569_v9 }
 0x65a   : > { %4698 = vrot.lane.b32.xlu1 %v4607_v22, %s5860_s28 }
 0x65b   : > { %v9354_v58 = vpop.permute.xlu0 %4672 }
 0x65c   : > { %4754 = vst.msk [vmem:[#allocation4 + $0xe8] sm:$0xff] %vm2837_vm12, %v9354_v58  ;;  %v9358_v31 = vpop.permute.xlu1 %4860 }
 0x65d   : > { %4928 = vst.msk [vmem:[#allocation5 + $0xe0] sm:$0xff] %vm2837_vm12, %v9358_v31  ;;  %v9362_v0 = vpop.permute.xlu2 %4676 }
 0x65e   : > { %4756 = vst.msk [vmem:[#allocation4 + $0x108] sm:$0xff] %vm2837_vm12, %v9362_v0 }
 0x663   : > { %v4469_v32 = vpop.permute.xlu0 %4468 }
 0x664   : > { %v4534_v27 = vmul.f32 %v4469_v32, %v8968_v47  ;;  %v4465_v5 = vpop.permute.xlu1 %4464 }
 0x665   : > { %v4532_v36 = vmul.f32 %v4465_v5, %v8925_v40 }
 0x666   : > { %v4572_v19 = vmul.f32 %v9788_v33, %v4534_v27 }
 0x667   : > { %v4570_v13 = vmul.f32 %v9788_v33, %v4532_v36 }
 0x668   : > { %v4610_v53 = vadd.f32 %v9789_v10, %v4572_v19 }
 0x669   : > { %v4608_v52 = vadd.f32 %v9789_v10, %v4570_v13 }
 0x66a   : > { %4704 = vrot.lane.b32.xlu1 %v4610_v53, %s5860_s28 }
 0x66b   : > { %4700 = vrot.lane.b32.xlu2 %v4608_v52, %s5860_s28  ;;  %v9374_v23 = vpop.permute.xlu0 %4678 }
 0x66c   : > { %4757 = vst.msk [vmem:[#allocation4 + $0x118] sm:$0xff] %vm2837_vm12, %v9374_v23  ;;  %v4675_v47 = vpop.permute.xlu1 %4674 }
 0x66d   : > { %4755 = vst.msk [vmem:[#allocation4 + $0xf8] sm:$0xff] %vm2837_vm12, %v4675_v47 }
 0x672   : > { %4866 = vrot.lane.b32.xlu1 %v9208_v12, %s5863_s25 }
 0x674   : > { %v4471_v40 = vpop.permute.xlu1 %4470 }
 0x675   : > { %v4535_v24 = vmul.f32 %v4471_v40, %v8998_v28 }
 0x677   : > { %v4573_v9 = vmul.f32 %v9788_v33, %v4535_v24 }
 0x679   : > { %v4611_v22 = vadd.f32 %v9789_v10, %v4573_v9 }
 0x67b   : > { %4706 = vrot.lane.b32.xlu2 %v4611_v22, %s5860_s28 }
 0x67d   : > { %v4683_v32 = vpop.permute.xlu2 %4682 }
 0x67e   : > { %4759 = vst.msk [vmem:[#allocation4 + $0x138] sm:$0xff] %vm2837_vm12, %v4683_v32 }
 0x681   : > { %v4685_v27 = vpop.permute.xlu0 %4684 }
 0x682   : > { %4760 = vst.msk [vmem:[#allocation4 + $0x148] sm:$0xff] %vm2837_vm12, %v4685_v27 }
 0x683   : > { %4862 = vrot.lane.b32.xlu2 %v9170_v35, %s5863_s25 }
 0x684   : > { %v4681_v5 = vpop.permute.xlu1 %4680 }
 0x685   : > { %4758 = vst.msk [vmem:[#allocation4 + $0x128] sm:$0xff] %vm2837_vm12, %v4681_v5 }
 0x695   : > { %v4689_v12 = vpop.permute.xlu2 %4688 }
 0x696   : > { %4762 = vst.msk [vmem:[#allocation4 + $0x168] sm:$0xff] %vm2837_vm12, %v4689_v12 }
 0x699   : > { %v4691_v33 = vpop.permute.xlu0 %4690 }
 0x69a   : > { %4763 = vst.msk [vmem:[#allocation4 + $0x178] sm:$0xff] %vm2837_vm12, %v4691_v33 }
 0x69c   : > { %v4687_v10 = vpop.permute.xlu1 %4686 }
 0x69d   : > { %4761 = vst.msk [vmem:[#allocation4 + $0x158] sm:$0xff] %vm2837_vm12, %v4687_v10 }
 0x6ad   : > { %v4695_v28 = vpop.permute.xlu2 %4694 }
 0x6ae   : > { %4765 = vst.msk [vmem:[#allocation4 + $0x198] sm:$0xff] %vm2837_vm12, %v4695_v28 }
 0x6b1   : > { %v4697_v36 = vpop.permute.xlu0 %4696 }
 0x6b2   : > { %4766 = vst.msk [vmem:[#allocation4 + $0x1a8] sm:$0xff] %vm2837_vm12, %v4697_v36 }
 0x6b4   : > { %v4693_v19 = vpop.permute.xlu1 %4692 }
 0x6b5   : > { %4764 = vst.msk [vmem:[#allocation4 + $0x188] sm:$0xff] %vm2837_vm12, %v4693_v19 }
 0x6c1   : > { %v4703_v35 = vpop.permute.xlu0 %4702 }
 0x6c2   : > { %4769 = vst.msk [vmem:[#allocation4 + $0x1d8] sm:$0xff] %vm2837_vm12, %v4703_v35 }
 0x6c5   : > { %v4701_v13 = vpop.permute.xlu2 %4700 }
 0x6c6   : > { %4768 = vst.msk [vmem:[#allocation4 + $0x1c8] sm:$0xff] %vm2837_vm12, %v4701_v13 }
 0x6c9   : > { %v9398_v53 = vpop.permute.xlu0 %4864 }
 0x6ca   : > { %4930 = vst.msk [vmem:[#allocation5 + $0xf0] sm:$0xff] %vm2837_vm12, %v9398_v53 }
 0x6cc   : > { %v4699_v52 = vpop.permute.xlu1 %4698 }
 0x6cd   : > { %4767 = vst.msk [vmem:[#allocation4 + $0x1b8] sm:$0xff] %vm2837_vm12, %v4699_v52 }
 0x6d5   : > { %v4707_v40 = vpop.permute.xlu2 %4706 }
 0x6d6   : > { %4771 = vst.msk [vmem:[#allocation4 + $0x1f8] sm:$0xff] %vm2837_vm12, %v4707_v40 }
 0x6dc   : > { %v4705_v24 = vpop.permute.xlu1 %4704 }
 0x6dd   : > { %4770 = vst.msk [vmem:[#allocation4 + $0x1e8] sm:$0xff] %vm2837_vm12, %v4705_v24  ;;  %v9405_v9 = vpop.permute.xlu2 %4862 }
 0x6de   : > { %4929 = vst.msk [vmem:[#allocation5 + $0xe8] sm:$0xff] %vm2837_vm12, %v9405_v9 }
 0x6e1   : > { %4935 = sbr.rel (%p5249_p8) target bundleno = 1830 (0x726), region = 56 }
 0x6e4   : > { %v9409_v22 = vpop.permute.xlu1 %4866 }
 0x6e5   : > { %4931 = vst.msk [vmem:[#allocation5 + $0xf8] sm:$0xff] %vm2837_vm12, %v9409_v22 }
 0x6e6   : > { %4936 = vst.msk [vmem:[%s5946_s20] sm:$0xff] %vm2837_vm12, %v9191_v55 }
 0x6e7   : > { %4937 = vst.msk [vmem:[%s5946_s20 + $0x8] sm:$0xff] %vm2837_vm12, %v9158_v60 }
 0x6e8   : > { %4938 = vst.msk [vmem:[%s5946_s20 + $0x10] sm:$0xff] %vm2837_vm12, %v9219_v37 }
 0x6e9   : > { %4939 = vst.msk [vmem:[%s5946_s20 + $0x18] sm:$0xff] %vm2837_vm12, %v9239_v38 }
 0x6ea   : > { %4940 = vst.msk [vmem:[%s5946_s20 + $0x20] sm:$0xff] %vm2837_vm12, %v9212_v8 }
 0x6eb   : > { %4941 = vst.msk [vmem:[%s5946_s20 + $0x28] sm:$0xff] %vm2837_vm12, %v9252_v34 }
 0x6ec   : > { %4942 = vst.msk [vmem:[%s5946_s20 + $0x30] sm:$0xff] %vm2837_vm12, %v9275_v26 }
 0x6ed   : > { %4943 = vst.msk [vmem:[%s5946_s20 + $0x38] sm:$0xff] %vm2837_vm12, %v9247_v39 }
 0x6ee   : > { %4944 = vst.msk [vmem:[%s5946_s20 + $0x40] sm:$0xff] %vm2837_vm12, %v9288_v16 }
 0x6ef   : > { %4945 = vst.msk [vmem:[%s5946_s20 + $0x48] sm:$0xff] %vm2837_vm12, %v9311_v50 }
 0x6f0   : > { %4946 = vst.msk [vmem:[%s5946_s20 + $0x50] sm:$0xff] %vm2837_vm12, %v9283_v59 }
 0x6f1   : > { %4947 = vst.msk [vmem:[%s5946_s20 + $0x58] sm:$0xff] %vm2837_vm12, %v9324_v17 }
 0x6f2   : > { %4948 = vst.msk [vmem:[%s5946_s20 + $0x60] sm:$0xff] %vm2837_vm12, %v9345_v56 }
 0x6f3   : > { %4949 = vst.msk [vmem:[%s5946_s20 + $0x68] sm:$0xff] %vm2837_vm12, %v9319_v41 }
 0x6f4   : > { %4950 = vst.msk [vmem:[%s5946_s20 + $0x70] sm:$0xff] %vm2837_vm12, %v9354_v58 }
 0x6f5   : > { %4951 = vst.msk [vmem:[%s5946_s20 + $0x78] sm:$0xff] %vm2837_vm12, %v4675_v47 }
 0x6f6   : > { %4952 = vst.msk [vmem:[%s5946_s20 + $0x80] sm:$0xff] %vm2837_vm12, %v9362_v0 }
 0x6f7   : > { %4953 = vst.msk [vmem:[%s5946_s20 + $0x88] sm:$0xff] %vm2837_vm12, %v9374_v23 }
 0x6f8   : > { %4954 = vst.msk [vmem:[%s5946_s20 + $0x90] sm:$0xff] %vm2837_vm12, %v4681_v5 }
 0x6f9   : > { %4955 = vst.msk [vmem:[%s5946_s20 + $0x98] sm:$0xff] %vm2837_vm12, %v4683_v32 }
 0x6fa   : > { %4956 = vst.msk [vmem:[%s5946_s20 + $0xa0] sm:$0xff] %vm2837_vm12, %v4685_v27 }
 0x6fb   : > { %4957 = vst.msk [vmem:[%s5946_s20 + $0xa8] sm:$0xff] %vm2837_vm12, %v4687_v10 }
 0x6fc   : > { %4958 = vst.msk [vmem:[%s5946_s20 + $0xb0] sm:$0xff] %vm2837_vm12, %v4689_v12 }
 0x6fd   : > { %4959 = vst.msk [vmem:[%s5946_s20 + $0xb8] sm:$0xff] %vm2837_vm12, %v4691_v33 }
 0x6fe   : > { %4960 = vst.msk [vmem:[%s5946_s20 + $0xc0] sm:$0xff] %vm2837_vm12, %v4693_v19 }
 0x6ff   : > { %4961 = vst.msk [vmem:[%s5946_s20 + $0xc8] sm:$0xff] %vm2837_vm12, %v4695_v28 }
 0x700   : > { %4962 = vst.msk [vmem:[%s5946_s20 + $0xd0] sm:$0xff] %vm2837_vm12, %v4697_v36 }
 0x701   : > { %4963 = vst.msk [vmem:[%s5946_s20 + $0xd8] sm:$0xff] %vm2837_vm12, %v4699_v52 }
 0x702   : > { %4964 = vst.msk [vmem:[%s5946_s20 + $0xe0] sm:$0xff] %vm2837_vm12, %v4701_v13 }
 0x703   : > { %4965 = vst.msk [vmem:[%s5946_s20 + $0xe8] sm:$0xff] %vm2837_vm12, %v4703_v35 }
 0x704   : > { %4966 = vst.msk [vmem:[%s5946_s20 + $0xf0] sm:$0xff] %vm2837_vm12, %v4705_v24 }
 0x705   : > { %4967 = vst.msk [vmem:[%s5946_s20 + $0xf8] sm:$0xff] %vm2837_vm12, %v4707_v40 }
 0x706   : > { %4968 = vst.msk [vmem:[%s5956_s26] sm:$0xff] %vm2837_vm12, %v8964_v46 }
 0x707   : > { %4969 = vst.msk [vmem:[%s5956_s26 + $0x8] sm:$0xff] %vm2837_vm12, %v8979_v11 }
 0x708   : > { %4970 = vst.msk [vmem:[%s5956_s26 + $0x10] sm:$0xff] %vm2837_vm12, %v8933_v43 }
 0x709   : > { %4971 = vst.msk [vmem:[%s5956_s26 + $0x18] sm:$0xff] %vm2837_vm12, %v9024_v51 }
 0x70a   : > { %4972 = vst.msk [vmem:[%s5956_s26 + $0x20] sm:$0xff] %vm2837_vm12, %v9022_v54 }
 0x70b   : > { %4973 = vst.msk [vmem:[%s5956_s26 + $0x28] sm:$0xff] %vm2837_vm12, %v9001_v62 }
 0x70c   : > { %4974 = vst.msk [vmem:[%s5956_s26 + $0x30] sm:$0xff] %vm2837_vm12, %v9062_v6 }
 0x70d   : > { %4975 = vst.msk [vmem:[%s5956_s26 + $0x38] sm:$0xff] %vm2837_vm12, %v9060_v42 }
 0x70e   : > { %4976 = vst.msk [vmem:[%s5956_s26 + $0x40] sm:$0xff] %vm2837_vm12, %v9037_v7 }
 0x70f   : > { %4977 = vst.msk [vmem:[%s5956_s26 + $0x48] sm:$0xff] %vm2837_vm12, %v9101_v30 }
 0x710   : > { %4978 = vst.msk [vmem:[%s5956_s26 + $0x50] sm:$0xff] %vm2837_vm12, %v9099_v18 }
 0x711   : > { %4979 = vst.msk [vmem:[%s5956_s26 + $0x58] sm:$0xff] %vm2837_vm12, %v9076_v25 }
 0x712   : > { %4980 = vst.msk [vmem:[%s5956_s26 + $0x60] sm:$0xff] %vm2837_vm12, %v9140_v29 }
 0x713   : > { %4981 = vst.msk [vmem:[%s5956_s26 + $0x68] sm:$0xff] %vm2837_vm12, %v9138_v63 }
 0x714   : > { %4982 = vst.msk [vmem:[%s5956_s26 + $0x70] sm:$0xff] %vm2837_vm12, %v9115_v1 }
 0x715   : > { %4983 = vst.msk [vmem:[%s5956_s26 + $0x78] sm:$0xff] %vm2837_vm12, %v9187_v49 }
 0x716   : > { %4984 = vst.msk [vmem:[%s5956_s26 + $0x80] sm:$0xff] %vm2837_vm12, %v9201_v2 }
 0x717   : > { %4985 = vst.msk [vmem:[%s5956_s26 + $0x88] sm:$0xff] %vm2837_vm12, %v9180_v61 }
 0x718   : > { %4986 = vst.msk [vmem:[%s5956_s26 + $0x90] sm:$0xff] %vm2837_vm12, %v9232_v14 }
 0x719   : > { %4987 = vst.msk [vmem:[%s5956_s26 + $0x98] sm:$0xff] %vm2837_vm12, %v9256_v44 }
 0x71a   : > { %4988 = vst.msk [vmem:[%s5956_s26 + $0xa0] sm:$0xff] %vm2837_vm12, %v9225_v15 }
 0x71b   : > { %4989 = vst.msk [vmem:[%s5956_s26 + $0xa8] sm:$0xff] %vm2837_vm12, %v9264_v57 }
 0x71c   : > { %4990 = vst.msk [vmem:[%s5956_s26 + $0xb0] sm:$0xff] %vm2837_vm12, %v9292_v21 }
 0x71d   : > { %4991 = vst.msk [vmem:[%s5956_s26 + $0xb8] sm:$0xff] %vm2837_vm12, %v9260_v45 }
 0x71e   : > { %4992 = vst.msk [vmem:[%s5956_s26 + $0xc0] sm:$0xff] %vm2837_vm12, %v9300_v4 }
 0x71f   : > { %4993 = vst.msk [vmem:[%s5956_s26 + $0xc8] sm:$0xff] %vm2837_vm12, %v9328_v20 }
 0x720   : > { %4994 = vst.msk [vmem:[%s5956_s26 + $0xd0] sm:$0xff] %vm2837_vm12, %v9296_v48 }
 0x721   : > { %4995 = vst.msk [vmem:[%s5956_s26 + $0xd8] sm:$0xff] %vm2837_vm12, %v9334_v3 }
 0x722   : > { %4996 = vst.msk [vmem:[%s5956_s26 + $0xe0] sm:$0xff] %vm2837_vm12, %v9358_v31 }
 0x723   : > { %4997 = vst.msk [vmem:[%s5956_s26 + $0xe8] sm:$0xff] %vm2837_vm12, %v9405_v9 }
 0x724   : > { %4998 = vst.msk [vmem:[%s5956_s26 + $0xf0] sm:$0xff] %vm2837_vm12, %v9398_v53 }
 0x725   : > { %4999 = vst.msk [vmem:[%s5956_s26 + $0xf8] sm:$0xff] %vm2837_vm12, %v9409_v22 }
 0x726 PF: > { %s19_s9 = sadd.s32 1, %s5855_s9   ;;  %s9806_s27 = smov %s5847_s29 }
 0x727   : > { %p16_p9 = scmp.ge.s32.totalorder %s19_s9, 12   ;;  %s9807_s28 = smov %s5851_s30 }
 0x728   : > { %s9808_s29 = smov %s9811_s10  ;;  %s9809_s30 = smov %s9815_s11 }
 0x729   :  { %18 = sbr.rel (!%p16_p9) target bundleno = 3 (0x3), region = 98 }

</bundles_post_ra>
